<compile_context>
chip_gen: v7x
topology: tpu7x:2x2x1
jax: 0.10.0
libtpu: 0.0.40
codegen_flags: <defaults>
</compile_context>

<pallas_src>
import functools

import jax
import jax.numpy as jnp
from jax.experimental import pallas as pl
from jax.experimental.pallas import tpu as pltpu


def _round_up(x, m):
    return (x + m - 1) // m * m


# Safe scoped-VMEM ceiling on v5e/v6e (128 MiB physical) and v7x (64 MiB).
_VMEM_LIMIT = 32 * 1024 * 1024


# --------------------------------------------------------------------------
# Pallas kernels
# --------------------------------------------------------------------------

def _mm_bias_act_kernel(a_ref, w_ref, b_ref, o_ref, *, relu):
    """Single-K-block bf16 matmul, f32 accumulate, fused bias (+ReLU)."""
    acc = jnp.dot(a_ref[...], w_ref[...], preferred_element_type=jnp.float32)
    r = acc + b_ref[...]
    if relu:
        r = jnp.maximum(r, 0.0)
    o_ref[...] = r.astype(o_ref.dtype)


def _mm_bias_res_relu_kernel(a_ref, w_ref, b_ref, r_ref, o_ref):
    """Same matmul with the residual add + ReLU fused into the epilogue."""
    acc = jnp.dot(a_ref[...], w_ref[...], preferred_element_type=jnp.float32)
    r = acc + b_ref[...] + r_ref[...].astype(jnp.float32)
    o_ref[...] = jnp.maximum(r, 0.0).astype(o_ref.dtype)


def matmul_bias_act(a, w, bias, *, relu, residual=None,
                    out_dtype=jnp.bfloat16):
    """(M, K) @ (K, N) + bias[N]; optional fused residual-add + ReLU.

    Inputs are padded and cast to bf16 for the MXU; K is a single resident
    block (no K grid); output dtype is `out_dtype` (bf16 for activations).
    """
    M, K = a.shape
    K2, N = w.shape
    assert K == K2
    Np = _round_up(N, 128)
    Kp = _round_up(K, 16)                     # bf16 packing; full-K block
    if M >= 512:
        tm = 512
    elif M >= 256:
        tm = 256
    else:
        tm = _round_up(M, 16)                 # tiny-M layers: no 128x padding
    Mp = _round_up(M, tm)

    a_p = jnp.pad(a.astype(jnp.bfloat16), ((0, Mp - M), (0, Kp - K)))
    w_p = jnp.pad(w.astype(jnp.float32),
                  ((0, Kp - K), (0, Np - N))).astype(jnp.bfloat16)
    b_p = jnp.pad(bias.astype(jnp.float32), (0, Np - N)).reshape(1, Np)

    in_specs = [
        pl.BlockSpec((tm, Kp), lambda i: (i, 0)),
        pl.BlockSpec((Kp, Np), lambda i: (0, 0)),   # weight resident across M
        pl.BlockSpec((1, Np), lambda i: (0, 0)),
    ]
    args = [a_p, w_p, b_p]
    if residual is None:
        kernel = functools.partial(_mm_bias_act_kernel, relu=relu)
    else:
        r_p = jnp.pad(residual.astype(jnp.bfloat16),
                      ((0, Mp - M), (0, Np - N)))
        in_specs.append(pl.BlockSpec((tm, Np), lambda i: (i, 0)))
        args.append(r_p)
        kernel = _mm_bias_res_relu_kernel

    out = pl.pallas_call(
        kernel,
        out_shape=jax.ShapeDtypeStruct((Mp, Np), out_dtype),
        grid=(Mp // tm,),
        in_specs=in_specs,
        out_specs=pl.BlockSpec((tm, Np), lambda i: (i, 0)),
        compiler_params=pltpu.CompilerParams(
            dimension_semantics=("parallel",),
            vmem_limit_bytes=_VMEM_LIMIT),
    )(*args)
    return out[:M, :N]


def _max_taps_kernel(*refs):
    """Elementwise max over N input tiles (VPU, lane-dense)."""
    *in_refs, o_ref = refs
    r = in_refs[0][...]
    for t_ref in in_refs[1:]:
        r = jnp.maximum(r, t_ref[...])
    o_ref[...] = r


def _flat_tiling(total):
    """Flat-array tiling: (padded_total, padded_rows, row_tile), 128 lanes.

    Rounded to (16, 128) so bf16 sublane packing is clean.
    """
    tp = _round_up(total, 16 * 128)
    rows = tp // 128
    tr = rows if rows <= 512 else 512
    rows_p = _round_up(rows, tr)
    return rows_p * 128, rows_p, tr


def max_pool_nhwc(x, *, kernel=3, stride=2, padding=1):
    """3x3/s2 max pool on NHWC via elementwise max of the 9 shifted slabs."""
    B, H, W, C = x.shape
    Ho = (H + 2 * padding - kernel) // stride + 1
    Wo = (W + 2 * padding - kernel) // stride + 1
    xp = jnp.pad(x, ((0, 0), (padding, padding), (padding, padding), (0, 0)),
                 constant_values=-jnp.inf)
    taps = [xp[:, di:di + stride * Ho:stride, dj:dj + stride * Wo:stride, :]
            for di in range(kernel) for dj in range(kernel)]
    total = B * Ho * Wo * C
    tp, rows_p, tr = _flat_tiling(total)
    taps2d = [jnp.pad(t.reshape(-1), (0, tp - total),
                      constant_values=-jnp.inf).reshape(rows_p, 128)
              for t in taps]
    out = pl.pallas_call(
        _max_taps_kernel,
        out_shape=jax.ShapeDtypeStruct((rows_p, 128), x.dtype),
        grid=(rows_p // tr,),
        in_specs=[pl.BlockSpec((tr, 128), lambda i: (i, 0))] * len(taps2d),
        out_specs=pl.BlockSpec((tr, 128), lambda i: (i, 0)),
        compiler_params=pltpu.CompilerParams(
            dimension_semantics=("parallel",),
            vmem_limit_bytes=_VMEM_LIMIT),
    )(*taps2d)
    return out.reshape(-1)[:total].reshape(B, Ho, Wo, C)


def _gap_fc_kernel(x_ref, w_ref, b_ref, o_ref, *, hw):
    """Global average pool fused with the final FC matmul."""
    acc = x_ref[0].astype(jnp.float32)
    for t in range(1, hw):
        acc = acc + x_ref[t].astype(jnp.float32)
    pooled = (acc * (1.0 / hw)).astype(jnp.bfloat16)
    o_ref[...] = (jnp.dot(pooled, w_ref[...],
                          preferred_element_type=jnp.float32) + b_ref[...])


def global_avg_pool_fc(x, fc_w, fc_b):
    """x: NHWC feature map (bf16); fc_w: (num_classes, C); fc_b: (num_classes,)."""
    B, H, W, C = x.shape
    HW = H * W
    N = fc_w.shape[0]
    Bp = _round_up(B, 8)
    Cp = _round_up(C, 128)
    Np = _round_up(N, 128)
    # (HW, B, C) so the spatial sum indexes the leading axis inside the kernel.
    x_t = jnp.transpose(x.reshape(B, HW, C), (1, 0, 2))
    x_p = jnp.pad(x_t.astype(jnp.bfloat16), ((0, 0), (0, Bp - B), (0, Cp - C)))
    w_p = jnp.pad(fc_w.T.astype(jnp.float32),
                  ((0, Cp - C), (0, Np - N))).astype(jnp.bfloat16)
    b_p = jnp.pad(fc_b.astype(jnp.float32), (0, Np - N)).reshape(1, Np)
    out = pl.pallas_call(
        functools.partial(_gap_fc_kernel, hw=HW),
        out_shape=jax.ShapeDtypeStruct((Bp, Np), jnp.float32),
        grid=(1,),
        in_specs=[pl.BlockSpec((HW, Bp, Cp), lambda i: (0, 0, 0)),
                  pl.BlockSpec((Cp, Np), lambda i: (0, 0)),
                  pl.BlockSpec((1, Np), lambda i: (0, 0))],
        out_specs=pl.BlockSpec((Bp, Np), lambda i: (0, 0)),
        compiler_params=pltpu.CompilerParams(vmem_limit_bytes=_VMEM_LIMIT),
    )(x_p, w_p, b_p)
    return out[:B, :N]


# --------------------------------------------------------------------------
# Layers built on the kernels (NHWC internally; im2col is transpose-free glue)
# --------------------------------------------------------------------------

def conv_bn_act(x, w, scale, bias, *, stride, padding, relu, residual=None):
    """Conv2d on NHWC activations with folded inference BatchNorm.

    Torch weight layout (Cout, Cin, kh, kw).  Optional `residual` (NHWC, same
    shape as the output) fuses the add + ReLU into the matmul epilogue.
    Activations flow in/out as bf16.
    """
    B, H, W_, Cin = x.shape
    Cout, _, kh, kw = w.shape
    Ho = (H + 2 * padding - kh) // stride + 1
    Wo = (W_ + 2 * padding - kw) // stride + 1

    if kh == 1 and kw == 1 and padding == 0:
        a = x[:, ::stride, ::stride, :].reshape(B * Ho * Wo, Cin)
    else:
        xp = jnp.pad(x, ((0, 0), (padding, padding), (padding, padding), (0, 0)))
        taps = [xp[:, di:di + stride * Ho:stride, dj:dj + stride * Wo:stride, :]
                for di in range(kh) for dj in range(kw)]
        # NHWC taps concatenated on channels -> (M, kh*kw*Cin), no 5-D transpose.
        a = jnp.concatenate(taps, axis=-1).reshape(B * Ho * Wo, kh * kw * Cin)

    # Fold BN gamma/sqrt(var) into conv weights; BN shift becomes the bias.
    wmat = (w * scale[:, None, None, None]).transpose(2, 3, 1, 0).reshape(
        kh * kw * Cin, Cout)
    res2d = None if residual is None else residual.reshape(B * Ho * Wo, Cout)
    y = matmul_bias_act(a, wmat, bias, relu=relu, residual=res2d)
    return y.reshape(B, Ho, Wo, Cout)


def bottleneck_block(x, blk):
    out = conv_bn_act(x, blk["conv1"]["w"], blk["conv1"]["scale"],
                      blk["conv1"]["bias"], stride=1, padding=0, relu=True)
    out = conv_bn_act(out, blk["conv2"]["w"], blk["conv2"]["scale"],
                      blk["conv2"]["bias"], stride=blk["stride"], padding=1,
                      relu=True)
    if "downsample" in blk:
        d = blk["downsample"]
        identity = conv_bn_act(x, d["w"], d["scale"], d["bias"],
                               stride=blk["stride"], padding=0, relu=False)
    else:
        identity = x
    # conv3 with residual add + ReLU fused into the matmul epilogue.
    return conv_bn_act(out, blk["conv3"]["w"], blk["conv3"]["scale"],
                       blk["conv3"]["bias"], stride=1, padding=0, relu=True,
                       residual=identity)


def resnet_forward(params, x_nchw):
    # Single layout change at the torch-facing boundary: NCHW -> NHWC.
    x = jnp.transpose(x_nchw.astype(jnp.float32), (0, 2, 3, 1))
    s = params["stem"]
    out = conv_bn_act(x, s["w"], s["scale"], s["bias"],
                      stride=2, padding=3, relu=True)
    out = max_pool_nhwc(out, kernel=3, stride=2, padding=1)
    for stage in params["stages"]:
        for blk in stage:
            out = bottleneck_block(out, blk)
    logits = global_avg_pool_fc(out, params["fc"]["w"], params["fc"]["b"])
    return logits                                                   # (B, 1000)


# --------------------------------------------------------------------------
# Deterministic synthetic parameters (shapes follow the ResNet-50 topology)
# --------------------------------------------------------------------------

def init_params(key, *, in_ch=3, base=8, depths=(2, 2, 2, 2), num_classes=1000):
    expansion = 4
    counter = [0]

    def nrm(shape, sc):
        counter[0] += 1
        k = jax.random.fold_in(key, counter[0])
        return sc * jax.random.normal(k, shape, jnp.float32)

    def conv_bn(cout, cin, ksize):
        return dict(w=nrm((cout, cin, ksize, ksize), 0.1),
                    scale=1.0 + nrm((cout,), 0.05),
                    bias=nrm((cout,), 0.05))

    params = dict(stem=conv_bn(base, in_ch, 7))
    stages = []
    cin = base
    mids = [base, base * 2, base * 4, base * 8]
    for s, (depth, mid) in enumerate(zip(depths, mids)):
        cout = mid * expansion
        blocks = []
        for b in range(depth):
            stride = 2 if (s > 0 and b == 0) else 1
            blk = dict(conv1=conv_bn(mid, cin, 1),
                       conv2=conv_bn(mid, mid, 3),
                       conv3=conv_bn(cout, mid, 1),
                       stride=stride)
            if stride != 1 or cin != cout:
                blk["downsample"] = conv_bn(cout, cin, 1)
            blocks.append(blk)
            cin = cout
        stages.append(blocks)
    params["stages"] = stages
    params["fc"] = dict(w=nrm((num_classes, cin), 0.05),
                        b=nrm((num_classes,), 0.01))
    return params


# --------------------------------------------------------------------------

if __name__ == "__main__":
    root = jax.random.PRNGKey(0)
    params = init_params(jax.random.fold_in(root, 1))
    # Small synthetic image batch (the real module takes NCHW RGB images).
    x = jax.random.normal(jax.random.fold_in(root, 2), (2, 3, 64, 64),
                          jnp.float32)

    fwd = jax.jit(lambda inp: resnet_forward(params, inp))
    logits = fwd(x)
    jax.block_until_ready(logits)

    assert logits.shape == (2, 1000), logits.shape
    assert bool(jnp.all(jnp.isfinite(logits)))
    print("KERNEL_OK")
</pallas_src>

<mosaic_0001>
module attributes {stable_mosaic.version = 11 : i64} {
  func.func @_mm_bias_act_kernel(%arg0: i32, %arg1: memref<512x160xbf16, #tpu.memory_space<vmem>>, %arg2: memref<160x128xbf16, #tpu.memory_space<vmem>>, %arg3: memref<1x128xf32, #tpu.memory_space<vmem>>, %arg4: memref<512x128xbf16, #tpu.memory_space<vmem>>) attributes {dimension_semantics = [#tpu.dimension_semantics<parallel>], iteration_bounds = array<i64: 4>, scalar_prefetch = 0 : i64, scratch_operands = 0 : i64, tpu.core_type = #tpu.core_type<tc>, window_params = [{transform_indices = @transform_0, window_bounds = array<i64: 512, 160>}, {pipeline_mode = #tpu.pipeline_mode<synchronous>, transform_indices = @transform_1, window_bounds = array<i64: 160, 128>}, {pipeline_mode = #tpu.pipeline_mode<synchronous>, transform_indices = @transform_2, window_bounds = array<i64: 1, 128>}, {transform_indices = @transform_3, window_bounds = array<i64: 512, 128>}]} {
    %c0 = arith.constant 0 : index
    %c0_0 = arith.constant 0 : index
    %0 = vector.load %arg1[%c0, %c0_0] : memref<512x160xbf16, #tpu.memory_space<vmem>>, vector<512x160xbf16>
    %c0_1 = arith.constant 0 : index
    %c0_2 = arith.constant 0 : index
    %1 = vector.load %arg2[%c0_1, %c0_2] : memref<160x128xbf16, #tpu.memory_space<vmem>>, vector<160x128xbf16>
    %cst = arith.constant dense<0.000000e+00> : vector<512x128xf32>
    %2 = tpu.matmul %0, %1, %cst {dimension_numbers = #tpu.dot_dimension_numbers<[1], [0], [0], [1], [0, 0, 1, 1], [], []>} : vector<512x160xbf16>, vector<160x128xbf16>, vector<512x128xf32> -> vector<512x128xf32>
    %c0_3 = arith.constant 0 : index
    %c0_4 = arith.constant 0 : index
    %3 = vector.load %arg3[%c0_3, %c0_4] : memref<1x128xf32, #tpu.memory_space<vmem>>, vector<1x128xf32>
    %4 = vector.broadcast %3 : vector<1x128xf32> to vector<512x128xf32>
    %5 = arith.addf %2, %4 : vector<512x128xf32>
    %cst_5 = arith.constant 0.000000e+00 : f32
    %6 = vector.broadcast %cst_5 : f32 to vector<512x128xf32>
    %7 = arith.maximumf %5, %6 : vector<512x128xf32>
    %8 = arith.truncf %7 : vector<512x128xf32> to vector<512x128xbf16>
    %c0_6 = arith.constant 0 : index
    %c0_7 = arith.constant 0 : index
    %9 = vector.load %arg4[%c0_6, %c0_7] : memref<512x128xbf16, #tpu.memory_space<vmem>>, vector<512x128xbf16>
    tpu.vector_store %arg4[%c0_6, %c0_7], %8 {strides = array<i32>} : memref<512x128xbf16, #tpu.memory_space<vmem>>, vector<512x128xbf16>,
    return
  }
  func.func @transform_0(%arg0: i32) -> (i32, i32) {
    %c0_i32 = arith.constant 0 : i32
    %c0_i32_0 = arith.constant 0 : i32
    return %arg0, %c0_i32 : i32, i32
  }
  func.func @transform_1(%arg0: i32) -> (i32, i32) {
    %c0_i32 = arith.constant 0 : i32
    %c0_i32_0 = arith.constant 0 : i32
    %c0_i32_1 = arith.constant 0 : i32
    return %c0_i32, %c0_i32_0 : i32, i32
  }
  func.func @transform_2(%arg0: i32) -> (i32, i32) {
    %c0_i32 = arith.constant 0 : i32
    %c0_i32_0 = arith.constant 0 : i32
    %c0_i32_1 = arith.constant 0 : i32
    return %c0_i32, %c0_i32_0 : i32, i32
  }
  func.func @transform_3(%arg0: i32) -> (i32, i32) {
    %c0_i32 = arith.constant 0 : i32
    %c0_i32_0 = arith.constant 0 : i32
    return %arg0, %c0_i32 : i32, i32
  }
}

module attributes {stable_mosaic.version = 11 : i64} {
  func.func @_max_taps_kernel(%arg0: i32, %arg1: memref<32x128xbf16, #tpu.memory_space<vmem>>, %arg2: memref<32x128xbf16, #tpu.memory_space<vmem>>, %arg3: memref<32x128xbf16, #tpu.memory_space<vmem>>, %arg4: memref<32x128xbf16, #tpu.memory_space<vmem>>, %arg5: memref<32x128xbf16, #tpu.memory_space<vmem>>, %arg6: memref<32x128xbf16, #tpu.memory_space<vmem>>, %arg7: memref<32x128xbf16, #tpu.memory_space<vmem>>, %arg8: memref<32x128xbf16, #tpu.memory_space<vmem>>, %arg9: memref<32x128xbf16, #tpu.memory_space<vmem>>, %arg10: memref<32x128xbf16, #tpu.memory_space<vmem>>) attributes {dimension_semantics = [#tpu.dimension_semantics<parallel>], iteration_bounds = array<i64: 1>, scalar_prefetch = 0 : i64, scratch_operands = 0 : i64, tpu.core_type = #tpu.core_type<tc>, window_params = [{transform_indices = @transform_0, window_bounds = array<i64: 32, 128>}, {transform_indices = @transform_1, window_bounds = array<i64: 32, 128>}, {transform_indices = @transform_2, window_bounds = array<i64: 32, 128>}, {transform_indices = @transform_3, window_bounds = array<i64: 32, 128>}, {transform_indices = @transform_4, window_bounds = array<i64: 32, 128>}, {transform_indices = @transform_5, window_bounds = array<i64: 32, 128>}, {transform_indices = @transform_6, window_bounds = array<i64: 32, 128>}, {transform_indices = @transform_7, window_bounds = array<i64: 32, 128>}, {transform_indices = @transform_8, window_bounds = array<i64: 32, 128>}, {transform_indices = @transform_9, window_bounds = array<i64: 32, 128>}]} {
    %c0 = arith.constant 0 : index
    %c0_0 = arith.constant 0 : index
    %0 = vector.load %arg1[%c0, %c0_0] : memref<32x128xbf16, #tpu.memory_space<vmem>>, vector<32x128xbf16>
    %c0_1 = arith.constant 0 : index
    %c0_2 = arith.constant 0 : index
    %1 = vector.load %arg2[%c0_1, %c0_2] : memref<32x128xbf16, #tpu.memory_space<vmem>>, vector<32x128xbf16>
    %2 = arith.maximumf %0, %1 : vector<32x128xbf16>
    %c0_3 = arith.constant 0 : index
    %c0_4 = arith.constant 0 : index
    %3 = vector.load %arg3[%c0_3, %c0_4] : memref<32x128xbf16, #tpu.memory_space<vmem>>, vector<32x128xbf16>
    %4 = arith.maximumf %2, %3 : vector<32x128xbf16>
    %c0_5 = arith.constant 0 : index
    %c0_6 = arith.constant 0 : index
    %5 = vector.load %arg4[%c0_5, %c0_6] : memref<32x128xbf16, #tpu.memory_space<vmem>>, vector<32x128xbf16>
    %6 = arith.maximumf %4, %5 : vector<32x128xbf16>
    %c0_7 = arith.constant 0 : index
    %c0_8 = arith.constant 0 : index
    %7 = vector.load %arg5[%c0_7, %c0_8] : memref<32x128xbf16, #tpu.memory_space<vmem>>, vector<32x128xbf16>
    %8 = arith.maximumf %6, %7 : vector<32x128xbf16>
    %c0_9 = arith.constant 0 : index
    %c0_10 = arith.constant 0 : index
    %9 = vector.load %arg6[%c0_9, %c0_10] : memref<32x128xbf16, #tpu.memory_space<vmem>>, vector<32x128xbf16>
    %10 = arith.maximumf %8, %9 : vector<32x128xbf16>
    %c0_11 = arith.constant 0 : index
    %c0_12 = arith.constant 0 : index
    %11 = vector.load %arg7[%c0_11, %c0_12] : memref<32x128xbf16, #tpu.memory_space<vmem>>, vector<32x128xbf16>
    %12 = arith.maximumf %10, %11 : vector<32x128xbf16>
    %c0_13 = arith.constant 0 : index
    %c0_14 = arith.constant 0 : index
    %13 = vector.load %arg8[%c0_13, %c0_14] : memref<32x128xbf16, #tpu.memory_space<vmem>>, vector<32x128xbf16>
    %14 = arith.maximumf %12, %13 : vector<32x128xbf16>
    %c0_15 = arith.constant 0 : index
    %c0_16 = arith.constant 0 : index
    %15 = vector.load %arg9[%c0_15, %c0_16] : memref<32x128xbf16, #tpu.memory_space<vmem>>, vector<32x128xbf16>
    %16 = arith.maximumf %14, %15 : vector<32x128xbf16>
    %c0_17 = arith.constant 0 : index
    %c0_18 = arith.constant 0 : index
    %17 = vector.load %arg10[%c0_17, %c0_18] : memref<32x128xbf16, #tpu.memory_space<vmem>>, vector<32x128xbf16>
    tpu.vector_store %arg10[%c0_17, %c0_18], %16 {strides = array<i32>} : memref<32x128xbf16, #tpu.memory_space<vmem>>, vector<32x128xbf16>,
    return
  }
  func.func @transform_0(%arg0: i32) -> (i32, i32) {
    %c0_i32 = arith.constant 0 : i32
    %c0_i32_0 = arith.constant 0 : i32
    return %arg0, %c0_i32 : i32, i32
  }
  func.func @transform_1(%arg0: i32) -> (i32, i32) {
    %c0_i32 = arith.constant 0 : i32
    %c0_i32_0 = arith.constant 0 : i32
    return %arg0, %c0_i32 : i32, i32
  }
  func.func @transform_2(%arg0: i32) -> (i32, i32) {
    %c0_i32 = arith.constant 0 : i32
    %c0_i32_0 = arith.constant 0 : i32
    return %arg0, %c0_i32 : i32, i32
  }
  func.func @transform_3(%arg0: i32) -> (i32, i32) {
    %c0_i32 = arith.constant 0 : i32
    %c0_i32_0 = arith.constant 0 : i32
    return %arg0, %c0_i32 : i32, i32
  }
  func.func @transform_4(%arg0: i32) -> (i32, i32) {
    %c0_i32 = arith.constant 0 : i32
    %c0_i32_0 = arith.constant 0 : i32
    return %arg0, %c0_i32 : i32, i32
  }
  func.func @transform_5(%arg0: i32) -> (i32, i32) {
    %c0_i32 = arith.constant 0 : i32
    %c0_i32_0 = arith.constant 0 : i32
    return %arg0, %c0_i32 : i32, i32
  }
  func.func @transform_6(%arg0: i32) -> (i32, i32) {
    %c0_i32 = arith.constant 0 : i32
    %c0_i32_0 = arith.constant 0 : i32
    return %arg0, %c0_i32 : i32, i32
  }
  func.func @transform_7(%arg0: i32) -> (i32, i32) {
    %c0_i32 = arith.constant 0 : i32
    %c0_i32_0 = arith.constant 0 : i32
    return %arg0, %c0_i32 : i32, i32
  }
  func.func @transform_8(%arg0: i32) -> (i32, i32) {
    %c0_i32 = arith.constant 0 : i32
    %c0_i32_0 = arith.constant 0 : i32
    return %arg0, %c0_i32 : i32, i32
  }
  func.func @transform_9(%arg0: i32) -> (i32, i32) {
    %c0_i32 = arith.constant 0 : i32
    %c0_i32_0 = arith.constant 0 : i32
    return %arg0, %c0_i32 : i32, i32
  }
}

module attributes {stable_mosaic.version = 11 : i64} {
  func.func @_mm_bias_act_kernel(%arg0: i32, %arg1: memref<512x16xbf16, #tpu.memory_space<vmem>>, %arg2: memref<16x128xbf16, #tpu.memory_space<vmem>>, %arg3: memref<1x128xf32, #tpu.memory_space<vmem>>, %arg4: memref<512x128xbf16, #tpu.memory_space<vmem>>) attributes {dimension_semantics = [#tpu.dimension_semantics<parallel>], iteration_bounds = array<i64: 1>, scalar_prefetch = 0 : i64, scratch_operands = 0 : i64, tpu.core_type = #tpu.core_type<tc>, window_params = [{transform_indices = @transform_0, window_bounds = array<i64: 512, 16>}, {pipeline_mode = #tpu.pipeline_mode<synchronous>, transform_indices = @transform_1, window_bounds = array<i64: 16, 128>}, {pipeline_mode = #tpu.pipeline_mode<synchronous>, transform_indices = @transform_2, window_bounds = array<i64: 1, 128>}, {transform_indices = @transform_3, window_bounds = array<i64: 512, 128>}]} {
    %c0 = arith.constant 0 : index
    %c0_0 = arith.constant 0 : index
    %0 = vector.load %arg1[%c0, %c0_0] : memref<512x16xbf16, #tpu.memory_space<vmem>>, vector<512x16xbf16>
    %c0_1 = arith.constant 0 : index
    %c0_2 = arith.constant 0 : index
    %1 = vector.load %arg2[%c0_1, %c0_2] : memref<16x128xbf16, #tpu.memory_space<vmem>>, vector<16x128xbf16>
    %cst = arith.constant dense<0.000000e+00> : vector<512x128xf32>
    %2 = tpu.matmul %0, %1, %cst {dimension_numbers = #tpu.dot_dimension_numbers<[1], [0], [0], [1], [0, 0, 1, 1], [], []>} : vector<512x16xbf16>, vector<16x128xbf16>, vector<512x128xf32> -> vector<512x128xf32>
    %c0_3 = arith.constant 0 : index
    %c0_4 = arith.constant 0 : index
    %3 = vector.load %arg3[%c0_3, %c0_4] : memref<1x128xf32, #tpu.memory_space<vmem>>, vector<1x128xf32>
    %4 = vector.broadcast %3 : vector<1x128xf32> to vector<512x128xf32>
    %5 = arith.addf %2, %4 : vector<512x128xf32>
    %cst_5 = arith.constant 0.000000e+00 : f32
    %6 = vector.broadcast %cst_5 : f32 to vector<512x128xf32>
    %7 = arith.maximumf %5, %6 : vector<512x128xf32>
    %8 = arith.truncf %7 : vector<512x128xf32> to vector<512x128xbf16>
    %c0_6 = arith.constant 0 : index
    %c0_7 = arith.constant 0 : index
    %9 = vector.load %arg4[%c0_6, %c0_7] : memref<512x128xbf16, #tpu.memory_space<vmem>>, vector<512x128xbf16>
    tpu.vector_store %arg4[%c0_6, %c0_7], %8 {strides = array<i32>} : memref<512x128xbf16, #tpu.memory_space<vmem>>, vector<512x128xbf16>,
    return
  }
  func.func @transform_0(%arg0: i32) -> (i32, i32) {
    %c0_i32 = arith.constant 0 : i32
    %c0_i32_0 = arith.constant 0 : i32
    return %arg0, %c0_i32 : i32, i32
  }
  func.func @transform_1(%arg0: i32) -> (i32, i32) {
    %c0_i32 = arith.constant 0 : i32
    %c0_i32_0 = arith.constant 0 : i32
    %c0_i32_1 = arith.constant 0 : i32
    return %c0_i32, %c0_i32_0 : i32, i32
  }
  func.func @transform_2(%arg0: i32) -> (i32, i32) {
    %c0_i32 = arith.constant 0 : i32
    %c0_i32_0 = arith.constant 0 : i32
    %c0_i32_1 = arith.constant 0 : i32
    return %c0_i32, %c0_i32_0 : i32, i32
  }
  func.func @transform_3(%arg0: i32) -> (i32, i32) {
    %c0_i32 = arith.constant 0 : i32
    %c0_i32_0 = arith.constant 0 : i32
    return %arg0, %c0_i32 : i32, i32
  }
}

module attributes {stable_mosaic.version = 11 : i64} {
  func.func @_mm_bias_act_kernel(%arg0: i32, %arg1: memref<512x80xbf16, #tpu.memory_space<vmem>>, %arg2: memref<80x128xbf16, #tpu.memory_space<vmem>>, %arg3: memref<1x128xf32, #tpu.memory_space<vmem>>, %arg4: memref<512x128xbf16, #tpu.memory_space<vmem>>) attributes {dimension_semantics = [#tpu.dimension_semantics<parallel>], iteration_bounds = array<i64: 1>, scalar_prefetch = 0 : i64, scratch_operands = 0 : i64, tpu.core_type = #tpu.core_type<tc>, window_params = [{transform_indices = @transform_0, window_bounds = array<i64: 512, 80>}, {pipeline_mode = #tpu.pipeline_mode<synchronous>, transform_indices = @transform_1, window_bounds = array<i64: 80, 128>}, {pipeline_mode = #tpu.pipeline_mode<synchronous>, transform_indices = @transform_2, window_bounds = array<i64: 1, 128>}, {transform_indices = @transform_3, window_bounds = array<i64: 512, 128>}]} {
    %c0 = arith.constant 0 : index
    %c0_0 = arith.constant 0 : index
    %0 = vector.load %arg1[%c0, %c0_0] : memref<512x80xbf16, #tpu.memory_space<vmem>>, vector<512x80xbf16>
    %c0_1 = arith.constant 0 : index
    %c0_2 = arith.constant 0 : index
    %1 = vector.load %arg2[%c0_1, %c0_2] : memref<80x128xbf16, #tpu.memory_space<vmem>>, vector<80x128xbf16>
    %cst = arith.constant dense<0.000000e+00> : vector<512x128xf32>
    %2 = tpu.matmul %0, %1, %cst {dimension_numbers = #tpu.dot_dimension_numbers<[1], [0], [0], [1], [0, 0, 1, 1], [], []>} : vector<512x80xbf16>, vector<80x128xbf16>, vector<512x128xf32> -> vector<512x128xf32>
    %c0_3 = arith.constant 0 : index
    %c0_4 = arith.constant 0 : index
    %3 = vector.load %arg3[%c0_3, %c0_4] : memref<1x128xf32, #tpu.memory_space<vmem>>, vector<1x128xf32>
    %4 = vector.broadcast %3 : vector<1x128xf32> to vector<512x128xf32>
    %5 = arith.addf %2, %4 : vector<512x128xf32>
    %cst_5 = arith.constant 0.000000e+00 : f32
    %6 = vector.broadcast %cst_5 : f32 to vector<512x128xf32>
    %7 = arith.maximumf %5, %6 : vector<512x128xf32>
    %8 = arith.truncf %7 : vector<512x128xf32> to vector<512x128xbf16>
    %c0_6 = arith.constant 0 : index
    %c0_7 = arith.constant 0 : index
    %9 = vector.load %arg4[%c0_6, %c0_7] : memref<512x128xbf16, #tpu.memory_space<vmem>>, vector<512x128xbf16>
    tpu.vector_store %arg4[%c0_6, %c0_7], %8 {strides = array<i32>} : memref<512x128xbf16, #tpu.memory_space<vmem>>, vector<512x128xbf16>,
    return
  }
  func.func @transform_0(%arg0: i32) -> (i32, i32) {
    %c0_i32 = arith.constant 0 : i32
    %c0_i32_0 = arith.constant 0 : i32
    return %arg0, %c0_i32 : i32, i32
  }
  func.func @transform_1(%arg0: i32) -> (i32, i32) {
    %c0_i32 = arith.constant 0 : i32
    %c0_i32_0 = arith.constant 0 : i32
    %c0_i32_1 = arith.constant 0 : i32
    return %c0_i32, %c0_i32_0 : i32, i32
  }
  func.func @transform_2(%arg0: i32) -> (i32, i32) {
    %c0_i32 = arith.constant 0 : i32
    %c0_i32_0 = arith.constant 0 : i32
    %c0_i32_1 = arith.constant 0 : i32
    return %c0_i32, %c0_i32_0 : i32, i32
  }
  func.func @transform_3(%arg0: i32) -> (i32, i32) {
    %c0_i32 = arith.constant 0 : i32
    %c0_i32_0 = arith.constant 0 : i32
    return %arg0, %c0_i32 : i32, i32
  }
}

module attributes {stable_mosaic.version = 11 : i64} {
  func.func @_mm_bias_act_kernel(%arg0: i32, %arg1: memref<512x16xbf16, #tpu.memory_space<vmem>>, %arg2: memref<16x128xbf16, #tpu.memory_space<vmem>>, %arg3: memref<1x128xf32, #tpu.memory_space<vmem>>, %arg4: memref<512x128xbf16, #tpu.memory_space<vmem>>) attributes {dimension_semantics = [#tpu.dimension_semantics<parallel>], iteration_bounds = array<i64: 1>, scalar_prefetch = 0 : i64, scratch_operands = 0 : i64, tpu.core_type = #tpu.core_type<tc>, window_params = [{transform_indices = @transform_0, window_bounds = array<i64: 512, 16>}, {pipeline_mode = #tpu.pipeline_mode<synchronous>, transform_indices = @transform_1, window_bounds = array<i64: 16, 128>}, {pipeline_mode = #tpu.pipeline_mode<synchronous>, transform_indices = @transform_2, window_bounds = array<i64: 1, 128>}, {transform_indices = @transform_3, window_bounds = array<i64: 512, 128>}]} {
    %c0 = arith.constant 0 : index
    %c0_0 = arith.constant 0 : index
    %0 = vector.load %arg1[%c0, %c0_0] : memref<512x16xbf16, #tpu.memory_space<vmem>>, vector<512x16xbf16>
    %c0_1 = arith.constant 0 : index
    %c0_2 = arith.constant 0 : index
    %1 = vector.load %arg2[%c0_1, %c0_2] : memref<16x128xbf16, #tpu.memory_space<vmem>>, vector<16x128xbf16>
    %cst = arith.constant dense<0.000000e+00> : vector<512x128xf32>
    %2 = tpu.matmul %0, %1, %cst {dimension_numbers = #tpu.dot_dimension_numbers<[1], [0], [0], [1], [0, 0, 1, 1], [], []>} : vector<512x16xbf16>, vector<16x128xbf16>, vector<512x128xf32> -> vector<512x128xf32>
    %c0_3 = arith.constant 0 : index
    %c0_4 = arith.constant 0 : index
    %3 = vector.load %arg3[%c0_3, %c0_4] : memref<1x128xf32, #tpu.memory_space<vmem>>, vector<1x128xf32>
    %4 = vector.broadcast %3 : vector<1x128xf32> to vector<512x128xf32>
    %5 = arith.addf %2, %4 : vector<512x128xf32>
    %6 = arith.truncf %5 : vector<512x128xf32> to vector<512x128xbf16>
    %c0_5 = arith.constant 0 : index
    %c0_6 = arith.constant 0 : index
    %7 = vector.load %arg4[%c0_5, %c0_6] : memref<512x128xbf16, #tpu.memory_space<vmem>>, vector<512x128xbf16>
    tpu.vector_store %arg4[%c0_5, %c0_6], %6 {strides = array<i32>} : memref<512x128xbf16, #tpu.memory_space<vmem>>, vector<512x128xbf16>,
    return
  }
  func.func @transform_0(%arg0: i32) -> (i32, i32) {
    %c0_i32 = arith.constant 0 : i32
    %c0_i32_0 = arith.constant 0 : i32
    return %arg0, %c0_i32 : i32, i32
  }
  func.func @transform_1(%arg0: i32) -> (i32, i32) {
    %c0_i32 = arith.constant 0 : i32
    %c0_i32_0 = arith.constant 0 : i32
    %c0_i32_1 = arith.constant 0 : i32
    return %c0_i32, %c0_i32_0 : i32, i32
  }
  func.func @transform_2(%arg0: i32) -> (i32, i32) {
    %c0_i32 = arith.constant 0 : i32
    %c0_i32_0 = arith.constant 0 : i32
    %c0_i32_1 = arith.constant 0 : i32
    return %c0_i32, %c0_i32_0 : i32, i32
  }
  func.func @transform_3(%arg0: i32) -> (i32, i32) {
    %c0_i32 = arith.constant 0 : i32
    %c0_i32_0 = arith.constant 0 : i32
    return %arg0, %c0_i32 : i32, i32
  }
}

module attributes {stable_mosaic.version = 11 : i64} {
  func.func @_mm_bias_res_relu_kernel(%arg0: i32, %arg1: memref<512x16xbf16, #tpu.memory_space<vmem>>, %arg2: memref<16x128xbf16, #tpu.memory_space<vmem>>, %arg3: memref<1x128xf32, #tpu.memory_space<vmem>>, %arg4: memref<512x128xbf16, #tpu.memory_space<vmem>>, %arg5: memref<512x128xbf16, #tpu.memory_space<vmem>>) attributes {dimension_semantics = [#tpu.dimension_semantics<parallel>], iteration_bounds = array<i64: 1>, scalar_prefetch = 0 : i64, scratch_operands = 0 : i64, tpu.core_type = #tpu.core_type<tc>, window_params = [{transform_indices = @transform_0, window_bounds = array<i64: 512, 16>}, {pipeline_mode = #tpu.pipeline_mode<synchronous>, transform_indices = @transform_1, window_bounds = array<i64: 16, 128>}, {pipeline_mode = #tpu.pipeline_mode<synchronous>, transform_indices = @transform_2, window_bounds = array<i64: 1, 128>}, {transform_indices = @transform_3, window_bounds = array<i64: 512, 128>}, {transform_indices = @transform_4, window_bounds = array<i64: 512, 128>}]} {
    %c0 = arith.constant 0 : index
    %c0_0 = arith.constant 0 : index
    %0 = vector.load %arg1[%c0, %c0_0] : memref<512x16xbf16, #tpu.memory_space<vmem>>, vector<512x16xbf16>
    %c0_1 = arith.constant 0 : index
    %c0_2 = arith.constant 0 : index
    %1 = vector.load %arg2[%c0_1, %c0_2] : memref<16x128xbf16, #tpu.memory_space<vmem>>, vector<16x128xbf16>
    %cst = arith.constant dense<0.000000e+00> : vector<512x128xf32>
    %2 = tpu.matmul %0, %1, %cst {dimension_numbers = #tpu.dot_dimension_numbers<[1], [0], [0], [1], [0, 0, 1, 1], [], []>} : vector<512x16xbf16>, vector<16x128xbf16>, vector<512x128xf32> -> vector<512x128xf32>
    %c0_3 = arith.constant 0 : index
    %c0_4 = arith.constant 0 : index
    %3 = vector.load %arg3[%c0_3, %c0_4] : memref<1x128xf32, #tpu.memory_space<vmem>>, vector<1x128xf32>
    %4 = vector.broadcast %3 : vector<1x128xf32> to vector<512x128xf32>
    %5 = arith.addf %2, %4 : vector<512x128xf32>
    %c0_5 = arith.constant 0 : index
    %c0_6 = arith.constant 0 : index
    %6 = vector.load %arg4[%c0_5, %c0_6] : memref<512x128xbf16, #tpu.memory_space<vmem>>, vector<512x128xbf16>
    %7 = arith.extf %6 : vector<512x128xbf16> to vector<512x128xf32>
    %8 = arith.addf %5, %7 : vector<512x128xf32>
    %cst_7 = arith.constant 0.000000e+00 : f32
    %9 = vector.broadcast %cst_7 : f32 to vector<512x128xf32>
    %10 = arith.maximumf %8, %9 : vector<512x128xf32>
    %11 = arith.truncf %10 : vector<512x128xf32> to vector<512x128xbf16>
    %c0_8 = arith.constant 0 : index
    %c0_9 = arith.constant 0 : index
    %12 = vector.load %arg5[%c0_8, %c0_9] : memref<512x128xbf16, #tpu.memory_space<vmem>>, vector<512x128xbf16>
    tpu.vector_store %arg5[%c0_8, %c0_9], %11 {strides = array<i32>} : memref<512x128xbf16, #tpu.memory_space<vmem>>, vector<512x128xbf16>,
    return
  }
  func.func @transform_0(%arg0: i32) -> (i32, i32) {
    %c0_i32 = arith.constant 0 : i32
    %c0_i32_0 = arith.constant 0 : i32
    return %arg0, %c0_i32 : i32, i32
  }
  func.func @transform_1(%arg0: i32) -> (i32, i32) {
    %c0_i32 = arith.constant 0 : i32
    %c0_i32_0 = arith.constant 0 : i32
    %c0_i32_1 = arith.constant 0 : i32
    return %c0_i32, %c0_i32_0 : i32, i32
  }
  func.func @transform_2(%arg0: i32) -> (i32, i32) {
    %c0_i32 = arith.constant 0 : i32
    %c0_i32_0 = arith.constant 0 : i32
    %c0_i32_1 = arith.constant 0 : i32
    return %c0_i32, %c0_i32_0 : i32, i32
  }
  func.func @transform_3(%arg0: i32) -> (i32, i32) {
    %c0_i32 = arith.constant 0 : i32
    %c0_i32_0 = arith.constant 0 : i32
    return %arg0, %c0_i32 : i32, i32
  }
  func.func @transform_4(%arg0: i32) -> (i32, i32) {
    %c0_i32 = arith.constant 0 : i32
    %c0_i32_0 = arith.constant 0 : i32
    return %arg0, %c0_i32 : i32, i32
  }
}

module attributes {stable_mosaic.version = 11 : i64} {
  func.func @_mm_bias_act_kernel(%arg0: i32, %arg1: memref<512x32xbf16, #tpu.memory_space<vmem>>, %arg2: memref<32x128xbf16, #tpu.memory_space<vmem>>, %arg3: memref<1x128xf32, #tpu.memory_space<vmem>>, %arg4: memref<512x128xbf16, #tpu.memory_space<vmem>>) attributes {dimension_semantics = [#tpu.dimension_semantics<parallel>], iteration_bounds = array<i64: 1>, scalar_prefetch = 0 : i64, scratch_operands = 0 : i64, tpu.core_type = #tpu.core_type<tc>, window_params = [{transform_indices = @transform_0, window_bounds = array<i64: 512, 32>}, {pipeline_mode = #tpu.pipeline_mode<synchronous>, transform_indices = @transform_1, window_bounds = array<i64: 32, 128>}, {pipeline_mode = #tpu.pipeline_mode<synchronous>, transform_indices = @transform_2, window_bounds = array<i64: 1, 128>}, {transform_indices = @transform_3, window_bounds = array<i64: 512, 128>}]} {
    %c0 = arith.constant 0 : index
    %c0_0 = arith.constant 0 : index
    %0 = vector.load %arg1[%c0, %c0_0] : memref<512x32xbf16, #tpu.memory_space<vmem>>, vector<512x32xbf16>
    %c0_1 = arith.constant 0 : index
    %c0_2 = arith.constant 0 : index
    %1 = vector.load %arg2[%c0_1, %c0_2] : memref<32x128xbf16, #tpu.memory_space<vmem>>, vector<32x128xbf16>
    %cst = arith.constant dense<0.000000e+00> : vector<512x128xf32>
    %2 = tpu.matmul %0, %1, %cst {dimension_numbers = #tpu.dot_dimension_numbers<[1], [0], [0], [1], [0, 0, 1, 1], [], []>} : vector<512x32xbf16>, vector<32x128xbf16>, vector<512x128xf32> -> vector<512x128xf32>
    %c0_3 = arith.constant 0 : index
    %c0_4 = arith.constant 0 : index
    %3 = vector.load %arg3[%c0_3, %c0_4] : memref<1x128xf32, #tpu.memory_space<vmem>>, vector<1x128xf32>
    %4 = vector.broadcast %3 : vector<1x128xf32> to vector<512x128xf32>
    %5 = arith.addf %2, %4 : vector<512x128xf32>
    %cst_5 = arith.constant 0.000000e+00 : f32
    %6 = vector.broadcast %cst_5 : f32 to vector<512x128xf32>
    %7 = arith.maximumf %5, %6 : vector<512x128xf32>
    %8 = arith.truncf %7 : vector<512x128xf32> to vector<512x128xbf16>
    %c0_6 = arith.constant 0 : index
    %c0_7 = arith.constant 0 : index
    %9 = vector.load %arg4[%c0_6, %c0_7] : memref<512x128xbf16, #tpu.memory_space<vmem>>, vector<512x128xbf16>
    tpu.vector_store %arg4[%c0_6, %c0_7], %8 {strides = array<i32>} : memref<512x128xbf16, #tpu.memory_space<vmem>>, vector<512x128xbf16>,
    return
  }
  func.func @transform_0(%arg0: i32) -> (i32, i32) {
    %c0_i32 = arith.constant 0 : i32
    %c0_i32_0 = arith.constant 0 : i32
    return %arg0, %c0_i32 : i32, i32
  }
  func.func @transform_1(%arg0: i32) -> (i32, i32) {
    %c0_i32 = arith.constant 0 : i32
    %c0_i32_0 = arith.constant 0 : i32
    %c0_i32_1 = arith.constant 0 : i32
    return %c0_i32, %c0_i32_0 : i32, i32
  }
  func.func @transform_2(%arg0: i32) -> (i32, i32) {
    %c0_i32 = arith.constant 0 : i32
    %c0_i32_0 = arith.constant 0 : i32
    %c0_i32_1 = arith.constant 0 : i32
    return %c0_i32, %c0_i32_0 : i32, i32
  }
  func.func @transform_3(%arg0: i32) -> (i32, i32) {
    %c0_i32 = arith.constant 0 : i32
    %c0_i32_0 = arith.constant 0 : i32
    return %arg0, %c0_i32 : i32, i32
  }
}

module attributes {stable_mosaic.version = 11 : i64} {
  func.func @_mm_bias_act_kernel(%arg0: i32, %arg1: memref<128x144xbf16, #tpu.memory_space<vmem>>, %arg2: memref<144x128xbf16, #tpu.memory_space<vmem>>, %arg3: memref<1x128xf32, #tpu.memory_space<vmem>>, %arg4: memref<128x128xbf16, #tpu.memory_space<vmem>>) attributes {dimension_semantics = [#tpu.dimension_semantics<parallel>], iteration_bounds = array<i64: 1>, scalar_prefetch = 0 : i64, scratch_operands = 0 : i64, tpu.core_type = #tpu.core_type<tc>, window_params = [{transform_indices = @transform_0, window_bounds = array<i64: 128, 144>}, {pipeline_mode = #tpu.pipeline_mode<synchronous>, transform_indices = @transform_1, window_bounds = array<i64: 144, 128>}, {pipeline_mode = #tpu.pipeline_mode<synchronous>, transform_indices = @transform_2, window_bounds = array<i64: 1, 128>}, {transform_indices = @transform_3, window_bounds = array<i64: 128, 128>}]} {
    %c0 = arith.constant 0 : index
    %c0_0 = arith.constant 0 : index
    %0 = vector.load %arg1[%c0, %c0_0] : memref<128x144xbf16, #tpu.memory_space<vmem>>, vector<128x144xbf16>
    %c0_1 = arith.constant 0 : index
    %c0_2 = arith.constant 0 : index
    %1 = vector.load %arg2[%c0_1, %c0_2] : memref<144x128xbf16, #tpu.memory_space<vmem>>, vector<144x128xbf16>
    %cst = arith.constant dense<0.000000e+00> : vector<128x128xf32>
    %2 = tpu.matmul %0, %1, %cst {dimension_numbers = #tpu.dot_dimension_numbers<[1], [0], [0], [1], [0, 0, 1, 1], [], []>} : vector<128x144xbf16>, vector<144x128xbf16>, vector<128x128xf32> -> vector<128x128xf32>
    %c0_3 = arith.constant 0 : index
    %c0_4 = arith.constant 0 : index
    %3 = vector.load %arg3[%c0_3, %c0_4] : memref<1x128xf32, #tpu.memory_space<vmem>>, vector<1x128xf32>
    %4 = vector.broadcast %3 : vector<1x128xf32> to vector<128x128xf32>
    %5 = arith.addf %2, %4 : vector<128x128xf32>
    %cst_5 = arith.constant 0.000000e+00 : f32
    %6 = vector.broadcast %cst_5 : f32 to vector<128x128xf32>
    %7 = arith.maximumf %5, %6 : vector<128x128xf32>
    %8 = arith.truncf %7 : vector<128x128xf32> to vector<128x128xbf16>
    %c0_6 = arith.constant 0 : index
    %c0_7 = arith.constant 0 : index
    %9 = vector.load %arg4[%c0_6, %c0_7] : memref<128x128xbf16, #tpu.memory_space<vmem>>, vector<128x128xbf16>
    tpu.vector_store %arg4[%c0_6, %c0_7], %8 {strides = array<i32>} : memref<128x128xbf16, #tpu.memory_space<vmem>>, vector<128x128xbf16>,
    return
  }
  func.func @transform_0(%arg0: i32) -> (i32, i32) {
    %c0_i32 = arith.constant 0 : i32
    %c0_i32_0 = arith.constant 0 : i32
    return %arg0, %c0_i32 : i32, i32
  }
  func.func @transform_1(%arg0: i32) -> (i32, i32) {
    %c0_i32 = arith.constant 0 : i32
    %c0_i32_0 = arith.constant 0 : i32
    %c0_i32_1 = arith.constant 0 : i32
    return %c0_i32, %c0_i32_0 : i32, i32
  }
  func.func @transform_2(%arg0: i32) -> (i32, i32) {
    %c0_i32 = arith.constant 0 : i32
    %c0_i32_0 = arith.constant 0 : i32
    %c0_i32_1 = arith.constant 0 : i32
    return %c0_i32, %c0_i32_0 : i32, i32
  }
  func.func @transform_3(%arg0: i32) -> (i32, i32) {
    %c0_i32 = arith.constant 0 : i32
    %c0_i32_0 = arith.constant 0 : i32
    return %arg0, %c0_i32 : i32, i32
  }
}

module attributes {stable_mosaic.version = 11 : i64} {
  func.func @_mm_bias_act_kernel(%arg0: i32, %arg1: memref<128x32xbf16, #tpu.memory_space<vmem>>, %arg2: memref<32x128xbf16, #tpu.memory_space<vmem>>, %arg3: memref<1x128xf32, #tpu.memory_space<vmem>>, %arg4: memref<128x128xbf16, #tpu.memory_space<vmem>>) attributes {dimension_semantics = [#tpu.dimension_semantics<parallel>], iteration_bounds = array<i64: 1>, scalar_prefetch = 0 : i64, scratch_operands = 0 : i64, tpu.core_type = #tpu.core_type<tc>, window_params = [{transform_indices = @transform_0, window_bounds = array<i64: 128, 32>}, {pipeline_mode = #tpu.pipeline_mode<synchronous>, transform_indices = @transform_1, window_bounds = array<i64: 32, 128>}, {pipeline_mode = #tpu.pipeline_mode<synchronous>, transform_indices = @transform_2, window_bounds = array<i64: 1, 128>}, {transform_indices = @transform_3, window_bounds = array<i64: 128, 128>}]} {
    %c0 = arith.constant 0 : index
    %c0_0 = arith.constant 0 : index
    %0 = vector.load %arg1[%c0, %c0_0] : memref<128x32xbf16, #tpu.memory_space<vmem>>, vector<128x32xbf16>
    %c0_1 = arith.constant 0 : index
    %c0_2 = arith.constant 0 : index
    %1 = vector.load %arg2[%c0_1, %c0_2] : memref<32x128xbf16, #tpu.memory_space<vmem>>, vector<32x128xbf16>
    %cst = arith.constant dense<0.000000e+00> : vector<128x128xf32>
    %2 = tpu.matmul %0, %1, %cst {dimension_numbers = #tpu.dot_dimension_numbers<[1], [0], [0], [1], [0, 0, 1, 1], [], []>} : vector<128x32xbf16>, vector<32x128xbf16>, vector<128x128xf32> -> vector<128x128xf32>
    %c0_3 = arith.constant 0 : index
    %c0_4 = arith.constant 0 : index
    %3 = vector.load %arg3[%c0_3, %c0_4] : memref<1x128xf32, #tpu.memory_space<vmem>>, vector<1x128xf32>
    %4 = vector.broadcast %3 : vector<1x128xf32> to vector<128x128xf32>
    %5 = arith.addf %2, %4 : vector<128x128xf32>
    %6 = arith.truncf %5 : vector<128x128xf32> to vector<128x128xbf16>
    %c0_5 = arith.constant 0 : index
    %c0_6 = arith.constant 0 : index
    %7 = vector.load %arg4[%c0_5, %c0_6] : memref<128x128xbf16, #tpu.memory_space<vmem>>, vector<128x128xbf16>
    tpu.vector_store %arg4[%c0_5, %c0_6], %6 {strides = array<i32>} : memref<128x128xbf16, #tpu.memory_space<vmem>>, vector<128x128xbf16>,
    return
  }
  func.func @transform_0(%arg0: i32) -> (i32, i32) {
    %c0_i32 = arith.constant 0 : i32
    %c0_i32_0 = arith.constant 0 : i32
    return %arg0, %c0_i32 : i32, i32
  }
  func.func @transform_1(%arg0: i32) -> (i32, i32) {
    %c0_i32 = arith.constant 0 : i32
    %c0_i32_0 = arith.constant 0 : i32
    %c0_i32_1 = arith.constant 0 : i32
    return %c0_i32, %c0_i32_0 : i32, i32
  }
  func.func @transform_2(%arg0: i32) -> (i32, i32) {
    %c0_i32 = arith.constant 0 : i32
    %c0_i32_0 = arith.constant 0 : i32
    %c0_i32_1 = arith.constant 0 : i32
    return %c0_i32, %c0_i32_0 : i32, i32
  }
  func.func @transform_3(%arg0: i32) -> (i32, i32) {
    %c0_i32 = arith.constant 0 : i32
    %c0_i32_0 = arith.constant 0 : i32
    return %arg0, %c0_i32 : i32, i32
  }
}

module attributes {stable_mosaic.version = 11 : i64} {
  func.func @_mm_bias_act_kernel(%arg0: i32, %arg1: memref<128x64xbf16, #tpu.memory_space<vmem>>, %arg2: memref<64x128xbf16, #tpu.memory_space<vmem>>, %arg3: memref<1x128xf32, #tpu.memory_space<vmem>>, %arg4: memref<128x128xbf16, #tpu.memory_space<vmem>>) attributes {dimension_semantics = [#tpu.dimension_semantics<parallel>], iteration_bounds = array<i64: 1>, scalar_prefetch = 0 : i64, scratch_operands = 0 : i64, tpu.core_type = #tpu.core_type<tc>, window_params = [{transform_indices = @transform_0, window_bounds = array<i64: 128, 64>}, {pipeline_mode = #tpu.pipeline_mode<synchronous>, transform_indices = @transform_1, window_bounds = array<i64: 64, 128>}, {pipeline_mode = #tpu.pipeline_mode<synchronous>, transform_indices = @transform_2, window_bounds = array<i64: 1, 128>}, {transform_indices = @transform_3, window_bounds = array<i64: 128, 128>}]} {
    %c0 = arith.constant 0 : index
    %c0_0 = arith.constant 0 : index
    %0 = vector.load %arg1[%c0, %c0_0] : memref<128x64xbf16, #tpu.memory_space<vmem>>, vector<128x64xbf16>
    %c0_1 = arith.constant 0 : index
    %c0_2 = arith.constant 0 : index
    %1 = vector.load %arg2[%c0_1, %c0_2] : memref<64x128xbf16, #tpu.memory_space<vmem>>, vector<64x128xbf16>
    %cst = arith.constant dense<0.000000e+00> : vector<128x128xf32>
    %2 = tpu.matmul %0, %1, %cst {dimension_numbers = #tpu.dot_dimension_numbers<[1], [0], [0], [1], [0, 0, 1, 1], [], []>} : vector<128x64xbf16>, vector<64x128xbf16>, vector<128x128xf32> -> vector<128x128xf32>
    %c0_3 = arith.constant 0 : index
    %c0_4 = arith.constant 0 : index
    %3 = vector.load %arg3[%c0_3, %c0_4] : memref<1x128xf32, #tpu.memory_space<vmem>>, vector<1x128xf32>
    %4 = vector.broadcast %3 : vector<1x128xf32> to vector<128x128xf32>
    %5 = arith.addf %2, %4 : vector<128x128xf32>
    %cst_5 = arith.constant 0.000000e+00 : f32
    %6 = vector.broadcast %cst_5 : f32 to vector<128x128xf32>
    %7 = arith.maximumf %5, %6 : vector<128x128xf32>
    %8 = arith.truncf %7 : vector<128x128xf32> to vector<128x128xbf16>
    %c0_6 = arith.constant 0 : index
    %c0_7 = arith.constant 0 : index
    %9 = vector.load %arg4[%c0_6, %c0_7] : memref<128x128xbf16, #tpu.memory_space<vmem>>, vector<128x128xbf16>
    tpu.vector_store %arg4[%c0_6, %c0_7], %8 {strides = array<i32>} : memref<128x128xbf16, #tpu.memory_space<vmem>>, vector<128x128xbf16>,
    return
  }
  func.func @transform_0(%arg0: i32) -> (i32, i32) {
    %c0_i32 = arith.constant 0 : i32
    %c0_i32_0 = arith.constant 0 : i32
    return %arg0, %c0_i32 : i32, i32
  }
  func.func @transform_1(%arg0: i32) -> (i32, i32) {
    %c0_i32 = arith.constant 0 : i32
    %c0_i32_0 = arith.constant 0 : i32
    %c0_i32_1 = arith.constant 0 : i32
    return %c0_i32, %c0_i32_0 : i32, i32
  }
  func.func @transform_2(%arg0: i32) -> (i32, i32) {
    %c0_i32 = arith.constant 0 : i32
    %c0_i32_0 = arith.constant 0 : i32
    %c0_i32_1 = arith.constant 0 : i32
    return %c0_i32, %c0_i32_0 : i32, i32
  }
  func.func @transform_3(%arg0: i32) -> (i32, i32) {
    %c0_i32 = arith.constant 0 : i32
    %c0_i32_0 = arith.constant 0 : i32
    return %arg0, %c0_i32 : i32, i32
  }
}

module attributes {stable_mosaic.version = 11 : i64} {
  func.func @_mm_bias_res_relu_kernel(%arg0: i32, %arg1: memref<128x16xbf16, #tpu.memory_space<vmem>>, %arg2: memref<16x128xbf16, #tpu.memory_space<vmem>>, %arg3: memref<1x128xf32, #tpu.memory_space<vmem>>, %arg4: memref<128x128xbf16, #tpu.memory_space<vmem>>, %arg5: memref<128x128xbf16, #tpu.memory_space<vmem>>) attributes {dimension_semantics = [#tpu.dimension_semantics<parallel>], iteration_bounds = array<i64: 1>, scalar_prefetch = 0 : i64, scratch_operands = 0 : i64, tpu.core_type = #tpu.core_type<tc>, window_params = [{transform_indices = @transform_0, window_bounds = array<i64: 128, 16>}, {pipeline_mode = #tpu.pipeline_mode<synchronous>, transform_indices = @transform_1, window_bounds = array<i64: 16, 128>}, {pipeline_mode = #tpu.pipeline_mode<synchronous>, transform_indices = @transform_2, window_bounds = array<i64: 1, 128>}, {transform_indices = @transform_3, window_bounds = array<i64: 128, 128>}, {transform_indices = @transform_4, window_bounds = array<i64: 128, 128>}]} {
    %c0 = arith.constant 0 : index
    %c0_0 = arith.constant 0 : index
    %0 = vector.load %arg1[%c0, %c0_0] : memref<128x16xbf16, #tpu.memory_space<vmem>>, vector<128x16xbf16>
    %c0_1 = arith.constant 0 : index
    %c0_2 = arith.constant 0 : index
    %1 = vector.load %arg2[%c0_1, %c0_2] : memref<16x128xbf16, #tpu.memory_space<vmem>>, vector<16x128xbf16>
    %cst = arith.constant dense<0.000000e+00> : vector<128x128xf32>
    %2 = tpu.matmul %0, %1, %cst {dimension_numbers = #tpu.dot_dimension_numbers<[1], [0], [0], [1], [0, 0, 1, 1], [], []>} : vector<128x16xbf16>, vector<16x128xbf16>, vector<128x128xf32> -> vector<128x128xf32>
    %c0_3 = arith.constant 0 : index
    %c0_4 = arith.constant 0 : index
    %3 = vector.load %arg3[%c0_3, %c0_4] : memref<1x128xf32, #tpu.memory_space<vmem>>, vector<1x128xf32>
    %4 = vector.broadcast %3 : vector<1x128xf32> to vector<128x128xf32>
    %5 = arith.addf %2, %4 : vector<128x128xf32>
    %c0_5 = arith.constant 0 : index
    %c0_6 = arith.constant 0 : index
    %6 = vector.load %arg4[%c0_5, %c0_6] : memref<128x128xbf16, #tpu.memory_space<vmem>>, vector<128x128xbf16>
    %7 = arith.extf %6 : vector<128x128xbf16> to vector<128x128xf32>
    %8 = arith.addf %5, %7 : vector<128x128xf32>
    %cst_7 = arith.constant 0.000000e+00 : f32
    %9 = vector.broadcast %cst_7 : f32 to vector<128x128xf32>
    %10 = arith.maximumf %8, %9 : vector<128x128xf32>
    %11 = arith.truncf %10 : vector<128x128xf32> to vector<128x128xbf16>
    %c0_8 = arith.constant 0 : index
    %c0_9 = arith.constant 0 : index
    %12 = vector.load %arg5[%c0_8, %c0_9] : memref<128x128xbf16, #tpu.memory_space<vmem>>, vector<128x128xbf16>
    tpu.vector_store %arg5[%c0_8, %c0_9], %11 {strides = array<i32>} : memref<128x128xbf16, #tpu.memory_space<vmem>>, vector<128x128xbf16>,
    return
  }
  func.func @transform_0(%arg0: i32) -> (i32, i32) {
    %c0_i32 = arith.constant 0 : i32
    %c0_i32_0 = arith.constant 0 : i32
    return %arg0, %c0_i32 : i32, i32
  }
  func.func @transform_1(%arg0: i32) -> (i32, i32) {
    %c0_i32 = arith.constant 0 : i32
    %c0_i32_0 = arith.constant 0 : i32
    %c0_i32_1 = arith.constant 0 : i32
    return %c0_i32, %c0_i32_0 : i32, i32
  }
  func.func @transform_2(%arg0: i32) -> (i32, i32) {
    %c0_i32 = arith.constant 0 : i32
    %c0_i32_0 = arith.constant 0 : i32
    %c0_i32_1 = arith.constant 0 : i32
    return %c0_i32, %c0_i32_0 : i32, i32
  }
  func.func @transform_3(%arg0: i32) -> (i32, i32) {
    %c0_i32 = arith.constant 0 : i32
    %c0_i32_0 = arith.constant 0 : i32
    return %arg0, %c0_i32 : i32, i32
  }
  func.func @transform_4(%arg0: i32) -> (i32, i32) {
    %c0_i32 = arith.constant 0 : i32
    %c0_i32_0 = arith.constant 0 : i32
    return %arg0, %c0_i32 : i32, i32
  }
}

module attributes {stable_mosaic.version = 11 : i64} {
  func.func @_mm_bias_act_kernel(%arg0: i32, %arg1: memref<128x144xbf16, #tpu.memory_space<vmem>>, %arg2: memref<144x128xbf16, #tpu.memory_space<vmem>>, %arg3: memref<1x128xf32, #tpu.memory_space<vmem>>, %arg4: memref<128x128xbf16, #tpu.memory_space<vmem>>) attributes {dimension_semantics = [#tpu.dimension_semantics<parallel>], iteration_bounds = array<i64: 1>, scalar_prefetch = 0 : i64, scratch_operands = 0 : i64, tpu.core_type = #tpu.core_type<tc>, window_params = [{transform_indices = @transform_0, window_bounds = array<i64: 128, 144>}, {pipeline_mode = #tpu.pipeline_mode<synchronous>, transform_indices = @transform_1, window_bounds = array<i64: 144, 128>}, {pipeline_mode = #tpu.pipeline_mode<synchronous>, transform_indices = @transform_2, window_bounds = array<i64: 1, 128>}, {transform_indices = @transform_3, window_bounds = array<i64: 128, 128>}]} {
    %c0 = arith.constant 0 : index
    %c0_0 = arith.constant 0 : index
    %0 = vector.load %arg1[%c0, %c0_0] : memref<128x144xbf16, #tpu.memory_space<vmem>>, vector<128x144xbf16>
    %c0_1 = arith.constant 0 : index
    %c0_2 = arith.constant 0 : index
    %1 = vector.load %arg2[%c0_1, %c0_2] : memref<144x128xbf16, #tpu.memory_space<vmem>>, vector<144x128xbf16>
    %cst = arith.constant dense<0.000000e+00> : vector<128x128xf32>
    %2 = tpu.matmul %0, %1, %cst {dimension_numbers = #tpu.dot_dimension_numbers<[1], [0], [0], [1], [0, 0, 1, 1], [], []>} : vector<128x144xbf16>, vector<144x128xbf16>, vector<128x128xf32> -> vector<128x128xf32>
    %c0_3 = arith.constant 0 : index
    %c0_4 = arith.constant 0 : index
    %3 = vector.load %arg3[%c0_3, %c0_4] : memref<1x128xf32, #tpu.memory_space<vmem>>, vector<1x128xf32>
    %4 = vector.broadcast %3 : vector<1x128xf32> to vector<128x128xf32>
    %5 = arith.addf %2, %4 : vector<128x128xf32>
    %cst_5 = arith.constant 0.000000e+00 : f32
    %6 = vector.broadcast %cst_5 : f32 to vector<128x128xf32>
    %7 = arith.maximumf %5, %6 : vector<128x128xf32>
    %8 = arith.truncf %7 : vector<128x128xf32> to vector<128x128xbf16>
    %c0_6 = arith.constant 0 : index
    %c0_7 = arith.constant 0 : index
    %9 = vector.load %arg4[%c0_6, %c0_7] : memref<128x128xbf16, #tpu.memory_space<vmem>>, vector<128x128xbf16>
    tpu.vector_store %arg4[%c0_6, %c0_7], %8 {strides = array<i32>} : memref<128x128xbf16, #tpu.memory_space<vmem>>, vector<128x128xbf16>,
    return
  }
  func.func @transform_0(%arg0: i32) -> (i32, i32) {
    %c0_i32 = arith.constant 0 : i32
    %c0_i32_0 = arith.constant 0 : i32
    return %arg0, %c0_i32 : i32, i32
  }
  func.func @transform_1(%arg0: i32) -> (i32, i32) {
    %c0_i32 = arith.constant 0 : i32
    %c0_i32_0 = arith.constant 0 : i32
    %c0_i32_1 = arith.constant 0 : i32
    return %c0_i32, %c0_i32_0 : i32, i32
  }
  func.func @transform_2(%arg0: i32) -> (i32, i32) {
    %c0_i32 = arith.constant 0 : i32
    %c0_i32_0 = arith.constant 0 : i32
    %c0_i32_1 = arith.constant 0 : i32
    return %c0_i32, %c0_i32_0 : i32, i32
  }
  func.func @transform_3(%arg0: i32) -> (i32, i32) {
    %c0_i32 = arith.constant 0 : i32
    %c0_i32_0 = arith.constant 0 : i32
    return %arg0, %c0_i32 : i32, i32
  }
}

module attributes {stable_mosaic.version = 11 : i64} {
  func.func @_mm_bias_act_kernel(%arg0: i32, %arg1: memref<128x64xbf16, #tpu.memory_space<vmem>>, %arg2: memref<64x128xbf16, #tpu.memory_space<vmem>>, %arg3: memref<1x128xf32, #tpu.memory_space<vmem>>, %arg4: memref<128x128xbf16, #tpu.memory_space<vmem>>) attributes {dimension_semantics = [#tpu.dimension_semantics<parallel>], iteration_bounds = array<i64: 1>, scalar_prefetch = 0 : i64, scratch_operands = 0 : i64, tpu.core_type = #tpu.core_type<tc>, window_params = [{transform_indices = @transform_0, window_bounds = array<i64: 128, 64>}, {pipeline_mode = #tpu.pipeline_mode<synchronous>, transform_indices = @transform_1, window_bounds = array<i64: 64, 128>}, {pipeline_mode = #tpu.pipeline_mode<synchronous>, transform_indices = @transform_2, window_bounds = array<i64: 1, 128>}, {transform_indices = @transform_3, window_bounds = array<i64: 128, 128>}]} {
    %c0 = arith.constant 0 : index
    %c0_0 = arith.constant 0 : index
    %0 = vector.load %arg1[%c0, %c0_0] : memref<128x64xbf16, #tpu.memory_space<vmem>>, vector<128x64xbf16>
    %c0_1 = arith.constant 0 : index
    %c0_2 = arith.constant 0 : index
    %1 = vector.load %arg2[%c0_1, %c0_2] : memref<64x128xbf16, #tpu.memory_space<vmem>>, vector<64x128xbf16>
    %cst = arith.constant dense<0.000000e+00> : vector<128x128xf32>
    %2 = tpu.matmul %0, %1, %cst {dimension_numbers = #tpu.dot_dimension_numbers<[1], [0], [0], [1], [0, 0, 1, 1], [], []>} : vector<128x64xbf16>, vector<64x128xbf16>, vector<128x128xf32> -> vector<128x128xf32>
    %c0_3 = arith.constant 0 : index
    %c0_4 = arith.constant 0 : index
    %3 = vector.load %arg3[%c0_3, %c0_4] : memref<1x128xf32, #tpu.memory_space<vmem>>, vector<1x128xf32>
    %4 = vector.broadcast %3 : vector<1x128xf32> to vector<128x128xf32>
    %5 = arith.addf %2, %4 : vector<128x128xf32>
    %cst_5 = arith.constant 0.000000e+00 : f32
    %6 = vector.broadcast %cst_5 : f32 to vector<128x128xf32>
    %7 = arith.maximumf %5, %6 : vector<128x128xf32>
    %8 = arith.truncf %7 : vector<128x128xf32> to vector<128x128xbf16>
    %c0_6 = arith.constant 0 : index
    %c0_7 = arith.constant 0 : index
    %9 = vector.load %arg4[%c0_6, %c0_7] : memref<128x128xbf16, #tpu.memory_space<vmem>>, vector<128x128xbf16>
    tpu.vector_store %arg4[%c0_6, %c0_7], %8 {strides = array<i32>} : memref<128x128xbf16, #tpu.memory_space<vmem>>, vector<128x128xbf16>,
    return
  }
  func.func @transform_0(%arg0: i32) -> (i32, i32) {
    %c0_i32 = arith.constant 0 : i32
    %c0_i32_0 = arith.constant 0 : i32
    return %arg0, %c0_i32 : i32, i32
  }
  func.func @transform_1(%arg0: i32) -> (i32, i32) {
    %c0_i32 = arith.constant 0 : i32
    %c0_i32_0 = arith.constant 0 : i32
    %c0_i32_1 = arith.constant 0 : i32
    return %c0_i32, %c0_i32_0 : i32, i32
  }
  func.func @transform_2(%arg0: i32) -> (i32, i32) {
    %c0_i32 = arith.constant 0 : i32
    %c0_i32_0 = arith.constant 0 : i32
    %c0_i32_1 = arith.constant 0 : i32
    return %c0_i32, %c0_i32_0 : i32, i32
  }
  func.func @transform_3(%arg0: i32) -> (i32, i32) {
    %c0_i32 = arith.constant 0 : i32
    %c0_i32_0 = arith.constant 0 : i32
    return %arg0, %c0_i32 : i32, i32
  }
}

module attributes {stable_mosaic.version = 11 : i64} {
  func.func @_mm_bias_res_relu_kernel(%arg0: i32, %arg1: memref<128x16xbf16, #tpu.memory_space<vmem>>, %arg2: memref<16x128xbf16, #tpu.memory_space<vmem>>, %arg3: memref<1x128xf32, #tpu.memory_space<vmem>>, %arg4: memref<128x128xbf16, #tpu.memory_space<vmem>>, %arg5: memref<128x128xbf16, #tpu.memory_space<vmem>>) attributes {dimension_semantics = [#tpu.dimension_semantics<parallel>], iteration_bounds = array<i64: 1>, scalar_prefetch = 0 : i64, scratch_operands = 0 : i64, tpu.core_type = #tpu.core_type<tc>, window_params = [{transform_indices = @transform_0, window_bounds = array<i64: 128, 16>}, {pipeline_mode = #tpu.pipeline_mode<synchronous>, transform_indices = @transform_1, window_bounds = array<i64: 16, 128>}, {pipeline_mode = #tpu.pipeline_mode<synchronous>, transform_indices = @transform_2, window_bounds = array<i64: 1, 128>}, {transform_indices = @transform_3, window_bounds = array<i64: 128, 128>}, {transform_indices = @transform_4, window_bounds = array<i64: 128, 128>}]} {
    %c0 = arith.constant 0 : index
    %c0_0 = arith.constant 0 : index
    %0 = vector.load %arg1[%c0, %c0_0] : memref<128x16xbf16, #tpu.memory_space<vmem>>, vector<128x16xbf16>
    %c0_1 = arith.constant 0 : index
    %c0_2 = arith.constant 0 : index
    %1 = vector.load %arg2[%c0_1, %c0_2] : memref<16x128xbf16, #tpu.memory_space<vmem>>, vector<16x128xbf16>
    %cst = arith.constant dense<0.000000e+00> : vector<128x128xf32>
    %2 = tpu.matmul %0, %1, %cst {dimension_numbers = #tpu.dot_dimension_numbers<[1], [0], [0], [1], [0, 0, 1, 1], [], []>} : vector<128x16xbf16>, vector<16x128xbf16>, vector<128x128xf32> -> vector<128x128xf32>
    %c0_3 = arith.constant 0 : index
    %c0_4 = arith.constant 0 : index
    %3 = vector.load %arg3[%c0_3, %c0_4] : memref<1x128xf32, #tpu.memory_space<vmem>>, vector<1x128xf32>
    %4 = vector.broadcast %3 : vector<1x128xf32> to vector<128x128xf32>
    %5 = arith.addf %2, %4 : vector<128x128xf32>
    %c0_5 = arith.constant 0 : index
    %c0_6 = arith.constant 0 : index
    %6 = vector.load %arg4[%c0_5, %c0_6] : memref<128x128xbf16, #tpu.memory_space<vmem>>, vector<128x128xbf16>
    %7 = arith.extf %6 : vector<128x128xbf16> to vector<128x128xf32>
    %8 = arith.addf %5, %7 : vector<128x128xf32>
    %cst_7 = arith.constant 0.000000e+00 : f32
    %9 = vector.broadcast %cst_7 : f32 to vector<128x128xf32>
    %10 = arith.maximumf %8, %9 : vector<128x128xf32>
    %11 = arith.truncf %10 : vector<128x128xf32> to vector<128x128xbf16>
    %c0_8 = arith.constant 0 : index
    %c0_9 = arith.constant 0 : index
    %12 = vector.load %arg5[%c0_8, %c0_9] : memref<128x128xbf16, #tpu.memory_space<vmem>>, vector<128x128xbf16>
    tpu.vector_store %arg5[%c0_8, %c0_9], %11 {strides = array<i32>} : memref<128x128xbf16, #tpu.memory_space<vmem>>, vector<128x128xbf16>,
    return
  }
  func.func @transform_0(%arg0: i32) -> (i32, i32) {
    %c0_i32 = arith.constant 0 : i32
    %c0_i32_0 = arith.constant 0 : i32
    return %arg0, %c0_i32 : i32, i32
  }
  func.func @transform_1(%arg0: i32) -> (i32, i32) {
    %c0_i32 = arith.constant 0 : i32
    %c0_i32_0 = arith.constant 0 : i32
    %c0_i32_1 = arith.constant 0 : i32
    return %c0_i32, %c0_i32_0 : i32, i32
  }
  func.func @transform_2(%arg0: i32) -> (i32, i32) {
    %c0_i32 = arith.constant 0 : i32
    %c0_i32_0 = arith.constant 0 : i32
    %c0_i32_1 = arith.constant 0 : i32
    return %c0_i32, %c0_i32_0 : i32, i32
  }
  func.func @transform_3(%arg0: i32) -> (i32, i32) {
    %c0_i32 = arith.constant 0 : i32
    %c0_i32_0 = arith.constant 0 : i32
    return %arg0, %c0_i32 : i32, i32
  }
  func.func @transform_4(%arg0: i32) -> (i32, i32) {
    %c0_i32 = arith.constant 0 : i32
    %c0_i32_0 = arith.constant 0 : i32
    return %arg0, %c0_i32 : i32, i32
  }
}

module attributes {stable_mosaic.version = 11 : i64} {
  func.func @_mm_bias_act_kernel(%arg0: i32, %arg1: memref<32x64xbf16, #tpu.memory_space<vmem>>, %arg2: memref<64x128xbf16, #tpu.memory_space<vmem>>, %arg3: memref<1x128xf32, #tpu.memory_space<vmem>>, %arg4: memref<32x128xbf16, #tpu.memory_space<vmem>>) attributes {dimension_semantics = [#tpu.dimension_semantics<parallel>], iteration_bounds = array<i64: 1>, scalar_prefetch = 0 : i64, scratch_operands = 0 : i64, tpu.core_type = #tpu.core_type<tc>, window_params = [{transform_indices = @transform_0, window_bounds = array<i64: 32, 64>}, {pipeline_mode = #tpu.pipeline_mode<synchronous>, transform_indices = @transform_1, window_bounds = array<i64: 64, 128>}, {pipeline_mode = #tpu.pipeline_mode<synchronous>, transform_indices = @transform_2, window_bounds = array<i64: 1, 128>}, {transform_indices = @transform_3, window_bounds = array<i64: 32, 128>}]} {
    %c0 = arith.constant 0 : index
    %c0_0 = arith.constant 0 : index
    %0 = vector.load %arg1[%c0, %c0_0] : memref<32x64xbf16, #tpu.memory_space<vmem>>, vector<32x64xbf16>
    %c0_1 = arith.constant 0 : index
    %c0_2 = arith.constant 0 : index
    %1 = vector.load %arg2[%c0_1, %c0_2] : memref<64x128xbf16, #tpu.memory_space<vmem>>, vector<64x128xbf16>
    %cst = arith.constant dense<0.000000e+00> : vector<32x128xf32>
    %2 = tpu.matmul %0, %1, %cst {dimension_numbers = #tpu.dot_dimension_numbers<[1], [0], [0], [1], [0, 0, 1, 1], [], []>} : vector<32x64xbf16>, vector<64x128xbf16>, vector<32x128xf32> -> vector<32x128xf32>
    %c0_3 = arith.constant 0 : index
    %c0_4 = arith.constant 0 : index
    %3 = vector.load %arg3[%c0_3, %c0_4] : memref<1x128xf32, #tpu.memory_space<vmem>>, vector<1x128xf32>
    %4 = vector.broadcast %3 : vector<1x128xf32> to vector<32x128xf32>
    %5 = arith.addf %2, %4 : vector<32x128xf32>
    %6 = arith.truncf %5 : vector<32x128xf32> to vector<32x128xbf16>
    %c0_5 = arith.constant 0 : index
    %c0_6 = arith.constant 0 : index
    %7 = vector.load %arg4[%c0_5, %c0_6] : memref<32x128xbf16, #tpu.memory_space<vmem>>, vector<32x128xbf16>
    tpu.vector_store %arg4[%c0_5, %c0_6], %6 {strides = array<i32>} : memref<32x128xbf16, #tpu.memory_space<vmem>>, vector<32x128xbf16>,
    return
  }
  func.func @transform_0(%arg0: i32) -> (i32, i32) {
    %c0_i32 = arith.constant 0 : i32
    %c0_i32_0 = arith.constant 0 : i32
    return %arg0, %c0_i32 : i32, i32
  }
  func.func @transform_1(%arg0: i32) -> (i32, i32) {
    %c0_i32 = arith.constant 0 : i32
    %c0_i32_0 = arith.constant 0 : i32
    %c0_i32_1 = arith.constant 0 : i32
    return %c0_i32, %c0_i32_0 : i32, i32
  }
  func.func @transform_2(%arg0: i32) -> (i32, i32) {
    %c0_i32 = arith.constant 0 : i32
    %c0_i32_0 = arith.constant 0 : i32
    %c0_i32_1 = arith.constant 0 : i32
    return %c0_i32, %c0_i32_0 : i32, i32
  }
  func.func @transform_3(%arg0: i32) -> (i32, i32) {
    %c0_i32 = arith.constant 0 : i32
    %c0_i32_0 = arith.constant 0 : i32
    return %arg0, %c0_i32 : i32, i32
  }
}

module attributes {stable_mosaic.version = 11 : i64} {
  func.func @_mm_bias_act_kernel(%arg0: i32, %arg1: memref<32x288xbf16, #tpu.memory_space<vmem>>, %arg2: memref<288x128xbf16, #tpu.memory_space<vmem>>, %arg3: memref<1x128xf32, #tpu.memory_space<vmem>>, %arg4: memref<32x128xbf16, #tpu.memory_space<vmem>>) attributes {dimension_semantics = [#tpu.dimension_semantics<parallel>], iteration_bounds = array<i64: 1>, scalar_prefetch = 0 : i64, scratch_operands = 0 : i64, tpu.core_type = #tpu.core_type<tc>, window_params = [{transform_indices = @transform_0, window_bounds = array<i64: 32, 288>}, {pipeline_mode = #tpu.pipeline_mode<synchronous>, transform_indices = @transform_1, window_bounds = array<i64: 288, 128>}, {pipeline_mode = #tpu.pipeline_mode<synchronous>, transform_indices = @transform_2, window_bounds = array<i64: 1, 128>}, {transform_indices = @transform_3, window_bounds = array<i64: 32, 128>}]} {
    %c0 = arith.constant 0 : index
    %c0_0 = arith.constant 0 : index
    %0 = vector.load %arg1[%c0, %c0_0] : memref<32x288xbf16, #tpu.memory_space<vmem>>, vector<32x288xbf16>
    %c0_1 = arith.constant 0 : index
    %c0_2 = arith.constant 0 : index
    %1 = vector.load %arg2[%c0_1, %c0_2] : memref<288x128xbf16, #tpu.memory_space<vmem>>, vector<288x128xbf16>
    %cst = arith.constant dense<0.000000e+00> : vector<32x128xf32>
    %2 = tpu.matmul %0, %1, %cst {dimension_numbers = #tpu.dot_dimension_numbers<[1], [0], [0], [1], [0, 0, 1, 1], [], []>} : vector<32x288xbf16>, vector<288x128xbf16>, vector<32x128xf32> -> vector<32x128xf32>
    %c0_3 = arith.constant 0 : index
    %c0_4 = arith.constant 0 : index
    %3 = vector.load %arg3[%c0_3, %c0_4] : memref<1x128xf32, #tpu.memory_space<vmem>>, vector<1x128xf32>
    %4 = vector.broadcast %3 : vector<1x128xf32> to vector<32x128xf32>
    %5 = arith.addf %2, %4 : vector<32x128xf32>
    %cst_5 = arith.constant 0.000000e+00 : f32
    %6 = vector.broadcast %cst_5 : f32 to vector<32x128xf32>
    %7 = arith.maximumf %5, %6 : vector<32x128xf32>
    %8 = arith.truncf %7 : vector<32x128xf32> to vector<32x128xbf16>
    %c0_6 = arith.constant 0 : index
    %c0_7 = arith.constant 0 : index
    %9 = vector.load %arg4[%c0_6, %c0_7] : memref<32x128xbf16, #tpu.memory_space<vmem>>, vector<32x128xbf16>
    tpu.vector_store %arg4[%c0_6, %c0_7], %8 {strides = array<i32>} : memref<32x128xbf16, #tpu.memory_space<vmem>>, vector<32x128xbf16>,
    return
  }
  func.func @transform_0(%arg0: i32) -> (i32, i32) {
    %c0_i32 = arith.constant 0 : i32
    %c0_i32_0 = arith.constant 0 : i32
    return %arg0, %c0_i32 : i32, i32
  }
  func.func @transform_1(%arg0: i32) -> (i32, i32) {
    %c0_i32 = arith.constant 0 : i32
    %c0_i32_0 = arith.constant 0 : i32
    %c0_i32_1 = arith.constant 0 : i32
    return %c0_i32, %c0_i32_0 : i32, i32
  }
  func.func @transform_2(%arg0: i32) -> (i32, i32) {
    %c0_i32 = arith.constant 0 : i32
    %c0_i32_0 = arith.constant 0 : i32
    %c0_i32_1 = arith.constant 0 : i32
    return %c0_i32, %c0_i32_0 : i32, i32
  }
  func.func @transform_3(%arg0: i32) -> (i32, i32) {
    %c0_i32 = arith.constant 0 : i32
    %c0_i32_0 = arith.constant 0 : i32
    return %arg0, %c0_i32 : i32, i32
  }
}

module attributes {stable_mosaic.version = 11 : i64} {
  func.func @_mm_bias_res_relu_kernel(%arg0: i32, %arg1: memref<32x32xbf16, #tpu.memory_space<vmem>>, %arg2: memref<32x128xbf16, #tpu.memory_space<vmem>>, %arg3: memref<1x128xf32, #tpu.memory_space<vmem>>, %arg4: memref<32x128xbf16, #tpu.memory_space<vmem>>, %arg5: memref<32x128xbf16, #tpu.memory_space<vmem>>) attributes {dimension_semantics = [#tpu.dimension_semantics<parallel>], iteration_bounds = array<i64: 1>, scalar_prefetch = 0 : i64, scratch_operands = 0 : i64, tpu.core_type = #tpu.core_type<tc>, window_params = [{transform_indices = @transform_0, window_bounds = array<i64: 32, 32>}, {pipeline_mode = #tpu.pipeline_mode<synchronous>, transform_indices = @transform_1, window_bounds = array<i64: 32, 128>}, {pipeline_mode = #tpu.pipeline_mode<synchronous>, transform_indices = @transform_2, window_bounds = array<i64: 1, 128>}, {transform_indices = @transform_3, window_bounds = array<i64: 32, 128>}, {transform_indices = @transform_4, window_bounds = array<i64: 32, 128>}]} {
    %c0 = arith.constant 0 : index
    %c0_0 = arith.constant 0 : index
    %0 = vector.load %arg1[%c0, %c0_0] : memref<32x32xbf16, #tpu.memory_space<vmem>>, vector<32x32xbf16>
    %c0_1 = arith.constant 0 : index
    %c0_2 = arith.constant 0 : index
    %1 = vector.load %arg2[%c0_1, %c0_2] : memref<32x128xbf16, #tpu.memory_space<vmem>>, vector<32x128xbf16>
    %cst = arith.constant dense<0.000000e+00> : vector<32x128xf32>
    %2 = tpu.matmul %0, %1, %cst {dimension_numbers = #tpu.dot_dimension_numbers<[1], [0], [0], [1], [0, 0, 1, 1], [], []>} : vector<32x32xbf16>, vector<32x128xbf16>, vector<32x128xf32> -> vector<32x128xf32>
    %c0_3 = arith.constant 0 : index
    %c0_4 = arith.constant 0 : index
    %3 = vector.load %arg3[%c0_3, %c0_4] : memref<1x128xf32, #tpu.memory_space<vmem>>, vector<1x128xf32>
    %4 = vector.broadcast %3 : vector<1x128xf32> to vector<32x128xf32>
    %5 = arith.addf %2, %4 : vector<32x128xf32>
    %c0_5 = arith.constant 0 : index
    %c0_6 = arith.constant 0 : index
    %6 = vector.load %arg4[%c0_5, %c0_6] : memref<32x128xbf16, #tpu.memory_space<vmem>>, vector<32x128xbf16>
    %7 = arith.extf %6 : vector<32x128xbf16> to vector<32x128xf32>
    %8 = arith.addf %5, %7 : vector<32x128xf32>
    %cst_7 = arith.constant 0.000000e+00 : f32
    %9 = vector.broadcast %cst_7 : f32 to vector<32x128xf32>
    %10 = arith.maximumf %8, %9 : vector<32x128xf32>
    %11 = arith.truncf %10 : vector<32x128xf32> to vector<32x128xbf16>
    %c0_8 = arith.constant 0 : index
    %c0_9 = arith.constant 0 : index
    %12 = vector.load %arg5[%c0_8, %c0_9] : memref<32x128xbf16, #tpu.memory_space<vmem>>, vector<32x128xbf16>
    tpu.vector_store %arg5[%c0_8, %c0_9], %11 {strides = array<i32>} : memref<32x128xbf16, #tpu.memory_space<vmem>>, vector<32x128xbf16>,
    return
  }
  func.func @transform_0(%arg0: i32) -> (i32, i32) {
    %c0_i32 = arith.constant 0 : i32
    %c0_i32_0 = arith.constant 0 : i32
    return %arg0, %c0_i32 : i32, i32
  }
  func.func @transform_1(%arg0: i32) -> (i32, i32) {
    %c0_i32 = arith.constant 0 : i32
    %c0_i32_0 = arith.constant 0 : i32
    %c0_i32_1 = arith.constant 0 : i32
    return %c0_i32, %c0_i32_0 : i32, i32
  }
  func.func @transform_2(%arg0: i32) -> (i32, i32) {
    %c0_i32 = arith.constant 0 : i32
    %c0_i32_0 = arith.constant 0 : i32
    %c0_i32_1 = arith.constant 0 : i32
    return %c0_i32, %c0_i32_0 : i32, i32
  }
  func.func @transform_3(%arg0: i32) -> (i32, i32) {
    %c0_i32 = arith.constant 0 : i32
    %c0_i32_0 = arith.constant 0 : i32
    return %arg0, %c0_i32 : i32, i32
  }
  func.func @transform_4(%arg0: i32) -> (i32, i32) {
    %c0_i32 = arith.constant 0 : i32
    %c0_i32_0 = arith.constant 0 : i32
    return %arg0, %c0_i32 : i32, i32
  }
}

module attributes {stable_mosaic.version = 11 : i64} {
  func.func @_mm_bias_act_kernel(%arg0: i32, %arg1: memref<32x128xbf16, #tpu.memory_space<vmem>>, %arg2: memref<128x128xbf16, #tpu.memory_space<vmem>>, %arg3: memref<1x128xf32, #tpu.memory_space<vmem>>, %arg4: memref<32x128xbf16, #tpu.memory_space<vmem>>) attributes {dimension_semantics = [#tpu.dimension_semantics<parallel>], iteration_bounds = array<i64: 1>, scalar_prefetch = 0 : i64, scratch_operands = 0 : i64, tpu.core_type = #tpu.core_type<tc>, window_params = [{transform_indices = @transform_0, window_bounds = array<i64: 32, 128>}, {pipeline_mode = #tpu.pipeline_mode<synchronous>, transform_indices = @transform_1, window_bounds = array<i64: 128, 128>}, {pipeline_mode = #tpu.pipeline_mode<synchronous>, transform_indices = @transform_2, window_bounds = array<i64: 1, 128>}, {transform_indices = @transform_3, window_bounds = array<i64: 32, 128>}]} {
    %c0 = arith.constant 0 : index
    %c0_0 = arith.constant 0 : index
    %0 = vector.load %arg1[%c0, %c0_0] : memref<32x128xbf16, #tpu.memory_space<vmem>>, vector<32x128xbf16>
    %c0_1 = arith.constant 0 : index
    %c0_2 = arith.constant 0 : index
    %1 = vector.load %arg2[%c0_1, %c0_2] : memref<128x128xbf16, #tpu.memory_space<vmem>>, vector<128x128xbf16>
    %cst = arith.constant dense<0.000000e+00> : vector<32x128xf32>
    %2 = tpu.matmul %0, %1, %cst {dimension_numbers = #tpu.dot_dimension_numbers<[1], [0], [0], [1], [0, 0, 1, 1], [], []>} : vector<32x128xbf16>, vector<128x128xbf16>, vector<32x128xf32> -> vector<32x128xf32>
    %c0_3 = arith.constant 0 : index
    %c0_4 = arith.constant 0 : index
    %3 = vector.load %arg3[%c0_3, %c0_4] : memref<1x128xf32, #tpu.memory_space<vmem>>, vector<1x128xf32>
    %4 = vector.broadcast %3 : vector<1x128xf32> to vector<32x128xf32>
    %5 = arith.addf %2, %4 : vector<32x128xf32>
    %cst_5 = arith.constant 0.000000e+00 : f32
    %6 = vector.broadcast %cst_5 : f32 to vector<32x128xf32>
    %7 = arith.maximumf %5, %6 : vector<32x128xf32>
    %8 = arith.truncf %7 : vector<32x128xf32> to vector<32x128xbf16>
    %c0_6 = arith.constant 0 : index
    %c0_7 = arith.constant 0 : index
    %9 = vector.load %arg4[%c0_6, %c0_7] : memref<32x128xbf16, #tpu.memory_space<vmem>>, vector<32x128xbf16>
    tpu.vector_store %arg4[%c0_6, %c0_7], %8 {strides = array<i32>} : memref<32x128xbf16, #tpu.memory_space<vmem>>, vector<32x128xbf16>,
    return
  }
  func.func @transform_0(%arg0: i32) -> (i32, i32) {
    %c0_i32 = arith.constant 0 : i32
    %c0_i32_0 = arith.constant 0 : i32
    return %arg0, %c0_i32 : i32, i32
  }
  func.func @transform_1(%arg0: i32) -> (i32, i32) {
    %c0_i32 = arith.constant 0 : i32
    %c0_i32_0 = arith.constant 0 : i32
    %c0_i32_1 = arith.constant 0 : i32
    return %c0_i32, %c0_i32_0 : i32, i32
  }
  func.func @transform_2(%arg0: i32) -> (i32, i32) {
    %c0_i32 = arith.constant 0 : i32
    %c0_i32_0 = arith.constant 0 : i32
    %c0_i32_1 = arith.constant 0 : i32
    return %c0_i32, %c0_i32_0 : i32, i32
  }
  func.func @transform_3(%arg0: i32) -> (i32, i32) {
    %c0_i32 = arith.constant 0 : i32
    %c0_i32_0 = arith.constant 0 : i32
    return %arg0, %c0_i32 : i32, i32
  }
}

module attributes {stable_mosaic.version = 11 : i64} {
  func.func @_mm_bias_act_kernel(%arg0: i32, %arg1: memref<16x576xbf16, #tpu.memory_space<vmem>>, %arg2: memref<576x128xbf16, #tpu.memory_space<vmem>>, %arg3: memref<1x128xf32, #tpu.memory_space<vmem>>, %arg4: memref<16x128xbf16, #tpu.memory_space<vmem>>) attributes {dimension_semantics = [#tpu.dimension_semantics<parallel>], iteration_bounds = array<i64: 1>, scalar_prefetch = 0 : i64, scratch_operands = 0 : i64, tpu.core_type = #tpu.core_type<tc>, window_params = [{transform_indices = @transform_0, window_bounds = array<i64: 16, 576>}, {pipeline_mode = #tpu.pipeline_mode<synchronous>, transform_indices = @transform_1, window_bounds = array<i64: 576, 128>}, {pipeline_mode = #tpu.pipeline_mode<synchronous>, transform_indices = @transform_2, window_bounds = array<i64: 1, 128>}, {transform_indices = @transform_3, window_bounds = array<i64: 16, 128>}]} {
    %c0 = arith.constant 0 : index
    %c0_0 = arith.constant 0 : index
    %0 = vector.load %arg1[%c0, %c0_0] : memref<16x576xbf16, #tpu.memory_space<vmem>>, vector<16x576xbf16>
    %c0_1 = arith.constant 0 : index
    %c0_2 = arith.constant 0 : index
    %1 = vector.load %arg2[%c0_1, %c0_2] : memref<576x128xbf16, #tpu.memory_space<vmem>>, vector<576x128xbf16>
    %cst = arith.constant dense<0.000000e+00> : vector<16x128xf32>
    %2 = tpu.matmul %0, %1, %cst {dimension_numbers = #tpu.dot_dimension_numbers<[1], [0], [0], [1], [0, 0, 1, 1], [], []>} : vector<16x576xbf16>, vector<576x128xbf16>, vector<16x128xf32> -> vector<16x128xf32>
    %c0_3 = arith.constant 0 : index
    %c0_4 = arith.constant 0 : index
    %3 = vector.load %arg3[%c0_3, %c0_4] : memref<1x128xf32, #tpu.memory_space<vmem>>, vector<1x128xf32>
    %4 = vector.broadcast %3 : vector<1x128xf32> to vector<16x128xf32>
    %5 = arith.addf %2, %4 : vector<16x128xf32>
    %cst_5 = arith.constant 0.000000e+00 : f32
    %6 = vector.broadcast %cst_5 : f32 to vector<16x128xf32>
    %7 = arith.maximumf %5, %6 : vector<16x128xf32>
    %8 = arith.truncf %7 : vector<16x128xf32> to vector<16x128xbf16>
    %c0_6 = arith.constant 0 : index
    %c0_7 = arith.constant 0 : index
    %9 = vector.load %arg4[%c0_6, %c0_7] : memref<16x128xbf16, #tpu.memory_space<vmem>>, vector<16x128xbf16>
    tpu.vector_store %arg4[%c0_6, %c0_7], %8 {strides = array<i32>} : memref<16x128xbf16, #tpu.memory_space<vmem>>, vector<16x128xbf16>,
    return
  }
  func.func @transform_0(%arg0: i32) -> (i32, i32) {
    %c0_i32 = arith.constant 0 : i32
    %c0_i32_0 = arith.constant 0 : i32
    return %arg0, %c0_i32 : i32, i32
  }
  func.func @transform_1(%arg0: i32) -> (i32, i32) {
    %c0_i32 = arith.constant 0 : i32
    %c0_i32_0 = arith.constant 0 : i32
    %c0_i32_1 = arith.constant 0 : i32
    return %c0_i32, %c0_i32_0 : i32, i32
  }
  func.func @transform_2(%arg0: i32) -> (i32, i32) {
    %c0_i32 = arith.constant 0 : i32
    %c0_i32_0 = arith.constant 0 : i32
    %c0_i32_1 = arith.constant 0 : i32
    return %c0_i32, %c0_i32_0 : i32, i32
  }
  func.func @transform_3(%arg0: i32) -> (i32, i32) {
    %c0_i32 = arith.constant 0 : i32
    %c0_i32_0 = arith.constant 0 : i32
    return %arg0, %c0_i32 : i32, i32
  }
}

module attributes {stable_mosaic.version = 11 : i64} {
  func.func @_mm_bias_act_kernel(%arg0: i32, %arg1: memref<16x128xbf16, #tpu.memory_space<vmem>>, %arg2: memref<128x256xbf16, #tpu.memory_space<vmem>>, %arg3: memref<1x256xf32, #tpu.memory_space<vmem>>, %arg4: memref<16x256xbf16, #tpu.memory_space<vmem>>) attributes {dimension_semantics = [#tpu.dimension_semantics<parallel>], iteration_bounds = array<i64: 1>, scalar_prefetch = 0 : i64, scratch_operands = 0 : i64, tpu.core_type = #tpu.core_type<tc>, window_params = [{transform_indices = @transform_0, window_bounds = array<i64: 16, 128>}, {pipeline_mode = #tpu.pipeline_mode<synchronous>, transform_indices = @transform_1, window_bounds = array<i64: 128, 256>}, {pipeline_mode = #tpu.pipeline_mode<synchronous>, transform_indices = @transform_2, window_bounds = array<i64: 1, 256>}, {transform_indices = @transform_3, window_bounds = array<i64: 16, 256>}]} {
    %c0 = arith.constant 0 : index
    %c0_0 = arith.constant 0 : index
    %0 = vector.load %arg1[%c0, %c0_0] : memref<16x128xbf16, #tpu.memory_space<vmem>>, vector<16x128xbf16>
    %c0_1 = arith.constant 0 : index
    %c0_2 = arith.constant 0 : index
    %1 = vector.load %arg2[%c0_1, %c0_2] : memref<128x256xbf16, #tpu.memory_space<vmem>>, vector<128x256xbf16>
    %cst = arith.constant dense<0.000000e+00> : vector<16x256xf32>
    %2 = tpu.matmul %0, %1, %cst {dimension_numbers = #tpu.dot_dimension_numbers<[1], [0], [0], [1], [0, 0, 1, 1], [], []>} : vector<16x128xbf16>, vector<128x256xbf16>, vector<16x256xf32> -> vector<16x256xf32>
    %c0_3 = arith.constant 0 : index
    %c0_4 = arith.constant 0 : index
    %3 = vector.load %arg3[%c0_3, %c0_4] : memref<1x256xf32, #tpu.memory_space<vmem>>, vector<1x256xf32>
    %4 = vector.broadcast %3 : vector<1x256xf32> to vector<16x256xf32>
    %5 = arith.addf %2, %4 : vector<16x256xf32>
    %6 = arith.truncf %5 : vector<16x256xf32> to vector<16x256xbf16>
    %c0_5 = arith.constant 0 : index
    %c0_6 = arith.constant 0 : index
    %7 = vector.load %arg4[%c0_5, %c0_6] : memref<16x256xbf16, #tpu.memory_space<vmem>>, vector<16x256xbf16>
    tpu.vector_store %arg4[%c0_5, %c0_6], %6 {strides = array<i32>} : memref<16x256xbf16, #tpu.memory_space<vmem>>, vector<16x256xbf16>,
    return
  }
  func.func @transform_0(%arg0: i32) -> (i32, i32) {
    %c0_i32 = arith.constant 0 : i32
    %c0_i32_0 = arith.constant 0 : i32
    return %arg0, %c0_i32 : i32, i32
  }
  func.func @transform_1(%arg0: i32) -> (i32, i32) {
    %c0_i32 = arith.constant 0 : i32
    %c0_i32_0 = arith.constant 0 : i32
    %c0_i32_1 = arith.constant 0 : i32
    return %c0_i32, %c0_i32_0 : i32, i32
  }
  func.func @transform_2(%arg0: i32) -> (i32, i32) {
    %c0_i32 = arith.constant 0 : i32
    %c0_i32_0 = arith.constant 0 : i32
    %c0_i32_1 = arith.constant 0 : i32
    return %c0_i32, %c0_i32_0 : i32, i32
  }
  func.func @transform_3(%arg0: i32) -> (i32, i32) {
    %c0_i32 = arith.constant 0 : i32
    %c0_i32_0 = arith.constant 0 : i32
    return %arg0, %c0_i32 : i32, i32
  }
}

module attributes {stable_mosaic.version = 11 : i64} {
  func.func @_mm_bias_res_relu_kernel(%arg0: i32, %arg1: memref<16x64xbf16, #tpu.memory_space<vmem>>, %arg2: memref<64x256xbf16, #tpu.memory_space<vmem>>, %arg3: memref<1x256xf32, #tpu.memory_space<vmem>>, %arg4: memref<16x256xbf16, #tpu.memory_space<vmem>>, %arg5: memref<16x256xbf16, #tpu.memory_space<vmem>>) attributes {dimension_semantics = [#tpu.dimension_semantics<parallel>], iteration_bounds = array<i64: 1>, scalar_prefetch = 0 : i64, scratch_operands = 0 : i64, tpu.core_type = #tpu.core_type<tc>, window_params = [{transform_indices = @transform_0, window_bounds = array<i64: 16, 64>}, {pipeline_mode = #tpu.pipeline_mode<synchronous>, transform_indices = @transform_1, window_bounds = array<i64: 64, 256>}, {pipeline_mode = #tpu.pipeline_mode<synchronous>, transform_indices = @transform_2, window_bounds = array<i64: 1, 256>}, {transform_indices = @transform_3, window_bounds = array<i64: 16, 256>}, {transform_indices = @transform_4, window_bounds = array<i64: 16, 256>}]} {
    %c0 = arith.constant 0 : index
    %c0_0 = arith.constant 0 : index
    %0 = vector.load %arg1[%c0, %c0_0] : memref<16x64xbf16, #tpu.memory_space<vmem>>, vector<16x64xbf16>
    %c0_1 = arith.constant 0 : index
    %c0_2 = arith.constant 0 : index
    %1 = vector.load %arg2[%c0_1, %c0_2] : memref<64x256xbf16, #tpu.memory_space<vmem>>, vector<64x256xbf16>
    %cst = arith.constant dense<0.000000e+00> : vector<16x256xf32>
    %2 = tpu.matmul %0, %1, %cst {dimension_numbers = #tpu.dot_dimension_numbers<[1], [0], [0], [1], [0, 0, 1, 1], [], []>} : vector<16x64xbf16>, vector<64x256xbf16>, vector<16x256xf32> -> vector<16x256xf32>
    %c0_3 = arith.constant 0 : index
    %c0_4 = arith.constant 0 : index
    %3 = vector.load %arg3[%c0_3, %c0_4] : memref<1x256xf32, #tpu.memory_space<vmem>>, vector<1x256xf32>
    %4 = vector.broadcast %3 : vector<1x256xf32> to vector<16x256xf32>
    %5 = arith.addf %2, %4 : vector<16x256xf32>
    %c0_5 = arith.constant 0 : index
    %c0_6 = arith.constant 0 : index
    %6 = vector.load %arg4[%c0_5, %c0_6] : memref<16x256xbf16, #tpu.memory_space<vmem>>, vector<16x256xbf16>
    %7 = arith.extf %6 : vector<16x256xbf16> to vector<16x256xf32>
    %8 = arith.addf %5, %7 : vector<16x256xf32>
    %cst_7 = arith.constant 0.000000e+00 : f32
    %9 = vector.broadcast %cst_7 : f32 to vector<16x256xf32>
    %10 = arith.maximumf %8, %9 : vector<16x256xf32>
    %11 = arith.truncf %10 : vector<16x256xf32> to vector<16x256xbf16>
    %c0_8 = arith.constant 0 : index
    %c0_9 = arith.constant 0 : index
    %12 = vector.load %arg5[%c0_8, %c0_9] : memref<16x256xbf16, #tpu.memory_space<vmem>>, vector<16x256xbf16>
    tpu.vector_store %arg5[%c0_8, %c0_9], %11 {strides = array<i32>} : memref<16x256xbf16, #tpu.memory_space<vmem>>, vector<16x256xbf16>,
    return
  }
  func.func @transform_0(%arg0: i32) -> (i32, i32) {
    %c0_i32 = arith.constant 0 : i32
    %c0_i32_0 = arith.constant 0 : i32
    return %arg0, %c0_i32 : i32, i32
  }
  func.func @transform_1(%arg0: i32) -> (i32, i32) {
    %c0_i32 = arith.constant 0 : i32
    %c0_i32_0 = arith.constant 0 : i32
    %c0_i32_1 = arith.constant 0 : i32
    return %c0_i32, %c0_i32_0 : i32, i32
  }
  func.func @transform_2(%arg0: i32) -> (i32, i32) {
    %c0_i32 = arith.constant 0 : i32
    %c0_i32_0 = arith.constant 0 : i32
    %c0_i32_1 = arith.constant 0 : i32
    return %c0_i32, %c0_i32_0 : i32, i32
  }
  func.func @transform_3(%arg0: i32) -> (i32, i32) {
    %c0_i32 = arith.constant 0 : i32
    %c0_i32_0 = arith.constant 0 : i32
    return %arg0, %c0_i32 : i32, i32
  }
  func.func @transform_4(%arg0: i32) -> (i32, i32) {
    %c0_i32 = arith.constant 0 : i32
    %c0_i32_0 = arith.constant 0 : i32
    return %arg0, %c0_i32 : i32, i32
  }
}

module attributes {stable_mosaic.version = 11 : i64} {
  func.func @_mm_bias_act_kernel(%arg0: i32, %arg1: memref<16x256xbf16, #tpu.memory_space<vmem>>, %arg2: memref<256x128xbf16, #tpu.memory_space<vmem>>, %arg3: memref<1x128xf32, #tpu.memory_space<vmem>>, %arg4: memref<16x128xbf16, #tpu.memory_space<vmem>>) attributes {dimension_semantics = [#tpu.dimension_semantics<parallel>], iteration_bounds = array<i64: 1>, scalar_prefetch = 0 : i64, scratch_operands = 0 : i64, tpu.core_type = #tpu.core_type<tc>, window_params = [{transform_indices = @transform_0, window_bounds = array<i64: 16, 256>}, {pipeline_mode = #tpu.pipeline_mode<synchronous>, transform_indices = @transform_1, window_bounds = array<i64: 256, 128>}, {pipeline_mode = #tpu.pipeline_mode<synchronous>, transform_indices = @transform_2, window_bounds = array<i64: 1, 128>}, {transform_indices = @transform_3, window_bounds = array<i64: 16, 128>}]} {
    %c0 = arith.constant 0 : index
    %c0_0 = arith.constant 0 : index
    %0 = vector.load %arg1[%c0, %c0_0] : memref<16x256xbf16, #tpu.memory_space<vmem>>, vector<16x256xbf16>
    %c0_1 = arith.constant 0 : index
    %c0_2 = arith.constant 0 : index
    %1 = vector.load %arg2[%c0_1, %c0_2] : memref<256x128xbf16, #tpu.memory_space<vmem>>, vector<256x128xbf16>
    %cst = arith.constant dense<0.000000e+00> : vector<16x128xf32>
    %2 = tpu.matmul %0, %1, %cst {dimension_numbers = #tpu.dot_dimension_numbers<[1], [0], [0], [1], [0, 0, 1, 1], [], []>} : vector<16x256xbf16>, vector<256x128xbf16>, vector<16x128xf32> -> vector<16x128xf32>
    %c0_3 = arith.constant 0 : index
    %c0_4 = arith.constant 0 : index
    %3 = vector.load %arg3[%c0_3, %c0_4] : memref<1x128xf32, #tpu.memory_space<vmem>>, vector<1x128xf32>
    %4 = vector.broadcast %3 : vector<1x128xf32> to vector<16x128xf32>
    %5 = arith.addf %2, %4 : vector<16x128xf32>
    %cst_5 = arith.constant 0.000000e+00 : f32
    %6 = vector.broadcast %cst_5 : f32 to vector<16x128xf32>
    %7 = arith.maximumf %5, %6 : vector<16x128xf32>
    %8 = arith.truncf %7 : vector<16x128xf32> to vector<16x128xbf16>
    %c0_6 = arith.constant 0 : index
    %c0_7 = arith.constant 0 : index
    %9 = vector.load %arg4[%c0_6, %c0_7] : memref<16x128xbf16, #tpu.memory_space<vmem>>, vector<16x128xbf16>
    tpu.vector_store %arg4[%c0_6, %c0_7], %8 {strides = array<i32>} : memref<16x128xbf16, #tpu.memory_space<vmem>>, vector<16x128xbf16>,
    return
  }
  func.func @transform_0(%arg0: i32) -> (i32, i32) {
    %c0_i32 = arith.constant 0 : i32
    %c0_i32_0 = arith.constant 0 : i32
    return %arg0, %c0_i32 : i32, i32
  }
  func.func @transform_1(%arg0: i32) -> (i32, i32) {
    %c0_i32 = arith.constant 0 : i32
    %c0_i32_0 = arith.constant 0 : i32
    %c0_i32_1 = arith.constant 0 : i32
    return %c0_i32, %c0_i32_0 : i32, i32
  }
  func.func @transform_2(%arg0: i32) -> (i32, i32) {
    %c0_i32 = arith.constant 0 : i32
    %c0_i32_0 = arith.constant 0 : i32
    %c0_i32_1 = arith.constant 0 : i32
    return %c0_i32, %c0_i32_0 : i32, i32
  }
  func.func @transform_3(%arg0: i32) -> (i32, i32) {
    %c0_i32 = arith.constant 0 : i32
    %c0_i32_0 = arith.constant 0 : i32
    return %arg0, %c0_i32 : i32, i32
  }
}

module attributes {stable_mosaic.version = 11 : i64} {
  func.func @_gap_fc_kernel(%arg0: i32, %arg1: memref<4x8x256xbf16, #tpu.memory_space<vmem>>, %arg2: memref<256x1024xbf16, #tpu.memory_space<vmem>>, %arg3: memref<1x1024xf32, #tpu.memory_space<vmem>>, %arg4: memref<8x1024xf32, #tpu.memory_space<vmem>>) attributes {dimension_semantics = [#tpu.dimension_semantics<arbitrary>], iteration_bounds = array<i64: 1>, scalar_prefetch = 0 : i64, scratch_operands = 0 : i64, tpu.core_type = #tpu.core_type<tc>, window_params = [{pipeline_mode = #tpu.pipeline_mode<synchronous>, transform_indices = @transform_0, window_bounds = array<i64: 4, 8, 256>}, {pipeline_mode = #tpu.pipeline_mode<synchronous>, transform_indices = @transform_1, window_bounds = array<i64: 256, 1024>}, {pipeline_mode = #tpu.pipeline_mode<synchronous>, transform_indices = @transform_2, window_bounds = array<i64: 1, 1024>}, {pipeline_mode = #tpu.pipeline_mode<synchronous>, transform_indices = @transform_3, window_bounds = array<i64: 8, 1024>}]} {
    %c0 = arith.constant 0 : index
    %c0_0 = arith.constant 0 : index
    %c0_1 = arith.constant 0 : index
    %0 = vector.load %arg1[%c0, %c0_0, %c0_1] : memref<4x8x256xbf16, #tpu.memory_space<vmem>>, vector<1x8x256xbf16>
    %1 = vector.shape_cast %0 : vector<1x8x256xbf16> to vector<8x256xbf16>
    %2 = arith.extf %1 : vector<8x256xbf16> to vector<8x256xf32>
    %c1 = arith.constant 1 : index
    %c0_2 = arith.constant 0 : index
    %c0_3 = arith.constant 0 : index
    %3 = vector.load %arg1[%c1, %c0_2, %c0_3] : memref<4x8x256xbf16, #tpu.memory_space<vmem>>, vector<1x8x256xbf16>
    %4 = vector.shape_cast %3 : vector<1x8x256xbf16> to vector<8x256xbf16>
    %5 = arith.extf %4 : vector<8x256xbf16> to vector<8x256xf32>
    %6 = arith.addf %2, %5 : vector<8x256xf32>
    %c2 = arith.constant 2 : index
    %c0_4 = arith.constant 0 : index
    %c0_5 = arith.constant 0 : index
    %7 = vector.load %arg1[%c2, %c0_4, %c0_5] : memref<4x8x256xbf16, #tpu.memory_space<vmem>>, vector<1x8x256xbf16>
    %8 = vector.shape_cast %7 : vector<1x8x256xbf16> to vector<8x256xbf16>
    %9 = arith.extf %8 : vector<8x256xbf16> to vector<8x256xf32>
    %10 = arith.addf %6, %9 : vector<8x256xf32>
    %c3 = arith.constant 3 : index
    %c0_6 = arith.constant 0 : index
    %c0_7 = arith.constant 0 : index
    %11 = vector.load %arg1[%c3, %c0_6, %c0_7] : memref<4x8x256xbf16, #tpu.memory_space<vmem>>, vector<1x8x256xbf16>
    %12 = vector.shape_cast %11 : vector<1x8x256xbf16> to vector<8x256xbf16>
    %13 = arith.extf %12 : vector<8x256xbf16> to vector<8x256xf32>
    %14 = arith.addf %10, %13 : vector<8x256xf32>
    %cst = arith.constant 2.500000e-01 : f32
    %15 = vector.broadcast %cst : f32 to vector<8x256xf32>
    %16 = arith.mulf %14, %15 : vector<8x256xf32>
    %17 = arith.truncf %16 : vector<8x256xf32> to vector<8x256xbf16>
    %c0_8 = arith.constant 0 : index
    %c0_9 = arith.constant 0 : index
    %18 = vector.load %arg2[%c0_8, %c0_9] : memref<256x1024xbf16, #tpu.memory_space<vmem>>, vector<256x1024xbf16>
    %cst_10 = arith.constant dense<0.000000e+00> : vector<8x1024xf32>
    %19 = tpu.matmul %17, %18, %cst_10 {dimension_numbers = #tpu.dot_dimension_numbers<[1], [0], [0], [1], [0, 0, 1, 1], [], []>} : vector<8x256xbf16>, vector<256x1024xbf16>, vector<8x1024xf32> -> vector<8x1024xf32>
    %c0_11 = arith.constant 0 : index
    %c0_12 = arith.constant 0 : index
    %20 = vector.load %arg3[%c0_11, %c0_12] : memref<1x1024xf32, #tpu.memory_space<vmem>>, vector<1x1024xf32>
    %21 = vector.broadcast %20 : vector<1x1024xf32> to vector<8x1024xf32>
    %22 = arith.addf %19, %21 : vector<8x1024xf32>
    %c0_13 = arith.constant 0 : index
    %c0_14 = arith.constant 0 : index
    %23 = vector.load %arg4[%c0_13, %c0_14] : memref<8x1024xf32, #tpu.memory_space<vmem>>, vector<8x1024xf32>
    tpu.vector_store %arg4[%c0_13, %c0_14], %22 {strides = array<i32>} : memref<8x1024xf32, #tpu.memory_space<vmem>>, vector<8x1024xf32>,
    return
  }
  func.func @transform_0(%arg0: i32) -> (i32, i32, i32) {
    %c0_i32 = arith.constant 0 : i32
    %c0_i32_0 = arith.constant 0 : i32
    %c0_i32_1 = arith.constant 0 : i32
    %c0_i32_2 = arith.constant 0 : i32
    return %c0_i32, %c0_i32_0, %c0_i32_1 : i32, i32, i32
  }
  func.func @transform_1(%arg0: i32) -> (i32, i32) {
    %c0_i32 = arith.constant 0 : i32
    %c0_i32_0 = arith.constant 0 : i32
    %c0_i32_1 = arith.constant 0 : i32
    return %c0_i32, %c0_i32_0 : i32, i32
  }
  func.func @transform_2(%arg0: i32) -> (i32, i32) {
    %c0_i32 = arith.constant 0 : i32
    %c0_i32_0 = arith.constant 0 : i32
    %c0_i32_1 = arith.constant 0 : i32
    return %c0_i32, %c0_i32_0 : i32, i32
  }
  func.func @transform_3(%arg0: i32) -> (i32, i32) {
    %c0_i32 = arith.constant 0 : i32
    %c0_i32_0 = arith.constant 0 : i32
    %c0_i32_1 = arith.constant 0 : i32
    return %c0_i32, %c0_i32_0 : i32, i32
  }
}

</mosaic_0001>

<bundles_post_ra>
// kernel: _lambda_.31
= control target key start
LH: loop header
LB: loop body
LE: loop exit
PB: predicated region body
PF: predicated region fallthrough
CT: control target
= control target key end

     0   :  { %s2046_s12 = smov 0   ;;  %s2298_s0 = inlined_call_operand.vmem [shape: bf16[2048,160], index: 0, kind: input, shape index: {}]   ;;  %s2299_s1 = inlined_call_operand.vmem [shape: bf16[160,128], index: 1, kind: input, shape index: {}]   ;;  %s2300_s2 = inlined_call_operand.vmem [shape: f32[1,128], index: 2, kind: input, shape index: {}]   ;;  %s2301_s3 = inlined_call_operand.vmem [shape: bf16[2048,128], index: 3, kind: output, shape index: {}]  }
   0x1 LB: > { %s1443_s13 = sadd.s32 4294967295, %s2023_s12   ;;  %p1447_p0 = scmp.ge.s32.totalorder %s2023_s12, 1  ;;  %s2023_s12 = sphi %s2046_s12, %s13_s12  }
   0x2   : > { %p139_p1 = scmp.lt.s32.totalorder %s2023_s12, 5 }
   0x4   : > { %p140_p2 = pnand %p1447_p0, %p139_p1 }
   0x5   : > { %v1911_v0 = vld [vmem:[%s2299_s1] sm:$0xff] (!%p140_p2)   ;;  %v2025_v1 = vmov (!%p140_p2), 0   ;;  %s1448_s16 = sshll.u32 (!%p140_p2), %s1443_s13, 6  ;;  %v1912_v2 = vld [vmem:[%s2299_s1 + $0x8] sm:$0xff] (!%p140_p2)   ;;  %v1913_v3 = vld [vmem:[%s2299_s1 + $0x10] sm:$0xff] (!%p140_p2)   ;;  %vm617_vm0 = vcmask (!%p140_p2), 261120  }
   0x6   : > { %143 = sbr.rel (%p140_p2) target bundleno = 387 (0x183), region = 32  ;;  %714 = vmatprep.subr.bf16.mxu0 (!%p140_p2), %v2025_v1  ;;  %1882 = vmatprep.subr.bf16.mxu1 (!%p140_p2), %v2025_v1  ;;  %p165_p3 = scmp.lt.s32.totalorder (!%p140_p2), %s1448_s16, 255  ;;  %v1914_v4 = vld [vmem:[%s2299_s1 + $0x18] sm:$0xff] (!%p140_p2)   ;;  %v1915_v7 = vld [vmem:[%s2299_s1 + $0x20] sm:$0xff] (!%p140_p2)   ;;  %v1916_v8 = vld [vmem:[%s2299_s1 + $0x28] sm:$0xff] (!%p140_p2)  }
   0x7   : > { %715 = vmatpush1.bf16.msra.mxu0 (!%p140_p2), %v1911_v0  ;;  %1892 = vmatpush1.bf16.msra.mxu1 (!%p140_p2), %v1911_v0  ;;  %v1917_v9 = vld [vmem:[%s2299_s1 + $0x30] sm:$0xff] (!%p140_p2)   ;;  %v1918_v10 = vld [vmem:[%s2299_s1 + $0x38] sm:$0xff] (!%p140_p2)   ;;  %v1919_v11 = vld [vmem:[%s2299_s1 + $0x40] sm:$0xff] (!%p140_p2)  }
   0x8   : > { %716 = vmatprep.subr.bf16.mxu0 (!%p140_p2), %v2025_v1  ;;  %1883 = vmatprep.subr.bf16.mxu1 (!%p140_p2), %v2025_v1  ;;  %v1920_v12 = vld [vmem:[%s2299_s1 + $0x48] sm:$0xff] (!%p140_p2)  }
   0xb   : > { %717 = vmatpush1.bf16.msra.mxu0 (!%p140_p2), %v1912_v2  ;;  %1893 = vmatpush1.bf16.msra.mxu1 (!%p140_p2), %v1912_v2 }
   0xc   : > { %718 = vmatprep.subr.bf16.mxu0 (!%p140_p2), %v2025_v1  ;;  %1884 = vmatprep.subr.bf16.mxu1 (!%p140_p2), %v2025_v1 }
   0xd   : > { %s2303_s16 = smov (!%p165_p3, %s1448_s16), 255 }
   0xe   : > { %s1626_s21 = sshll.u32 %s2303_s16, 3  ;;  %s1452_s15 = sshll.u32 %s2303_s16, 2 }
   0xf   : > { %s2069_s24 = scalar_lea.vmem %s2298_s0, %s1626_s21  ;;  %719 = vmatpush1.bf16.msra.mxu0 %v1913_v3  ;;  %1894 = vmatpush1.bf16.msra.mxu1 %v1913_v3  ;;  %s2201_s19 = scalar_lea.vmem %s2301_s3, %s1452_s15 }
  0x10   : > { %720 = vmatprep.subr.bf16.mxu0 %v2025_v1  ;;  %1885 = vmatprep.subr.bf16.mxu1 %v2025_v1  ;;  %v1923_v5 = vld [vmem:[%s2069_s24 + $0x4] ss:$8 sps:$4 sm:$0xff]   ;;  %v1921_v13 = vld [vmem:[%s2069_s24] ss:$8 sps:$4 sm:$0xff]   ;;  %v1927_v15 = vld [vmem:[%s2069_s24 + $0x14] ss:$8 sps:$4 sm:$0xff]  }
  0x11   : > { %v1926_v6 = vld [vmem:[%s2069_s24 + $0x104] ss:$8 sps:$4 sm:$0xff]   ;;  %1528 = vmatprep.mubr.msk.bf16.mxu0 %vm617_vm0, %v1923_v5  ;;  %v1924_v14 = vld [vmem:[%s2069_s24 + $0x100] ss:$8 sps:$4 sm:$0xff]   ;;  %v1929_v16 = vld [vmem:[%s2069_s24 + $0x114] ss:$8 sps:$4 sm:$0xff]  }
  0x12   : > { %1544 = vmatprep.mubr.msk.bf16.mxu1 %vm617_vm0, %v1926_v6  ;;  %v1931_v17 = vld [vmem:[%s2069_s24 + $0x10] ss:$8 sps:$4 sm:$0xff]   ;;  %v1933_v19 = vld [vmem:[%s2069_s24 + $0x24] ss:$8 sps:$4 sm:$0xff]   ;;  %v1937_v21 = vld [vmem:[%s2069_s24 + $0x20] ss:$8 sps:$4 sm:$0xff]  }
  0x13   : > { %721 = vmatpush1.bf16.msra.mxu0 %v1914_v4  ;;  %1895 = vmatpush1.bf16.msra.mxu1 %v1914_v4  ;;  %v1932_v18 = vld [vmem:[%s2069_s24 + $0x110] ss:$8 sps:$4 sm:$0xff]   ;;  %v1935_v20 = vld [vmem:[%s2069_s24 + $0x124] ss:$8 sps:$4 sm:$0xff]   ;;  %v1938_v22 = vld [vmem:[%s2069_s24 + $0x120] ss:$8 sps:$4 sm:$0xff]  }
  0x14   : > { %722 = vmatprep.subr.bf16.mxu0 %v2025_v1  ;;  %1886 = vmatprep.subr.bf16.mxu1 %v2025_v1  ;;  %v1939_v23 = vld [vmem:[%s2069_s24 + $0x34] ss:$8 sps:$4 sm:$0xff]   ;;  %v1943_v25 = vld [vmem:[%s2069_s24 + $0x30] ss:$8 sps:$4 sm:$0xff]   ;;  %v1945_v27 = vld [vmem:[%s2069_s24 + $0x44] ss:$8 sps:$4 sm:$0xff]  }
  0x15   : > { %v1941_v24 = vld [vmem:[%s2069_s24 + $0x134] ss:$8 sps:$4 sm:$0xff]   ;;  %v1944_v26 = vld [vmem:[%s2069_s24 + $0x130] ss:$8 sps:$4 sm:$0xff]   ;;  %v1947_v28 = vld [vmem:[%s2069_s24 + $0x144] ss:$8 sps:$4 sm:$0xff]  }
  0x16   : > { %v1949_v29 = vld [vmem:[%s2069_s24 + $0x40] ss:$8 sps:$4 sm:$0xff]   ;;  %v1951_v31 = vld [vmem:[%s2069_s24 + $0x54] ss:$8 sps:$4 sm:$0xff]   ;;  %v1955_v33 = vld [vmem:[%s2069_s24 + $0x50] ss:$8 sps:$4 sm:$0xff]  }
  0x17   : > { %723 = vmatpush1.bf16.msra.mxu0 %v1915_v7  ;;  %1896 = vmatpush1.bf16.msra.mxu1 %v1915_v7  ;;  %v1950_v30 = vld [vmem:[%s2069_s24 + $0x140] ss:$8 sps:$4 sm:$0xff]   ;;  %v1953_v32 = vld [vmem:[%s2069_s24 + $0x154] ss:$8 sps:$4 sm:$0xff]   ;;  %v1956_v34 = vld [vmem:[%s2069_s24 + $0x150] ss:$8 sps:$4 sm:$0xff]  }
  0x18   : > { %724 = vmatprep.subr.bf16.mxu0 %v2025_v1  ;;  %1887 = vmatprep.subr.bf16.mxu1 %v2025_v1  ;;  %v1957_v35 = vld [vmem:[%s2069_s24 + $0x64] ss:$8 sps:$4 sm:$0xff]   ;;  %v1961_v37 = vld [vmem:[%s2069_s24 + $0x60] ss:$8 sps:$4 sm:$0xff]   ;;  %v1963_v39 = vld [vmem:[%s2069_s24 + $0x74] ss:$8 sps:$4 sm:$0xff]  }
  0x19   : > { %v1959_v36 = vld [vmem:[%s2069_s24 + $0x164] ss:$8 sps:$4 sm:$0xff]   ;;  %v1962_v38 = vld [vmem:[%s2069_s24 + $0x160] ss:$8 sps:$4 sm:$0xff]   ;;  %v1965_v40 = vld [vmem:[%s2069_s24 + $0x174] ss:$8 sps:$4 sm:$0xff]  }
  0x1a   : > { %v1967_v41 = vld [vmem:[%s2069_s24 + $0x70] ss:$8 sps:$4 sm:$0xff]   ;;  %v1969_v43 = vld [vmem:[%s2069_s24 + $0x84] ss:$8 sps:$4 sm:$0xff]   ;;  %v1973_v45 = vld [vmem:[%s2069_s24 + $0x80] ss:$8 sps:$4 sm:$0xff]  }
  0x1b   : > { %725 = vmatpush1.bf16.msra.mxu0 %v1916_v8  ;;  %1897 = vmatpush1.bf16.msra.mxu1 %v1916_v8  ;;  %v1968_v42 = vld [vmem:[%s2069_s24 + $0x170] ss:$8 sps:$4 sm:$0xff]   ;;  %v1971_v44 = vld [vmem:[%s2069_s24 + $0x184] ss:$8 sps:$4 sm:$0xff]   ;;  %v1974_v46 = vld [vmem:[%s2069_s24 + $0x180] ss:$8 sps:$4 sm:$0xff]  }
  0x1c   : > { %726 = vmatprep.subr.bf16.mxu0 %v2025_v1  ;;  %1888 = vmatprep.subr.bf16.mxu1 %v2025_v1  ;;  %v1975_v47 = vld [vmem:[%s2069_s24 + $0x94] ss:$8 sps:$4 sm:$0xff]   ;;  %v1979_v49 = vld [vmem:[%s2069_s24 + $0x90] ss:$8 sps:$4 sm:$0xff]   ;;  %v1981_v51 = vld [vmem:[%s2069_s24 + $0xa4] ss:$8 sps:$4 sm:$0xff]  }
  0x1d   : > { %v1977_v48 = vld [vmem:[%s2069_s24 + $0x194] ss:$8 sps:$4 sm:$0xff]   ;;  %v1980_v50 = vld [vmem:[%s2069_s24 + $0x190] ss:$8 sps:$4 sm:$0xff]   ;;  %v1983_v52 = vld [vmem:[%s2069_s24 + $0x1a4] ss:$8 sps:$4 sm:$0xff]  }
  0x1e   : > { %v1985_v53 = vld [vmem:[%s2069_s24 + $0xa0] ss:$8 sps:$4 sm:$0xff]   ;;  %v1987_v55 = vld [vmem:[%s2069_s24 + $0xb4] ss:$8 sps:$4 sm:$0xff]   ;;  %v1991_v57 = vld [vmem:[%s2069_s24 + $0xb0] ss:$8 sps:$4 sm:$0xff]  }
  0x1f   : > { %727 = vmatpush1.bf16.msra.mxu0 %v1917_v9  ;;  %1898 = vmatpush1.bf16.msra.mxu1 %v1917_v9  ;;  %v1986_v54 = vld [vmem:[%s2069_s24 + $0x1a0] ss:$8 sps:$4 sm:$0xff]   ;;  %v1989_v56 = vld [vmem:[%s2069_s24 + $0x1b4] ss:$8 sps:$4 sm:$0xff]   ;;  %v1992_v58 = vld [vmem:[%s2069_s24 + $0x1b0] ss:$8 sps:$4 sm:$0xff]  }
  0x20   : > { %728 = vmatprep.subr.bf16.mxu0 %v2025_v1  ;;  %1889 = vmatprep.subr.bf16.mxu1 %v2025_v1  ;;  %v1993_v59 = vld [vmem:[%s2069_s24 + $0xc4] ss:$8 sps:$4 sm:$0xff]   ;;  %v1997_v61 = vld [vmem:[%s2069_s24 + $0xc0] ss:$8 sps:$4 sm:$0xff]   ;;  %v1999_v63 = vld [vmem:[%s2069_s24 + $0xd4] ss:$8 sps:$4 sm:$0xff]  }
  0x21   : > { %v1995_v60 = vld [vmem:[%s2069_s24 + $0x1c4] ss:$8 sps:$4 sm:$0xff]   ;;  %v1998_v62 = vld [vmem:[%s2069_s24 + $0x1c0] ss:$8 sps:$4 sm:$0xff]   ;;  %v2001_v0 = vld [vmem:[%s2069_s24 + $0x1d4] ss:$8 sps:$4 sm:$0xff]  }
  0x22   : > { %v2004_v2 = vld [vmem:[%s2069_s24 + $0x1d0] ss:$8 sps:$4 sm:$0xff]   ;;  %v2005_v3 = vld [vmem:[%s2069_s24 + $0xe4] ss:$8 sps:$4 sm:$0xff]   ;;  %v2009_v5 = vld [vmem:[%s2069_s24 + $0xe0] ss:$8 sps:$4 sm:$0xff]  }
  0x23   : > { %729 = vmatpush1.bf16.msra.mxu0 %v1918_v10  ;;  %1899 = vmatpush1.bf16.msra.mxu1 %v1918_v10  ;;  %v2007_v4 = vld [vmem:[%s2069_s24 + $0x1e4] ss:$8 sps:$4 sm:$0xff]   ;;  %v2010_v6 = vld [vmem:[%s2069_s24 + $0x1e0] ss:$8 sps:$4 sm:$0xff]   ;;  %v2011_v7 = vld [vmem:[%s2069_s24 + $0xf4] ss:$8 sps:$4 sm:$0xff]  }
  0x24   : > { %730 = vmatprep.subr.bf16.mxu0 %v2025_v1  ;;  %1890 = vmatprep.subr.bf16.mxu1 %v2025_v1  ;;  %v2013_v8 = vld [vmem:[%s2069_s24 + $0x1f4] ss:$8 sps:$4 sm:$0xff]   ;;  %v2015_v9 = vld [vmem:[%s2069_s24 + $0xf0] ss:$8 sps:$4 sm:$0xff]  }
  0x25   : > { %v2016_v10 = vld [vmem:[%s2069_s24 + $0x1f0] ss:$8 sps:$4 sm:$0xff]  }
  0x27   : > { %731 = vmatpush1.bf16.msra.mxu0 %v1919_v11  ;;  %1900 = vmatpush1.bf16.msra.mxu1 %v1919_v11  ;;  %v2191_v11 = vld [vmem:[%s2300_s2] ss:$0 sm:$0xff] }
  0x28   : > { %732 = vmatprep.subr.bf16.mxu0 %v2025_v1  ;;  %1891 = vmatprep.subr.bf16.mxu1 %v2025_v1  ;;  %v2003_v1 = vld [vmem:[%s2069_s24 + $0xd0] ss:$8 sps:$4 sm:$0xff]  }
  0x2b   : > { %733 = vmatpush1.bf16.msra.mxu0 %v1920_v12  ;;  %1901 = vmatpush1.bf16.msra.mxu1 %v1920_v12 }
  0x2e   : > { %747 = vmatmul.mubr.bf16.vlgmr.msra.gmra.mrb[0].mxu0 %v1921_v13  ;;  %875 = vmatmul.mubr.bf16.vlgmr.msra.gmra.mrb[0].mxu1 %v1924_v14 }
  0x2f   : > { %1529 = vmatprep.mubr.msk.bf16.mxu0 %vm617_vm0, %v1927_v15  ;;  %1545 = vmatprep.mubr.msk.bf16.mxu1 %vm617_vm0, %v1929_v16 }
  0x36   : > { %755 = vmatmul.mubr.bf16.gmra.mrb[4].mxu0 %v1931_v17  ;;  %883 = vmatmul.mubr.bf16.gmra.mrb[4].mxu1 %v1932_v18 }
  0x37   : > { %1530 = vmatprep.mubr.msk.bf16.mxu0 %vm617_vm0, %v1933_v19  ;;  %1546 = vmatprep.mubr.msk.bf16.mxu1 %vm617_vm0, %v1935_v20 }
  0x3e   : > { %763 = vmatmul.mubr.bf16.gmra.mrb[8].mxu0 %v1937_v21  ;;  %891 = vmatmul.mubr.bf16.gmra.mrb[8].mxu1 %v1938_v22 }
  0x3f   : > { %1531 = vmatprep.mubr.msk.bf16.mxu0 %vm617_vm0, %v1939_v23  ;;  %1547 = vmatprep.mubr.msk.bf16.mxu1 %vm617_vm0, %v1941_v24 }
  0x46   : > { %771 = vmatmul.mubr.bf16.gmra.mrb[12].mxu0 %v1943_v25  ;;  %899 = vmatmul.mubr.bf16.gmra.mrb[12].mxu1 %v1944_v26 }
  0x47   : > { %1532 = vmatprep.mubr.msk.bf16.mxu0 %vm617_vm0, %v1945_v27  ;;  %1548 = vmatprep.mubr.msk.bf16.mxu1 %vm617_vm0, %v1947_v28 }
  0x4e   : > { %779 = vmatmul.mubr.bf16.gmra.mrb[16].mxu0 %v1949_v29  ;;  %907 = vmatmul.mubr.bf16.gmra.mrb[16].mxu1 %v1950_v30 }
  0x4f   : > { %1533 = vmatprep.mubr.msk.bf16.mxu0 %vm617_vm0, %v1951_v31  ;;  %1549 = vmatprep.mubr.msk.bf16.mxu1 %vm617_vm0, %v1953_v32 }
  0x56   : > { %787 = vmatmul.mubr.bf16.gmra.mrb[20].mxu0 %v1955_v33  ;;  %915 = vmatmul.mubr.bf16.gmra.mrb[20].mxu1 %v1956_v34 }
  0x57   : > { %1534 = vmatprep.mubr.msk.bf16.mxu0 %vm617_vm0, %v1957_v35  ;;  %1550 = vmatprep.mubr.msk.bf16.mxu1 %vm617_vm0, %v1959_v36 }
  0x5e   : > { %795 = vmatmul.mubr.bf16.gmra.mrb[24].mxu0 %v1961_v37  ;;  %923 = vmatmul.mubr.bf16.gmra.mrb[24].mxu1 %v1962_v38 }
  0x5f   : > { %1535 = vmatprep.mubr.msk.bf16.mxu0 %vm617_vm0, %v1963_v39  ;;  %1551 = vmatprep.mubr.msk.bf16.mxu1 %vm617_vm0, %v1965_v40 }
  0x66   : > { %803 = vmatmul.mubr.bf16.gmra.mrb[28].mxu0 %v1967_v41  ;;  %931 = vmatmul.mubr.bf16.gmra.mrb[28].mxu1 %v1968_v42 }
  0x67   : > { %1536 = vmatprep.mubr.msk.bf16.mxu0 %vm617_vm0, %v1969_v43  ;;  %1552 = vmatprep.mubr.msk.bf16.mxu1 %vm617_vm0, %v1971_v44 }
  0x6e   : > { %811 = vmatmul.mubr.bf16.gmra.mrb[32].mxu0 %v1973_v45  ;;  %939 = vmatmul.mubr.bf16.gmra.mrb[32].mxu1 %v1974_v46 }
  0x6f   : > { %1537 = vmatprep.mubr.msk.bf16.mxu0 %vm617_vm0, %v1975_v47  ;;  %1553 = vmatprep.mubr.msk.bf16.mxu1 %vm617_vm0, %v1977_v48 }
  0x76   : > { %819 = vmatmul.mubr.bf16.gmra.mrb[36].mxu0 %v1979_v49  ;;  %947 = vmatmul.mubr.bf16.gmra.mrb[36].mxu1 %v1980_v50 }
  0x77   : > { %1538 = vmatprep.mubr.msk.bf16.mxu0 %vm617_vm0, %v1981_v51  ;;  %1554 = vmatprep.mubr.msk.bf16.mxu1 %vm617_vm0, %v1983_v52 }
  0x7e   : > { %827 = vmatmul.mubr.bf16.gmra.mrb[40].mxu0 %v1985_v53  ;;  %955 = vmatmul.mubr.bf16.gmra.mrb[40].mxu1 %v1986_v54 }
  0x7f   : > { %1539 = vmatprep.mubr.msk.bf16.mxu0 %vm617_vm0, %v1987_v55  ;;  %1555 = vmatprep.mubr.msk.bf16.mxu1 %vm617_vm0, %v1989_v56 }
  0x86   : > { %835 = vmatmul.mubr.bf16.gmra.mrb[44].mxu0 %v1991_v57  ;;  %963 = vmatmul.mubr.bf16.gmra.mrb[44].mxu1 %v1992_v58 }
  0x87   : > { %1540 = vmatprep.mubr.msk.bf16.mxu0 %vm617_vm0, %v1993_v59  ;;  %1556 = vmatprep.mubr.msk.bf16.mxu1 %vm617_vm0, %v1995_v60 }
  0x8e   : > { %843 = vmatmul.mubr.bf16.gmra.mrb[48].mxu0 %v1997_v61  ;;  %971 = vmatmul.mubr.bf16.gmra.mrb[48].mxu1 %v1998_v62 }
  0x8f   : > { %1541 = vmatprep.mubr.msk.bf16.mxu0 %vm617_vm0, %v1999_v63  ;;  %1557 = vmatprep.mubr.msk.bf16.mxu1 %vm617_vm0, %v2001_v0 }
  0x96   : > { %851 = vmatmul.mubr.bf16.gmra.mrb[52].mxu0 %v2003_v1  ;;  %979 = vmatmul.mubr.bf16.gmra.mrb[52].mxu1 %v2004_v2 }
  0x97   : > { %1542 = vmatprep.mubr.msk.bf16.mxu0 %vm617_vm0, %v2005_v3  ;;  %1558 = vmatprep.mubr.msk.bf16.mxu1 %vm617_vm0, %v2007_v4 }
  0x9e   : > { %859 = vmatmul.mubr.bf16.gmra.mrb[56].mxu0 %v2009_v5  ;;  %987 = vmatmul.mubr.bf16.gmra.mrb[56].mxu1 %v2010_v6 }
  0x9f   : > { %1543 = vmatprep.mubr.msk.bf16.mxu0 %vm617_vm0, %v2011_v7  ;;  %1559 = vmatprep.mubr.msk.bf16.mxu1 %vm617_vm0, %v2013_v8 }
  0xa6   : > { %867 = vmatmul.mubr.bf16.gmra.mrb[60].mxu0 %v2015_v9  ;;  %995 = vmatmul.mubr.bf16.gmra.mrb[60].mxu1 %v2016_v10 }
 0x101   : > { %v748_v12 = vpop.f32.mrb[0].mxu0  ;;  %v876_v13 = vpop.f32.mrb[0].mxu1 }
 0x102   : > { %v749_v14 = vadd.f32 %v2191_v11, %v748_v12  ;;  %v877_v15 = vadd.f32 %v2191_v11, %v876_v13  ;;  %v750_v16 = vpop.f32.mrb[1].mxu0  ;;  %v878_v17 = vpop.f32.mrb[1].mxu1 }
 0x103   : > { %v751_v18 = vpop.f32.mrb[2].mxu0  ;;  %v879_v19 = vpop.f32.mrb[2].mxu1 }
 0x104   : > { %v752_v20 = vadd.f32 %v2191_v11, %v751_v18  ;;  %v880_v21 = vadd.f32 %v2191_v11, %v879_v19  ;;  %v753_v22 = vpop.f32.mrb[3].mxu0  ;;  %v881_v23 = vpop.f32.mrb[3].mxu1  ;;  %v1003_v24 = vmax.f32 %v749_v14, 0.0  ;;  %v1035_v25 = vmax.f32 %v877_v15, 0.0 }
 0x106   : > { %v1004_v26 = vmax.f32 %v752_v20, 0.0  ;;  %v1036_v27 = vmax.f32 %v880_v21, 0.0 }
 0x108   : > { %v1694_v28 = vpack.c.bf16 %v1004_v26, %v1003_v24  ;;  %v1774_v29 = vpack.c.bf16 %v1036_v27, %v1035_v25 }
 0x109   : > { %v756_v30 = vpop.f32.mrb[4].mxu0  ;;  %v884_v31 = vpop.f32.mrb[4].mxu1 }
 0x10a   : > { %1695 = vst [vmem:[%s2201_s19] sm:$0xff] %v1694_v28   ;;  %1866 = vst [vmem:[%s2201_s19 + $0x80] sm:$0xff] %v1774_v29   ;;  %v757_v32 = vadd.f32 %v2191_v11, %v756_v30  ;;  %v885_v33 = vadd.f32 %v2191_v11, %v884_v31  ;;  %v758_v34 = vpop.f32.mrb[5].mxu0  ;;  %v886_v35 = vpop.f32.mrb[5].mxu1 }
 0x10b   : > { %v759_v36 = vpop.f32.mrb[6].mxu0  ;;  %v887_v37 = vpop.f32.mrb[6].mxu1 }
 0x10c   : > { %v760_v38 = vadd.f32 %v2191_v11, %v759_v36  ;;  %v888_v39 = vadd.f32 %v2191_v11, %v887_v37  ;;  %v761_v40 = vpop.f32.mrb[7].mxu0  ;;  %v889_v41 = vpop.f32.mrb[7].mxu1  ;;  %v1005_v42 = vmax.f32 %v757_v32, 0.0  ;;  %v1037_v43 = vmax.f32 %v885_v33, 0.0 }
 0x10e   : > { %v1006_v44 = vmax.f32 %v760_v38, 0.0  ;;  %v1038_v45 = vmax.f32 %v888_v39, 0.0 }
 0x110   : > { %v1699_v46 = vpack.c.bf16 %v1006_v44, %v1005_v42  ;;  %v1779_v47 = vpack.c.bf16 %v1038_v45, %v1037_v43 }
 0x111   : > { %v764_v48 = vpop.f32.mrb[8].mxu0  ;;  %v892_v49 = vpop.f32.mrb[8].mxu1 }
 0x112   : > { %1851 = vst [vmem:[%s2201_s19 + $0x8] sm:$0xff] %v1699_v46   ;;  %1867 = vst [vmem:[%s2201_s19 + $0x88] sm:$0xff] %v1779_v47   ;;  %v765_v50 = vadd.f32 %v2191_v11, %v764_v48  ;;  %v893_v51 = vadd.f32 %v2191_v11, %v892_v49  ;;  %v766_v52 = vpop.f32.mrb[9].mxu0  ;;  %v894_v53 = vpop.f32.mrb[9].mxu1 }
 0x113   : > { %v767_v54 = vpop.f32.mrb[10].mxu0  ;;  %v895_v55 = vpop.f32.mrb[10].mxu1 }
 0x114   : > { %v768_v56 = vadd.f32 %v2191_v11, %v767_v54  ;;  %v896_v57 = vadd.f32 %v2191_v11, %v895_v55  ;;  %v769_v58 = vpop.f32.mrb[11].mxu0  ;;  %v897_v59 = vpop.f32.mrb[11].mxu1  ;;  %v1007_v60 = vmax.f32 %v765_v50, 0.0  ;;  %v1039_v61 = vmax.f32 %v893_v51, 0.0 }
 0x116   : > { %v1008_v62 = vmax.f32 %v768_v56, 0.0  ;;  %v1040_v63 = vmax.f32 %v896_v57, 0.0 }
 0x118   : > { %v1704_v0 = vpack.c.bf16 %v1008_v62, %v1007_v60  ;;  %v1784_v1 = vpack.c.bf16 %v1040_v63, %v1039_v61 }
 0x119   : > { %v772_v2 = vpop.f32.mrb[12].mxu0  ;;  %v900_v3 = vpop.f32.mrb[12].mxu1 }
 0x11a   : > { %1852 = vst [vmem:[%s2201_s19 + $0x10] sm:$0xff] %v1704_v0   ;;  %1868 = vst [vmem:[%s2201_s19 + $0x90] sm:$0xff] %v1784_v1   ;;  %v773_v4 = vadd.f32 %v2191_v11, %v772_v2  ;;  %v901_v5 = vadd.f32 %v2191_v11, %v900_v3  ;;  %v774_v6 = vpop.f32.mrb[13].mxu0  ;;  %v902_v7 = vpop.f32.mrb[13].mxu1 }
 0x11b   : > { %v775_v8 = vpop.f32.mrb[14].mxu0  ;;  %v903_v9 = vpop.f32.mrb[14].mxu1 }
 0x11c   : > { %v776_v10 = vadd.f32 %v2191_v11, %v775_v8  ;;  %v904_v12 = vadd.f32 %v2191_v11, %v903_v9  ;;  %v777_v13 = vpop.f32.mrb[15].mxu0  ;;  %v905_v14 = vpop.f32.mrb[15].mxu1  ;;  %v1009_v15 = vmax.f32 %v773_v4, 0.0  ;;  %v1041_v16 = vmax.f32 %v901_v5, 0.0 }
 0x11e   : > { %v1010_v17 = vmax.f32 %v776_v10, 0.0  ;;  %v1042_v18 = vmax.f32 %v904_v12, 0.0 }
 0x120   : > { %v1709_v19 = vpack.c.bf16 %v1010_v17, %v1009_v15  ;;  %v1789_v20 = vpack.c.bf16 %v1042_v18, %v1041_v16 }
 0x121   : > { %v780_v21 = vpop.f32.mrb[16].mxu0  ;;  %v908_v22 = vpop.f32.mrb[16].mxu1 }
 0x122   : > { %1853 = vst [vmem:[%s2201_s19 + $0x18] sm:$0xff] %v1709_v19   ;;  %1869 = vst [vmem:[%s2201_s19 + $0x98] sm:$0xff] %v1789_v20   ;;  %v781_v23 = vadd.f32 %v2191_v11, %v780_v21  ;;  %v909_v24 = vadd.f32 %v2191_v11, %v908_v22  ;;  %v782_v25 = vpop.f32.mrb[17].mxu0  ;;  %v910_v26 = vpop.f32.mrb[17].mxu1 }
 0x123   : > { %v783_v27 = vpop.f32.mrb[18].mxu0  ;;  %v911_v28 = vpop.f32.mrb[18].mxu1 }
 0x124   : > { %v784_v29 = vadd.f32 %v2191_v11, %v783_v27  ;;  %v912_v30 = vadd.f32 %v2191_v11, %v911_v28  ;;  %v785_v31 = vpop.f32.mrb[19].mxu0  ;;  %v913_v32 = vpop.f32.mrb[19].mxu1  ;;  %v1011_v33 = vmax.f32 %v781_v23, 0.0  ;;  %v1043_v34 = vmax.f32 %v909_v24, 0.0 }
 0x126   : > { %v1012_v35 = vmax.f32 %v784_v29, 0.0  ;;  %v1044_v36 = vmax.f32 %v912_v30, 0.0 }
 0x128   : > { %v1714_v37 = vpack.c.bf16 %v1012_v35, %v1011_v33  ;;  %v1794_v38 = vpack.c.bf16 %v1044_v36, %v1043_v34 }
 0x129   : > { %v788_v39 = vpop.f32.mrb[20].mxu0  ;;  %v916_v40 = vpop.f32.mrb[20].mxu1 }
 0x12a   : > { %1854 = vst [vmem:[%s2201_s19 + $0x20] sm:$0xff] %v1714_v37   ;;  %1870 = vst [vmem:[%s2201_s19 + $0xa0] sm:$0xff] %v1794_v38   ;;  %v789_v41 = vadd.f32 %v2191_v11, %v788_v39  ;;  %v917_v42 = vadd.f32 %v2191_v11, %v916_v40  ;;  %v790_v43 = vpop.f32.mrb[21].mxu0  ;;  %v918_v44 = vpop.f32.mrb[21].mxu1 }
 0x12b   : > { %v791_v45 = vpop.f32.mrb[22].mxu0  ;;  %v919_v46 = vpop.f32.mrb[22].mxu1 }
 0x12c   : > { %v792_v47 = vadd.f32 %v2191_v11, %v791_v45  ;;  %v920_v48 = vadd.f32 %v2191_v11, %v919_v46  ;;  %v793_v49 = vpop.f32.mrb[23].mxu0  ;;  %v921_v50 = vpop.f32.mrb[23].mxu1  ;;  %v1013_v51 = vmax.f32 %v789_v41, 0.0  ;;  %v1045_v52 = vmax.f32 %v917_v42, 0.0 }
 0x12e   : > { %v1014_v53 = vmax.f32 %v792_v47, 0.0  ;;  %v1046_v54 = vmax.f32 %v920_v48, 0.0 }
 0x130   : > { %v1719_v55 = vpack.c.bf16 %v1014_v53, %v1013_v51  ;;  %v1799_v56 = vpack.c.bf16 %v1046_v54, %v1045_v52 }
 0x131   : > { %v796_v57 = vpop.f32.mrb[24].mxu0  ;;  %v924_v58 = vpop.f32.mrb[24].mxu1 }
 0x132   : > { %1855 = vst [vmem:[%s2201_s19 + $0x28] sm:$0xff] %v1719_v55   ;;  %1871 = vst [vmem:[%s2201_s19 + $0xa8] sm:$0xff] %v1799_v56   ;;  %v797_v59 = vadd.f32 %v2191_v11, %v796_v57  ;;  %v925_v60 = vadd.f32 %v2191_v11, %v924_v58  ;;  %v798_v61 = vpop.f32.mrb[25].mxu0  ;;  %v926_v62 = vpop.f32.mrb[25].mxu1 }
 0x133   : > { %v799_v63 = vpop.f32.mrb[26].mxu0  ;;  %v927_v0 = vpop.f32.mrb[26].mxu1 }
 0x134   : > { %v800_v1 = vadd.f32 %v2191_v11, %v799_v63  ;;  %v928_v2 = vadd.f32 %v2191_v11, %v927_v0  ;;  %v801_v3 = vpop.f32.mrb[27].mxu0  ;;  %v929_v4 = vpop.f32.mrb[27].mxu1  ;;  %v1015_v5 = vmax.f32 %v797_v59, 0.0  ;;  %v1047_v6 = vmax.f32 %v925_v60, 0.0 }
 0x136   : > { %v1016_v7 = vmax.f32 %v800_v1, 0.0  ;;  %v1048_v8 = vmax.f32 %v928_v2, 0.0 }
 0x138   : > { %v1724_v9 = vpack.c.bf16 %v1016_v7, %v1015_v5  ;;  %v1804_v10 = vpack.c.bf16 %v1048_v8, %v1047_v6 }
 0x139   : > { %v804_v12 = vpop.f32.mrb[28].mxu0  ;;  %v932_v13 = vpop.f32.mrb[28].mxu1 }
 0x13a   : > { %1856 = vst [vmem:[%s2201_s19 + $0x30] sm:$0xff] %v1724_v9   ;;  %1872 = vst [vmem:[%s2201_s19 + $0xb0] sm:$0xff] %v1804_v10   ;;  %v805_v14 = vadd.f32 %v2191_v11, %v804_v12  ;;  %v933_v15 = vadd.f32 %v2191_v11, %v932_v13  ;;  %v806_v16 = vpop.f32.mrb[29].mxu0  ;;  %v934_v17 = vpop.f32.mrb[29].mxu1 }
 0x13b   : > { %v807_v18 = vpop.f32.mrb[30].mxu0  ;;  %v935_v19 = vpop.f32.mrb[30].mxu1 }
 0x13c   : > { %v808_v20 = vadd.f32 %v2191_v11, %v807_v18  ;;  %v936_v21 = vadd.f32 %v2191_v11, %v935_v19  ;;  %v809_v22 = vpop.f32.mrb[31].mxu0  ;;  %v937_v23 = vpop.f32.mrb[31].mxu1  ;;  %v1017_v24 = vmax.f32 %v805_v14, 0.0  ;;  %v1049_v25 = vmax.f32 %v933_v15, 0.0 }
 0x13e   : > { %v1018_v26 = vmax.f32 %v808_v20, 0.0  ;;  %v1050_v27 = vmax.f32 %v936_v21, 0.0 }
 0x140   : > { %v1729_v28 = vpack.c.bf16 %v1018_v26, %v1017_v24  ;;  %v1809_v29 = vpack.c.bf16 %v1050_v27, %v1049_v25 }
 0x141   : > { %v812_v30 = vpop.f32.mrb[32].mxu0  ;;  %v940_v31 = vpop.f32.mrb[32].mxu1 }
 0x142   : > { %1857 = vst [vmem:[%s2201_s19 + $0x38] sm:$0xff] %v1729_v28   ;;  %1873 = vst [vmem:[%s2201_s19 + $0xb8] sm:$0xff] %v1809_v29   ;;  %v813_v32 = vadd.f32 %v2191_v11, %v812_v30  ;;  %v941_v33 = vadd.f32 %v2191_v11, %v940_v31  ;;  %v814_v34 = vpop.f32.mrb[33].mxu0  ;;  %v942_v35 = vpop.f32.mrb[33].mxu1 }
 0x143   : > { %v815_v36 = vpop.f32.mrb[34].mxu0  ;;  %v943_v37 = vpop.f32.mrb[34].mxu1 }
 0x144   : > { %v816_v38 = vadd.f32 %v2191_v11, %v815_v36  ;;  %v944_v39 = vadd.f32 %v2191_v11, %v943_v37  ;;  %v817_v40 = vpop.f32.mrb[35].mxu0  ;;  %v945_v41 = vpop.f32.mrb[35].mxu1  ;;  %v1019_v42 = vmax.f32 %v813_v32, 0.0  ;;  %v1051_v43 = vmax.f32 %v941_v33, 0.0 }
 0x146   : > { %v1020_v44 = vmax.f32 %v816_v38, 0.0  ;;  %v1052_v45 = vmax.f32 %v944_v39, 0.0 }
 0x148   : > { %v1734_v46 = vpack.c.bf16 %v1020_v44, %v1019_v42  ;;  %v1814_v47 = vpack.c.bf16 %v1052_v45, %v1051_v43 }
 0x149   : > { %v820_v48 = vpop.f32.mrb[36].mxu0  ;;  %v948_v49 = vpop.f32.mrb[36].mxu1 }
 0x14a   : > { %1858 = vst [vmem:[%s2201_s19 + $0x40] sm:$0xff] %v1734_v46   ;;  %1874 = vst [vmem:[%s2201_s19 + $0xc0] sm:$0xff] %v1814_v47   ;;  %v821_v50 = vadd.f32 %v2191_v11, %v820_v48  ;;  %v949_v51 = vadd.f32 %v2191_v11, %v948_v49  ;;  %v822_v52 = vpop.f32.mrb[37].mxu0  ;;  %v950_v53 = vpop.f32.mrb[37].mxu1 }
 0x14b   : > { %v823_v54 = vpop.f32.mrb[38].mxu0  ;;  %v951_v55 = vpop.f32.mrb[38].mxu1 }
 0x14c   : > { %v824_v56 = vadd.f32 %v2191_v11, %v823_v54  ;;  %v952_v57 = vadd.f32 %v2191_v11, %v951_v55  ;;  %v825_v58 = vpop.f32.mrb[39].mxu0  ;;  %v953_v59 = vpop.f32.mrb[39].mxu1  ;;  %v1021_v60 = vmax.f32 %v821_v50, 0.0  ;;  %v1053_v61 = vmax.f32 %v949_v51, 0.0 }
 0x14e   : > { %v1022_v62 = vmax.f32 %v824_v56, 0.0  ;;  %v1054_v63 = vmax.f32 %v952_v57, 0.0 }
 0x150   : > { %v1739_v0 = vpack.c.bf16 %v1022_v62, %v1021_v60  ;;  %v1819_v1 = vpack.c.bf16 %v1054_v63, %v1053_v61 }
 0x151   : > { %v828_v2 = vpop.f32.mrb[40].mxu0  ;;  %v956_v3 = vpop.f32.mrb[40].mxu1 }
 0x152   : > { %1859 = vst [vmem:[%s2201_s19 + $0x48] sm:$0xff] %v1739_v0   ;;  %1875 = vst [vmem:[%s2201_s19 + $0xc8] sm:$0xff] %v1819_v1   ;;  %v829_v4 = vadd.f32 %v2191_v11, %v828_v2  ;;  %v957_v5 = vadd.f32 %v2191_v11, %v956_v3  ;;  %v830_v6 = vpop.f32.mrb[41].mxu0  ;;  %v958_v7 = vpop.f32.mrb[41].mxu1 }
 0x153   : > { %v831_v8 = vpop.f32.mrb[42].mxu0  ;;  %v959_v9 = vpop.f32.mrb[42].mxu1 }
 0x154   : > { %v832_v10 = vadd.f32 %v2191_v11, %v831_v8  ;;  %v960_v12 = vadd.f32 %v2191_v11, %v959_v9  ;;  %v833_v13 = vpop.f32.mrb[43].mxu0  ;;  %v961_v14 = vpop.f32.mrb[43].mxu1  ;;  %v1023_v15 = vmax.f32 %v829_v4, 0.0  ;;  %v1055_v16 = vmax.f32 %v957_v5, 0.0 }
 0x156   : > { %v1024_v17 = vmax.f32 %v832_v10, 0.0  ;;  %v1056_v18 = vmax.f32 %v960_v12, 0.0 }
 0x158   : > { %v1744_v19 = vpack.c.bf16 %v1024_v17, %v1023_v15  ;;  %v1824_v20 = vpack.c.bf16 %v1056_v18, %v1055_v16 }
 0x159   : > { %v836_v21 = vpop.f32.mrb[44].mxu0  ;;  %v964_v22 = vpop.f32.mrb[44].mxu1 }
 0x15a   : > { %1860 = vst [vmem:[%s2201_s19 + $0x50] sm:$0xff] %v1744_v19   ;;  %1876 = vst [vmem:[%s2201_s19 + $0xd0] sm:$0xff] %v1824_v20   ;;  %v837_v23 = vadd.f32 %v2191_v11, %v836_v21  ;;  %v965_v24 = vadd.f32 %v2191_v11, %v964_v22  ;;  %v838_v25 = vpop.f32.mrb[45].mxu0  ;;  %v966_v26 = vpop.f32.mrb[45].mxu1 }
 0x15b   : > { %v839_v27 = vpop.f32.mrb[46].mxu0  ;;  %v967_v28 = vpop.f32.mrb[46].mxu1 }
 0x15c   : > { %v840_v29 = vadd.f32 %v2191_v11, %v839_v27  ;;  %v968_v30 = vadd.f32 %v2191_v11, %v967_v28  ;;  %v841_v31 = vpop.f32.mrb[47].mxu0  ;;  %v969_v32 = vpop.f32.mrb[47].mxu1  ;;  %v1025_v33 = vmax.f32 %v837_v23, 0.0  ;;  %v1057_v34 = vmax.f32 %v965_v24, 0.0 }
 0x15e   : > { %v1026_v35 = vmax.f32 %v840_v29, 0.0  ;;  %v1058_v36 = vmax.f32 %v968_v30, 0.0 }
 0x160   : > { %v1749_v37 = vpack.c.bf16 %v1026_v35, %v1025_v33  ;;  %v1829_v38 = vpack.c.bf16 %v1058_v36, %v1057_v34 }
 0x161   : > { %v844_v39 = vpop.f32.mrb[48].mxu0  ;;  %v972_v40 = vpop.f32.mrb[48].mxu1 }
 0x162   : > { %1861 = vst [vmem:[%s2201_s19 + $0x58] sm:$0xff] %v1749_v37   ;;  %1877 = vst [vmem:[%s2201_s19 + $0xd8] sm:$0xff] %v1829_v38   ;;  %v845_v41 = vadd.f32 %v2191_v11, %v844_v39  ;;  %v973_v42 = vadd.f32 %v2191_v11, %v972_v40  ;;  %v846_v43 = vpop.f32.mrb[49].mxu0  ;;  %v974_v44 = vpop.f32.mrb[49].mxu1 }
 0x163   : > { %v847_v45 = vpop.f32.mrb[50].mxu0  ;;  %v975_v46 = vpop.f32.mrb[50].mxu1 }
 0x164   : > { %v848_v47 = vadd.f32 %v2191_v11, %v847_v45  ;;  %v976_v48 = vadd.f32 %v2191_v11, %v975_v46  ;;  %v849_v49 = vpop.f32.mrb[51].mxu0  ;;  %v977_v50 = vpop.f32.mrb[51].mxu1  ;;  %v1027_v51 = vmax.f32 %v845_v41, 0.0  ;;  %v1059_v52 = vmax.f32 %v973_v42, 0.0 }
 0x166   : > { %v1028_v53 = vmax.f32 %v848_v47, 0.0  ;;  %v1060_v54 = vmax.f32 %v976_v48, 0.0 }
 0x168   : > { %v1754_v55 = vpack.c.bf16 %v1028_v53, %v1027_v51  ;;  %v1834_v56 = vpack.c.bf16 %v1060_v54, %v1059_v52 }
 0x169   : > { %v852_v57 = vpop.f32.mrb[52].mxu0  ;;  %v980_v58 = vpop.f32.mrb[52].mxu1 }
 0x16a   : > { %1862 = vst [vmem:[%s2201_s19 + $0x60] sm:$0xff] %v1754_v55   ;;  %1878 = vst [vmem:[%s2201_s19 + $0xe0] sm:$0xff] %v1834_v56   ;;  %v853_v59 = vadd.f32 %v2191_v11, %v852_v57  ;;  %v981_v60 = vadd.f32 %v2191_v11, %v980_v58  ;;  %v854_v61 = vpop.f32.mrb[53].mxu0  ;;  %v982_v62 = vpop.f32.mrb[53].mxu1 }
 0x16b   : > { %v855_v63 = vpop.f32.mrb[54].mxu0  ;;  %v983_v0 = vpop.f32.mrb[54].mxu1 }
 0x16c   : > { %v856_v1 = vadd.f32 %v2191_v11, %v855_v63  ;;  %v984_v2 = vadd.f32 %v2191_v11, %v983_v0  ;;  %v857_v3 = vpop.f32.mrb[55].mxu0  ;;  %v985_v4 = vpop.f32.mrb[55].mxu1  ;;  %v1029_v5 = vmax.f32 %v853_v59, 0.0  ;;  %v1061_v6 = vmax.f32 %v981_v60, 0.0 }
 0x16e   : > { %v1030_v7 = vmax.f32 %v856_v1, 0.0  ;;  %v1062_v8 = vmax.f32 %v984_v2, 0.0 }
 0x170   : > { %v1759_v9 = vpack.c.bf16 %v1030_v7, %v1029_v5  ;;  %v1839_v10 = vpack.c.bf16 %v1062_v8, %v1061_v6 }
 0x171   : > { %v860_v12 = vpop.f32.mrb[56].mxu0  ;;  %v988_v13 = vpop.f32.mrb[56].mxu1 }
 0x172   : > { %1863 = vst [vmem:[%s2201_s19 + $0x68] sm:$0xff] %v1759_v9   ;;  %1879 = vst [vmem:[%s2201_s19 + $0xe8] sm:$0xff] %v1839_v10   ;;  %v861_v14 = vadd.f32 %v2191_v11, %v860_v12  ;;  %v989_v15 = vadd.f32 %v2191_v11, %v988_v13  ;;  %v862_v16 = vpop.f32.mrb[57].mxu0  ;;  %v990_v17 = vpop.f32.mrb[57].mxu1 }
 0x173   : > { %v863_v18 = vpop.f32.mrb[58].mxu0  ;;  %v991_v19 = vpop.f32.mrb[58].mxu1 }
 0x174   : > { %v864_v20 = vadd.f32 %v2191_v11, %v863_v18  ;;  %v992_v21 = vadd.f32 %v2191_v11, %v991_v19  ;;  %v865_v22 = vpop.f32.mrb[59].mxu0  ;;  %v993_v23 = vpop.f32.mrb[59].mxu1  ;;  %v1031_v24 = vmax.f32 %v861_v14, 0.0  ;;  %v1063_v25 = vmax.f32 %v989_v15, 0.0 }
 0x176   : > { %v1032_v26 = vmax.f32 %v864_v20, 0.0  ;;  %v1064_v27 = vmax.f32 %v992_v21, 0.0 }
 0x178   : > { %v1764_v28 = vpack.c.bf16 %v1032_v26, %v1031_v24  ;;  %v1844_v29 = vpack.c.bf16 %v1064_v27, %v1063_v25 }
 0x179   : > { %v868_v30 = vpop.f32.mrb[60].mxu0  ;;  %v996_v31 = vpop.f32.mrb[60].mxu1 }
 0x17a   : > { %1864 = vst [vmem:[%s2201_s19 + $0x70] sm:$0xff] %v1764_v28   ;;  %1880 = vst [vmem:[%s2201_s19 + $0xf0] sm:$0xff] %v1844_v29   ;;  %v869_v32 = vadd.f32 %v2191_v11, %v868_v30  ;;  %v997_v33 = vadd.f32 %v2191_v11, %v996_v31  ;;  %v870_v34 = vpop.f32.mrb[61].mxu0  ;;  %v998_v35 = vpop.f32.mrb[61].mxu1 }
 0x17b   : > { %v871_v36 = vpop.f32.mrb[62].mxu0  ;;  %v999_v37 = vpop.f32.mrb[62].mxu1 }
 0x17c   : > { %v872_v38 = vadd.f32 %v2191_v11, %v871_v36  ;;  %v1000_v39 = vadd.f32 %v2191_v11, %v999_v37  ;;  %v873_v40 = vpop.f32.mrb[63].mxu0  ;;  %v1001_v41 = vpop.f32.mrb[63].mxu1  ;;  %v1033_v42 = vmax.f32 %v869_v32, 0.0  ;;  %v1065_v43 = vmax.f32 %v997_v33, 0.0 }
 0x17e   : > { %v1034_v44 = vmax.f32 %v872_v38, 0.0  ;;  %v1066_v45 = vmax.f32 %v1000_v39, 0.0 }
 0x180   : > { %v1769_v46 = vpack.c.bf16 %v1034_v44, %v1033_v42  ;;  %v1849_v47 = vpack.c.bf16 %v1066_v45, %v1065_v43 }
 0x182   : > { %1865 = vst [vmem:[%s2201_s19 + $0x78] sm:$0xff] %v1769_v46   ;;  %1881 = vst [vmem:[%s2201_s19 + $0xf8] sm:$0xff] %v1849_v47  }
 0x183 PF: > { %s13_s12 = sadd.s32 1, %s2023_s12  }
 0x184   : > { %p10_p4 = scmp.ge.s32.totalorder %s13_s12, 6  }
 0x186   :  { %12 = sbr.rel (!%p10_p4) target bundleno = 1 (0x1), region = 62 }

// kernel: _lambda_.32
= control target key start
LH: loop header
LB: loop body
LE: loop exit
PB: predicated region body
PF: predicated region fallthrough
CT: control target
= control target key end

     0   :  { %s285_s0 = inlined_call_operand.vmem [shape: bf16[32,128], index: 0, kind: input, shape index: {}]   ;;  %s286_s1 = inlined_call_operand.vmem [shape: bf16[32,128], index: 1, kind: input, shape index: {}]   ;;  %s287_s2 = inlined_call_operand.vmem [shape: bf16[32,128], index: 2, kind: input, shape index: {}]   ;;  %s288_s3 = inlined_call_operand.vmem [shape: bf16[32,128], index: 3, kind: input, shape index: {}]   ;;  %s289_s4 = inlined_call_operand.vmem [shape: bf16[32,128], index: 4, kind: input, shape index: {}]   ;;  %s290_s5 = inlined_call_operand.vmem [shape: bf16[32,128], index: 5, kind: input, shape index: {}]   ;;  %s291_s6 = inlined_call_operand.vmem [shape: bf16[32,128], index: 6, kind: input, shape index: {}]   ;;  %s292_s7 = inlined_call_operand.vmem [shape: bf16[32,128], index: 7, kind: input, shape index: {}]   ;;  %s293_s8 = inlined_call_operand.vmem [shape: bf16[32,128], index: 8, kind: input, shape index: {}]   ;;  %s294_s9 = inlined_call_operand.vmem [shape: bf16[32,128], index: 9, kind: output, shape index: {}]  }
   0x1   :  { %v32_v0 = vld [vmem:[%s285_s0] sm:$0xf]  ;;  %v33_v1 = vld [vmem:[%s285_s0 + $0x4] sm:$0xf]  ;;  %v34_v18 = vld [vmem:[%s285_s0 + $0x8] sm:$0xf] }
   0x2   :  { %v36_v2 = vld [vmem:[%s286_s1] sm:$0xf]  ;;  %v37_v3 = vld [vmem:[%s286_s1 + $0x4] sm:$0xf]  ;;  %v35_v19 = vld [vmem:[%s285_s0 + $0xc] sm:$0xf] }
   0x3   :  { %v40_v4 = vmax.bf16 %v36_v2, %v32_v0  ;;  %v44_v5 = vld [vmem:[%s287_s2] sm:$0xf]  ;;  %v45_v6 = vld [vmem:[%s287_s2 + $0x4] sm:$0xf]  ;;  %v41_v7 = vmax.bf16 %v37_v3, %v33_v1  ;;  %v38_v20 = vld [vmem:[%s286_s1 + $0x8] sm:$0xf] }
   0x4   :  { %v52_v8 = vld [vmem:[%s288_s3] sm:$0xf]  ;;  %v53_v10 = vld [vmem:[%s288_s3 + $0x4] sm:$0xf]  ;;  %v39_v22 = vld [vmem:[%s286_s1 + $0xc] sm:$0xf]  ;;  %v42_v23 = vmax.bf16 %v38_v20, %v34_v18 }
   0x5   :  { %v48_v9 = vmax.bf16 %v44_v5, %v40_v4  ;;  %v49_v11 = vmax.bf16 %v45_v6, %v41_v7  ;;  %v60_v12 = vld [vmem:[%s289_s4] sm:$0xf]  ;;  %v61_v14 = vld [vmem:[%s289_s4 + $0x4] sm:$0xf]  ;;  %v46_v24 = vld [vmem:[%s287_s2 + $0x8] sm:$0xf]  ;;  %v43_v28 = vmax.bf16 %v39_v22, %v35_v19 }
   0x6   :  { %v68_v15 = vld [vmem:[%s290_s5] sm:$0xf]  ;;  %v69_v16 = vld [vmem:[%s290_s5 + $0x4] sm:$0xf]  ;;  %v47_v25 = vld [vmem:[%s287_s2 + $0xc] sm:$0xf]  ;;  %v50_v32 = vmax.bf16 %v46_v24, %v42_v23 }
   0x7   :  { %v56_v13 = vmax.bf16 %v52_v8, %v48_v9  ;;  %v57_v17 = vmax.bf16 %v53_v10, %v49_v11  ;;  %v76_v27 = vld [vmem:[%s291_s6] sm:$0xf]  ;;  %v54_v29 = vld [vmem:[%s288_s3 + $0x8] sm:$0xf]  ;;  %v77_v31 = vld [vmem:[%s291_s6 + $0x4] sm:$0xf]  ;;  %v51_v36 = vmax.bf16 %v47_v25, %v43_v28 }
   0x8   :  { %v55_v33 = vld [vmem:[%s288_s3 + $0xc] sm:$0xf]  ;;  %v84_v35 = vld [vmem:[%s292_s7] sm:$0xf]  ;;  %v62_v37 = vld [vmem:[%s289_s4 + $0x8] sm:$0xf]  ;;  %v58_v40 = vmax.bf16 %v54_v29, %v50_v32 }
   0x9   :  { %v64_v21 = vmax.bf16 %v60_v12, %v56_v13  ;;  %v65_v26 = vmax.bf16 %v61_v14, %v57_v17  ;;  %v85_v39 = vld [vmem:[%s292_s7 + $0x4] sm:$0xf]  ;;  %v63_v41 = vld [vmem:[%s289_s4 + $0xc] sm:$0xf]  ;;  %v92_v43 = vld [vmem:[%s293_s8] sm:$0xf]  ;;  %v59_v44 = vmax.bf16 %v55_v33, %v51_v36 }
   0xa   :  { %v70_v45 = vld [vmem:[%s290_s5 + $0x8] sm:$0xf]  ;;  %v93_v47 = vld [vmem:[%s293_s8 + $0x4] sm:$0xf]  ;;  %v66_v48 = vmax.bf16 %v62_v37, %v58_v40  ;;  %v71_v49 = vld [vmem:[%s290_s5 + $0xc] sm:$0xf] }
   0xb   :  { %v72_v30 = vmax.bf16 %v68_v15, %v64_v21  ;;  %v73_v34 = vmax.bf16 %v69_v16, %v65_v26  ;;  %v67_v51 = vmax.bf16 %v63_v41, %v59_v44  ;;  %v78_v52 = vld [vmem:[%s291_s6 + $0x8] sm:$0xf]  ;;  %v79_v55 = vld [vmem:[%s291_s6 + $0xc] sm:$0xf] }
   0xc   :  { %v74_v54 = vmax.bf16 %v70_v45, %v66_v48  ;;  %v86_v58 = vld [vmem:[%s292_s7 + $0x8] sm:$0xf]  ;;  %v87_v60 = vld [vmem:[%s292_s7 + $0xc] sm:$0xf] }
   0xd   :  { %v80_v38 = vmax.bf16 %v76_v27, %v72_v30  ;;  %v81_v42 = vmax.bf16 %v77_v31, %v73_v34  ;;  %v75_v57 = vmax.bf16 %v71_v49, %v67_v51  ;;  %v94_v63 = vld [vmem:[%s293_s8 + $0x8] sm:$0xf]  ;;  %v95_v1 = vld [vmem:[%s293_s8 + $0xc] sm:$0xf] }
   0xe   :  { %v82_v59 = vmax.bf16 %v78_v52, %v74_v54 }
   0xf   :  { %v88_v46 = vmax.bf16 %v84_v35, %v80_v38  ;;  %v89_v50 = vmax.bf16 %v85_v39, %v81_v42  ;;  %v83_v62 = vmax.bf16 %v79_v55, %v75_v57 }
  0x10   :  { %v90_v0 = vmax.bf16 %v86_v58, %v82_v59 }
  0x11   :  { %v96_v53 = vmax.bf16 %v92_v43, %v88_v46  ;;  %v97_v56 = vmax.bf16 %v93_v47, %v89_v50  ;;  %v91_v2 = vmax.bf16 %v87_v60, %v83_v62 }
  0x12   :  { %v98_v3 = vmax.bf16 %v94_v63, %v90_v0 }
  0x13   :  { %v118_v61 = vcombine.low %v96_v53, %v97_v56  ;;  %v99_v4 = vmax.bf16 %v95_v1, %v91_v2 }
  0x15   :  { %112 = vst [vmem:[%s294_s9] sm:$0xff] %v118_v61   ;;  %v119_v5 = vcombine.low %v98_v3, %v99_v4 }
  0x17   :  { %120 = vst [vmem:[%s294_s9 + $0x8] sm:$0xff] %v119_v5  }

// kernel: _lambda_.33
= control target key start
LH: loop header
LB: loop body
LE: loop exit
PB: predicated region body
PF: predicated region fallthrough
CT: control target
= control target key end

     0   :  { %vm254_vm0 = vcmask 130048   ;;  %s1863_s1 = inlined_call_operand.vmem [shape: bf16[16,128], index: 1, kind: input, shape index: {}]   ;;  %s1864_s0 = inlined_call_operand.vmem [shape: bf16[512,16], index: 0, kind: input, shape index: {}]   ;;  %s1865_s2 = inlined_call_operand.vmem [shape: f32[1,128], index: 2, kind: input, shape index: {}]   ;;  %s1866_s3 = inlined_call_operand.vmem [shape: bf16[512,128], index: 3, kind: output, shape index: {}]  }
   0x1   :  { %v1514_v0 = vld [vmem:[%s1863_s1] sm:$0xff]   ;;  %v1517_v3 = vld [vmem:[%s1864_s0 + $0x8] sm:$0xff]   ;;  %v1519_v5 = vld [vmem:[%s1864_s0 + $0x10] sm:$0xff]  }
   0x2   :  { %v1515_v1 = vld [vmem:[%s1864_s0] sm:$0xff]   ;;  %1446 = vmatprep.subr.bf16.mxu0 %v1514_v0  ;;  %1512 = vmatprep.subr.bf16.mxu1 %v1514_v0  ;;  %v1518_v4 = vld [vmem:[%s1864_s0 + $0x88] sm:$0xff]   ;;  %v1520_v6 = vld [vmem:[%s1864_s0 + $0x90] sm:$0xff]  }
   0x3   :  { %v1516_v2 = vld [vmem:[%s1864_s0 + $0x80] sm:$0xff]   ;;  %1447 = vmatpush3.bf16.msra.mxu0 %v1514_v0  ;;  %1513 = vmatpush3.bf16.msra.mxu1 %v1514_v0  ;;  %v1521_v7 = vld [vmem:[%s1864_s0 + $0x18] sm:$0xff]   ;;  %v1525_v11 = vld [vmem:[%s1864_s0 + $0x28] sm:$0xff]  }
   0x4   :  { %1448 = vmatprep.mubr.msk.bf16.mxu0 %vm254_vm0, %v1515_v1  ;;  %1480 = vmatprep.mubr.msk.bf16.mxu1 %vm254_vm0, %v1516_v2  ;;  %v1522_v8 = vld [vmem:[%s1864_s0 + $0x98] sm:$0xff]   ;;  %v1523_v9 = vld [vmem:[%s1864_s0 + $0x20] sm:$0xff]   ;;  %v1526_v12 = vld [vmem:[%s1864_s0 + $0xa8] sm:$0xff]  }
   0x5   :  { %v1524_v10 = vld [vmem:[%s1864_s0 + $0xa0] sm:$0xff]   ;;  %v1527_v13 = vld [vmem:[%s1864_s0 + $0x30] sm:$0xff]   ;;  %v1529_v15 = vld [vmem:[%s1864_s0 + $0x38] sm:$0xff]  }
   0x6   :  { %1449 = vmatmul.mubr.msk.bf16.vlgmr.msra.gmra.mrb[0].mxu0 %vm254_vm0, %v1517_v3  ;;  %1481 = vmatmul.mubr.msk.bf16.vlgmr.msra.gmra.mrb[0].mxu1 %vm254_vm0, %v1518_v4  ;;  %v1528_v14 = vld [vmem:[%s1864_s0 + $0xb0] sm:$0xff]   ;;  %v1530_v16 = vld [vmem:[%s1864_s0 + $0xb8] sm:$0xff]   ;;  %v1531_v17 = vld [vmem:[%s1864_s0 + $0x40] sm:$0xff]  }
   0x7   :  { %1452 = vmatprep.mubr.msk.bf16.mxu0 %vm254_vm0, %v1519_v5  ;;  %1484 = vmatprep.mubr.msk.bf16.mxu1 %vm254_vm0, %v1520_v6  ;;  %v1532_v18 = vld [vmem:[%s1864_s0 + $0xc0] sm:$0xff]   ;;  %v1533_v19 = vld [vmem:[%s1864_s0 + $0x48] sm:$0xff]   ;;  %v1535_v21 = vld [vmem:[%s1864_s0 + $0x50] sm:$0xff]  }
   0x8   :  { %v1534_v20 = vld [vmem:[%s1864_s0 + $0xc8] sm:$0xff]   ;;  %v1536_v22 = vld [vmem:[%s1864_s0 + $0xd0] sm:$0xff]   ;;  %v1537_v23 = vld [vmem:[%s1864_s0 + $0x58] sm:$0xff]  }
   0x9   :  { %v1538_v24 = vld [vmem:[%s1864_s0 + $0xd8] sm:$0xff]   ;;  %v1539_v25 = vld [vmem:[%s1864_s0 + $0x60] sm:$0xff]   ;;  %v1541_v27 = vld [vmem:[%s1864_s0 + $0x68] sm:$0xff]  }
   0xa   :  { %v1540_v26 = vld [vmem:[%s1864_s0 + $0xe0] sm:$0xff]   ;;  %v1542_v28 = vld [vmem:[%s1864_s0 + $0xe8] sm:$0xff]   ;;  %v1543_v29 = vld [vmem:[%s1864_s0 + $0x70] sm:$0xff]  }
   0xb   :  { %v1544_v30 = vld [vmem:[%s1864_s0 + $0xf0] sm:$0xff]   ;;  %v1545_v31 = vld [vmem:[%s1864_s0 + $0x78] sm:$0xff]   ;;  %v1701_v33 = vld [vmem:[%s1865_s2] ss:$0 sm:$0xff] }
   0xc   :  { %v1546_v32 = vld [vmem:[%s1864_s0 + $0xf8] sm:$0xff]  }
   0xe   :  { %1453 = vmatmul.mubr.msk.bf16.gmra.mrb[4].mxu0 %vm254_vm0, %v1521_v7  ;;  %1485 = vmatmul.mubr.msk.bf16.gmra.mrb[4].mxu1 %vm254_vm0, %v1522_v8 }
   0xf   :  { %1456 = vmatprep.mubr.msk.bf16.mxu0 %vm254_vm0, %v1523_v9  ;;  %1488 = vmatprep.mubr.msk.bf16.mxu1 %vm254_vm0, %v1524_v10 }
  0x16   :  { %1457 = vmatmul.mubr.msk.bf16.gmra.mrb[8].mxu0 %vm254_vm0, %v1525_v11  ;;  %1489 = vmatmul.mubr.msk.bf16.gmra.mrb[8].mxu1 %vm254_vm0, %v1526_v12 }
  0x17   :  { %1460 = vmatprep.mubr.msk.bf16.mxu0 %vm254_vm0, %v1527_v13  ;;  %1492 = vmatprep.mubr.msk.bf16.mxu1 %vm254_vm0, %v1528_v14 }
  0x1e   :  { %1461 = vmatmul.mubr.msk.bf16.gmra.mrb[12].mxu0 %vm254_vm0, %v1529_v15  ;;  %1493 = vmatmul.mubr.msk.bf16.gmra.mrb[12].mxu1 %vm254_vm0, %v1530_v16 }
  0x1f   :  { %1464 = vmatprep.mubr.msk.bf16.mxu0 %vm254_vm0, %v1531_v17  ;;  %1496 = vmatprep.mubr.msk.bf16.mxu1 %vm254_vm0, %v1532_v18 }
  0x26   :  { %1465 = vmatmul.mubr.msk.bf16.gmra.mrb[16].mxu0 %vm254_vm0, %v1533_v19  ;;  %1497 = vmatmul.mubr.msk.bf16.gmra.mrb[16].mxu1 %vm254_vm0, %v1534_v20 }
  0x27   :  { %1468 = vmatprep.mubr.msk.bf16.mxu0 %vm254_vm0, %v1535_v21  ;;  %1500 = vmatprep.mubr.msk.bf16.mxu1 %vm254_vm0, %v1536_v22 }
  0x2e   :  { %1469 = vmatmul.mubr.msk.bf16.gmra.mrb[20].mxu0 %vm254_vm0, %v1537_v23  ;;  %1501 = vmatmul.mubr.msk.bf16.gmra.mrb[20].mxu1 %vm254_vm0, %v1538_v24 }
  0x2f   :  { %1472 = vmatprep.mubr.msk.bf16.mxu0 %vm254_vm0, %v1539_v25  ;;  %1504 = vmatprep.mubr.msk.bf16.mxu1 %vm254_vm0, %v1540_v26 }
  0x36   :  { %1473 = vmatmul.mubr.msk.bf16.gmra.mrb[24].mxu0 %vm254_vm0, %v1541_v27  ;;  %1505 = vmatmul.mubr.msk.bf16.gmra.mrb[24].mxu1 %vm254_vm0, %v1542_v28 }
  0x37   :  { %1476 = vmatprep.mubr.msk.bf16.mxu0 %vm254_vm0, %v1543_v29  ;;  %1508 = vmatprep.mubr.msk.bf16.mxu1 %vm254_vm0, %v1544_v30 }
  0x3e   :  { %1477 = vmatmul.mubr.msk.bf16.gmra.mrb[28].mxu0 %vm254_vm0, %v1545_v31  ;;  %1509 = vmatmul.mubr.msk.bf16.gmra.mrb[28].mxu1 %vm254_vm0, %v1546_v32 }
  0xd9   :  { %v1450_v34 = vpop.f32.mrb[0].mxu0  ;;  %v1482_v35 = vpop.f32.mrb[0].mxu1 }
  0xda   :  { %v394_v36 = vadd.f32 %v1450_v34, %v1701_v33  ;;  %v522_v37 = vadd.f32 %v1482_v35, %v1701_v33  ;;  %v385_v38 = vpop.f32.mrb[1].mxu0  ;;  %v513_v39 = vpop.f32.mrb[1].mxu1 }
  0xdb   :  { %v386_v40 = vadd.f32 %v1701_v33, %v385_v38  ;;  %v514_v41 = vadd.f32 %v1701_v33, %v513_v39  ;;  %v1451_v42 = vpop.f32.mrb[2].mxu0  ;;  %v1483_v43 = vpop.f32.mrb[2].mxu1 }
  0xdc   :  { %v397_v44 = vadd.f32 %v1451_v42, %v1701_v33  ;;  %v525_v45 = vadd.f32 %v1483_v43, %v1701_v33  ;;  %v388_v46 = vpop.f32.mrb[3].mxu0  ;;  %v516_v47 = vpop.f32.mrb[3].mxu1  ;;  %v642_v50 = vmax.f32 %v394_v36, 0.0  ;;  %v674_v51 = vmax.f32 %v522_v37, 0.0 }
  0xdd   :  { %v389_v48 = vadd.f32 %v1701_v33, %v388_v46  ;;  %v517_v49 = vadd.f32 %v1701_v33, %v516_v47  ;;  %v640_v54 = vmax.f32 %v386_v40, 0.0  ;;  %v672_v55 = vmax.f32 %v514_v41, 0.0 }
  0xde   :  { %v643_v52 = vmax.f32 %v397_v44, 0.0  ;;  %v675_v53 = vmax.f32 %v525_v45, 0.0 }
  0xdf   :  { %v641_v56 = vmax.f32 %v389_v48, 0.0  ;;  %v673_v57 = vmax.f32 %v517_v49, 0.0 }
  0xe0   :  { %v1230_v58 = vpack.c.bf16 %v643_v52, %v642_v50  ;;  %v1310_v59 = vpack.c.bf16 %v675_v53, %v674_v51 }
  0xe1   :  { %v1225_v60 = vpack.c.bf16 %v641_v56, %v640_v54  ;;  %v1305_v61 = vpack.c.bf16 %v673_v57, %v672_v55  ;;  %v1454_v62 = vpop.f32.mrb[4].mxu0  ;;  %v1486_v63 = vpop.f32.mrb[4].mxu1 }
  0xe2   :  { %1382 = vst [vmem:[%s1866_s3 + $0x8] sm:$0xff] %v1230_v58   ;;  %1398 = vst [vmem:[%s1866_s3 + $0x88] sm:$0xff] %v1310_v59   ;;  %v410_v0 = vadd.f32 %v1454_v62, %v1701_v33  ;;  %v538_v1 = vadd.f32 %v1486_v63, %v1701_v33  ;;  %v401_v2 = vpop.f32.mrb[5].mxu0  ;;  %v529_v3 = vpop.f32.mrb[5].mxu1 }
  0xe3   :  { %1226 = vst [vmem:[%s1866_s3] sm:$0xff] %v1225_v60   ;;  %1397 = vst [vmem:[%s1866_s3 + $0x80] sm:$0xff] %v1305_v61   ;;  %v402_v4 = vadd.f32 %v1701_v33, %v401_v2  ;;  %v530_v5 = vadd.f32 %v1701_v33, %v529_v3  ;;  %v1455_v6 = vpop.f32.mrb[6].mxu0  ;;  %v1487_v7 = vpop.f32.mrb[6].mxu1 }
  0xe4   :  { %v413_v8 = vadd.f32 %v1455_v6, %v1701_v33  ;;  %v541_v9 = vadd.f32 %v1487_v7, %v1701_v33  ;;  %v404_v10 = vpop.f32.mrb[7].mxu0  ;;  %v532_v11 = vpop.f32.mrb[7].mxu1  ;;  %v646_v14 = vmax.f32 %v410_v0, 0.0  ;;  %v678_v15 = vmax.f32 %v538_v1, 0.0 }
  0xe5   :  { %v405_v12 = vadd.f32 %v1701_v33, %v404_v10  ;;  %v533_v13 = vadd.f32 %v1701_v33, %v532_v11  ;;  %v644_v18 = vmax.f32 %v402_v4, 0.0  ;;  %v676_v19 = vmax.f32 %v530_v5, 0.0 }
  0xe6   :  { %v647_v16 = vmax.f32 %v413_v8, 0.0  ;;  %v679_v17 = vmax.f32 %v541_v9, 0.0 }
  0xe7   :  { %v645_v20 = vmax.f32 %v405_v12, 0.0  ;;  %v677_v21 = vmax.f32 %v533_v13, 0.0 }
  0xe8   :  { %v1240_v22 = vpack.c.bf16 %v647_v16, %v646_v14  ;;  %v1320_v23 = vpack.c.bf16 %v679_v17, %v678_v15 }
  0xe9   :  { %v1235_v24 = vpack.c.bf16 %v645_v20, %v644_v18  ;;  %v1315_v25 = vpack.c.bf16 %v677_v21, %v676_v19  ;;  %v1458_v26 = vpop.f32.mrb[8].mxu0  ;;  %v1490_v27 = vpop.f32.mrb[8].mxu1 }
  0xea   :  { %1384 = vst [vmem:[%s1866_s3 + $0x18] sm:$0xff] %v1240_v22   ;;  %1400 = vst [vmem:[%s1866_s3 + $0x98] sm:$0xff] %v1320_v23   ;;  %v426_v28 = vadd.f32 %v1458_v26, %v1701_v33  ;;  %v554_v29 = vadd.f32 %v1490_v27, %v1701_v33  ;;  %v417_v30 = vpop.f32.mrb[9].mxu0  ;;  %v545_v31 = vpop.f32.mrb[9].mxu1 }
  0xeb   :  { %1383 = vst [vmem:[%s1866_s3 + $0x10] sm:$0xff] %v1235_v24   ;;  %1399 = vst [vmem:[%s1866_s3 + $0x90] sm:$0xff] %v1315_v25   ;;  %v418_v32 = vadd.f32 %v1701_v33, %v417_v30  ;;  %v546_v34 = vadd.f32 %v1701_v33, %v545_v31  ;;  %v1459_v35 = vpop.f32.mrb[10].mxu0  ;;  %v1491_v36 = vpop.f32.mrb[10].mxu1 }
  0xec   :  { %v429_v37 = vadd.f32 %v1459_v35, %v1701_v33  ;;  %v557_v38 = vadd.f32 %v1491_v36, %v1701_v33  ;;  %v420_v39 = vpop.f32.mrb[11].mxu0  ;;  %v548_v40 = vpop.f32.mrb[11].mxu1  ;;  %v650_v43 = vmax.f32 %v426_v28, 0.0  ;;  %v682_v44 = vmax.f32 %v554_v29, 0.0 }
  0xed   :  { %v421_v41 = vadd.f32 %v1701_v33, %v420_v39  ;;  %v549_v42 = vadd.f32 %v1701_v33, %v548_v40  ;;  %v648_v47 = vmax.f32 %v418_v32, 0.0  ;;  %v680_v48 = vmax.f32 %v546_v34, 0.0 }
  0xee   :  { %v651_v45 = vmax.f32 %v429_v37, 0.0  ;;  %v683_v46 = vmax.f32 %v557_v38, 0.0 }
  0xef   :  { %v649_v49 = vmax.f32 %v421_v41, 0.0  ;;  %v681_v50 = vmax.f32 %v549_v42, 0.0 }
  0xf0   :  { %v1250_v51 = vpack.c.bf16 %v651_v45, %v650_v43  ;;  %v1330_v52 = vpack.c.bf16 %v683_v46, %v682_v44 }
  0xf1   :  { %v1245_v53 = vpack.c.bf16 %v649_v49, %v648_v47  ;;  %v1325_v54 = vpack.c.bf16 %v681_v50, %v680_v48  ;;  %v1462_v55 = vpop.f32.mrb[12].mxu0  ;;  %v1494_v56 = vpop.f32.mrb[12].mxu1 }
  0xf2   :  { %1386 = vst [vmem:[%s1866_s3 + $0x28] sm:$0xff] %v1250_v51   ;;  %1402 = vst [vmem:[%s1866_s3 + $0xa8] sm:$0xff] %v1330_v52   ;;  %v442_v57 = vadd.f32 %v1462_v55, %v1701_v33  ;;  %v570_v58 = vadd.f32 %v1494_v56, %v1701_v33  ;;  %v433_v59 = vpop.f32.mrb[13].mxu0  ;;  %v561_v60 = vpop.f32.mrb[13].mxu1 }
  0xf3   :  { %1385 = vst [vmem:[%s1866_s3 + $0x20] sm:$0xff] %v1245_v53   ;;  %1401 = vst [vmem:[%s1866_s3 + $0xa0] sm:$0xff] %v1325_v54   ;;  %v434_v61 = vadd.f32 %v1701_v33, %v433_v59  ;;  %v562_v62 = vadd.f32 %v1701_v33, %v561_v60  ;;  %v1463_v63 = vpop.f32.mrb[14].mxu0  ;;  %v1495_v0 = vpop.f32.mrb[14].mxu1 }
  0xf4   :  { %v445_v1 = vadd.f32 %v1463_v63, %v1701_v33  ;;  %v573_v2 = vadd.f32 %v1495_v0, %v1701_v33  ;;  %v436_v3 = vpop.f32.mrb[15].mxu0  ;;  %v564_v4 = vpop.f32.mrb[15].mxu1  ;;  %v654_v7 = vmax.f32 %v442_v57, 0.0  ;;  %v686_v8 = vmax.f32 %v570_v58, 0.0 }
  0xf5   :  { %v437_v5 = vadd.f32 %v1701_v33, %v436_v3  ;;  %v565_v6 = vadd.f32 %v1701_v33, %v564_v4  ;;  %v652_v11 = vmax.f32 %v434_v61, 0.0  ;;  %v684_v12 = vmax.f32 %v562_v62, 0.0 }
  0xf6   :  { %v655_v9 = vmax.f32 %v445_v1, 0.0  ;;  %v687_v10 = vmax.f32 %v573_v2, 0.0 }
  0xf7   :  { %v653_v13 = vmax.f32 %v437_v5, 0.0  ;;  %v685_v14 = vmax.f32 %v565_v6, 0.0 }
  0xf8   :  { %v1260_v15 = vpack.c.bf16 %v655_v9, %v654_v7  ;;  %v1340_v16 = vpack.c.bf16 %v687_v10, %v686_v8 }
  0xf9   :  { %v1255_v17 = vpack.c.bf16 %v653_v13, %v652_v11  ;;  %v1335_v18 = vpack.c.bf16 %v685_v14, %v684_v12  ;;  %v1466_v19 = vpop.f32.mrb[16].mxu0  ;;  %v1498_v20 = vpop.f32.mrb[16].mxu1 }
  0xfa   :  { %1388 = vst [vmem:[%s1866_s3 + $0x38] sm:$0xff] %v1260_v15   ;;  %1404 = vst [vmem:[%s1866_s3 + $0xb8] sm:$0xff] %v1340_v16   ;;  %v458_v21 = vadd.f32 %v1466_v19, %v1701_v33  ;;  %v586_v22 = vadd.f32 %v1498_v20, %v1701_v33  ;;  %v449_v23 = vpop.f32.mrb[17].mxu0  ;;  %v577_v24 = vpop.f32.mrb[17].mxu1 }
  0xfb   :  { %1387 = vst [vmem:[%s1866_s3 + $0x30] sm:$0xff] %v1255_v17   ;;  %1403 = vst [vmem:[%s1866_s3 + $0xb0] sm:$0xff] %v1335_v18   ;;  %v450_v25 = vadd.f32 %v1701_v33, %v449_v23  ;;  %v578_v26 = vadd.f32 %v1701_v33, %v577_v24  ;;  %v1467_v27 = vpop.f32.mrb[18].mxu0  ;;  %v1499_v28 = vpop.f32.mrb[18].mxu1 }
  0xfc   :  { %v461_v29 = vadd.f32 %v1467_v27, %v1701_v33  ;;  %v589_v30 = vadd.f32 %v1499_v28, %v1701_v33  ;;  %v452_v31 = vpop.f32.mrb[19].mxu0  ;;  %v580_v32 = vpop.f32.mrb[19].mxu1  ;;  %v658_v36 = vmax.f32 %v458_v21, 0.0  ;;  %v690_v37 = vmax.f32 %v586_v22, 0.0 }
  0xfd   :  { %v453_v34 = vadd.f32 %v1701_v33, %v452_v31  ;;  %v581_v35 = vadd.f32 %v1701_v33, %v580_v32  ;;  %v656_v40 = vmax.f32 %v450_v25, 0.0  ;;  %v688_v41 = vmax.f32 %v578_v26, 0.0 }
  0xfe   :  { %v659_v38 = vmax.f32 %v461_v29, 0.0  ;;  %v691_v39 = vmax.f32 %v589_v30, 0.0 }
  0xff   :  { %v657_v42 = vmax.f32 %v453_v34, 0.0  ;;  %v689_v43 = vmax.f32 %v581_v35, 0.0 }
 0x100   :  { %v1270_v44 = vpack.c.bf16 %v659_v38, %v658_v36  ;;  %v1350_v45 = vpack.c.bf16 %v691_v39, %v690_v37 }
 0x101   :  { %v1265_v46 = vpack.c.bf16 %v657_v42, %v656_v40  ;;  %v1345_v47 = vpack.c.bf16 %v689_v43, %v688_v41  ;;  %v1470_v48 = vpop.f32.mrb[20].mxu0  ;;  %v1502_v49 = vpop.f32.mrb[20].mxu1 }
 0x102   :  { %1390 = vst [vmem:[%s1866_s3 + $0x48] sm:$0xff] %v1270_v44   ;;  %1406 = vst [vmem:[%s1866_s3 + $0xc8] sm:$0xff] %v1350_v45   ;;  %v474_v50 = vadd.f32 %v1470_v48, %v1701_v33  ;;  %v602_v51 = vadd.f32 %v1502_v49, %v1701_v33  ;;  %v465_v52 = vpop.f32.mrb[21].mxu0  ;;  %v593_v53 = vpop.f32.mrb[21].mxu1 }
 0x103   :  { %1389 = vst [vmem:[%s1866_s3 + $0x40] sm:$0xff] %v1265_v46   ;;  %1405 = vst [vmem:[%s1866_s3 + $0xc0] sm:$0xff] %v1345_v47   ;;  %v466_v54 = vadd.f32 %v1701_v33, %v465_v52  ;;  %v594_v55 = vadd.f32 %v1701_v33, %v593_v53  ;;  %v1471_v56 = vpop.f32.mrb[22].mxu0  ;;  %v1503_v57 = vpop.f32.mrb[22].mxu1 }
 0x104   :  { %v477_v58 = vadd.f32 %v1471_v56, %v1701_v33  ;;  %v605_v59 = vadd.f32 %v1503_v57, %v1701_v33  ;;  %v468_v60 = vpop.f32.mrb[23].mxu0  ;;  %v596_v61 = vpop.f32.mrb[23].mxu1  ;;  %v662_v0 = vmax.f32 %v474_v50, 0.0  ;;  %v694_v1 = vmax.f32 %v602_v51, 0.0 }
 0x105   :  { %v469_v62 = vadd.f32 %v1701_v33, %v468_v60  ;;  %v597_v63 = vadd.f32 %v1701_v33, %v596_v61  ;;  %v660_v4 = vmax.f32 %v466_v54, 0.0  ;;  %v692_v5 = vmax.f32 %v594_v55, 0.0 }
 0x106   :  { %v663_v2 = vmax.f32 %v477_v58, 0.0  ;;  %v695_v3 = vmax.f32 %v605_v59, 0.0 }
 0x107   :  { %v661_v6 = vmax.f32 %v469_v62, 0.0  ;;  %v693_v7 = vmax.f32 %v597_v63, 0.0 }
 0x108   :  { %v1280_v8 = vpack.c.bf16 %v663_v2, %v662_v0  ;;  %v1360_v9 = vpack.c.bf16 %v695_v3, %v694_v1 }
 0x109   :  { %v1275_v10 = vpack.c.bf16 %v661_v6, %v660_v4  ;;  %v1355_v11 = vpack.c.bf16 %v693_v7, %v692_v5  ;;  %v1474_v12 = vpop.f32.mrb[24].mxu0  ;;  %v1506_v13 = vpop.f32.mrb[24].mxu1 }
 0x10a   :  { %1392 = vst [vmem:[%s1866_s3 + $0x58] sm:$0xff] %v1280_v8   ;;  %1408 = vst [vmem:[%s1866_s3 + $0xd8] sm:$0xff] %v1360_v9   ;;  %v490_v14 = vadd.f32 %v1474_v12, %v1701_v33  ;;  %v618_v15 = vadd.f32 %v1506_v13, %v1701_v33  ;;  %v481_v16 = vpop.f32.mrb[25].mxu0  ;;  %v609_v17 = vpop.f32.mrb[25].mxu1 }
 0x10b   :  { %1391 = vst [vmem:[%s1866_s3 + $0x50] sm:$0xff] %v1275_v10   ;;  %1407 = vst [vmem:[%s1866_s3 + $0xd0] sm:$0xff] %v1355_v11   ;;  %v482_v18 = vadd.f32 %v1701_v33, %v481_v16  ;;  %v610_v19 = vadd.f32 %v1701_v33, %v609_v17  ;;  %v1475_v20 = vpop.f32.mrb[26].mxu0  ;;  %v1507_v21 = vpop.f32.mrb[26].mxu1 }
 0x10c   :  { %v493_v22 = vadd.f32 %v1475_v20, %v1701_v33  ;;  %v621_v23 = vadd.f32 %v1507_v21, %v1701_v33  ;;  %v484_v24 = vpop.f32.mrb[27].mxu0  ;;  %v612_v25 = vpop.f32.mrb[27].mxu1  ;;  %v666_v28 = vmax.f32 %v490_v14, 0.0  ;;  %v698_v29 = vmax.f32 %v618_v15, 0.0 }
 0x10d   :  { %v485_v26 = vadd.f32 %v1701_v33, %v484_v24  ;;  %v613_v27 = vadd.f32 %v1701_v33, %v612_v25  ;;  %v664_v32 = vmax.f32 %v482_v18, 0.0  ;;  %v696_v34 = vmax.f32 %v610_v19, 0.0 }
 0x10e   :  { %v667_v30 = vmax.f32 %v493_v22, 0.0  ;;  %v699_v31 = vmax.f32 %v621_v23, 0.0 }
 0x10f   :  { %v665_v35 = vmax.f32 %v485_v26, 0.0  ;;  %v697_v36 = vmax.f32 %v613_v27, 0.0 }
 0x110   :  { %v1290_v37 = vpack.c.bf16 %v667_v30, %v666_v28  ;;  %v1370_v38 = vpack.c.bf16 %v699_v31, %v698_v29 }
 0x111   :  { %v1285_v39 = vpack.c.bf16 %v665_v35, %v664_v32  ;;  %v1365_v40 = vpack.c.bf16 %v697_v36, %v696_v34  ;;  %v1478_v41 = vpop.f32.mrb[28].mxu0  ;;  %v1510_v42 = vpop.f32.mrb[28].mxu1 }
 0x112   :  { %1394 = vst [vmem:[%s1866_s3 + $0x68] sm:$0xff] %v1290_v37   ;;  %1410 = vst [vmem:[%s1866_s3 + $0xe8] sm:$0xff] %v1370_v38   ;;  %v506_v43 = vadd.f32 %v1478_v41, %v1701_v33  ;;  %v634_v44 = vadd.f32 %v1510_v42, %v1701_v33  ;;  %v497_v45 = vpop.f32.mrb[29].mxu0  ;;  %v625_v46 = vpop.f32.mrb[29].mxu1 }
 0x113   :  { %1393 = vst [vmem:[%s1866_s3 + $0x60] sm:$0xff] %v1285_v39   ;;  %1409 = vst [vmem:[%s1866_s3 + $0xe0] sm:$0xff] %v1365_v40   ;;  %v498_v47 = vadd.f32 %v1701_v33, %v497_v45  ;;  %v626_v48 = vadd.f32 %v1701_v33, %v625_v46  ;;  %v1479_v49 = vpop.f32.mrb[30].mxu0  ;;  %v1511_v50 = vpop.f32.mrb[30].mxu1 }
 0x114   :  { %v509_v51 = vadd.f32 %v1479_v49, %v1701_v33  ;;  %v637_v52 = vadd.f32 %v1511_v50, %v1701_v33  ;;  %v500_v53 = vpop.f32.mrb[31].mxu0  ;;  %v628_v54 = vpop.f32.mrb[31].mxu1  ;;  %v670_v57 = vmax.f32 %v506_v43, 0.0  ;;  %v702_v58 = vmax.f32 %v634_v44, 0.0 }
 0x115   :  { %v501_v55 = vadd.f32 %v1701_v33, %v500_v53  ;;  %v629_v56 = vadd.f32 %v1701_v33, %v628_v54  ;;  %v668_v61 = vmax.f32 %v498_v47, 0.0  ;;  %v700_v62 = vmax.f32 %v626_v48, 0.0 }
 0x116   :  { %v671_v59 = vmax.f32 %v509_v51, 0.0  ;;  %v703_v60 = vmax.f32 %v637_v52, 0.0 }
 0x117   :  { %v669_v63 = vmax.f32 %v501_v55, 0.0  ;;  %v701_v0 = vmax.f32 %v629_v56, 0.0 }
 0x118   :  { %v1300_v1 = vpack.c.bf16 %v671_v59, %v670_v57  ;;  %v1380_v2 = vpack.c.bf16 %v703_v60, %v702_v58 }
 0x119   :  { %v1295_v3 = vpack.c.bf16 %v669_v63, %v668_v61  ;;  %v1375_v4 = vpack.c.bf16 %v701_v0, %v700_v62 }
 0x11a   :  { %1396 = vst [vmem:[%s1866_s3 + $0x78] sm:$0xff] %v1300_v1   ;;  %1412 = vst [vmem:[%s1866_s3 + $0xf8] sm:$0xff] %v1380_v2  }
 0x11b   :  { %1395 = vst [vmem:[%s1866_s3 + $0x70] sm:$0xff] %v1295_v3   ;;  %1411 = vst [vmem:[%s1866_s3 + $0xf0] sm:$0xff] %v1375_v4  }

// kernel: _lambda_.34
= control target key start
LH: loop header
LB: loop body
LE: loop exit
PB: predicated region body
PF: predicated region fallthrough
CT: control target
= control target key end

     0   :  { %vm286_vm0 = vcmask 654336   ;;  %s1935_s1 = inlined_call_operand.vmem [shape: bf16[80,128], index: 1, kind: input, shape index: {}]   ;;  %s1936_s0 = inlined_call_operand.vmem [shape: bf16[512,80], index: 0, kind: input, shape index: {}]   ;;  %s1937_s2 = inlined_call_operand.vmem [shape: f32[1,128], index: 2, kind: input, shape index: {}]   ;;  %s1938_s3 = inlined_call_operand.vmem [shape: bf16[512,128], index: 3, kind: output, shape index: {}]  }
   0x1   :  { %v1570_v0 = vld [vmem:[%s1935_s1] sm:$0xff]   ;;  %v1571_v1 = vld [vmem:[%s1935_s1 + $0x8] sm:$0xff]   ;;  %v1572_v2 = vld [vmem:[%s1935_s1 + $0x10] sm:$0xff]  }
   0x2   :  { %1486 = vmatprep.subr.bf16.mxu0 %v1570_v0  ;;  %1560 = vmatprep.subr.bf16.mxu1 %v1570_v0  ;;  %v1575_v3 = vld [vmem:[%s1936_s0] sm:$0xff]   ;;  %v1573_v5 = vld [vmem:[%s1935_s1 + $0x18] sm:$0xff]   ;;  %v1577_v7 = vld [vmem:[%s1936_s0 + $0x8] sm:$0xff]  }
   0x3   :  { %1487 = vmatpush3.bf16.msra.mxu0 %v1570_v0  ;;  %1565 = vmatpush3.bf16.msra.mxu1 %v1570_v0  ;;  %v1576_v4 = vld [vmem:[%s1936_s0 + $0x80] sm:$0xff]   ;;  %v1578_v8 = vld [vmem:[%s1936_s0 + $0x88] sm:$0xff]   ;;  %v1579_v9 = vld [vmem:[%s1936_s0 + $0x10] sm:$0xff]  }
   0x4   :  { %1488 = vmatprep.subr.bf16.mxu0 %v1571_v1  ;;  %1561 = vmatprep.subr.bf16.mxu1 %v1571_v1  ;;  %v1574_v6 = vld [vmem:[%s1935_s1 + $0x20] sm:$0xff]   ;;  %v1580_v10 = vld [vmem:[%s1936_s0 + $0x90] sm:$0xff]   ;;  %v1581_v11 = vld [vmem:[%s1936_s0 + $0x18] sm:$0xff]  }
   0x5   :  { %1496 = vmatprep.mubr.msk.bf16.mxu0 %vm286_vm0, %v1575_v3  ;;  %1528 = vmatprep.mubr.msk.bf16.mxu1 %vm286_vm0, %v1576_v4  ;;  %v1582_v12 = vld [vmem:[%s1936_s0 + $0x98] sm:$0xff]   ;;  %v1583_v13 = vld [vmem:[%s1936_s0 + $0x20] sm:$0xff]   ;;  %v1585_v15 = vld [vmem:[%s1936_s0 + $0x28] sm:$0xff]  }
   0x6   :  { %v1584_v14 = vld [vmem:[%s1936_s0 + $0xa0] sm:$0xff]   ;;  %v1586_v16 = vld [vmem:[%s1936_s0 + $0xa8] sm:$0xff]   ;;  %v1587_v17 = vld [vmem:[%s1936_s0 + $0x30] sm:$0xff]  }
   0x7   :  { %1489 = vmatpush3.bf16.msra.mxu0 %v1571_v1  ;;  %1566 = vmatpush3.bf16.msra.mxu1 %v1571_v1  ;;  %v1588_v18 = vld [vmem:[%s1936_s0 + $0xb0] sm:$0xff]   ;;  %v1589_v19 = vld [vmem:[%s1936_s0 + $0x38] sm:$0xff]   ;;  %v1591_v21 = vld [vmem:[%s1936_s0 + $0x40] sm:$0xff]  }
   0x8   :  { %1490 = vmatprep.subr.bf16.mxu0 %v1572_v2  ;;  %1562 = vmatprep.subr.bf16.mxu1 %v1572_v2  ;;  %v1590_v20 = vld [vmem:[%s1936_s0 + $0xb8] sm:$0xff]   ;;  %v1592_v22 = vld [vmem:[%s1936_s0 + $0xc0] sm:$0xff]   ;;  %v1593_v23 = vld [vmem:[%s1936_s0 + $0x48] sm:$0xff]  }
   0x9   :  { %v1594_v24 = vld [vmem:[%s1936_s0 + $0xc8] sm:$0xff]   ;;  %v1595_v25 = vld [vmem:[%s1936_s0 + $0x50] sm:$0xff]   ;;  %v1597_v27 = vld [vmem:[%s1936_s0 + $0x58] sm:$0xff]  }
   0xa   :  { %v1596_v26 = vld [vmem:[%s1936_s0 + $0xd0] sm:$0xff]   ;;  %v1598_v28 = vld [vmem:[%s1936_s0 + $0xd8] sm:$0xff]   ;;  %v1599_v29 = vld [vmem:[%s1936_s0 + $0x60] sm:$0xff]  }
   0xb   :  { %1491 = vmatpush3.bf16.msra.mxu0 %v1572_v2  ;;  %1567 = vmatpush3.bf16.msra.mxu1 %v1572_v2  ;;  %v1600_v30 = vld [vmem:[%s1936_s0 + $0xe0] sm:$0xff]   ;;  %v1601_v31 = vld [vmem:[%s1936_s0 + $0x68] sm:$0xff]   ;;  %v1603_v33 = vld [vmem:[%s1936_s0 + $0x70] sm:$0xff]  }
   0xc   :  { %1492 = vmatprep.subr.bf16.mxu0 %v1573_v5  ;;  %1563 = vmatprep.subr.bf16.mxu1 %v1573_v5  ;;  %v1602_v32 = vld [vmem:[%s1936_s0 + $0xe8] sm:$0xff]   ;;  %v1604_v34 = vld [vmem:[%s1936_s0 + $0xf0] sm:$0xff]   ;;  %v1605_v35 = vld [vmem:[%s1936_s0 + $0x78] sm:$0xff]  }
   0xd   :  { %v1606_v36 = vld [vmem:[%s1936_s0 + $0xf8] sm:$0xff]   ;;  %v1773_v37 = vld [vmem:[%s1937_s2] ss:$0 sm:$0xff] }
   0xf   :  { %1493 = vmatpush3.bf16.msra.mxu0 %v1573_v5  ;;  %1568 = vmatpush3.bf16.msra.mxu1 %v1573_v5 }
  0x10   :  { %1494 = vmatprep.subr.bf16.mxu0 %v1574_v6  ;;  %1564 = vmatprep.subr.bf16.mxu1 %v1574_v6 }
  0x13   :  { %1495 = vmatpush3.bf16.msra.mxu0 %v1574_v6  ;;  %1569 = vmatpush3.bf16.msra.mxu1 %v1574_v6 }
  0x16   :  { %1497 = vmatmul.mubr.msk.bf16.vlgmr.msra.gmra.mrb[0].mxu0 %vm286_vm0, %v1577_v7  ;;  %1529 = vmatmul.mubr.msk.bf16.vlgmr.msra.gmra.mrb[0].mxu1 %vm286_vm0, %v1578_v8 }
  0x17   :  { %1500 = vmatprep.mubr.msk.bf16.mxu0 %vm286_vm0, %v1579_v9  ;;  %1532 = vmatprep.mubr.msk.bf16.mxu1 %vm286_vm0, %v1580_v10 }
  0x1e   :  { %1501 = vmatmul.mubr.msk.bf16.gmra.mrb[4].mxu0 %vm286_vm0, %v1581_v11  ;;  %1533 = vmatmul.mubr.msk.bf16.gmra.mrb[4].mxu1 %vm286_vm0, %v1582_v12 }
  0x1f   :  { %1504 = vmatprep.mubr.msk.bf16.mxu0 %vm286_vm0, %v1583_v13  ;;  %1536 = vmatprep.mubr.msk.bf16.mxu1 %vm286_vm0, %v1584_v14 }
  0x26   :  { %1505 = vmatmul.mubr.msk.bf16.gmra.mrb[8].mxu0 %vm286_vm0, %v1585_v15  ;;  %1537 = vmatmul.mubr.msk.bf16.gmra.mrb[8].mxu1 %vm286_vm0, %v1586_v16 }
  0x27   :  { %1508 = vmatprep.mubr.msk.bf16.mxu0 %vm286_vm0, %v1587_v17  ;;  %1540 = vmatprep.mubr.msk.bf16.mxu1 %vm286_vm0, %v1588_v18 }
  0x2e   :  { %1509 = vmatmul.mubr.msk.bf16.gmra.mrb[12].mxu0 %vm286_vm0, %v1589_v19  ;;  %1541 = vmatmul.mubr.msk.bf16.gmra.mrb[12].mxu1 %vm286_vm0, %v1590_v20 }
  0x2f   :  { %1512 = vmatprep.mubr.msk.bf16.mxu0 %vm286_vm0, %v1591_v21  ;;  %1544 = vmatprep.mubr.msk.bf16.mxu1 %vm286_vm0, %v1592_v22 }
  0x36   :  { %1513 = vmatmul.mubr.msk.bf16.gmra.mrb[16].mxu0 %vm286_vm0, %v1593_v23  ;;  %1545 = vmatmul.mubr.msk.bf16.gmra.mrb[16].mxu1 %vm286_vm0, %v1594_v24 }
  0x37   :  { %1516 = vmatprep.mubr.msk.bf16.mxu0 %vm286_vm0, %v1595_v25  ;;  %1548 = vmatprep.mubr.msk.bf16.mxu1 %vm286_vm0, %v1596_v26 }
  0x3e   :  { %1517 = vmatmul.mubr.msk.bf16.gmra.mrb[20].mxu0 %vm286_vm0, %v1597_v27  ;;  %1549 = vmatmul.mubr.msk.bf16.gmra.mrb[20].mxu1 %vm286_vm0, %v1598_v28 }
  0x3f   :  { %1520 = vmatprep.mubr.msk.bf16.mxu0 %vm286_vm0, %v1599_v29  ;;  %1552 = vmatprep.mubr.msk.bf16.mxu1 %vm286_vm0, %v1600_v30 }
  0x46   :  { %1521 = vmatmul.mubr.msk.bf16.gmra.mrb[24].mxu0 %vm286_vm0, %v1601_v31  ;;  %1553 = vmatmul.mubr.msk.bf16.gmra.mrb[24].mxu1 %vm286_vm0, %v1602_v32 }
  0x47   :  { %1524 = vmatprep.mubr.msk.bf16.mxu0 %vm286_vm0, %v1603_v33  ;;  %1556 = vmatprep.mubr.msk.bf16.mxu1 %vm286_vm0, %v1604_v34 }
  0x4e   :  { %1525 = vmatmul.mubr.msk.bf16.gmra.mrb[28].mxu0 %vm286_vm0, %v1605_v35  ;;  %1557 = vmatmul.mubr.msk.bf16.gmra.mrb[28].mxu1 %vm286_vm0, %v1606_v36 }
  0xe9   :  { %v1498_v38 = vpop.f32.mrb[0].mxu0  ;;  %v1530_v39 = vpop.f32.mrb[0].mxu1 }
  0xea   :  { %v426_v40 = vadd.f32 %v1498_v38, %v1773_v37  ;;  %v554_v41 = vadd.f32 %v1530_v39, %v1773_v37  ;;  %v417_v42 = vpop.f32.mrb[1].mxu0  ;;  %v545_v43 = vpop.f32.mrb[1].mxu1 }
  0xeb   :  { %v418_v44 = vadd.f32 %v1773_v37, %v417_v42  ;;  %v546_v45 = vadd.f32 %v1773_v37, %v545_v43  ;;  %v1499_v46 = vpop.f32.mrb[2].mxu0  ;;  %v1531_v47 = vpop.f32.mrb[2].mxu1 }
  0xec   :  { %v429_v48 = vadd.f32 %v1499_v46, %v1773_v37  ;;  %v557_v49 = vadd.f32 %v1531_v47, %v1773_v37  ;;  %v420_v50 = vpop.f32.mrb[3].mxu0  ;;  %v548_v51 = vpop.f32.mrb[3].mxu1  ;;  %v674_v54 = vmax.f32 %v426_v40, 0.0  ;;  %v706_v55 = vmax.f32 %v554_v41, 0.0 }
  0xed   :  { %v421_v52 = vadd.f32 %v1773_v37, %v420_v50  ;;  %v549_v53 = vadd.f32 %v1773_v37, %v548_v51  ;;  %v672_v58 = vmax.f32 %v418_v44, 0.0  ;;  %v704_v59 = vmax.f32 %v546_v45, 0.0 }
  0xee   :  { %v675_v56 = vmax.f32 %v429_v48, 0.0  ;;  %v707_v57 = vmax.f32 %v557_v49, 0.0 }
  0xef   :  { %v673_v60 = vmax.f32 %v421_v52, 0.0  ;;  %v705_v61 = vmax.f32 %v549_v53, 0.0 }
  0xf0   :  { %v1266_v62 = vpack.c.bf16 %v675_v56, %v674_v54  ;;  %v1346_v63 = vpack.c.bf16 %v707_v57, %v706_v55 }
  0xf1   :  { %v1261_v0 = vpack.c.bf16 %v673_v60, %v672_v58  ;;  %v1341_v1 = vpack.c.bf16 %v705_v61, %v704_v59  ;;  %v1502_v2 = vpop.f32.mrb[4].mxu0  ;;  %v1534_v3 = vpop.f32.mrb[4].mxu1 }
  0xf2   :  { %1418 = vst [vmem:[%s1938_s3 + $0x8] sm:$0xff] %v1266_v62   ;;  %1434 = vst [vmem:[%s1938_s3 + $0x88] sm:$0xff] %v1346_v63   ;;  %v442_v4 = vadd.f32 %v1502_v2, %v1773_v37  ;;  %v570_v5 = vadd.f32 %v1534_v3, %v1773_v37  ;;  %v433_v6 = vpop.f32.mrb[5].mxu0  ;;  %v561_v7 = vpop.f32.mrb[5].mxu1 }
  0xf3   :  { %1262 = vst [vmem:[%s1938_s3] sm:$0xff] %v1261_v0   ;;  %1433 = vst [vmem:[%s1938_s3 + $0x80] sm:$0xff] %v1341_v1   ;;  %v434_v8 = vadd.f32 %v1773_v37, %v433_v6  ;;  %v562_v9 = vadd.f32 %v1773_v37, %v561_v7  ;;  %v1503_v10 = vpop.f32.mrb[6].mxu0  ;;  %v1535_v11 = vpop.f32.mrb[6].mxu1 }
  0xf4   :  { %v445_v12 = vadd.f32 %v1503_v10, %v1773_v37  ;;  %v573_v13 = vadd.f32 %v1535_v11, %v1773_v37  ;;  %v436_v14 = vpop.f32.mrb[7].mxu0  ;;  %v564_v15 = vpop.f32.mrb[7].mxu1  ;;  %v678_v18 = vmax.f32 %v442_v4, 0.0  ;;  %v710_v19 = vmax.f32 %v570_v5, 0.0 }
  0xf5   :  { %v437_v16 = vadd.f32 %v1773_v37, %v436_v14  ;;  %v565_v17 = vadd.f32 %v1773_v37, %v564_v15  ;;  %v676_v22 = vmax.f32 %v434_v8, 0.0  ;;  %v708_v23 = vmax.f32 %v562_v9, 0.0 }
  0xf6   :  { %v679_v20 = vmax.f32 %v445_v12, 0.0  ;;  %v711_v21 = vmax.f32 %v573_v13, 0.0 }
  0xf7   :  { %v677_v24 = vmax.f32 %v437_v16, 0.0  ;;  %v709_v25 = vmax.f32 %v565_v17, 0.0 }
  0xf8   :  { %v1276_v26 = vpack.c.bf16 %v679_v20, %v678_v18  ;;  %v1356_v27 = vpack.c.bf16 %v711_v21, %v710_v19 }
  0xf9   :  { %v1271_v28 = vpack.c.bf16 %v677_v24, %v676_v22  ;;  %v1351_v29 = vpack.c.bf16 %v709_v25, %v708_v23  ;;  %v1506_v30 = vpop.f32.mrb[8].mxu0  ;;  %v1538_v31 = vpop.f32.mrb[8].mxu1 }
  0xfa   :  { %1420 = vst [vmem:[%s1938_s3 + $0x18] sm:$0xff] %v1276_v26   ;;  %1436 = vst [vmem:[%s1938_s3 + $0x98] sm:$0xff] %v1356_v27   ;;  %v458_v32 = vadd.f32 %v1506_v30, %v1773_v37  ;;  %v586_v33 = vadd.f32 %v1538_v31, %v1773_v37  ;;  %v449_v34 = vpop.f32.mrb[9].mxu0  ;;  %v577_v35 = vpop.f32.mrb[9].mxu1 }
  0xfb   :  { %1419 = vst [vmem:[%s1938_s3 + $0x10] sm:$0xff] %v1271_v28   ;;  %1435 = vst [vmem:[%s1938_s3 + $0x90] sm:$0xff] %v1351_v29   ;;  %v450_v36 = vadd.f32 %v1773_v37, %v449_v34  ;;  %v578_v38 = vadd.f32 %v1773_v37, %v577_v35  ;;  %v1507_v39 = vpop.f32.mrb[10].mxu0  ;;  %v1539_v40 = vpop.f32.mrb[10].mxu1 }
  0xfc   :  { %v461_v41 = vadd.f32 %v1507_v39, %v1773_v37  ;;  %v589_v42 = vadd.f32 %v1539_v40, %v1773_v37  ;;  %v452_v43 = vpop.f32.mrb[11].mxu0  ;;  %v580_v44 = vpop.f32.mrb[11].mxu1  ;;  %v682_v47 = vmax.f32 %v458_v32, 0.0  ;;  %v714_v48 = vmax.f32 %v586_v33, 0.0 }
  0xfd   :  { %v453_v45 = vadd.f32 %v1773_v37, %v452_v43  ;;  %v581_v46 = vadd.f32 %v1773_v37, %v580_v44  ;;  %v680_v51 = vmax.f32 %v450_v36, 0.0  ;;  %v712_v52 = vmax.f32 %v578_v38, 0.0 }
  0xfe   :  { %v683_v49 = vmax.f32 %v461_v41, 0.0  ;;  %v715_v50 = vmax.f32 %v589_v42, 0.0 }
  0xff   :  { %v681_v53 = vmax.f32 %v453_v45, 0.0  ;;  %v713_v54 = vmax.f32 %v581_v46, 0.0 }
 0x100   :  { %v1286_v55 = vpack.c.bf16 %v683_v49, %v682_v47  ;;  %v1366_v56 = vpack.c.bf16 %v715_v50, %v714_v48 }
 0x101   :  { %v1281_v57 = vpack.c.bf16 %v681_v53, %v680_v51  ;;  %v1361_v58 = vpack.c.bf16 %v713_v54, %v712_v52  ;;  %v1510_v59 = vpop.f32.mrb[12].mxu0  ;;  %v1542_v60 = vpop.f32.mrb[12].mxu1 }
 0x102   :  { %1422 = vst [vmem:[%s1938_s3 + $0x28] sm:$0xff] %v1286_v55   ;;  %1438 = vst [vmem:[%s1938_s3 + $0xa8] sm:$0xff] %v1366_v56   ;;  %v474_v61 = vadd.f32 %v1510_v59, %v1773_v37  ;;  %v602_v62 = vadd.f32 %v1542_v60, %v1773_v37  ;;  %v465_v63 = vpop.f32.mrb[13].mxu0  ;;  %v593_v0 = vpop.f32.mrb[13].mxu1 }
 0x103   :  { %1421 = vst [vmem:[%s1938_s3 + $0x20] sm:$0xff] %v1281_v57   ;;  %1437 = vst [vmem:[%s1938_s3 + $0xa0] sm:$0xff] %v1361_v58   ;;  %v466_v1 = vadd.f32 %v1773_v37, %v465_v63  ;;  %v594_v2 = vadd.f32 %v1773_v37, %v593_v0  ;;  %v1511_v3 = vpop.f32.mrb[14].mxu0  ;;  %v1543_v4 = vpop.f32.mrb[14].mxu1 }
 0x104   :  { %v477_v5 = vadd.f32 %v1511_v3, %v1773_v37  ;;  %v605_v6 = vadd.f32 %v1543_v4, %v1773_v37  ;;  %v468_v7 = vpop.f32.mrb[15].mxu0  ;;  %v596_v8 = vpop.f32.mrb[15].mxu1  ;;  %v686_v11 = vmax.f32 %v474_v61, 0.0  ;;  %v718_v12 = vmax.f32 %v602_v62, 0.0 }
 0x105   :  { %v469_v9 = vadd.f32 %v1773_v37, %v468_v7  ;;  %v597_v10 = vadd.f32 %v1773_v37, %v596_v8  ;;  %v684_v15 = vmax.f32 %v466_v1, 0.0  ;;  %v716_v16 = vmax.f32 %v594_v2, 0.0 }
 0x106   :  { %v687_v13 = vmax.f32 %v477_v5, 0.0  ;;  %v719_v14 = vmax.f32 %v605_v6, 0.0 }
 0x107   :  { %v685_v17 = vmax.f32 %v469_v9, 0.0  ;;  %v717_v18 = vmax.f32 %v597_v10, 0.0 }
 0x108   :  { %v1296_v19 = vpack.c.bf16 %v687_v13, %v686_v11  ;;  %v1376_v20 = vpack.c.bf16 %v719_v14, %v718_v12 }
 0x109   :  { %v1291_v21 = vpack.c.bf16 %v685_v17, %v684_v15  ;;  %v1371_v22 = vpack.c.bf16 %v717_v18, %v716_v16  ;;  %v1514_v23 = vpop.f32.mrb[16].mxu0  ;;  %v1546_v24 = vpop.f32.mrb[16].mxu1 }
 0x10a   :  { %1424 = vst [vmem:[%s1938_s3 + $0x38] sm:$0xff] %v1296_v19   ;;  %1440 = vst [vmem:[%s1938_s3 + $0xb8] sm:$0xff] %v1376_v20   ;;  %v490_v25 = vadd.f32 %v1514_v23, %v1773_v37  ;;  %v618_v26 = vadd.f32 %v1546_v24, %v1773_v37  ;;  %v481_v27 = vpop.f32.mrb[17].mxu0  ;;  %v609_v28 = vpop.f32.mrb[17].mxu1 }
 0x10b   :  { %1423 = vst [vmem:[%s1938_s3 + $0x30] sm:$0xff] %v1291_v21   ;;  %1439 = vst [vmem:[%s1938_s3 + $0xb0] sm:$0xff] %v1371_v22   ;;  %v482_v29 = vadd.f32 %v1773_v37, %v481_v27  ;;  %v610_v30 = vadd.f32 %v1773_v37, %v609_v28  ;;  %v1515_v31 = vpop.f32.mrb[18].mxu0  ;;  %v1547_v32 = vpop.f32.mrb[18].mxu1 }
 0x10c   :  { %v493_v33 = vadd.f32 %v1515_v31, %v1773_v37  ;;  %v621_v34 = vadd.f32 %v1547_v32, %v1773_v37  ;;  %v484_v35 = vpop.f32.mrb[19].mxu0  ;;  %v612_v36 = vpop.f32.mrb[19].mxu1  ;;  %v690_v40 = vmax.f32 %v490_v25, 0.0  ;;  %v722_v41 = vmax.f32 %v618_v26, 0.0 }
 0x10d   :  { %v485_v38 = vadd.f32 %v1773_v37, %v484_v35  ;;  %v613_v39 = vadd.f32 %v1773_v37, %v612_v36  ;;  %v688_v44 = vmax.f32 %v482_v29, 0.0  ;;  %v720_v45 = vmax.f32 %v610_v30, 0.0 }
 0x10e   :  { %v691_v42 = vmax.f32 %v493_v33, 0.0  ;;  %v723_v43 = vmax.f32 %v621_v34, 0.0 }
 0x10f   :  { %v689_v46 = vmax.f32 %v485_v38, 0.0  ;;  %v721_v47 = vmax.f32 %v613_v39, 0.0 }
 0x110   :  { %v1306_v48 = vpack.c.bf16 %v691_v42, %v690_v40  ;;  %v1386_v49 = vpack.c.bf16 %v723_v43, %v722_v41 }
 0x111   :  { %v1301_v50 = vpack.c.bf16 %v689_v46, %v688_v44  ;;  %v1381_v51 = vpack.c.bf16 %v721_v47, %v720_v45  ;;  %v1518_v52 = vpop.f32.mrb[20].mxu0  ;;  %v1550_v53 = vpop.f32.mrb[20].mxu1 }
 0x112   :  { %1426 = vst [vmem:[%s1938_s3 + $0x48] sm:$0xff] %v1306_v48   ;;  %1442 = vst [vmem:[%s1938_s3 + $0xc8] sm:$0xff] %v1386_v49   ;;  %v506_v54 = vadd.f32 %v1518_v52, %v1773_v37  ;;  %v634_v55 = vadd.f32 %v1550_v53, %v1773_v37  ;;  %v497_v56 = vpop.f32.mrb[21].mxu0  ;;  %v625_v57 = vpop.f32.mrb[21].mxu1 }
 0x113   :  { %1425 = vst [vmem:[%s1938_s3 + $0x40] sm:$0xff] %v1301_v50   ;;  %1441 = vst [vmem:[%s1938_s3 + $0xc0] sm:$0xff] %v1381_v51   ;;  %v498_v58 = vadd.f32 %v1773_v37, %v497_v56  ;;  %v626_v59 = vadd.f32 %v1773_v37, %v625_v57  ;;  %v1519_v60 = vpop.f32.mrb[22].mxu0  ;;  %v1551_v61 = vpop.f32.mrb[22].mxu1 }
 0x114   :  { %v509_v62 = vadd.f32 %v1519_v60, %v1773_v37  ;;  %v637_v63 = vadd.f32 %v1551_v61, %v1773_v37  ;;  %v500_v0 = vpop.f32.mrb[23].mxu0  ;;  %v628_v1 = vpop.f32.mrb[23].mxu1  ;;  %v694_v4 = vmax.f32 %v506_v54, 0.0  ;;  %v726_v5 = vmax.f32 %v634_v55, 0.0 }
 0x115   :  { %v501_v2 = vadd.f32 %v1773_v37, %v500_v0  ;;  %v629_v3 = vadd.f32 %v1773_v37, %v628_v1  ;;  %v692_v8 = vmax.f32 %v498_v58, 0.0  ;;  %v724_v9 = vmax.f32 %v626_v59, 0.0 }
 0x116   :  { %v695_v6 = vmax.f32 %v509_v62, 0.0  ;;  %v727_v7 = vmax.f32 %v637_v63, 0.0 }
 0x117   :  { %v693_v10 = vmax.f32 %v501_v2, 0.0  ;;  %v725_v11 = vmax.f32 %v629_v3, 0.0 }
 0x118   :  { %v1316_v12 = vpack.c.bf16 %v695_v6, %v694_v4  ;;  %v1396_v13 = vpack.c.bf16 %v727_v7, %v726_v5 }
 0x119   :  { %v1311_v14 = vpack.c.bf16 %v693_v10, %v692_v8  ;;  %v1391_v15 = vpack.c.bf16 %v725_v11, %v724_v9  ;;  %v1522_v16 = vpop.f32.mrb[24].mxu0  ;;  %v1554_v17 = vpop.f32.mrb[24].mxu1 }
 0x11a   :  { %1428 = vst [vmem:[%s1938_s3 + $0x58] sm:$0xff] %v1316_v12   ;;  %1444 = vst [vmem:[%s1938_s3 + $0xd8] sm:$0xff] %v1396_v13   ;;  %v522_v18 = vadd.f32 %v1522_v16, %v1773_v37  ;;  %v650_v19 = vadd.f32 %v1554_v17, %v1773_v37  ;;  %v513_v20 = vpop.f32.mrb[25].mxu0  ;;  %v641_v21 = vpop.f32.mrb[25].mxu1 }
 0x11b   :  { %1427 = vst [vmem:[%s1938_s3 + $0x50] sm:$0xff] %v1311_v14   ;;  %1443 = vst [vmem:[%s1938_s3 + $0xd0] sm:$0xff] %v1391_v15   ;;  %v514_v22 = vadd.f32 %v1773_v37, %v513_v20  ;;  %v642_v23 = vadd.f32 %v1773_v37, %v641_v21  ;;  %v1523_v24 = vpop.f32.mrb[26].mxu0  ;;  %v1555_v25 = vpop.f32.mrb[26].mxu1 }
 0x11c   :  { %v525_v26 = vadd.f32 %v1523_v24, %v1773_v37  ;;  %v653_v27 = vadd.f32 %v1555_v25, %v1773_v37  ;;  %v516_v28 = vpop.f32.mrb[27].mxu0  ;;  %v644_v29 = vpop.f32.mrb[27].mxu1  ;;  %v698_v32 = vmax.f32 %v522_v18, 0.0  ;;  %v730_v33 = vmax.f32 %v650_v19, 0.0 }
 0x11d   :  { %v517_v30 = vadd.f32 %v1773_v37, %v516_v28  ;;  %v645_v31 = vadd.f32 %v1773_v37, %v644_v29  ;;  %v696_v36 = vmax.f32 %v514_v22, 0.0  ;;  %v728_v38 = vmax.f32 %v642_v23, 0.0 }
 0x11e   :  { %v699_v34 = vmax.f32 %v525_v26, 0.0  ;;  %v731_v35 = vmax.f32 %v653_v27, 0.0 }
 0x11f   :  { %v697_v39 = vmax.f32 %v517_v30, 0.0  ;;  %v729_v40 = vmax.f32 %v645_v31, 0.0 }
 0x120   :  { %v1326_v41 = vpack.c.bf16 %v699_v34, %v698_v32  ;;  %v1406_v42 = vpack.c.bf16 %v731_v35, %v730_v33 }
 0x121   :  { %v1321_v43 = vpack.c.bf16 %v697_v39, %v696_v36  ;;  %v1401_v44 = vpack.c.bf16 %v729_v40, %v728_v38  ;;  %v1526_v45 = vpop.f32.mrb[28].mxu0  ;;  %v1558_v46 = vpop.f32.mrb[28].mxu1 }
 0x122   :  { %1430 = vst [vmem:[%s1938_s3 + $0x68] sm:$0xff] %v1326_v41   ;;  %1446 = vst [vmem:[%s1938_s3 + $0xe8] sm:$0xff] %v1406_v42   ;;  %v538_v47 = vadd.f32 %v1526_v45, %v1773_v37  ;;  %v666_v48 = vadd.f32 %v1558_v46, %v1773_v37  ;;  %v529_v49 = vpop.f32.mrb[29].mxu0  ;;  %v657_v50 = vpop.f32.mrb[29].mxu1 }
 0x123   :  { %1429 = vst [vmem:[%s1938_s3 + $0x60] sm:$0xff] %v1321_v43   ;;  %1445 = vst [vmem:[%s1938_s3 + $0xe0] sm:$0xff] %v1401_v44   ;;  %v530_v51 = vadd.f32 %v1773_v37, %v529_v49  ;;  %v658_v52 = vadd.f32 %v1773_v37, %v657_v50  ;;  %v1527_v53 = vpop.f32.mrb[30].mxu0  ;;  %v1559_v54 = vpop.f32.mrb[30].mxu1 }
 0x124   :  { %v541_v55 = vadd.f32 %v1527_v53, %v1773_v37  ;;  %v669_v56 = vadd.f32 %v1559_v54, %v1773_v37  ;;  %v532_v57 = vpop.f32.mrb[31].mxu0  ;;  %v660_v58 = vpop.f32.mrb[31].mxu1  ;;  %v702_v61 = vmax.f32 %v538_v47, 0.0  ;;  %v734_v62 = vmax.f32 %v666_v48, 0.0 }
 0x125   :  { %v533_v59 = vadd.f32 %v1773_v37, %v532_v57  ;;  %v661_v60 = vadd.f32 %v1773_v37, %v660_v58  ;;  %v700_v1 = vmax.f32 %v530_v51, 0.0  ;;  %v732_v2 = vmax.f32 %v658_v52, 0.0 }
 0x126   :  { %v703_v63 = vmax.f32 %v541_v55, 0.0  ;;  %v735_v0 = vmax.f32 %v669_v56, 0.0 }
 0x127   :  { %v701_v3 = vmax.f32 %v533_v59, 0.0  ;;  %v733_v4 = vmax.f32 %v661_v60, 0.0 }
 0x128   :  { %v1336_v5 = vpack.c.bf16 %v703_v63, %v702_v61  ;;  %v1416_v6 = vpack.c.bf16 %v735_v0, %v734_v62 }
 0x129   :  { %v1331_v7 = vpack.c.bf16 %v701_v3, %v700_v1  ;;  %v1411_v8 = vpack.c.bf16 %v733_v4, %v732_v2 }
 0x12a   :  { %1432 = vst [vmem:[%s1938_s3 + $0x78] sm:$0xff] %v1336_v5   ;;  %1448 = vst [vmem:[%s1938_s3 + $0xf8] sm:$0xff] %v1416_v6  }
 0x12b   :  { %1431 = vst [vmem:[%s1938_s3 + $0x70] sm:$0xff] %v1331_v7   ;;  %1447 = vst [vmem:[%s1938_s3 + $0xf0] sm:$0xff] %v1411_v8  }

// kernel: _lambda_.35
= control target key start
LH: loop header
LB: loop body
LE: loop exit
PB: predicated region body
PF: predicated region fallthrough
CT: control target
= control target key end

     0   :  { %vm254_vm0 = vcmask 130048   ;;  %s1799_s1 = inlined_call_operand.vmem [shape: bf16[16,128], index: 1, kind: input, shape index: {}]   ;;  %s1800_s0 = inlined_call_operand.vmem [shape: bf16[512,16], index: 0, kind: input, shape index: {}]   ;;  %s1801_s2 = inlined_call_operand.vmem [shape: f32[1,128], index: 2, kind: input, shape index: {}]   ;;  %s1802_s3 = inlined_call_operand.vmem [shape: bf16[512,128], index: 3, kind: output, shape index: {}]  }
   0x1   :  { %v1450_v0 = vld [vmem:[%s1799_s1] sm:$0xff]   ;;  %v1453_v3 = vld [vmem:[%s1800_s0 + $0x8] sm:$0xff]   ;;  %v1455_v5 = vld [vmem:[%s1800_s0 + $0x10] sm:$0xff]  }
   0x2   :  { %v1451_v1 = vld [vmem:[%s1800_s0] sm:$0xff]   ;;  %1382 = vmatprep.subr.bf16.mxu0 %v1450_v0  ;;  %1448 = vmatprep.subr.bf16.mxu1 %v1450_v0  ;;  %v1454_v4 = vld [vmem:[%s1800_s0 + $0x88] sm:$0xff]   ;;  %v1456_v6 = vld [vmem:[%s1800_s0 + $0x90] sm:$0xff]  }
   0x3   :  { %v1452_v2 = vld [vmem:[%s1800_s0 + $0x80] sm:$0xff]   ;;  %1383 = vmatpush3.bf16.msra.mxu0 %v1450_v0  ;;  %1449 = vmatpush3.bf16.msra.mxu1 %v1450_v0  ;;  %v1457_v7 = vld [vmem:[%s1800_s0 + $0x18] sm:$0xff]   ;;  %v1461_v11 = vld [vmem:[%s1800_s0 + $0x28] sm:$0xff]  }
   0x4   :  { %1384 = vmatprep.mubr.msk.bf16.mxu0 %vm254_vm0, %v1451_v1  ;;  %1416 = vmatprep.mubr.msk.bf16.mxu1 %vm254_vm0, %v1452_v2  ;;  %v1458_v8 = vld [vmem:[%s1800_s0 + $0x98] sm:$0xff]   ;;  %v1459_v9 = vld [vmem:[%s1800_s0 + $0x20] sm:$0xff]   ;;  %v1462_v12 = vld [vmem:[%s1800_s0 + $0xa8] sm:$0xff]  }
   0x5   :  { %v1460_v10 = vld [vmem:[%s1800_s0 + $0xa0] sm:$0xff]   ;;  %v1463_v13 = vld [vmem:[%s1800_s0 + $0x30] sm:$0xff]   ;;  %v1465_v15 = vld [vmem:[%s1800_s0 + $0x38] sm:$0xff]  }
   0x6   :  { %1385 = vmatmul.mubr.msk.bf16.vlgmr.msra.gmra.mrb[0].mxu0 %vm254_vm0, %v1453_v3  ;;  %1417 = vmatmul.mubr.msk.bf16.vlgmr.msra.gmra.mrb[0].mxu1 %vm254_vm0, %v1454_v4  ;;  %v1464_v14 = vld [vmem:[%s1800_s0 + $0xb0] sm:$0xff]   ;;  %v1466_v16 = vld [vmem:[%s1800_s0 + $0xb8] sm:$0xff]   ;;  %v1467_v17 = vld [vmem:[%s1800_s0 + $0x40] sm:$0xff]  }
   0x7   :  { %1388 = vmatprep.mubr.msk.bf16.mxu0 %vm254_vm0, %v1455_v5  ;;  %1420 = vmatprep.mubr.msk.bf16.mxu1 %vm254_vm0, %v1456_v6  ;;  %v1468_v18 = vld [vmem:[%s1800_s0 + $0xc0] sm:$0xff]   ;;  %v1469_v19 = vld [vmem:[%s1800_s0 + $0x48] sm:$0xff]   ;;  %v1471_v21 = vld [vmem:[%s1800_s0 + $0x50] sm:$0xff]  }
   0x8   :  { %v1470_v20 = vld [vmem:[%s1800_s0 + $0xc8] sm:$0xff]   ;;  %v1472_v22 = vld [vmem:[%s1800_s0 + $0xd0] sm:$0xff]   ;;  %v1473_v23 = vld [vmem:[%s1800_s0 + $0x58] sm:$0xff]  }
   0x9   :  { %v1474_v24 = vld [vmem:[%s1800_s0 + $0xd8] sm:$0xff]   ;;  %v1475_v25 = vld [vmem:[%s1800_s0 + $0x60] sm:$0xff]   ;;  %v1477_v27 = vld [vmem:[%s1800_s0 + $0x68] sm:$0xff]  }
   0xa   :  { %v1476_v26 = vld [vmem:[%s1800_s0 + $0xe0] sm:$0xff]   ;;  %v1478_v28 = vld [vmem:[%s1800_s0 + $0xe8] sm:$0xff]   ;;  %v1479_v29 = vld [vmem:[%s1800_s0 + $0x70] sm:$0xff]  }
   0xb   :  { %v1480_v30 = vld [vmem:[%s1800_s0 + $0xf0] sm:$0xff]   ;;  %v1481_v31 = vld [vmem:[%s1800_s0 + $0x78] sm:$0xff]   ;;  %v1637_v34 = vld [vmem:[%s1801_s2] ss:$0 sm:$0xff] }
   0xc   :  { %v1482_v32 = vld [vmem:[%s1800_s0 + $0xf8] sm:$0xff]  }
   0xe   :  { %1389 = vmatmul.mubr.msk.bf16.gmra.mrb[4].mxu0 %vm254_vm0, %v1457_v7  ;;  %1421 = vmatmul.mubr.msk.bf16.gmra.mrb[4].mxu1 %vm254_vm0, %v1458_v8 }
   0xf   :  { %1392 = vmatprep.mubr.msk.bf16.mxu0 %vm254_vm0, %v1459_v9  ;;  %1424 = vmatprep.mubr.msk.bf16.mxu1 %vm254_vm0, %v1460_v10 }
  0x16   :  { %1393 = vmatmul.mubr.msk.bf16.gmra.mrb[8].mxu0 %vm254_vm0, %v1461_v11  ;;  %1425 = vmatmul.mubr.msk.bf16.gmra.mrb[8].mxu1 %vm254_vm0, %v1462_v12 }
  0x17   :  { %1396 = vmatprep.mubr.msk.bf16.mxu0 %vm254_vm0, %v1463_v13  ;;  %1428 = vmatprep.mubr.msk.bf16.mxu1 %vm254_vm0, %v1464_v14 }
  0x1e   :  { %1397 = vmatmul.mubr.msk.bf16.gmra.mrb[12].mxu0 %vm254_vm0, %v1465_v15  ;;  %1429 = vmatmul.mubr.msk.bf16.gmra.mrb[12].mxu1 %vm254_vm0, %v1466_v16 }
  0x1f   :  { %1400 = vmatprep.mubr.msk.bf16.mxu0 %vm254_vm0, %v1467_v17  ;;  %1432 = vmatprep.mubr.msk.bf16.mxu1 %vm254_vm0, %v1468_v18 }
  0x26   :  { %1401 = vmatmul.mubr.msk.bf16.gmra.mrb[16].mxu0 %vm254_vm0, %v1469_v19  ;;  %1433 = vmatmul.mubr.msk.bf16.gmra.mrb[16].mxu1 %vm254_vm0, %v1470_v20 }
  0x27   :  { %1404 = vmatprep.mubr.msk.bf16.mxu0 %vm254_vm0, %v1471_v21  ;;  %1436 = vmatprep.mubr.msk.bf16.mxu1 %vm254_vm0, %v1472_v22 }
  0x2e   :  { %1405 = vmatmul.mubr.msk.bf16.gmra.mrb[20].mxu0 %vm254_vm0, %v1473_v23  ;;  %1437 = vmatmul.mubr.msk.bf16.gmra.mrb[20].mxu1 %vm254_vm0, %v1474_v24 }
  0x2f   :  { %1408 = vmatprep.mubr.msk.bf16.mxu0 %vm254_vm0, %v1475_v25  ;;  %1440 = vmatprep.mubr.msk.bf16.mxu1 %vm254_vm0, %v1476_v26 }
  0x36   :  { %1409 = vmatmul.mubr.msk.bf16.gmra.mrb[24].mxu0 %vm254_vm0, %v1477_v27  ;;  %1441 = vmatmul.mubr.msk.bf16.gmra.mrb[24].mxu1 %vm254_vm0, %v1478_v28 }
  0x37   :  { %1412 = vmatprep.mubr.msk.bf16.mxu0 %vm254_vm0, %v1479_v29  ;;  %1444 = vmatprep.mubr.msk.bf16.mxu1 %vm254_vm0, %v1480_v30 }
  0x3e   :  { %1413 = vmatmul.mubr.msk.bf16.gmra.mrb[28].mxu0 %vm254_vm0, %v1481_v31  ;;  %1445 = vmatmul.mubr.msk.bf16.gmra.mrb[28].mxu1 %vm254_vm0, %v1482_v32 }
  0xd9   :  { %v1386_v33 = vpop.f32.mrb[0].mxu0  ;;  %v1418_v35 = vpop.f32.mrb[0].mxu1 }
  0xda   :  { %v385_v36 = vpop.f32.mrb[1].mxu0  ;;  %v513_v37 = vpop.f32.mrb[1].mxu1  ;;  %v394_v40 = vadd.f32 %v1386_v33, %v1637_v34  ;;  %v522_v41 = vadd.f32 %v1418_v35, %v1637_v34 }
  0xdb   :  { %v1387_v38 = vpop.f32.mrb[2].mxu0  ;;  %v1419_v39 = vpop.f32.mrb[2].mxu1  ;;  %v386_v46 = vadd.f32 %v1637_v34, %v385_v36  ;;  %v514_v47 = vadd.f32 %v1637_v34, %v513_v37 }
  0xdc   :  { %v397_v42 = vadd.f32 %v1387_v38, %v1637_v34  ;;  %v525_v43 = vadd.f32 %v1419_v39, %v1637_v34  ;;  %v388_v44 = vpop.f32.mrb[3].mxu0  ;;  %v516_v45 = vpop.f32.mrb[3].mxu1 }
  0xdd   :  { %v389_v48 = vadd.f32 %v1637_v34, %v388_v44  ;;  %v517_v49 = vadd.f32 %v1637_v34, %v516_v45 }
  0xde   :  { %v1166_v50 = vpack.c.bf16 %v397_v42, %v394_v40  ;;  %v1246_v51 = vpack.c.bf16 %v525_v43, %v522_v41 }
  0xdf   :  { %v1161_v52 = vpack.c.bf16 %v389_v48, %v386_v46  ;;  %v1241_v53 = vpack.c.bf16 %v517_v49, %v514_v47 }
  0xe0   :  { %1318 = vst [vmem:[%s1802_s3 + $0x8] sm:$0xff] %v1166_v50   ;;  %1334 = vst [vmem:[%s1802_s3 + $0x88] sm:$0xff] %v1246_v51  }
  0xe1   :  { %1162 = vst [vmem:[%s1802_s3] sm:$0xff] %v1161_v52   ;;  %1333 = vst [vmem:[%s1802_s3 + $0x80] sm:$0xff] %v1241_v53   ;;  %v1390_v54 = vpop.f32.mrb[4].mxu0  ;;  %v1422_v55 = vpop.f32.mrb[4].mxu1 }
  0xe2   :  { %v401_v56 = vpop.f32.mrb[5].mxu0  ;;  %v529_v57 = vpop.f32.mrb[5].mxu1  ;;  %v410_v60 = vadd.f32 %v1390_v54, %v1637_v34  ;;  %v538_v61 = vadd.f32 %v1422_v55, %v1637_v34 }
  0xe3   :  { %v1391_v58 = vpop.f32.mrb[6].mxu0  ;;  %v1423_v59 = vpop.f32.mrb[6].mxu1  ;;  %v402_v2 = vadd.f32 %v1637_v34, %v401_v56  ;;  %v530_v3 = vadd.f32 %v1637_v34, %v529_v57 }
  0xe4   :  { %v413_v62 = vadd.f32 %v1391_v58, %v1637_v34  ;;  %v541_v63 = vadd.f32 %v1423_v59, %v1637_v34  ;;  %v404_v0 = vpop.f32.mrb[7].mxu0  ;;  %v532_v1 = vpop.f32.mrb[7].mxu1 }
  0xe5   :  { %v405_v4 = vadd.f32 %v1637_v34, %v404_v0  ;;  %v533_v5 = vadd.f32 %v1637_v34, %v532_v1 }
  0xe6   :  { %v1176_v6 = vpack.c.bf16 %v413_v62, %v410_v60  ;;  %v1256_v7 = vpack.c.bf16 %v541_v63, %v538_v61 }
  0xe7   :  { %v1171_v8 = vpack.c.bf16 %v405_v4, %v402_v2  ;;  %v1251_v9 = vpack.c.bf16 %v533_v5, %v530_v3 }
  0xe8   :  { %1320 = vst [vmem:[%s1802_s3 + $0x18] sm:$0xff] %v1176_v6   ;;  %1336 = vst [vmem:[%s1802_s3 + $0x98] sm:$0xff] %v1256_v7  }
  0xe9   :  { %1319 = vst [vmem:[%s1802_s3 + $0x10] sm:$0xff] %v1171_v8   ;;  %1335 = vst [vmem:[%s1802_s3 + $0x90] sm:$0xff] %v1251_v9   ;;  %v1394_v10 = vpop.f32.mrb[8].mxu0  ;;  %v1426_v11 = vpop.f32.mrb[8].mxu1 }
  0xea   :  { %v417_v12 = vpop.f32.mrb[9].mxu0  ;;  %v545_v13 = vpop.f32.mrb[9].mxu1  ;;  %v426_v16 = vadd.f32 %v1394_v10, %v1637_v34  ;;  %v554_v17 = vadd.f32 %v1426_v11, %v1637_v34 }
  0xeb   :  { %v1395_v14 = vpop.f32.mrb[10].mxu0  ;;  %v1427_v15 = vpop.f32.mrb[10].mxu1  ;;  %v418_v22 = vadd.f32 %v1637_v34, %v417_v12  ;;  %v546_v23 = vadd.f32 %v1637_v34, %v545_v13 }
  0xec   :  { %v429_v18 = vadd.f32 %v1395_v14, %v1637_v34  ;;  %v557_v19 = vadd.f32 %v1427_v15, %v1637_v34  ;;  %v420_v20 = vpop.f32.mrb[11].mxu0  ;;  %v548_v21 = vpop.f32.mrb[11].mxu1 }
  0xed   :  { %v421_v24 = vadd.f32 %v1637_v34, %v420_v20  ;;  %v549_v25 = vadd.f32 %v1637_v34, %v548_v21 }
  0xee   :  { %v1186_v26 = vpack.c.bf16 %v429_v18, %v426_v16  ;;  %v1266_v27 = vpack.c.bf16 %v557_v19, %v554_v17 }
  0xef   :  { %v1181_v28 = vpack.c.bf16 %v421_v24, %v418_v22  ;;  %v1261_v29 = vpack.c.bf16 %v549_v25, %v546_v23 }
  0xf0   :  { %1322 = vst [vmem:[%s1802_s3 + $0x28] sm:$0xff] %v1186_v26   ;;  %1338 = vst [vmem:[%s1802_s3 + $0xa8] sm:$0xff] %v1266_v27  }
  0xf1   :  { %1321 = vst [vmem:[%s1802_s3 + $0x20] sm:$0xff] %v1181_v28   ;;  %1337 = vst [vmem:[%s1802_s3 + $0xa0] sm:$0xff] %v1261_v29   ;;  %v1398_v30 = vpop.f32.mrb[12].mxu0  ;;  %v1430_v31 = vpop.f32.mrb[12].mxu1 }
  0xf2   :  { %v433_v32 = vpop.f32.mrb[13].mxu0  ;;  %v561_v33 = vpop.f32.mrb[13].mxu1  ;;  %v442_v37 = vadd.f32 %v1398_v30, %v1637_v34  ;;  %v570_v38 = vadd.f32 %v1430_v31, %v1637_v34 }
  0xf3   :  { %v1399_v35 = vpop.f32.mrb[14].mxu0  ;;  %v1431_v36 = vpop.f32.mrb[14].mxu1  ;;  %v434_v43 = vadd.f32 %v1637_v34, %v433_v32  ;;  %v562_v44 = vadd.f32 %v1637_v34, %v561_v33 }
  0xf4   :  { %v445_v39 = vadd.f32 %v1399_v35, %v1637_v34  ;;  %v573_v40 = vadd.f32 %v1431_v36, %v1637_v34  ;;  %v436_v41 = vpop.f32.mrb[15].mxu0  ;;  %v564_v42 = vpop.f32.mrb[15].mxu1 }
  0xf5   :  { %v437_v45 = vadd.f32 %v1637_v34, %v436_v41  ;;  %v565_v46 = vadd.f32 %v1637_v34, %v564_v42 }
  0xf6   :  { %v1196_v47 = vpack.c.bf16 %v445_v39, %v442_v37  ;;  %v1276_v48 = vpack.c.bf16 %v573_v40, %v570_v38 }
  0xf7   :  { %v1191_v49 = vpack.c.bf16 %v437_v45, %v434_v43  ;;  %v1271_v50 = vpack.c.bf16 %v565_v46, %v562_v44 }
  0xf8   :  { %1324 = vst [vmem:[%s1802_s3 + $0x38] sm:$0xff] %v1196_v47   ;;  %1340 = vst [vmem:[%s1802_s3 + $0xb8] sm:$0xff] %v1276_v48  }
  0xf9   :  { %1323 = vst [vmem:[%s1802_s3 + $0x30] sm:$0xff] %v1191_v49   ;;  %1339 = vst [vmem:[%s1802_s3 + $0xb0] sm:$0xff] %v1271_v50   ;;  %v1402_v51 = vpop.f32.mrb[16].mxu0  ;;  %v1434_v52 = vpop.f32.mrb[16].mxu1 }
  0xfa   :  { %v449_v53 = vpop.f32.mrb[17].mxu0  ;;  %v577_v54 = vpop.f32.mrb[17].mxu1  ;;  %v458_v57 = vadd.f32 %v1402_v51, %v1637_v34  ;;  %v586_v58 = vadd.f32 %v1434_v52, %v1637_v34 }
  0xfb   :  { %v1403_v55 = vpop.f32.mrb[18].mxu0  ;;  %v1435_v56 = vpop.f32.mrb[18].mxu1  ;;  %v450_v63 = vadd.f32 %v1637_v34, %v449_v53  ;;  %v578_v0 = vadd.f32 %v1637_v34, %v577_v54 }
  0xfc   :  { %v461_v59 = vadd.f32 %v1403_v55, %v1637_v34  ;;  %v589_v60 = vadd.f32 %v1435_v56, %v1637_v34  ;;  %v452_v61 = vpop.f32.mrb[19].mxu0  ;;  %v580_v62 = vpop.f32.mrb[19].mxu1 }
  0xfd   :  { %v453_v1 = vadd.f32 %v1637_v34, %v452_v61  ;;  %v581_v2 = vadd.f32 %v1637_v34, %v580_v62 }
  0xfe   :  { %v1206_v3 = vpack.c.bf16 %v461_v59, %v458_v57  ;;  %v1286_v4 = vpack.c.bf16 %v589_v60, %v586_v58 }
  0xff   :  { %v1201_v5 = vpack.c.bf16 %v453_v1, %v450_v63  ;;  %v1281_v6 = vpack.c.bf16 %v581_v2, %v578_v0 }
 0x100   :  { %1326 = vst [vmem:[%s1802_s3 + $0x48] sm:$0xff] %v1206_v3   ;;  %1342 = vst [vmem:[%s1802_s3 + $0xc8] sm:$0xff] %v1286_v4  }
 0x101   :  { %1325 = vst [vmem:[%s1802_s3 + $0x40] sm:$0xff] %v1201_v5   ;;  %1341 = vst [vmem:[%s1802_s3 + $0xc0] sm:$0xff] %v1281_v6   ;;  %v1406_v7 = vpop.f32.mrb[20].mxu0  ;;  %v1438_v8 = vpop.f32.mrb[20].mxu1 }
 0x102   :  { %v465_v9 = vpop.f32.mrb[21].mxu0  ;;  %v593_v10 = vpop.f32.mrb[21].mxu1  ;;  %v474_v13 = vadd.f32 %v1406_v7, %v1637_v34  ;;  %v602_v14 = vadd.f32 %v1438_v8, %v1637_v34 }
 0x103   :  { %v1407_v11 = vpop.f32.mrb[22].mxu0  ;;  %v1439_v12 = vpop.f32.mrb[22].mxu1  ;;  %v466_v19 = vadd.f32 %v1637_v34, %v465_v9  ;;  %v594_v20 = vadd.f32 %v1637_v34, %v593_v10 }
 0x104   :  { %v477_v15 = vadd.f32 %v1407_v11, %v1637_v34  ;;  %v605_v16 = vadd.f32 %v1439_v12, %v1637_v34  ;;  %v468_v17 = vpop.f32.mrb[23].mxu0  ;;  %v596_v18 = vpop.f32.mrb[23].mxu1 }
 0x105   :  { %v469_v21 = vadd.f32 %v1637_v34, %v468_v17  ;;  %v597_v22 = vadd.f32 %v1637_v34, %v596_v18 }
 0x106   :  { %v1216_v23 = vpack.c.bf16 %v477_v15, %v474_v13  ;;  %v1296_v24 = vpack.c.bf16 %v605_v16, %v602_v14 }
 0x107   :  { %v1211_v25 = vpack.c.bf16 %v469_v21, %v466_v19  ;;  %v1291_v26 = vpack.c.bf16 %v597_v22, %v594_v20 }
 0x108   :  { %1328 = vst [vmem:[%s1802_s3 + $0x58] sm:$0xff] %v1216_v23   ;;  %1344 = vst [vmem:[%s1802_s3 + $0xd8] sm:$0xff] %v1296_v24  }
 0x109   :  { %1327 = vst [vmem:[%s1802_s3 + $0x50] sm:$0xff] %v1211_v25   ;;  %1343 = vst [vmem:[%s1802_s3 + $0xd0] sm:$0xff] %v1291_v26   ;;  %v1410_v27 = vpop.f32.mrb[24].mxu0  ;;  %v1442_v28 = vpop.f32.mrb[24].mxu1 }
 0x10a   :  { %v481_v29 = vpop.f32.mrb[25].mxu0  ;;  %v609_v30 = vpop.f32.mrb[25].mxu1  ;;  %v490_v33 = vadd.f32 %v1410_v27, %v1637_v34  ;;  %v618_v35 = vadd.f32 %v1442_v28, %v1637_v34 }
 0x10b   :  { %v1411_v31 = vpop.f32.mrb[26].mxu0  ;;  %v1443_v32 = vpop.f32.mrb[26].mxu1  ;;  %v482_v40 = vadd.f32 %v1637_v34, %v481_v29  ;;  %v610_v41 = vadd.f32 %v1637_v34, %v609_v30 }
 0x10c   :  { %v493_v36 = vadd.f32 %v1411_v31, %v1637_v34  ;;  %v621_v37 = vadd.f32 %v1443_v32, %v1637_v34  ;;  %v484_v38 = vpop.f32.mrb[27].mxu0  ;;  %v612_v39 = vpop.f32.mrb[27].mxu1 }
 0x10d   :  { %v485_v42 = vadd.f32 %v1637_v34, %v484_v38  ;;  %v613_v43 = vadd.f32 %v1637_v34, %v612_v39 }
 0x10e   :  { %v1226_v44 = vpack.c.bf16 %v493_v36, %v490_v33  ;;  %v1306_v45 = vpack.c.bf16 %v621_v37, %v618_v35 }
 0x10f   :  { %v1221_v46 = vpack.c.bf16 %v485_v42, %v482_v40  ;;  %v1301_v47 = vpack.c.bf16 %v613_v43, %v610_v41 }
 0x110   :  { %1330 = vst [vmem:[%s1802_s3 + $0x68] sm:$0xff] %v1226_v44   ;;  %1346 = vst [vmem:[%s1802_s3 + $0xe8] sm:$0xff] %v1306_v45  }
 0x111   :  { %1329 = vst [vmem:[%s1802_s3 + $0x60] sm:$0xff] %v1221_v46   ;;  %1345 = vst [vmem:[%s1802_s3 + $0xe0] sm:$0xff] %v1301_v47   ;;  %v1414_v48 = vpop.f32.mrb[28].mxu0  ;;  %v1446_v49 = vpop.f32.mrb[28].mxu1 }
 0x112   :  { %v497_v50 = vpop.f32.mrb[29].mxu0  ;;  %v625_v51 = vpop.f32.mrb[29].mxu1  ;;  %v506_v54 = vadd.f32 %v1414_v48, %v1637_v34  ;;  %v634_v55 = vadd.f32 %v1446_v49, %v1637_v34 }
 0x113   :  { %v1415_v52 = vpop.f32.mrb[30].mxu0  ;;  %v1447_v53 = vpop.f32.mrb[30].mxu1  ;;  %v498_v60 = vadd.f32 %v1637_v34, %v497_v50  ;;  %v626_v61 = vadd.f32 %v1637_v34, %v625_v51 }
 0x114   :  { %v509_v56 = vadd.f32 %v1415_v52, %v1637_v34  ;;  %v637_v57 = vadd.f32 %v1447_v53, %v1637_v34  ;;  %v500_v58 = vpop.f32.mrb[31].mxu0  ;;  %v628_v59 = vpop.f32.mrb[31].mxu1 }
 0x115   :  { %v501_v62 = vadd.f32 %v1637_v34, %v500_v58  ;;  %v629_v63 = vadd.f32 %v1637_v34, %v628_v59 }
 0x116   :  { %v1236_v0 = vpack.c.bf16 %v509_v56, %v506_v54  ;;  %v1316_v1 = vpack.c.bf16 %v637_v57, %v634_v55 }
 0x117   :  { %v1231_v2 = vpack.c.bf16 %v501_v62, %v498_v60  ;;  %v1311_v3 = vpack.c.bf16 %v629_v63, %v626_v61 }
 0x118   :  { %1332 = vst [vmem:[%s1802_s3 + $0x78] sm:$0xff] %v1236_v0   ;;  %1348 = vst [vmem:[%s1802_s3 + $0xf8] sm:$0xff] %v1316_v1  }
 0x119   :  { %1331 = vst [vmem:[%s1802_s3 + $0x70] sm:$0xff] %v1231_v2   ;;  %1347 = vst [vmem:[%s1802_s3 + $0xf0] sm:$0xff] %v1311_v3  }

// kernel: _lambda_.36
= control target key start
LH: loop header
LB: loop body
LE: loop exit
PB: predicated region body
PF: predicated region fallthrough
CT: control target
= control target key end

     0   :  { %vm257_vm0 = vcmask 130048   ;;  %s2562_s1 = inlined_call_operand.vmem [shape: bf16[16,128], index: 1, kind: input, shape index: {}]   ;;  %s2563_s0 = inlined_call_operand.vmem [shape: bf16[512,16], index: 0, kind: input, shape index: {}]   ;;  %s2564_s3 = inlined_call_operand.vmem [shape: bf16[512,128], index: 3, kind: input, shape index: {}]   ;;  %s2565_s2 = inlined_call_operand.vmem [shape: f32[1,128], index: 2, kind: input, shape index: {}]   ;;  %s2566_s4 = inlined_call_operand.vmem [shape: bf16[512,128], index: 4, kind: output, shape index: {}]  }
   0x1   :  { %v1868_v0 = vld [vmem:[%s2562_s1] sm:$0xff]   ;;  %v1871_v3 = vld [vmem:[%s2563_s0 + $0x8] sm:$0xff]   ;;  %v1873_v5 = vld [vmem:[%s2563_s0 + $0x10] sm:$0xff]  }
   0x2   :  { %v1869_v1 = vld [vmem:[%s2563_s0] sm:$0xff]   ;;  %1800 = vmatprep.subr.bf16.mxu0 %v1868_v0  ;;  %1866 = vmatprep.subr.bf16.mxu1 %v1868_v0  ;;  %v1872_v4 = vld [vmem:[%s2563_s0 + $0x88] sm:$0xff]   ;;  %v1874_v6 = vld [vmem:[%s2563_s0 + $0x90] sm:$0xff]  }
   0x3   :  { %v1870_v2 = vld [vmem:[%s2563_s0 + $0x80] sm:$0xff]   ;;  %1801 = vmatpush3.bf16.msra.mxu0 %v1868_v0  ;;  %1867 = vmatpush3.bf16.msra.mxu1 %v1868_v0  ;;  %v1875_v7 = vld [vmem:[%s2563_s0 + $0x18] sm:$0xff]   ;;  %v1879_v11 = vld [vmem:[%s2563_s0 + $0x28] sm:$0xff]  }
   0x4   :  { %1802 = vmatprep.mubr.msk.bf16.mxu0 %vm257_vm0, %v1869_v1  ;;  %1834 = vmatprep.mubr.msk.bf16.mxu1 %vm257_vm0, %v1870_v2  ;;  %v1876_v8 = vld [vmem:[%s2563_s0 + $0x98] sm:$0xff]   ;;  %v1877_v9 = vld [vmem:[%s2563_s0 + $0x20] sm:$0xff]   ;;  %v1880_v12 = vld [vmem:[%s2563_s0 + $0xa8] sm:$0xff]  }
   0x5   :  { %v1878_v10 = vld [vmem:[%s2563_s0 + $0xa0] sm:$0xff]   ;;  %v1881_v13 = vld [vmem:[%s2563_s0 + $0x30] sm:$0xff]   ;;  %v1883_v15 = vld [vmem:[%s2563_s0 + $0x38] sm:$0xff]  }
   0x6   :  { %1803 = vmatmul.mubr.msk.bf16.vlgmr.msra.gmra.mrb[0].mxu0 %vm257_vm0, %v1871_v3  ;;  %1835 = vmatmul.mubr.msk.bf16.vlgmr.msra.gmra.mrb[0].mxu1 %vm257_vm0, %v1872_v4  ;;  %v1882_v14 = vld [vmem:[%s2563_s0 + $0xb0] sm:$0xff]   ;;  %v1884_v16 = vld [vmem:[%s2563_s0 + $0xb8] sm:$0xff]   ;;  %v1885_v17 = vld [vmem:[%s2563_s0 + $0x40] sm:$0xff]  }
   0x7   :  { %1806 = vmatprep.mubr.msk.bf16.mxu0 %vm257_vm0, %v1873_v5  ;;  %1838 = vmatprep.mubr.msk.bf16.mxu1 %vm257_vm0, %v1874_v6  ;;  %v1886_v18 = vld [vmem:[%s2563_s0 + $0xc0] sm:$0xff]   ;;  %v1887_v19 = vld [vmem:[%s2563_s0 + $0x48] sm:$0xff]   ;;  %v1889_v21 = vld [vmem:[%s2563_s0 + $0x50] sm:$0xff]  }
   0x8   :  { %v1888_v20 = vld [vmem:[%s2563_s0 + $0xc8] sm:$0xff]   ;;  %v1890_v22 = vld [vmem:[%s2563_s0 + $0xd0] sm:$0xff]   ;;  %v1891_v23 = vld [vmem:[%s2563_s0 + $0x58] sm:$0xff]  }
   0x9   :  { %v1892_v24 = vld [vmem:[%s2563_s0 + $0xd8] sm:$0xff]   ;;  %v1893_v25 = vld [vmem:[%s2563_s0 + $0x60] sm:$0xff]   ;;  %v1895_v27 = vld [vmem:[%s2563_s0 + $0x68] sm:$0xff]  }
   0xa   :  { %v1894_v26 = vld [vmem:[%s2563_s0 + $0xe0] sm:$0xff]   ;;  %v1896_v28 = vld [vmem:[%s2563_s0 + $0xe8] sm:$0xff]   ;;  %v1897_v29 = vld [vmem:[%s2563_s0 + $0x70] sm:$0xff]  }
   0xb   :  { %v1898_v30 = vld [vmem:[%s2563_s0 + $0xf0] sm:$0xff]   ;;  %v1899_v31 = vld [vmem:[%s2563_s0 + $0x78] sm:$0xff]   ;;  %v2060_v33 = vld [vmem:[%s2564_s3 + $0x8] sm:$0xff]  }
   0xc   :  { %v1900_v32 = vld [vmem:[%s2563_s0 + $0xf8] sm:$0xff]   ;;  %v2065_v34 = vld [vmem:[%s2564_s3 + $0x88] sm:$0xff]   ;;  %v2070_v35 = vld [vmem:[%s2564_s3] sm:$0xff]   ;;  %v1423_v41 = vunpack.c.l.bf16 %v2060_v33  ;;  %v1424_v46 = vunpack.c.h.bf16 %v2060_v33 }
   0xd   :  { %v2075_v36 = vld [vmem:[%s2564_s3 + $0x80] sm:$0xff]   ;;  %v2080_v37 = vld [vmem:[%s2564_s3 + $0x18] sm:$0xff]   ;;  %v2090_v39 = vld [vmem:[%s2564_s3 + $0x10] sm:$0xff]   ;;  %v1487_v42 = vunpack.c.l.bf16 %v2065_v34  ;;  %v1419_v43 = vunpack.c.l.bf16 %v2070_v35  ;;  %v1488_v47 = vunpack.c.h.bf16 %v2065_v34  ;;  %v1420_v48 = vunpack.c.h.bf16 %v2070_v35 }
   0xe   :  { %1807 = vmatmul.mubr.msk.bf16.gmra.mrb[4].mxu0 %vm257_vm0, %v1875_v7  ;;  %1839 = vmatmul.mubr.msk.bf16.gmra.mrb[4].mxu1 %vm257_vm0, %v1876_v8  ;;  %v2085_v38 = vld [vmem:[%s2564_s3 + $0x98] sm:$0xff]   ;;  %v2095_v40 = vld [vmem:[%s2564_s3 + $0x90] sm:$0xff]   ;;  %v1483_v44 = vunpack.c.l.bf16 %v2075_v36  ;;  %v2104_v45 = vld [vmem:[%s2564_s3 + $0x28] sm:$0xff]   ;;  %v1484_v49 = vunpack.c.h.bf16 %v2075_v36  ;;  %v1431_v53 = vunpack.c.l.bf16 %v2080_v37  ;;  %v1427_v55 = vunpack.c.l.bf16 %v2090_v39 }
   0xf   :  { %1810 = vmatprep.mubr.msk.bf16.mxu0 %vm257_vm0, %v1877_v9  ;;  %1842 = vmatprep.mubr.msk.bf16.mxu1 %vm257_vm0, %v1878_v10  ;;  %v2113_v50 = vld [vmem:[%s2564_s3 + $0xa8] sm:$0xff]   ;;  %v2118_v51 = vld [vmem:[%s2564_s3 + $0x20] sm:$0xff]   ;;  %v1495_v54 = vunpack.c.l.bf16 %v2085_v38  ;;  %v1491_v56 = vunpack.c.l.bf16 %v2095_v40  ;;  %v2132_v57 = vld [vmem:[%s2564_s3 + $0x38] sm:$0xff]   ;;  %v1432_v58 = vunpack.c.h.bf16 %v2080_v37  ;;  %v1496_v59 = vunpack.c.h.bf16 %v2085_v38 }
  0x10   :  { %v2123_v52 = vld [vmem:[%s2564_s3 + $0xa0] sm:$0xff]   ;;  %v1428_v60 = vunpack.c.h.bf16 %v2090_v39  ;;  %v1492_v61 = vunpack.c.h.bf16 %v2095_v40  ;;  %v2141_v62 = vld [vmem:[%s2564_s3 + $0xb8] sm:$0xff]   ;;  %v2146_v63 = vld [vmem:[%s2564_s3 + $0x30] sm:$0xff]   ;;  %v1439_v1 = vunpack.c.l.bf16 %v2104_v45  ;;  %v1503_v2 = vunpack.c.l.bf16 %v2113_v50 }
  0x11   :  { %v2151_v0 = vld [vmem:[%s2564_s3 + $0xb0] sm:$0xff]   ;;  %v1435_v3 = vunpack.c.l.bf16 %v2118_v51  ;;  %v1499_v4 = vunpack.c.l.bf16 %v2123_v52  ;;  %v2160_v5 = vld [vmem:[%s2565_s2] ss:$0 sm:$0xff]  ;;  %v1440_v6 = vunpack.c.h.bf16 %v2104_v45  ;;  %v1504_v7 = vunpack.c.h.bf16 %v2113_v50  ;;  %v2169_v10 = vld [vmem:[%s2564_s3 + $0x48] sm:$0xff]  }
  0x12   :  { %v1436_v8 = vunpack.c.h.bf16 %v2118_v51  ;;  %v1500_v9 = vunpack.c.h.bf16 %v2123_v52 }
  0x16   :  { %1811 = vmatmul.mubr.msk.bf16.gmra.mrb[8].mxu0 %vm257_vm0, %v1879_v11  ;;  %1843 = vmatmul.mubr.msk.bf16.gmra.mrb[8].mxu1 %vm257_vm0, %v1880_v12  ;;  %v2174_v11 = vld [vmem:[%s2564_s3 + $0xc8] sm:$0xff]   ;;  %v1447_v12 = vunpack.c.l.bf16 %v2132_v57 }
  0x17   :  { %1814 = vmatprep.mubr.msk.bf16.mxu0 %vm257_vm0, %v1881_v13  ;;  %1846 = vmatprep.mubr.msk.bf16.mxu1 %vm257_vm0, %v1882_v14  ;;  %v1511_v13 = vunpack.c.l.bf16 %v2141_v62 }
  0x1e   :  { %1815 = vmatmul.mubr.msk.bf16.gmra.mrb[12].mxu0 %vm257_vm0, %v1883_v15  ;;  %1847 = vmatmul.mubr.msk.bf16.gmra.mrb[12].mxu1 %vm257_vm0, %v1884_v16  ;;  %v2183_v16 = vld [vmem:[%s2564_s3 + $0x40] sm:$0xff]  }
  0x1f   :  { %1818 = vmatprep.mubr.msk.bf16.mxu0 %vm257_vm0, %v1885_v17  ;;  %1850 = vmatprep.mubr.msk.bf16.mxu1 %vm257_vm0, %v1886_v18  ;;  %v2188_v17 = vld [vmem:[%s2564_s3 + $0xc0] sm:$0xff]  }
  0x26   :  { %1819 = vmatmul.mubr.msk.bf16.gmra.mrb[16].mxu0 %vm257_vm0, %v1887_v19  ;;  %1851 = vmatmul.mubr.msk.bf16.gmra.mrb[16].mxu1 %vm257_vm0, %v1888_v20 }
  0x27   :  { %1822 = vmatprep.mubr.msk.bf16.mxu0 %vm257_vm0, %v1889_v21  ;;  %1854 = vmatprep.mubr.msk.bf16.mxu1 %vm257_vm0, %v1890_v22 }
  0x2e   :  { %1823 = vmatmul.mubr.msk.bf16.gmra.mrb[20].mxu0 %vm257_vm0, %v1891_v23  ;;  %1855 = vmatmul.mubr.msk.bf16.gmra.mrb[20].mxu1 %vm257_vm0, %v1892_v24  ;;  %v1515_v23 = vunpack.c.l.bf16 %v2188_v17 }
  0x2f   :  { %1826 = vmatprep.mubr.msk.bf16.mxu0 %vm257_vm0, %v1893_v25  ;;  %1858 = vmatprep.mubr.msk.bf16.mxu1 %vm257_vm0, %v1894_v26 }
  0x36   :  { %1827 = vmatmul.mubr.msk.bf16.gmra.mrb[24].mxu0 %vm257_vm0, %v1895_v27  ;;  %1859 = vmatmul.mubr.msk.bf16.gmra.mrb[24].mxu1 %vm257_vm0, %v1896_v28 }
  0x37   :  { %1830 = vmatprep.mubr.msk.bf16.mxu0 %vm257_vm0, %v1897_v29  ;;  %1862 = vmatprep.mubr.msk.bf16.mxu1 %vm257_vm0, %v1898_v30 }
  0x3e   :  { %1831 = vmatmul.mubr.msk.bf16.gmra.mrb[28].mxu0 %vm257_vm0, %v1899_v31  ;;  %1863 = vmatmul.mubr.msk.bf16.gmra.mrb[28].mxu1 %vm257_vm0, %v1900_v32 }
  0xd9   :  { %v1804_v18 = vpop.f32.mrb[0].mxu0  ;;  %v1836_v19 = vpop.f32.mrb[0].mxu1 }
  0xda   :  { %v397_v24 = vadd.f32 %v1804_v18, %v2160_v5  ;;  %v525_v25 = vadd.f32 %v1836_v19, %v2160_v5  ;;  %v388_v26 = vpop.f32.mrb[1].mxu0  ;;  %v516_v27 = vpop.f32.mrb[1].mxu1 }
  0xdb   :  { %v389_v30 = vadd.f32 %v2160_v5, %v388_v26  ;;  %v517_v31 = vadd.f32 %v2160_v5, %v516_v27  ;;  %v1805_v32 = vpop.f32.mrb[2].mxu0  ;;  %v1837_v21 = vpop.f32.mrb[2].mxu1 }
  0xdc   :  { %v773_v20 = vadd.f32 %v1423_v41, %v397_v24  ;;  %v805_v18 = vadd.f32 %v1487_v42, %v525_v25  ;;  %v400_v19 = vadd.f32 %v1805_v32, %v2160_v5  ;;  %v528_v15 = vadd.f32 %v1837_v21, %v2160_v5  ;;  %v391_v14 = vpop.f32.mrb[3].mxu0  ;;  %v519_v28 = vpop.f32.mrb[3].mxu1 }
  0xdd   :  { %v771_v29 = vadd.f32 %v1419_v43, %v389_v30  ;;  %v803_v26 = vadd.f32 %v1483_v44, %v517_v31  ;;  %v392_v27 = vadd.f32 %v2160_v5, %v391_v14  ;;  %v520_v22 = vadd.f32 %v2160_v5, %v519_v28 }
  0xde   :  { %v774_v41 = vadd.f32 %v1424_v46, %v400_v19  ;;  %v806_v42 = vadd.f32 %v1488_v47, %v528_v15  ;;  %v1456_v21 = vunpack.c.h.bf16 %v2169_v10  ;;  %v1452_v14 = vunpack.c.h.bf16 %v2183_v16 }
  0xdf   :  { %v772_v43 = vadd.f32 %v1420_v48, %v392_v27  ;;  %v804_v44 = vadd.f32 %v1484_v49, %v520_v22  ;;  %v837_v28 = vmax.f32 %v773_v20, 0.0  ;;  %v869_v33 = vmax.f32 %v805_v18, 0.0 }
  0xe0   :  { %v838_v46 = vmax.f32 %v774_v41, 0.0  ;;  %v870_v30 = vmax.f32 %v806_v42, 0.0  ;;  %v835_v34 = vmax.f32 %v771_v29, 0.0  ;;  %v867_v47 = vmax.f32 %v803_v26, 0.0  ;;  %v2229_v41 = vld [vmem:[%s2564_s3 + $0x58] sm:$0xff]  }
  0xe1   :  { %v836_v15 = vmax.f32 %v772_v43, 0.0  ;;  %v868_v31 = vmax.f32 %v804_v44, 0.0  ;;  %v1808_v32 = vpop.f32.mrb[4].mxu0  ;;  %v1840_v19 = vpop.f32.mrb[4].mxu1  ;;  %v2234_v42 = vld [vmem:[%s2564_s3 + $0xd8] sm:$0xff]  }
  0xe2   :  { %v1553_v24 = vpack.c.bf16 %v838_v46, %v837_v28  ;;  %v1633_v35 = vpack.c.bf16 %v870_v30, %v869_v33  ;;  %v413_v48 = vadd.f32 %v1808_v32, %v2160_v5  ;;  %v541_v36 = vadd.f32 %v1840_v19, %v2160_v5  ;;  %v404_v49 = vpop.f32.mrb[5].mxu0  ;;  %v532_v22 = vpop.f32.mrb[5].mxu1 }
  0xe3   :  { %v1548_v27 = vpack.c.bf16 %v836_v15, %v835_v34  ;;  %v1628_v25 = vpack.c.bf16 %v868_v31, %v867_v47  ;;  %v405_v20 = vadd.f32 %v2160_v5, %v404_v49  ;;  %v533_v18 = vadd.f32 %v2160_v5, %v532_v22  ;;  %v1809_v29 = vpop.f32.mrb[6].mxu0  ;;  %v1841_v26 = vpop.f32.mrb[6].mxu1  ;;  %v2256_v34 = vld [vmem:[%s2564_s3 + $0xd0] sm:$0xff]  }
  0xe4   :  { %1736 = vst [vmem:[%s2566_s4 + $0x8] sm:$0xff] %v1553_v24   ;;  %1752 = vst [vmem:[%s2566_s4 + $0x88] sm:$0xff] %v1633_v35   ;;  %v777_v43 = vadd.f32 %v1431_v53, %v413_v48  ;;  %v809_v44 = vadd.f32 %v1495_v54, %v541_v36  ;;  %v416_v28 = vadd.f32 %v1809_v29, %v2160_v5  ;;  %v407_v46 = vpop.f32.mrb[7].mxu0  ;;  %v535_v30 = vpop.f32.mrb[7].mxu1  ;;  %v2251_v24 = vld [vmem:[%s2564_s3 + $0x50] sm:$0xff]   ;;  %v1463_v19 = vunpack.c.l.bf16 %v2229_v41 }
  0xe5   :  { %v544_v33 = vadd.f32 %v1841_v26, %v2160_v5  ;;  %1549 = vst [vmem:[%s2566_s4] sm:$0xff] %v1548_v27   ;;  %1751 = vst [vmem:[%s2566_s4 + $0x80] sm:$0xff] %v1628_v25   ;;  %v775_v53 = vadd.f32 %v1427_v55, %v405_v20  ;;  %v807_v54 = vadd.f32 %v1491_v56, %v533_v18  ;;  %v1527_v25 = vunpack.c.l.bf16 %v2234_v42 }
  0xe6   :  { %v408_v47 = vadd.f32 %v2160_v5, %v407_v46  ;;  %v536_v15 = vadd.f32 %v2160_v5, %v535_v30  ;;  %v778_v31 = vadd.f32 %v1432_v58, %v416_v28  ;;  %v1459_v35 = vunpack.c.l.bf16 %v2251_v24 }
  0xe7   :  { %v810_v32 = vadd.f32 %v1496_v59, %v544_v33  ;;  %v1523_v48 = vunpack.c.l.bf16 %v2256_v34  ;;  %v841_v36 = vmax.f32 %v777_v43, 0.0  ;;  %v873_v37 = vmax.f32 %v809_v44, 0.0 }
  0xe8   :  { %v776_v55 = vadd.f32 %v1428_v60, %v408_v47  ;;  %v808_v56 = vadd.f32 %v1492_v61, %v536_v15  ;;  %v842_v58 = vmax.f32 %v778_v31, 0.0  ;;  %v839_v38 = vmax.f32 %v775_v53, 0.0 }
  0xe9   :  { %v874_v49 = vmax.f32 %v810_v32, 0.0  ;;  %v871_v59 = vmax.f32 %v807_v54, 0.0  ;;  %v1812_v20 = vpop.f32.mrb[8].mxu0  ;;  %v1844_v18 = vpop.f32.mrb[8].mxu1 }
  0xea   :  { %v840_v22 = vmax.f32 %v776_v55, 0.0  ;;  %v872_v27 = vmax.f32 %v808_v56, 0.0  ;;  %v1563_v29 = vpack.c.bf16 %v842_v58, %v841_v36  ;;  %v429_v60 = vadd.f32 %v1812_v20, %v2160_v5  ;;  %v420_v61 = vpop.f32.mrb[9].mxu0  ;;  %v548_v26 = vpop.f32.mrb[9].mxu1 }
  0xeb   :  { %v1643_v39 = vpack.c.bf16 %v874_v49, %v873_v37  ;;  %v557_v40 = vadd.f32 %v1844_v18, %v2160_v5  ;;  %v421_v43 = vadd.f32 %v2160_v5, %v420_v61  ;;  %v549_v44 = vadd.f32 %v2160_v5, %v548_v26  ;;  %v1813_v46 = vpop.f32.mrb[10].mxu0  ;;  %v1845_v30 = vpop.f32.mrb[10].mxu1 }
  0xec   :  { %v1558_v28 = vpack.c.bf16 %v840_v22, %v839_v38  ;;  %v1638_v33 = vpack.c.bf16 %v872_v27, %v871_v59  ;;  %1738 = vst [vmem:[%s2566_s4 + $0x18] sm:$0xff] %v1563_v29   ;;  %v781_v53 = vadd.f32 %v1439_v1, %v429_v60  ;;  %v432_v47 = vadd.f32 %v1813_v46, %v2160_v5  ;;  %v423_v31 = vpop.f32.mrb[11].mxu0  ;;  %v551_v32 = vpop.f32.mrb[11].mxu1  ;;  %v2329_v46 = vld [vmem:[%s2564_s3 + $0x68] sm:$0xff]  }
  0xed   :  { %1754 = vst [vmem:[%s2566_s4 + $0x98] sm:$0xff] %v1643_v39   ;;  %v813_v54 = vadd.f32 %v1503_v2, %v557_v40  ;;  %v560_v15 = vadd.f32 %v1845_v30, %v2160_v5  ;;  %v779_v1 = vadd.f32 %v1435_v3, %v421_v43  ;;  %v811_v2 = vadd.f32 %v1499_v4, %v549_v44  ;;  %v2334_v30 = vld [vmem:[%s2564_s3 + $0xe8] sm:$0xff]  }
  0xee   :  { %1737 = vst [vmem:[%s2566_s4 + $0x10] sm:$0xff] %v1558_v28   ;;  %1753 = vst [vmem:[%s2566_s4 + $0x90] sm:$0xff] %v1638_v33   ;;  %v424_v55 = vadd.f32 %v2160_v5, %v423_v31  ;;  %v552_v56 = vadd.f32 %v2160_v5, %v551_v32  ;;  %v782_v36 = vadd.f32 %v1440_v6, %v432_v47  ;;  %v1464_v58 = vunpack.c.h.bf16 %v2229_v41 }
  0xef   :  { %v814_v37 = vadd.f32 %v1504_v7, %v560_v15  ;;  %v1528_v49 = vunpack.c.h.bf16 %v2234_v42  ;;  %v1460_v38 = vunpack.c.h.bf16 %v2251_v24  ;;  %v1524_v59 = vunpack.c.h.bf16 %v2256_v34 }
  0xf0   :  { %v780_v3 = vadd.f32 %v1436_v8, %v424_v55  ;;  %v812_v4 = vadd.f32 %v1500_v9, %v552_v56  ;;  %v845_v22 = vmax.f32 %v781_v53, 0.0  ;;  %v877_v45 = vmax.f32 %v813_v54, 0.0 }
  0xf1   :  { %v846_v6 = vmax.f32 %v782_v36, 0.0  ;;  %v878_v27 = vmax.f32 %v814_v37, 0.0  ;;  %v843_v50 = vmax.f32 %v779_v1, 0.0  ;;  %v875_v7 = vmax.f32 %v811_v2, 0.0  ;;  %v1816_v29 = vpop.f32.mrb[12].mxu0  ;;  %v1848_v39 = vpop.f32.mrb[12].mxu1 }
  0xf2   :  { %v844_v20 = vmax.f32 %v780_v3, 0.0  ;;  %v876_v18 = vmax.f32 %v812_v4, 0.0  ;;  %v445_v8 = vadd.f32 %v1816_v29, %v2160_v5  ;;  %v573_v52 = vadd.f32 %v1848_v39, %v2160_v5  ;;  %v436_v9 = vpop.f32.mrb[13].mxu0  ;;  %v564_v40 = vpop.f32.mrb[13].mxu1  ;;  %v2351_v1 = vld [vmem:[%s2564_s3 + $0x60] sm:$0xff]  }
  0xf3   :  { %v1573_v60 = vpack.c.bf16 %v846_v6, %v845_v22  ;;  %v1653_v51 = vpack.c.bf16 %v878_v27, %v877_v45  ;;  %v437_v28 = vadd.f32 %v2160_v5, %v436_v9  ;;  %v565_v33 = vadd.f32 %v2160_v5, %v564_v40  ;;  %v1817_v43 = vpop.f32.mrb[14].mxu0  ;;  %v1849_v44 = vpop.f32.mrb[14].mxu1  ;;  %v2356_v2 = vld [vmem:[%s2564_s3 + $0xe0] sm:$0xff]  }
  0xf4   :  { %v1568_v61 = vpack.c.bf16 %v844_v20, %v843_v50  ;;  %v1648_v26 = vpack.c.bf16 %v876_v18, %v875_v7  ;;  %v785_v53 = vadd.f32 %v1447_v12, %v445_v8  ;;  %v817_v54 = vadd.f32 %v1511_v13, %v573_v52  ;;  %v439_v31 = vpop.f32.mrb[15].mxu0  ;;  %v567_v32 = vpop.f32.mrb[15].mxu1 }
  0xf5   :  { %1740 = vst [vmem:[%s2566_s4 + $0x28] sm:$0xff] %v1573_v60   ;;  %1756 = vst [vmem:[%s2566_s4 + $0xa8] sm:$0xff] %v1653_v51   ;;  %v448_v47 = vadd.f32 %v1817_v43, %v2160_v5  ;;  %v576_v15 = vadd.f32 %v1849_v44, %v2160_v5  ;;  %v2567_v12 = vunpack.c.l.bf16 %v2146_v63  ;;  %v2568_v55 = vunpack.c.l.bf16 %v2151_v0 }
  0xf6   :  { %1739 = vst [vmem:[%s2566_s4 + $0x20] sm:$0xff] %v1568_v61   ;;  %1755 = vst [vmem:[%s2566_s4 + $0xa0] sm:$0xff] %v1648_v26   ;;  %v440_v36 = vadd.f32 %v2160_v5, %v439_v31  ;;  %v568_v37 = vadd.f32 %v2160_v5, %v567_v32  ;;  %v2569_v3 = vunpack.c.h.bf16 %v2132_v57  ;;  %v2570_v22 = vunpack.c.h.bf16 %v2141_v62 }
  0xf7   :  { %v783_v13 = vadd.f32 %v2567_v12, %v437_v28  ;;  %v815_v56 = vadd.f32 %v2568_v55, %v565_v33  ;;  %v1471_v6 = vunpack.c.l.bf16 %v2329_v46  ;;  %v1535_v27 = vunpack.c.l.bf16 %v2334_v30 }
  0xf8   :  { %v786_v4 = vadd.f32 %v2569_v3, %v448_v47  ;;  %v818_v45 = vadd.f32 %v2570_v22, %v576_v15  ;;  %v2571_v50 = vunpack.c.h.bf16 %v2146_v63  ;;  %v2572_v20 = vunpack.c.h.bf16 %v2151_v0 }
  0xf9   :  { %v1467_v29 = vunpack.c.l.bf16 %v2351_v1  ;;  %v1531_v39 = vunpack.c.l.bf16 %v2356_v2  ;;  %v849_v60 = vmax.f32 %v785_v53, 0.0  ;;  %v881_v57 = vmax.f32 %v817_v54, 0.0  ;;  %v1820_v61 = vpop.f32.mrb[16].mxu0  ;;  %v1852_v26 = vpop.f32.mrb[16].mxu1 }
  0xfa   :  { %v784_v7 = vadd.f32 %v2571_v50, %v440_v36  ;;  %v816_v18 = vadd.f32 %v2572_v20, %v568_v37  ;;  %v850_v51 = vmax.f32 %v786_v4, 0.0  ;;  %v882_v8 = vmax.f32 %v818_v45, 0.0  ;;  %v452_v43 = vpop.f32.mrb[17].mxu0  ;;  %v580_v44 = vpop.f32.mrb[17].mxu1 }
  0xfb   :  { %v847_v62 = vmax.f32 %v783_v13, 0.0  ;;  %v879_v52 = vmax.f32 %v815_v56, 0.0  ;;  %v461_v33 = vadd.f32 %v1820_v61, %v2160_v5  ;;  %v589_v0 = vadd.f32 %v1852_v26, %v2160_v5  ;;  %v1821_v31 = vpop.f32.mrb[18].mxu0  ;;  %v1853_v32 = vpop.f32.mrb[18].mxu1 }
  0xfc   :  { %v848_v9 = vmax.f32 %v784_v7, 0.0  ;;  %v880_v40 = vmax.f32 %v816_v18, 0.0  ;;  %v1583_v28 = vpack.c.bf16 %v850_v51, %v849_v60  ;;  %v1663_v63 = vpack.c.bf16 %v882_v8, %v881_v57  ;;  %v455_v3 = vpop.f32.mrb[19].mxu0  ;;  %v583_v4 = vpop.f32.mrb[19].mxu1 }
  0xfd   :  { %v453_v53 = vadd.f32 %v2160_v5, %v452_v43  ;;  %v581_v54 = vadd.f32 %v2160_v5, %v580_v44  ;;  %v2573_v12 = vunpack.c.l.bf16 %v2169_v10  ;;  %v2574_v55 = vunpack.c.l.bf16 %v2174_v11 }
  0xfe   :  { %v1578_v47 = vpack.c.bf16 %v848_v9, %v847_v62  ;;  %v1658_v15 = vpack.c.bf16 %v880_v40, %v879_v52  ;;  %1742 = vst [vmem:[%s2566_s4 + $0x38] sm:$0xff] %v1583_v28   ;;  %1758 = vst [vmem:[%s2566_s4 + $0xb8] sm:$0xff] %v1663_v63   ;;  %v464_v36 = vadd.f32 %v1821_v31, %v2160_v5  ;;  %v2575_v22 = vunpack.c.l.bf16 %v2183_v16 }
  0xff   :  { %v789_v13 = vadd.f32 %v2573_v12, %v461_v33  ;;  %v821_v56 = vadd.f32 %v2574_v55, %v589_v0  ;;  %v592_v37 = vadd.f32 %v1853_v32, %v2160_v5  ;;  %v819_v50 = vadd.f32 %v1515_v23, %v581_v54  ;;  %v2429_v55 = vld [vmem:[%s2564_s3 + $0x78] sm:$0xff]  }
 0x100   :  { %1741 = vst [vmem:[%s2566_s4 + $0x30] sm:$0xff] %v1578_v47   ;;  %1757 = vst [vmem:[%s2566_s4 + $0xb0] sm:$0xff] %v1658_v15   ;;  %v787_v45 = vadd.f32 %v2575_v22, %v453_v53  ;;  %v456_v7 = vadd.f32 %v2160_v5, %v455_v3  ;;  %v584_v20 = vadd.f32 %v2160_v5, %v583_v4  ;;  %v2576_v60 = vunpack.c.h.bf16 %v2174_v11 }
 0x101   :  { %v790_v18 = vadd.f32 %v1456_v21, %v464_v36  ;;  %v1472_v51 = vunpack.c.h.bf16 %v2329_v46  ;;  %v1536_v8 = vunpack.c.h.bf16 %v2334_v30  ;;  %v2577_v52 = vunpack.c.h.bf16 %v2188_v17  ;;  %v1824_v0 = vpop.f32.mrb[20].mxu0  ;;  %v1856_v43 = vpop.f32.mrb[20].mxu1 }
 0x102   :  { %v822_v57 = vadd.f32 %v2576_v60, %v592_v37  ;;  %v788_v62 = vadd.f32 %v1452_v14, %v456_v7  ;;  %v1468_v9 = vunpack.c.h.bf16 %v2351_v1  ;;  %v1532_v40 = vunpack.c.h.bf16 %v2356_v2  ;;  %v468_v47 = vpop.f32.mrb[21].mxu0  ;;  %v596_v15 = vpop.f32.mrb[21].mxu1  ;;  %v2456_v7 = vld [vmem:[%s2564_s3 + $0xf0] sm:$0xff]  }
 0x103   :  { %v820_v23 = vadd.f32 %v2577_v52, %v584_v20  ;;  %v853_v61 = vmax.f32 %v789_v13, 0.0  ;;  %v885_v10 = vmax.f32 %v821_v56, 0.0  ;;  %v854_v21 = vmax.f32 %v790_v18, 0.0  ;;  %v1825_v12 = vpop.f32.mrb[22].mxu0  ;;  %v1857_v13 = vpop.f32.mrb[22].mxu1  ;;  %v2434_v56 = vld [vmem:[%s2564_s3 + $0xf8] sm:$0xff]  }
 0x104   :  { %v886_v26 = vmax.f32 %v822_v57, 0.0  ;;  %v851_v11 = vmax.f32 %v787_v45, 0.0  ;;  %v883_v28 = vmax.f32 %v819_v50, 0.0  ;;  %v852_v63 = vmax.f32 %v788_v62, 0.0  ;;  %v471_v22 = vpop.f32.mrb[23].mxu0  ;;  %v599_v45 = vpop.f32.mrb[23].mxu1 }
 0x105   :  { %v884_v33 = vmax.f32 %v820_v23, 0.0  ;;  %v1593_v44 = vpack.c.bf16 %v854_v21, %v853_v61  ;;  %v477_v14 = vadd.f32 %v1824_v0, %v2160_v5  ;;  %v605_v17 = vadd.f32 %v1856_v43, %v2160_v5  ;;  %v2451_v50 = vld [vmem:[%s2564_s3 + $0x70] sm:$0xff]  }
 0x106   :  { %v1673_v16 = vpack.c.bf16 %v886_v26, %v885_v10  ;;  %v1588_v53 = vpack.c.bf16 %v852_v63, %v851_v11  ;;  %v469_v31 = vadd.f32 %v2160_v5, %v468_v47  ;;  %v597_v32 = vadd.f32 %v2160_v5, %v596_v15 }
 0x107   :  { %v1668_v54 = vpack.c.bf16 %v884_v33, %v883_v28  ;;  %1744 = vst [vmem:[%s2566_s4 + $0x48] sm:$0xff] %v1593_v44   ;;  %v793_v36 = vadd.f32 %v1463_v19, %v477_v14  ;;  %v825_v37 = vadd.f32 %v1527_v25, %v605_v17  ;;  %v480_v3 = vadd.f32 %v1825_v12, %v2160_v5 }
 0x108   :  { %1760 = vst [vmem:[%s2566_s4 + $0xc8] sm:$0xff] %v1673_v16   ;;  %v608_v4 = vadd.f32 %v1857_v13, %v2160_v5  ;;  %1743 = vst [vmem:[%s2566_s4 + $0x40] sm:$0xff] %v1588_v53   ;;  %v791_v19 = vadd.f32 %v1459_v35, %v469_v31  ;;  %v823_v25 = vadd.f32 %v1523_v48, %v597_v32  ;;  %v1479_v62 = vunpack.c.l.bf16 %v2429_v55 }
 0x109   :  { %1759 = vst [vmem:[%s2566_s4 + $0xc0] sm:$0xff] %v1668_v54   ;;  %v472_v20 = vadd.f32 %v2160_v5, %v471_v22  ;;  %v600_v18 = vadd.f32 %v2160_v5, %v599_v45  ;;  %v794_v60 = vadd.f32 %v1464_v58, %v480_v3  ;;  %v1543_v52 = vunpack.c.l.bf16 %v2434_v56  ;;  %v1828_v28 = vpop.f32.mrb[24].mxu0  ;;  %v1860_v63 = vpop.f32.mrb[24].mxu1 }
 0x10a   :  { %v826_v57 = vadd.f32 %v1528_v49, %v608_v4  ;;  %v1475_v23 = vunpack.c.l.bf16 %v2451_v50  ;;  %v1539_v61 = vunpack.c.l.bf16 %v2456_v7  ;;  %v857_v10 = vmax.f32 %v793_v36, 0.0  ;;  %v612_v0 = vpop.f32.mrb[25].mxu1 }
 0x10b   :  { %v792_v35 = vadd.f32 %v1460_v38, %v472_v20  ;;  %v824_v48 = vadd.f32 %v1524_v59, %v600_v18  ;;  %v889_v41 = vmax.f32 %v825_v37, 0.0  ;;  %v858_v58 = vmax.f32 %v794_v60, 0.0  ;;  %v484_v59 = vpop.f32.mrb[25].mxu0  ;;  %v1861_v47 = vpop.f32.mrb[26].mxu1 }
 0x10c   :  { %v890_v21 = vmax.f32 %v826_v57, 0.0  ;;  %v855_v42 = vmax.f32 %v791_v19, 0.0  ;;  %v887_v49 = vmax.f32 %v823_v25, 0.0  ;;  %v493_v38 = vadd.f32 %v1828_v28, %v2160_v5  ;;  %v1829_v17 = vpop.f32.mrb[26].mxu0  ;;  %v615_v12 = vpop.f32.mrb[27].mxu1 }
 0x10d   :  { %v856_v26 = vmax.f32 %v792_v35, 0.0  ;;  %v888_v11 = vmax.f32 %v824_v48, 0.0  ;;  %v1603_v33 = vpack.c.bf16 %v858_v58, %v857_v10  ;;  %v621_v34 = vadd.f32 %v1860_v63, %v2160_v5  ;;  %v487_v32 = vpop.f32.mrb[27].mxu0 }
 0x10e   :  { %v1683_v24 = vpack.c.bf16 %v890_v21, %v889_v41  ;;  %v485_v16 = vadd.f32 %v2160_v5, %v484_v59  ;;  %v613_v14 = vadd.f32 %v2160_v5, %v612_v0  ;;  %v797_v15 = vadd.f32 %v1471_v6, %v493_v38 }
 0x10f   :  { %v1598_v43 = vpack.c.bf16 %v856_v26, %v855_v42  ;;  %v1678_v44 = vpack.c.bf16 %v888_v11, %v887_v49  ;;  %1746 = vst [vmem:[%s2566_s4 + $0x58] sm:$0xff] %v1603_v33   ;;  %v829_v53 = vadd.f32 %v1535_v27, %v621_v34  ;;  %v496_v54 = vadd.f32 %v1829_v17, %v2160_v5 }
 0x110   :  { %1762 = vst [vmem:[%s2566_s4 + $0xd8] sm:$0xff] %v1683_v24   ;;  %v624_v31 = vadd.f32 %v1861_v47, %v2160_v5  ;;  %v795_v6 = vadd.f32 %v1467_v29, %v485_v16  ;;  %v827_v27 = vadd.f32 %v1531_v39, %v613_v14  ;;  %v488_v13 = vadd.f32 %v2160_v5, %v487_v32 }
 0x111   :  { %1745 = vst [vmem:[%s2566_s4 + $0x50] sm:$0xff] %v1598_v43   ;;  %1761 = vst [vmem:[%s2566_s4 + $0xd0] sm:$0xff] %v1678_v44   ;;  %v616_v36 = vadd.f32 %v2160_v5, %v615_v12  ;;  %v798_v37 = vadd.f32 %v1472_v51, %v496_v54  ;;  %v1480_v4 = vunpack.c.h.bf16 %v2429_v55  ;;  %v1544_v22 = vunpack.c.h.bf16 %v2434_v56  ;;  %v1832_v57 = vpop.f32.mrb[28].mxu0  ;;  %v1864_v35 = vpop.f32.mrb[28].mxu1 }
 0x112   :  { %v830_v3 = vadd.f32 %v1536_v8, %v624_v31  ;;  %v796_v29 = vadd.f32 %v1468_v9, %v488_v13  ;;  %v1476_v45 = vunpack.c.h.bf16 %v2451_v50  ;;  %v1540_v19 = vunpack.c.h.bf16 %v2456_v7  ;;  %v628_v10 = vpop.f32.mrb[29].mxu1 }
 0x113   :  { %v828_v39 = vadd.f32 %v1532_v40, %v616_v36  ;;  %v861_v25 = vmax.f32 %v797_v15, 0.0  ;;  %v893_v46 = vmax.f32 %v829_v53, 0.0  ;;  %v862_v51 = vmax.f32 %v798_v37, 0.0  ;;  %v500_v40 = vpop.f32.mrb[29].mxu0  ;;  %v1865_v26 = vpop.f32.mrb[30].mxu1 }
 0x114   :  { %v894_v20 = vmax.f32 %v830_v3, 0.0  ;;  %v859_v30 = vmax.f32 %v795_v6, 0.0  ;;  %v891_v8 = vmax.f32 %v827_v27, 0.0  ;;  %v860_v18 = vmax.f32 %v796_v29, 0.0  ;;  %v1833_v49 = vpop.f32.mrb[30].mxu0  ;;  %v631_v38 = vpop.f32.mrb[31].mxu1 }
 0x115   :  { %v892_v60 = vmax.f32 %v828_v39, 0.0  ;;  %v1613_v48 = vpack.c.bf16 %v862_v51, %v861_v25  ;;  %v509_v9 = vadd.f32 %v1832_v57, %v2160_v5  ;;  %v637_v2 = vadd.f32 %v1864_v35, %v2160_v5  ;;  %v503_v24 = vpop.f32.mrb[31].mxu0 }
 0x116   :  { %v1693_v1 = vpack.c.bf16 %v894_v20, %v893_v46  ;;  %v1608_v41 = vpack.c.bf16 %v860_v18, %v859_v30  ;;  %v501_v21 = vadd.f32 %v2160_v5, %v500_v40  ;;  %v629_v42 = vadd.f32 %v2160_v5, %v628_v10 }
 0x117   :  { %v1688_v58 = vpack.c.bf16 %v892_v60, %v891_v8  ;;  %1748 = vst [vmem:[%s2566_s4 + $0x68] sm:$0xff] %v1613_v48   ;;  %v801_v11 = vadd.f32 %v1479_v62, %v509_v9  ;;  %v833_v28 = vadd.f32 %v1543_v52, %v637_v2  ;;  %v512_v63 = vadd.f32 %v1833_v49, %v2160_v5 }
 0x118   :  { %1764 = vst [vmem:[%s2566_s4 + $0xe8] sm:$0xff] %v1693_v1   ;;  %v640_v33 = vadd.f32 %v1865_v26, %v2160_v5  ;;  %1747 = vst [vmem:[%s2566_s4 + $0x60] sm:$0xff] %v1608_v41   ;;  %v799_v55 = vadd.f32 %v1475_v23, %v501_v21  ;;  %v831_v56 = vadd.f32 %v1539_v61, %v629_v42 }
 0x119   :  { %1763 = vst [vmem:[%s2566_s4 + $0xe0] sm:$0xff] %v1688_v58   ;;  %v504_v62 = vadd.f32 %v2160_v5, %v503_v24  ;;  %v632_v52 = vadd.f32 %v2160_v5, %v631_v38  ;;  %v802_v34 = vadd.f32 %v1480_v4, %v512_v63  ;;  %v865_v44 = vmax.f32 %v801_v11, 0.0 }
 0x11a   :  { %v834_v59 = vadd.f32 %v1544_v22, %v640_v33  ;;  %v897_v16 = vmax.f32 %v833_v28, 0.0  ;;  %v863_v47 = vmax.f32 %v799_v55, 0.0  ;;  %v895_v15 = vmax.f32 %v831_v56, 0.0 }
 0x11b   :  { %v800_v0 = vadd.f32 %v1476_v45, %v504_v62  ;;  %v832_v43 = vadd.f32 %v1540_v19, %v632_v52  ;;  %v866_v14 = vmax.f32 %v802_v34, 0.0 }
 0x11c   :  { %v898_v17 = vmax.f32 %v834_v59, 0.0 }
 0x11d   :  { %v864_v53 = vmax.f32 %v800_v0, 0.0  ;;  %v896_v50 = vmax.f32 %v832_v43, 0.0  ;;  %v1623_v23 = vpack.c.bf16 %v866_v14, %v865_v44 }
 0x11e   :  { %v1703_v54 = vpack.c.bf16 %v898_v17, %v897_v16 }
 0x11f   :  { %v1618_v7 = vpack.c.bf16 %v864_v53, %v863_v47  ;;  %v1698_v61 = vpack.c.bf16 %v896_v50, %v895_v15  ;;  %1750 = vst [vmem:[%s2566_s4 + $0x78] sm:$0xff] %v1623_v23  }
 0x120   :  { %1766 = vst [vmem:[%s2566_s4 + $0xf8] sm:$0xff] %v1703_v54  }
 0x121   :  { %1749 = vst [vmem:[%s2566_s4 + $0x70] sm:$0xff] %v1618_v7   ;;  %1765 = vst [vmem:[%s2566_s4 + $0xf0] sm:$0xff] %v1698_v61  }

// kernel: _lambda_.37
= control target key start
LH: loop header
LB: loop body
LE: loop exit
PB: predicated region body
PF: predicated region fallthrough
CT: control target
= control target key end

     0   :  { %vm262_vm0 = vcmask 261120   ;;  %s1881_s1 = inlined_call_operand.vmem [shape: bf16[32,128], index: 1, kind: input, shape index: {}]   ;;  %s1882_s0 = inlined_call_operand.vmem [shape: bf16[512,32], index: 0, kind: input, shape index: {}]   ;;  %s1883_s2 = inlined_call_operand.vmem [shape: f32[1,128], index: 2, kind: input, shape index: {}]   ;;  %s1884_s3 = inlined_call_operand.vmem [shape: bf16[512,128], index: 3, kind: output, shape index: {}]  }
   0x1   :  { %v1528_v0 = vld [vmem:[%s1881_s1] sm:$0xff]   ;;  %v1529_v1 = vld [vmem:[%s1881_s1 + $0x8] sm:$0xff]   ;;  %v1534_v6 = vld [vmem:[%s1882_s0 + $0x10] sm:$0xff]  }
   0x2   :  { %1456 = vmatprep.subr.bf16.mxu0 %v1528_v0  ;;  %1524 = vmatprep.subr.bf16.mxu1 %v1528_v0  ;;  %v1530_v2 = vld [vmem:[%s1882_s0] sm:$0xff]   ;;  %v1532_v4 = vld [vmem:[%s1882_s0 + $0x8] sm:$0xff]   ;;  %v1535_v7 = vld [vmem:[%s1882_s0 + $0x90] sm:$0xff]  }
   0x3   :  { %1457 = vmatpush3.bf16.msra.mxu0 %v1528_v0  ;;  %1526 = vmatpush3.bf16.msra.mxu1 %v1528_v0  ;;  %v1531_v3 = vld [vmem:[%s1882_s0 + $0x80] sm:$0xff]   ;;  %v1533_v5 = vld [vmem:[%s1882_s0 + $0x88] sm:$0xff]   ;;  %v1536_v8 = vld [vmem:[%s1882_s0 + $0x18] sm:$0xff]  }
   0x4   :  { %1458 = vmatprep.subr.bf16.mxu0 %v1529_v1  ;;  %1525 = vmatprep.subr.bf16.mxu1 %v1529_v1  ;;  %v1537_v9 = vld [vmem:[%s1882_s0 + $0x98] sm:$0xff]   ;;  %v1538_v10 = vld [vmem:[%s1882_s0 + $0x20] sm:$0xff]   ;;  %v1540_v12 = vld [vmem:[%s1882_s0 + $0x28] sm:$0xff]  }
   0x5   :  { %1460 = vmatprep.mubr.msk.bf16.mxu0 %vm262_vm0, %v1530_v2  ;;  %1492 = vmatprep.mubr.msk.bf16.mxu1 %vm262_vm0, %v1531_v3  ;;  %v1539_v11 = vld [vmem:[%s1882_s0 + $0xa0] sm:$0xff]   ;;  %v1541_v13 = vld [vmem:[%s1882_s0 + $0xa8] sm:$0xff]   ;;  %v1542_v14 = vld [vmem:[%s1882_s0 + $0x30] sm:$0xff]  }
   0x6   :  { %v1543_v15 = vld [vmem:[%s1882_s0 + $0xb0] sm:$0xff]   ;;  %v1544_v16 = vld [vmem:[%s1882_s0 + $0x38] sm:$0xff]   ;;  %v1546_v18 = vld [vmem:[%s1882_s0 + $0x40] sm:$0xff]  }
   0x7   :  { %1459 = vmatpush3.bf16.msra.mxu0 %v1529_v1  ;;  %1527 = vmatpush3.bf16.msra.mxu1 %v1529_v1  ;;  %v1545_v17 = vld [vmem:[%s1882_s0 + $0xb8] sm:$0xff]   ;;  %v1547_v19 = vld [vmem:[%s1882_s0 + $0xc0] sm:$0xff]   ;;  %v1548_v20 = vld [vmem:[%s1882_s0 + $0x48] sm:$0xff]  }
   0x8   :  { %v1549_v21 = vld [vmem:[%s1882_s0 + $0xc8] sm:$0xff]   ;;  %v1550_v22 = vld [vmem:[%s1882_s0 + $0x50] sm:$0xff]   ;;  %v1552_v24 = vld [vmem:[%s1882_s0 + $0x58] sm:$0xff]  }
   0x9   :  { %v1551_v23 = vld [vmem:[%s1882_s0 + $0xd0] sm:$0xff]   ;;  %v1553_v25 = vld [vmem:[%s1882_s0 + $0xd8] sm:$0xff]   ;;  %v1554_v26 = vld [vmem:[%s1882_s0 + $0x60] sm:$0xff]  }
   0xa   :  { %1461 = vmatmul.mubr.msk.bf16.vlgmr.msra.gmra.mrb[0].mxu0 %vm262_vm0, %v1532_v4  ;;  %1493 = vmatmul.mubr.msk.bf16.vlgmr.msra.gmra.mrb[0].mxu1 %vm262_vm0, %v1533_v5  ;;  %v1555_v27 = vld [vmem:[%s1882_s0 + $0xe0] sm:$0xff]   ;;  %v1556_v28 = vld [vmem:[%s1882_s0 + $0x68] sm:$0xff]   ;;  %v1558_v30 = vld [vmem:[%s1882_s0 + $0x70] sm:$0xff]  }
   0xb   :  { %1464 = vmatprep.mubr.msk.bf16.mxu0 %vm262_vm0, %v1534_v6  ;;  %1496 = vmatprep.mubr.msk.bf16.mxu1 %vm262_vm0, %v1535_v7  ;;  %v1557_v29 = vld [vmem:[%s1882_s0 + $0xe8] sm:$0xff]   ;;  %v1559_v31 = vld [vmem:[%s1882_s0 + $0xf0] sm:$0xff]   ;;  %v1560_v32 = vld [vmem:[%s1882_s0 + $0x78] sm:$0xff]  }
   0xc   :  { %v1561_v33 = vld [vmem:[%s1882_s0 + $0xf8] sm:$0xff]   ;;  %v1719_v34 = vld [vmem:[%s1883_s2] ss:$0 sm:$0xff] }
  0x12   :  { %1465 = vmatmul.mubr.msk.bf16.gmra.mrb[4].mxu0 %vm262_vm0, %v1536_v8  ;;  %1497 = vmatmul.mubr.msk.bf16.gmra.mrb[4].mxu1 %vm262_vm0, %v1537_v9 }
  0x13   :  { %1468 = vmatprep.mubr.msk.bf16.mxu0 %vm262_vm0, %v1538_v10  ;;  %1500 = vmatprep.mubr.msk.bf16.mxu1 %vm262_vm0, %v1539_v11 }
  0x1a   :  { %1469 = vmatmul.mubr.msk.bf16.gmra.mrb[8].mxu0 %vm262_vm0, %v1540_v12  ;;  %1501 = vmatmul.mubr.msk.bf16.gmra.mrb[8].mxu1 %vm262_vm0, %v1541_v13 }
  0x1b   :  { %1472 = vmatprep.mubr.msk.bf16.mxu0 %vm262_vm0, %v1542_v14  ;;  %1504 = vmatprep.mubr.msk.bf16.mxu1 %vm262_vm0, %v1543_v15 }
  0x22   :  { %1473 = vmatmul.mubr.msk.bf16.gmra.mrb[12].mxu0 %vm262_vm0, %v1544_v16  ;;  %1505 = vmatmul.mubr.msk.bf16.gmra.mrb[12].mxu1 %vm262_vm0, %v1545_v17 }
  0x23   :  { %1476 = vmatprep.mubr.msk.bf16.mxu0 %vm262_vm0, %v1546_v18  ;;  %1508 = vmatprep.mubr.msk.bf16.mxu1 %vm262_vm0, %v1547_v19 }
  0x2a   :  { %1477 = vmatmul.mubr.msk.bf16.gmra.mrb[16].mxu0 %vm262_vm0, %v1548_v20  ;;  %1509 = vmatmul.mubr.msk.bf16.gmra.mrb[16].mxu1 %vm262_vm0, %v1549_v21 }
  0x2b   :  { %1480 = vmatprep.mubr.msk.bf16.mxu0 %vm262_vm0, %v1550_v22  ;;  %1512 = vmatprep.mubr.msk.bf16.mxu1 %vm262_vm0, %v1551_v23 }
  0x32   :  { %1481 = vmatmul.mubr.msk.bf16.gmra.mrb[20].mxu0 %vm262_vm0, %v1552_v24  ;;  %1513 = vmatmul.mubr.msk.bf16.gmra.mrb[20].mxu1 %vm262_vm0, %v1553_v25 }
  0x33   :  { %1484 = vmatprep.mubr.msk.bf16.mxu0 %vm262_vm0, %v1554_v26  ;;  %1516 = vmatprep.mubr.msk.bf16.mxu1 %vm262_vm0, %v1555_v27 }
  0x3a   :  { %1485 = vmatmul.mubr.msk.bf16.gmra.mrb[24].mxu0 %vm262_vm0, %v1556_v28  ;;  %1517 = vmatmul.mubr.msk.bf16.gmra.mrb[24].mxu1 %vm262_vm0, %v1557_v29 }
  0x3b   :  { %1488 = vmatprep.mubr.msk.bf16.mxu0 %vm262_vm0, %v1558_v30  ;;  %1520 = vmatprep.mubr.msk.bf16.mxu1 %vm262_vm0, %v1559_v31 }
  0x42   :  { %1489 = vmatmul.mubr.msk.bf16.gmra.mrb[28].mxu0 %vm262_vm0, %v1560_v32  ;;  %1521 = vmatmul.mubr.msk.bf16.gmra.mrb[28].mxu1 %vm262_vm0, %v1561_v33 }
  0xdd   :  { %v1462_v35 = vpop.f32.mrb[0].mxu0  ;;  %v1494_v36 = vpop.f32.mrb[0].mxu1 }
  0xde   :  { %v402_v37 = vadd.f32 %v1462_v35, %v1719_v34  ;;  %v530_v38 = vadd.f32 %v1494_v36, %v1719_v34  ;;  %v393_v39 = vpop.f32.mrb[1].mxu0  ;;  %v521_v40 = vpop.f32.mrb[1].mxu1 }
  0xdf   :  { %v394_v41 = vadd.f32 %v1719_v34, %v393_v39  ;;  %v522_v42 = vadd.f32 %v1719_v34, %v521_v40  ;;  %v1463_v43 = vpop.f32.mrb[2].mxu0  ;;  %v1495_v44 = vpop.f32.mrb[2].mxu1 }
  0xe0   :  { %v405_v45 = vadd.f32 %v1463_v43, %v1719_v34  ;;  %v533_v46 = vadd.f32 %v1495_v44, %v1719_v34  ;;  %v396_v47 = vpop.f32.mrb[3].mxu0  ;;  %v524_v48 = vpop.f32.mrb[3].mxu1  ;;  %v650_v51 = vmax.f32 %v402_v37, 0.0  ;;  %v682_v52 = vmax.f32 %v530_v38, 0.0 }
  0xe1   :  { %v397_v49 = vadd.f32 %v1719_v34, %v396_v47  ;;  %v525_v50 = vadd.f32 %v1719_v34, %v524_v48  ;;  %v648_v55 = vmax.f32 %v394_v41, 0.0  ;;  %v680_v56 = vmax.f32 %v522_v42, 0.0 }
  0xe2   :  { %v651_v53 = vmax.f32 %v405_v45, 0.0  ;;  %v683_v54 = vmax.f32 %v533_v46, 0.0 }
  0xe3   :  { %v649_v57 = vmax.f32 %v397_v49, 0.0  ;;  %v681_v58 = vmax.f32 %v525_v50, 0.0 }
  0xe4   :  { %v1239_v59 = vpack.c.bf16 %v651_v53, %v650_v51  ;;  %v1319_v60 = vpack.c.bf16 %v683_v54, %v682_v52 }
  0xe5   :  { %v1234_v61 = vpack.c.bf16 %v649_v57, %v648_v55  ;;  %v1314_v62 = vpack.c.bf16 %v681_v58, %v680_v56  ;;  %v1466_v63 = vpop.f32.mrb[4].mxu0  ;;  %v1498_v0 = vpop.f32.mrb[4].mxu1 }
  0xe6   :  { %1391 = vst [vmem:[%s1884_s3 + $0x8] sm:$0xff] %v1239_v59   ;;  %1407 = vst [vmem:[%s1884_s3 + $0x88] sm:$0xff] %v1319_v60   ;;  %v418_v1 = vadd.f32 %v1466_v63, %v1719_v34  ;;  %v546_v2 = vadd.f32 %v1498_v0, %v1719_v34  ;;  %v409_v3 = vpop.f32.mrb[5].mxu0  ;;  %v537_v4 = vpop.f32.mrb[5].mxu1 }
  0xe7   :  { %1235 = vst [vmem:[%s1884_s3] sm:$0xff] %v1234_v61   ;;  %1406 = vst [vmem:[%s1884_s3 + $0x80] sm:$0xff] %v1314_v62   ;;  %v410_v5 = vadd.f32 %v1719_v34, %v409_v3  ;;  %v538_v6 = vadd.f32 %v1719_v34, %v537_v4  ;;  %v1467_v7 = vpop.f32.mrb[6].mxu0  ;;  %v1499_v8 = vpop.f32.mrb[6].mxu1 }
  0xe8   :  { %v421_v9 = vadd.f32 %v1467_v7, %v1719_v34  ;;  %v549_v10 = vadd.f32 %v1499_v8, %v1719_v34  ;;  %v412_v11 = vpop.f32.mrb[7].mxu0  ;;  %v540_v12 = vpop.f32.mrb[7].mxu1  ;;  %v654_v15 = vmax.f32 %v418_v1, 0.0  ;;  %v686_v16 = vmax.f32 %v546_v2, 0.0 }
  0xe9   :  { %v413_v13 = vadd.f32 %v1719_v34, %v412_v11  ;;  %v541_v14 = vadd.f32 %v1719_v34, %v540_v12  ;;  %v652_v19 = vmax.f32 %v410_v5, 0.0  ;;  %v684_v20 = vmax.f32 %v538_v6, 0.0 }
  0xea   :  { %v655_v17 = vmax.f32 %v421_v9, 0.0  ;;  %v687_v18 = vmax.f32 %v549_v10, 0.0 }
  0xeb   :  { %v653_v21 = vmax.f32 %v413_v13, 0.0  ;;  %v685_v22 = vmax.f32 %v541_v14, 0.0 }
  0xec   :  { %v1249_v23 = vpack.c.bf16 %v655_v17, %v654_v15  ;;  %v1329_v24 = vpack.c.bf16 %v687_v18, %v686_v16 }
  0xed   :  { %v1244_v25 = vpack.c.bf16 %v653_v21, %v652_v19  ;;  %v1324_v26 = vpack.c.bf16 %v685_v22, %v684_v20  ;;  %v1470_v27 = vpop.f32.mrb[8].mxu0  ;;  %v1502_v28 = vpop.f32.mrb[8].mxu1 }
  0xee   :  { %1393 = vst [vmem:[%s1884_s3 + $0x18] sm:$0xff] %v1249_v23   ;;  %1409 = vst [vmem:[%s1884_s3 + $0x98] sm:$0xff] %v1329_v24   ;;  %v434_v29 = vadd.f32 %v1470_v27, %v1719_v34  ;;  %v562_v30 = vadd.f32 %v1502_v28, %v1719_v34  ;;  %v425_v31 = vpop.f32.mrb[9].mxu0  ;;  %v553_v32 = vpop.f32.mrb[9].mxu1 }
  0xef   :  { %1392 = vst [vmem:[%s1884_s3 + $0x10] sm:$0xff] %v1244_v25   ;;  %1408 = vst [vmem:[%s1884_s3 + $0x90] sm:$0xff] %v1324_v26   ;;  %v426_v33 = vadd.f32 %v1719_v34, %v425_v31  ;;  %v554_v35 = vadd.f32 %v1719_v34, %v553_v32  ;;  %v1471_v36 = vpop.f32.mrb[10].mxu0  ;;  %v1503_v37 = vpop.f32.mrb[10].mxu1 }
  0xf0   :  { %v437_v38 = vadd.f32 %v1471_v36, %v1719_v34  ;;  %v565_v39 = vadd.f32 %v1503_v37, %v1719_v34  ;;  %v428_v40 = vpop.f32.mrb[11].mxu0  ;;  %v556_v41 = vpop.f32.mrb[11].mxu1  ;;  %v658_v44 = vmax.f32 %v434_v29, 0.0  ;;  %v690_v45 = vmax.f32 %v562_v30, 0.0 }
  0xf1   :  { %v429_v42 = vadd.f32 %v1719_v34, %v428_v40  ;;  %v557_v43 = vadd.f32 %v1719_v34, %v556_v41  ;;  %v656_v48 = vmax.f32 %v426_v33, 0.0  ;;  %v688_v49 = vmax.f32 %v554_v35, 0.0 }
  0xf2   :  { %v659_v46 = vmax.f32 %v437_v38, 0.0  ;;  %v691_v47 = vmax.f32 %v565_v39, 0.0 }
  0xf3   :  { %v657_v50 = vmax.f32 %v429_v42, 0.0  ;;  %v689_v51 = vmax.f32 %v557_v43, 0.0 }
  0xf4   :  { %v1259_v52 = vpack.c.bf16 %v659_v46, %v658_v44  ;;  %v1339_v53 = vpack.c.bf16 %v691_v47, %v690_v45 }
  0xf5   :  { %v1254_v54 = vpack.c.bf16 %v657_v50, %v656_v48  ;;  %v1334_v55 = vpack.c.bf16 %v689_v51, %v688_v49  ;;  %v1474_v56 = vpop.f32.mrb[12].mxu0  ;;  %v1506_v57 = vpop.f32.mrb[12].mxu1 }
  0xf6   :  { %1395 = vst [vmem:[%s1884_s3 + $0x28] sm:$0xff] %v1259_v52   ;;  %1411 = vst [vmem:[%s1884_s3 + $0xa8] sm:$0xff] %v1339_v53   ;;  %v450_v58 = vadd.f32 %v1474_v56, %v1719_v34  ;;  %v578_v59 = vadd.f32 %v1506_v57, %v1719_v34  ;;  %v441_v60 = vpop.f32.mrb[13].mxu0  ;;  %v569_v61 = vpop.f32.mrb[13].mxu1 }
  0xf7   :  { %1394 = vst [vmem:[%s1884_s3 + $0x20] sm:$0xff] %v1254_v54   ;;  %1410 = vst [vmem:[%s1884_s3 + $0xa0] sm:$0xff] %v1334_v55   ;;  %v442_v62 = vadd.f32 %v1719_v34, %v441_v60  ;;  %v570_v63 = vadd.f32 %v1719_v34, %v569_v61  ;;  %v1475_v0 = vpop.f32.mrb[14].mxu0  ;;  %v1507_v1 = vpop.f32.mrb[14].mxu1 }
  0xf8   :  { %v453_v2 = vadd.f32 %v1475_v0, %v1719_v34  ;;  %v581_v3 = vadd.f32 %v1507_v1, %v1719_v34  ;;  %v444_v4 = vpop.f32.mrb[15].mxu0  ;;  %v572_v5 = vpop.f32.mrb[15].mxu1  ;;  %v662_v8 = vmax.f32 %v450_v58, 0.0  ;;  %v694_v9 = vmax.f32 %v578_v59, 0.0 }
  0xf9   :  { %v445_v6 = vadd.f32 %v1719_v34, %v444_v4  ;;  %v573_v7 = vadd.f32 %v1719_v34, %v572_v5  ;;  %v660_v12 = vmax.f32 %v442_v62, 0.0  ;;  %v692_v13 = vmax.f32 %v570_v63, 0.0 }
  0xfa   :  { %v663_v10 = vmax.f32 %v453_v2, 0.0  ;;  %v695_v11 = vmax.f32 %v581_v3, 0.0 }
  0xfb   :  { %v661_v14 = vmax.f32 %v445_v6, 0.0  ;;  %v693_v15 = vmax.f32 %v573_v7, 0.0 }
  0xfc   :  { %v1269_v16 = vpack.c.bf16 %v663_v10, %v662_v8  ;;  %v1349_v17 = vpack.c.bf16 %v695_v11, %v694_v9 }
  0xfd   :  { %v1264_v18 = vpack.c.bf16 %v661_v14, %v660_v12  ;;  %v1344_v19 = vpack.c.bf16 %v693_v15, %v692_v13  ;;  %v1478_v20 = vpop.f32.mrb[16].mxu0  ;;  %v1510_v21 = vpop.f32.mrb[16].mxu1 }
  0xfe   :  { %1397 = vst [vmem:[%s1884_s3 + $0x38] sm:$0xff] %v1269_v16   ;;  %1413 = vst [vmem:[%s1884_s3 + $0xb8] sm:$0xff] %v1349_v17   ;;  %v466_v22 = vadd.f32 %v1478_v20, %v1719_v34  ;;  %v594_v23 = vadd.f32 %v1510_v21, %v1719_v34  ;;  %v457_v24 = vpop.f32.mrb[17].mxu0  ;;  %v585_v25 = vpop.f32.mrb[17].mxu1 }
  0xff   :  { %1396 = vst [vmem:[%s1884_s3 + $0x30] sm:$0xff] %v1264_v18   ;;  %1412 = vst [vmem:[%s1884_s3 + $0xb0] sm:$0xff] %v1344_v19   ;;  %v458_v26 = vadd.f32 %v1719_v34, %v457_v24  ;;  %v586_v27 = vadd.f32 %v1719_v34, %v585_v25  ;;  %v1479_v28 = vpop.f32.mrb[18].mxu0  ;;  %v1511_v29 = vpop.f32.mrb[18].mxu1 }
 0x100   :  { %v469_v30 = vadd.f32 %v1479_v28, %v1719_v34  ;;  %v597_v31 = vadd.f32 %v1511_v29, %v1719_v34  ;;  %v460_v32 = vpop.f32.mrb[19].mxu0  ;;  %v588_v33 = vpop.f32.mrb[19].mxu1  ;;  %v666_v37 = vmax.f32 %v466_v22, 0.0  ;;  %v698_v38 = vmax.f32 %v594_v23, 0.0 }
 0x101   :  { %v461_v35 = vadd.f32 %v1719_v34, %v460_v32  ;;  %v589_v36 = vadd.f32 %v1719_v34, %v588_v33  ;;  %v664_v41 = vmax.f32 %v458_v26, 0.0  ;;  %v696_v42 = vmax.f32 %v586_v27, 0.0 }
 0x102   :  { %v667_v39 = vmax.f32 %v469_v30, 0.0  ;;  %v699_v40 = vmax.f32 %v597_v31, 0.0 }
 0x103   :  { %v665_v43 = vmax.f32 %v461_v35, 0.0  ;;  %v697_v44 = vmax.f32 %v589_v36, 0.0 }
 0x104   :  { %v1279_v45 = vpack.c.bf16 %v667_v39, %v666_v37  ;;  %v1359_v46 = vpack.c.bf16 %v699_v40, %v698_v38 }
 0x105   :  { %v1274_v47 = vpack.c.bf16 %v665_v43, %v664_v41  ;;  %v1354_v48 = vpack.c.bf16 %v697_v44, %v696_v42  ;;  %v1482_v49 = vpop.f32.mrb[20].mxu0  ;;  %v1514_v50 = vpop.f32.mrb[20].mxu1 }
 0x106   :  { %1399 = vst [vmem:[%s1884_s3 + $0x48] sm:$0xff] %v1279_v45   ;;  %1415 = vst [vmem:[%s1884_s3 + $0xc8] sm:$0xff] %v1359_v46   ;;  %v482_v51 = vadd.f32 %v1482_v49, %v1719_v34  ;;  %v610_v52 = vadd.f32 %v1514_v50, %v1719_v34  ;;  %v473_v53 = vpop.f32.mrb[21].mxu0  ;;  %v601_v54 = vpop.f32.mrb[21].mxu1 }
 0x107   :  { %1398 = vst [vmem:[%s1884_s3 + $0x40] sm:$0xff] %v1274_v47   ;;  %1414 = vst [vmem:[%s1884_s3 + $0xc0] sm:$0xff] %v1354_v48   ;;  %v474_v55 = vadd.f32 %v1719_v34, %v473_v53  ;;  %v602_v56 = vadd.f32 %v1719_v34, %v601_v54  ;;  %v1483_v57 = vpop.f32.mrb[22].mxu0  ;;  %v1515_v58 = vpop.f32.mrb[22].mxu1 }
 0x108   :  { %v485_v59 = vadd.f32 %v1483_v57, %v1719_v34  ;;  %v613_v60 = vadd.f32 %v1515_v58, %v1719_v34  ;;  %v476_v61 = vpop.f32.mrb[23].mxu0  ;;  %v604_v62 = vpop.f32.mrb[23].mxu1  ;;  %v670_v1 = vmax.f32 %v482_v51, 0.0  ;;  %v702_v2 = vmax.f32 %v610_v52, 0.0 }
 0x109   :  { %v477_v63 = vadd.f32 %v1719_v34, %v476_v61  ;;  %v605_v0 = vadd.f32 %v1719_v34, %v604_v62  ;;  %v668_v5 = vmax.f32 %v474_v55, 0.0  ;;  %v700_v6 = vmax.f32 %v602_v56, 0.0 }
 0x10a   :  { %v671_v3 = vmax.f32 %v485_v59, 0.0  ;;  %v703_v4 = vmax.f32 %v613_v60, 0.0 }
 0x10b   :  { %v669_v7 = vmax.f32 %v477_v63, 0.0  ;;  %v701_v8 = vmax.f32 %v605_v0, 0.0 }
 0x10c   :  { %v1289_v9 = vpack.c.bf16 %v671_v3, %v670_v1  ;;  %v1369_v10 = vpack.c.bf16 %v703_v4, %v702_v2 }
 0x10d   :  { %v1284_v11 = vpack.c.bf16 %v669_v7, %v668_v5  ;;  %v1364_v12 = vpack.c.bf16 %v701_v8, %v700_v6  ;;  %v1486_v13 = vpop.f32.mrb[24].mxu0  ;;  %v1518_v14 = vpop.f32.mrb[24].mxu1 }
 0x10e   :  { %1401 = vst [vmem:[%s1884_s3 + $0x58] sm:$0xff] %v1289_v9   ;;  %1417 = vst [vmem:[%s1884_s3 + $0xd8] sm:$0xff] %v1369_v10   ;;  %v498_v15 = vadd.f32 %v1486_v13, %v1719_v34  ;;  %v626_v16 = vadd.f32 %v1518_v14, %v1719_v34  ;;  %v489_v17 = vpop.f32.mrb[25].mxu0  ;;  %v617_v18 = vpop.f32.mrb[25].mxu1 }
 0x10f   :  { %1400 = vst [vmem:[%s1884_s3 + $0x50] sm:$0xff] %v1284_v11   ;;  %1416 = vst [vmem:[%s1884_s3 + $0xd0] sm:$0xff] %v1364_v12   ;;  %v490_v19 = vadd.f32 %v1719_v34, %v489_v17  ;;  %v618_v20 = vadd.f32 %v1719_v34, %v617_v18  ;;  %v1487_v21 = vpop.f32.mrb[26].mxu0  ;;  %v1519_v22 = vpop.f32.mrb[26].mxu1 }
 0x110   :  { %v501_v23 = vadd.f32 %v1487_v21, %v1719_v34  ;;  %v629_v24 = vadd.f32 %v1519_v22, %v1719_v34  ;;  %v492_v25 = vpop.f32.mrb[27].mxu0  ;;  %v620_v26 = vpop.f32.mrb[27].mxu1  ;;  %v674_v29 = vmax.f32 %v498_v15, 0.0  ;;  %v706_v30 = vmax.f32 %v626_v16, 0.0 }
 0x111   :  { %v493_v27 = vadd.f32 %v1719_v34, %v492_v25  ;;  %v621_v28 = vadd.f32 %v1719_v34, %v620_v26  ;;  %v672_v33 = vmax.f32 %v490_v19, 0.0  ;;  %v704_v35 = vmax.f32 %v618_v20, 0.0 }
 0x112   :  { %v675_v31 = vmax.f32 %v501_v23, 0.0  ;;  %v707_v32 = vmax.f32 %v629_v24, 0.0 }
 0x113   :  { %v673_v36 = vmax.f32 %v493_v27, 0.0  ;;  %v705_v37 = vmax.f32 %v621_v28, 0.0 }
 0x114   :  { %v1299_v38 = vpack.c.bf16 %v675_v31, %v674_v29  ;;  %v1379_v39 = vpack.c.bf16 %v707_v32, %v706_v30 }
 0x115   :  { %v1294_v40 = vpack.c.bf16 %v673_v36, %v672_v33  ;;  %v1374_v41 = vpack.c.bf16 %v705_v37, %v704_v35  ;;  %v1490_v42 = vpop.f32.mrb[28].mxu0  ;;  %v1522_v43 = vpop.f32.mrb[28].mxu1 }
 0x116   :  { %1403 = vst [vmem:[%s1884_s3 + $0x68] sm:$0xff] %v1299_v38   ;;  %1419 = vst [vmem:[%s1884_s3 + $0xe8] sm:$0xff] %v1379_v39   ;;  %v514_v44 = vadd.f32 %v1490_v42, %v1719_v34  ;;  %v642_v45 = vadd.f32 %v1522_v43, %v1719_v34  ;;  %v505_v46 = vpop.f32.mrb[29].mxu0  ;;  %v633_v47 = vpop.f32.mrb[29].mxu1 }
 0x117   :  { %1402 = vst [vmem:[%s1884_s3 + $0x60] sm:$0xff] %v1294_v40   ;;  %1418 = vst [vmem:[%s1884_s3 + $0xe0] sm:$0xff] %v1374_v41   ;;  %v506_v48 = vadd.f32 %v1719_v34, %v505_v46  ;;  %v634_v49 = vadd.f32 %v1719_v34, %v633_v47  ;;  %v1491_v50 = vpop.f32.mrb[30].mxu0  ;;  %v1523_v51 = vpop.f32.mrb[30].mxu1 }
 0x118   :  { %v517_v52 = vadd.f32 %v1491_v50, %v1719_v34  ;;  %v645_v53 = vadd.f32 %v1523_v51, %v1719_v34  ;;  %v508_v54 = vpop.f32.mrb[31].mxu0  ;;  %v636_v55 = vpop.f32.mrb[31].mxu1  ;;  %v678_v58 = vmax.f32 %v514_v44, 0.0  ;;  %v710_v59 = vmax.f32 %v642_v45, 0.0 }
 0x119   :  { %v509_v56 = vadd.f32 %v1719_v34, %v508_v54  ;;  %v637_v57 = vadd.f32 %v1719_v34, %v636_v55  ;;  %v676_v62 = vmax.f32 %v506_v48, 0.0  ;;  %v708_v63 = vmax.f32 %v634_v49, 0.0 }
 0x11a   :  { %v679_v60 = vmax.f32 %v517_v52, 0.0  ;;  %v711_v61 = vmax.f32 %v645_v53, 0.0 }
 0x11b   :  { %v677_v0 = vmax.f32 %v509_v56, 0.0  ;;  %v709_v1 = vmax.f32 %v637_v57, 0.0 }
 0x11c   :  { %v1309_v2 = vpack.c.bf16 %v679_v60, %v678_v58  ;;  %v1389_v3 = vpack.c.bf16 %v711_v61, %v710_v59 }
 0x11d   :  { %v1304_v4 = vpack.c.bf16 %v677_v0, %v676_v62  ;;  %v1384_v5 = vpack.c.bf16 %v709_v1, %v708_v63 }
 0x11e   :  { %1405 = vst [vmem:[%s1884_s3 + $0x78] sm:$0xff] %v1309_v2   ;;  %1421 = vst [vmem:[%s1884_s3 + $0xf8] sm:$0xff] %v1389_v3  }
 0x11f   :  { %1404 = vst [vmem:[%s1884_s3 + $0x70] sm:$0xff] %v1304_v4   ;;  %1420 = vst [vmem:[%s1884_s3 + $0xf0] sm:$0xff] %v1384_v5  }

// kernel: _lambda_.41
= control target key start
LH: loop header
LB: loop body
LE: loop exit
PB: predicated region body
PF: predicated region fallthrough
CT: control target
= control target key end

     0   :  { %8 = vsyncpa [#allocation3], 0  ;;  %s607_s12 = smov [#allocation2]   ;;  %s766_s0 = inlined_call_operand.vmem [shape: bf16[128,144], index: 0, kind: input, shape index: {}]   ;;  %s767_s1 = inlined_call_operand.vmem [shape: bf16[144,128], index: 1, kind: input, shape index: {}]   ;;  %s768_s2 = inlined_call_operand.hbm [shape: f32[1,128], index: 2, kind: input, shape index: {}]   ;;  %s769_s3 = inlined_call_operand.vmem [shape: bf16[128,128], index: 3, kind: output, shape index: {}]  }
   0x1   :  { %s19_s13 = sshll.u32 %s607_s12, 4  ;;  %s583_s16 = scalar_lea.hbm %s768_s2, 16  ;;  %s20_s13 = int_to_ptr.vmem [resolvable:$true] %s19_s13 }
   0x2   :  { %p584_p0 = scmp.ne.s32.totalorder %s768_s2, %s583_s16  ;;  %p587_p1 = scmp.lt.u32.totalorder %s583_s16, %s768_s2 }
   0x4   :  { %p589_p2 = pnand %p587_p1, %p584_p0 }
   0x6   :  { %592 = shalt.err (!%p589_p2)
}
   0x7   :  { %s593_s21 = scalar_lea.vmem %s20_s13, 16  ;;  %s597_s22 = scalar_lea.vmem %s20_s13, 32 }
   0x8   :  { %p594_p3 = scmp.ne.s32.totalorder %s20_s13, %s593_s21  ;;  %p598_p4 = scmp.lt.s32.totalorder %s20_s13, %s20_s13 }
   0x9   :  { %p599_p5 = scmp.lt.s32.totalorder %s597_s22, %s593_s21 }
   0xb   :  { %p600_p6 = por %p599_p5, %p598_p4 }
   0xd   :  { %p601_p7 = pnand %p600_p6, %p594_p3 }
   0xf   :  { %604 = shalt.err (!%p601_p7)
}
  0x10   :  { %22 = dma.hbm_to_vmem [thread:$0]  %s768_s2, 16, %s20_s13, [#allocation3]  }
  0x11   :  { %605 = dma.done.wait [#allocation3], 16  }
  0x12   :  { %606 = vsyncadd [#allocation3], 4294967280  ;;  %v608_v0 = vmov 0   ;;  %v550_v1 = vld [vmem:[%s767_s1] sm:$0xff]   ;;  %v551_v2 = vld [vmem:[%s767_s1 + $0x8] sm:$0xff]   ;;  %vm194_vm0 = vcmask 130048  }
  0x13   :  { %219 = vmatprep.subr.bf16.mxu0 %v608_v0  ;;  %530 = vmatprep.subr.bf16.mxu1 %v608_v0  ;;  %v552_v3 = vld [vmem:[%s767_s1 + $0x10] sm:$0xff]   ;;  %v553_v4 = vld [vmem:[%s767_s1 + $0x18] sm:$0xff]   ;;  %v561_v5 = vld [vmem:[%s766_s0 + $0x4] ss:$8 sps:$4 sm:$0xff]  }
  0x14   :  { %220 = vmatpush1.bf16.msra.mxu0 %v550_v1  ;;  %539 = vmatpush1.bf16.msra.mxu1 %v550_v1  ;;  %v564_v6 = vld [vmem:[%s766_s0 + $0x44] ss:$8 sps:$4 sm:$0xff]   ;;  %v556_v9 = vld [vmem:[%s767_s1 + $0x30] sm:$0xff]   ;;  %v557_v10 = vld [vmem:[%s767_s1 + $0x38] sm:$0xff]  }
  0x15   :  { %221 = vmatprep.subr.bf16.mxu0 %v608_v0  ;;  %531 = vmatprep.subr.bf16.mxu1 %v608_v0  ;;  %v554_v7 = vld [vmem:[%s767_s1 + $0x20] sm:$0xff]   ;;  %v555_v8 = vld [vmem:[%s767_s1 + $0x28] sm:$0xff]   ;;  %v565_v14 = vld [vmem:[%s766_s0 + $0x14] ss:$8 sps:$4 sm:$0xff]  }
  0x16   :  { %443 = vmatprep.mubr.msk.bf16.mxu0 %vm194_vm0, %v561_v5  ;;  %447 = vmatprep.mubr.msk.bf16.mxu1 %vm194_vm0, %v564_v6  ;;  %v558_v11 = vld [vmem:[%s767_s1 + $0x40] sm:$0xff]   ;;  %v567_v15 = vld [vmem:[%s766_s0 + $0x54] ss:$8 sps:$4 sm:$0xff]   ;;  %v569_v16 = vld [vmem:[%s766_s0 + $0x10] ss:$8 sps:$4 sm:$0xff]  }
  0x17   :  { %v559_v12 = vld [vmem:[%s766_s0] ss:$8 sps:$4 sm:$0xff]   ;;  %v570_v17 = vld [vmem:[%s766_s0 + $0x50] ss:$8 sps:$4 sm:$0xff]   ;;  %v571_v18 = vld [vmem:[%s766_s0 + $0x24] ss:$8 sps:$4 sm:$0xff]  }
  0x18   :  { %222 = vmatpush1.bf16.msra.mxu0 %v551_v2  ;;  %540 = vmatpush1.bf16.msra.mxu1 %v551_v2  ;;  %v562_v13 = vld [vmem:[%s766_s0 + $0x40] ss:$8 sps:$4 sm:$0xff]   ;;  %v573_v19 = vld [vmem:[%s766_s0 + $0x64] ss:$8 sps:$4 sm:$0xff]   ;;  %v577_v22 = vld [vmem:[%s766_s0 + $0x34] ss:$8 sps:$4 sm:$0xff]  }
  0x19   :  { %223 = vmatprep.subr.bf16.mxu0 %v608_v0  ;;  %532 = vmatprep.subr.bf16.mxu1 %v608_v0  ;;  %v575_v20 = vld [vmem:[%s766_s0 + $0x20] ss:$8 sps:$4 sm:$0xff]   ;;  %v579_v23 = vld [vmem:[%s766_s0 + $0x74] ss:$8 sps:$4 sm:$0xff]   ;;  %v581_v24 = vld [vmem:[%s766_s0 + $0x30] ss:$8 sps:$4 sm:$0xff]  }
  0x1a   :  { %v576_v21 = vld [vmem:[%s766_s0 + $0x60] ss:$8 sps:$4 sm:$0xff]   ;;  %v582_v25 = vld [vmem:[%s766_s0 + $0x70] ss:$8 sps:$4 sm:$0xff]  }
  0x1b   :  { %v724_v26 = vld [vmem:[#allocation2] ss:$0 sm:$0xff] }
  0x1c   :  { %224 = vmatpush1.bf16.msra.mxu0 %v552_v3  ;;  %541 = vmatpush1.bf16.msra.mxu1 %v552_v3 }
  0x1d   :  { %225 = vmatprep.subr.bf16.mxu0 %v608_v0  ;;  %533 = vmatprep.subr.bf16.mxu1 %v608_v0 }
  0x20   :  { %226 = vmatpush1.bf16.msra.mxu0 %v553_v4  ;;  %542 = vmatpush1.bf16.msra.mxu1 %v553_v4 }
  0x21   :  { %227 = vmatprep.subr.bf16.mxu0 %v608_v0  ;;  %534 = vmatprep.subr.bf16.mxu1 %v608_v0 }
  0x24   :  { %228 = vmatpush1.bf16.msra.mxu0 %v554_v7  ;;  %543 = vmatpush1.bf16.msra.mxu1 %v554_v7 }
  0x25   :  { %229 = vmatprep.subr.bf16.mxu0 %v608_v0  ;;  %535 = vmatprep.subr.bf16.mxu1 %v608_v0 }
  0x28   :  { %230 = vmatpush1.bf16.msra.mxu0 %v555_v8  ;;  %544 = vmatpush1.bf16.msra.mxu1 %v555_v8 }
  0x29   :  { %231 = vmatprep.subr.bf16.mxu0 %v608_v0  ;;  %536 = vmatprep.subr.bf16.mxu1 %v608_v0 }
  0x2c   :  { %232 = vmatpush1.bf16.msra.mxu0 %v556_v9  ;;  %545 = vmatpush1.bf16.msra.mxu1 %v556_v9 }
  0x2d   :  { %233 = vmatprep.subr.bf16.mxu0 %v608_v0  ;;  %537 = vmatprep.subr.bf16.mxu1 %v608_v0 }
  0x30   :  { %234 = vmatpush1.bf16.msra.mxu0 %v557_v10  ;;  %546 = vmatpush1.bf16.msra.mxu1 %v557_v10 }
  0x31   :  { %235 = vmatprep.subr.bf16.mxu0 %v608_v0  ;;  %538 = vmatprep.subr.bf16.mxu1 %v608_v0 }
  0x34   :  { %236 = vmatpush1.bf16.msra.mxu0 %v558_v11  ;;  %547 = vmatpush1.bf16.msra.mxu1 %v558_v11 }
  0x37   :  { %252 = vmatmul.mubr.bf16.vlgmr.msra.gmra.mrb[0].mxu0 %v559_v12  ;;  %284 = vmatmul.mubr.bf16.vlgmr.msra.gmra.mrb[0].mxu1 %v562_v13 }
  0x38   :  { %444 = vmatprep.mubr.msk.bf16.mxu0 %vm194_vm0, %v565_v14  ;;  %448 = vmatprep.mubr.msk.bf16.mxu1 %vm194_vm0, %v567_v15 }
  0x3f   :  { %260 = vmatmul.mubr.bf16.gmra.mrb[4].mxu0 %v569_v16  ;;  %292 = vmatmul.mubr.bf16.gmra.mrb[4].mxu1 %v570_v17 }
  0x40   :  { %445 = vmatprep.mubr.msk.bf16.mxu0 %vm194_vm0, %v571_v18  ;;  %449 = vmatprep.mubr.msk.bf16.mxu1 %vm194_vm0, %v573_v19 }
  0x47   :  { %268 = vmatmul.mubr.bf16.gmra.mrb[8].mxu0 %v575_v20  ;;  %300 = vmatmul.mubr.bf16.gmra.mrb[8].mxu1 %v576_v21 }
  0x48   :  { %446 = vmatprep.mubr.msk.bf16.mxu0 %vm194_vm0, %v577_v22  ;;  %450 = vmatprep.mubr.msk.bf16.mxu1 %vm194_vm0, %v579_v23 }
  0x4f   :  { %276 = vmatmul.mubr.bf16.gmra.mrb[12].mxu0 %v581_v24  ;;  %308 = vmatmul.mubr.bf16.gmra.mrb[12].mxu1 %v582_v25 }
 0x10a   :  { %v253_v27 = vpop.f32.mrb[0].mxu0  ;;  %v285_v28 = vpop.f32.mrb[0].mxu1 }
 0x10b   :  { %v254_v29 = vadd.f32 %v724_v26, %v253_v27  ;;  %v286_v30 = vadd.f32 %v724_v26, %v285_v28  ;;  %v255_v31 = vpop.f32.mrb[1].mxu0  ;;  %v287_v32 = vpop.f32.mrb[1].mxu1 }
 0x10c   :  { %v256_v33 = vpop.f32.mrb[2].mxu0  ;;  %v288_v34 = vpop.f32.mrb[2].mxu1 }
 0x10d   :  { %v257_v35 = vadd.f32 %v724_v26, %v256_v33  ;;  %v289_v36 = vadd.f32 %v724_v26, %v288_v34  ;;  %v258_v37 = vpop.f32.mrb[3].mxu0  ;;  %v290_v38 = vpop.f32.mrb[3].mxu1  ;;  %v316_v39 = vmax.f32 %v254_v29, 0.0  ;;  %v324_v40 = vmax.f32 %v286_v30, 0.0 }
 0x10f   :  { %v317_v41 = vmax.f32 %v257_v35, 0.0  ;;  %v325_v42 = vmax.f32 %v289_v36, 0.0 }
 0x111   :  { %v486_v43 = vpack.c.bf16 %v317_v41, %v316_v39  ;;  %v506_v44 = vpack.c.bf16 %v325_v42, %v324_v40 }
 0x112   :  { %v261_v45 = vpop.f32.mrb[4].mxu0  ;;  %v293_v46 = vpop.f32.mrb[4].mxu1 }
 0x113   :  { %487 = vst [vmem:[%s769_s3] sm:$0xff] %v486_v43   ;;  %526 = vst [vmem:[%s769_s3 + $0x20] sm:$0xff] %v506_v44   ;;  %v262_v47 = vadd.f32 %v724_v26, %v261_v45  ;;  %v294_v48 = vadd.f32 %v724_v26, %v293_v46  ;;  %v263_v49 = vpop.f32.mrb[5].mxu0  ;;  %v295_v50 = vpop.f32.mrb[5].mxu1 }
 0x114   :  { %v264_v51 = vpop.f32.mrb[6].mxu0  ;;  %v296_v52 = vpop.f32.mrb[6].mxu1 }
 0x115   :  { %v265_v53 = vadd.f32 %v724_v26, %v264_v51  ;;  %v297_v54 = vadd.f32 %v724_v26, %v296_v52  ;;  %v266_v55 = vpop.f32.mrb[7].mxu0  ;;  %v298_v56 = vpop.f32.mrb[7].mxu1  ;;  %v318_v57 = vmax.f32 %v262_v47, 0.0  ;;  %v326_v58 = vmax.f32 %v294_v48, 0.0 }
 0x117   :  { %v319_v59 = vmax.f32 %v265_v53, 0.0  ;;  %v327_v60 = vmax.f32 %v297_v54, 0.0 }
 0x119   :  { %v491_v61 = vpack.c.bf16 %v319_v59, %v318_v57  ;;  %v511_v62 = vpack.c.bf16 %v327_v60, %v326_v58 }
 0x11a   :  { %v269_v63 = vpop.f32.mrb[8].mxu0  ;;  %v301_v0 = vpop.f32.mrb[8].mxu1 }
 0x11b   :  { %523 = vst [vmem:[%s769_s3 + $0x8] sm:$0xff] %v491_v61   ;;  %527 = vst [vmem:[%s769_s3 + $0x28] sm:$0xff] %v511_v62   ;;  %v270_v1 = vadd.f32 %v724_v26, %v269_v63  ;;  %v302_v2 = vadd.f32 %v724_v26, %v301_v0  ;;  %v271_v3 = vpop.f32.mrb[9].mxu0  ;;  %v303_v4 = vpop.f32.mrb[9].mxu1 }
 0x11c   :  { %v272_v5 = vpop.f32.mrb[10].mxu0  ;;  %v304_v6 = vpop.f32.mrb[10].mxu1 }
 0x11d   :  { %v273_v7 = vadd.f32 %v724_v26, %v272_v5  ;;  %v305_v8 = vadd.f32 %v724_v26, %v304_v6  ;;  %v274_v9 = vpop.f32.mrb[11].mxu0  ;;  %v306_v10 = vpop.f32.mrb[11].mxu1  ;;  %v320_v11 = vmax.f32 %v270_v1, 0.0  ;;  %v328_v12 = vmax.f32 %v302_v2, 0.0 }
 0x11f   :  { %v321_v13 = vmax.f32 %v273_v7, 0.0  ;;  %v329_v14 = vmax.f32 %v305_v8, 0.0 }
 0x121   :  { %v496_v15 = vpack.c.bf16 %v321_v13, %v320_v11  ;;  %v516_v16 = vpack.c.bf16 %v329_v14, %v328_v12 }
 0x122   :  { %v277_v17 = vpop.f32.mrb[12].mxu0  ;;  %v309_v18 = vpop.f32.mrb[12].mxu1 }
 0x123   :  { %524 = vst [vmem:[%s769_s3 + $0x10] sm:$0xff] %v496_v15   ;;  %528 = vst [vmem:[%s769_s3 + $0x30] sm:$0xff] %v516_v16   ;;  %v278_v19 = vadd.f32 %v724_v26, %v277_v17  ;;  %v310_v20 = vadd.f32 %v724_v26, %v309_v18  ;;  %v279_v21 = vpop.f32.mrb[13].mxu0  ;;  %v311_v22 = vpop.f32.mrb[13].mxu1 }
 0x124   :  { %v280_v23 = vpop.f32.mrb[14].mxu0  ;;  %v312_v24 = vpop.f32.mrb[14].mxu1 }
 0x125   :  { %v281_v25 = vadd.f32 %v724_v26, %v280_v23  ;;  %v313_v27 = vadd.f32 %v724_v26, %v312_v24  ;;  %v282_v28 = vpop.f32.mrb[15].mxu0  ;;  %v314_v29 = vpop.f32.mrb[15].mxu1  ;;  %v322_v30 = vmax.f32 %v278_v19, 0.0  ;;  %v330_v31 = vmax.f32 %v310_v20, 0.0 }
 0x127   :  { %v323_v32 = vmax.f32 %v281_v25, 0.0  ;;  %v331_v33 = vmax.f32 %v313_v27, 0.0 }
 0x129   :  { %v501_v34 = vpack.c.bf16 %v323_v32, %v322_v30  ;;  %v521_v35 = vpack.c.bf16 %v331_v33, %v330_v31 }
 0x12b   :  { %525 = vst [vmem:[%s769_s3 + $0x18] sm:$0xff] %v501_v34   ;;  %529 = vst [vmem:[%s769_s3 + $0x38] sm:$0xff] %v521_v35  }
 0x12c   :  { %416 = vsyncpa [#allocation3], 1 }

// kernel: _lambda_.42
= control target key start
LH: loop header
LB: loop body
LE: loop exit
PB: predicated region body
PF: predicated region fallthrough
CT: control target
= control target key end

     0   :  { %8 = vsyncpa [#allocation3], 0  ;;  %s480_s12 = smov [#allocation2]   ;;  %s575_s0 = inlined_call_operand.vmem [shape: bf16[128,32], index: 0, kind: input, shape index: {}]   ;;  %s576_s1 = inlined_call_operand.vmem [shape: bf16[32,128], index: 1, kind: input, shape index: {}]   ;;  %s577_s2 = inlined_call_operand.hbm [shape: f32[1,128], index: 2, kind: input, shape index: {}]   ;;  %s578_s3 = inlined_call_operand.vmem [shape: bf16[128,128], index: 3, kind: output, shape index: {}]  }
   0x1   :  { %s19_s13 = sshll.u32 %s480_s12, 4  ;;  %s456_s16 = scalar_lea.hbm %s577_s2, 16  ;;  %s20_s13 = int_to_ptr.vmem [resolvable:$true] %s19_s13 }
   0x2   :  { %p457_p0 = scmp.ne.s32.totalorder %s577_s2, %s456_s16  ;;  %p460_p1 = scmp.lt.u32.totalorder %s456_s16, %s577_s2 }
   0x4   :  { %p462_p2 = pnand %p460_p1, %p457_p0 }
   0x6   :  { %465 = shalt.err (!%p462_p2)
}
   0x7   :  { %s466_s21 = scalar_lea.vmem %s20_s13, 16  ;;  %s470_s22 = scalar_lea.vmem %s20_s13, 32 }
   0x8   :  { %p467_p3 = scmp.ne.s32.totalorder %s20_s13, %s466_s21  ;;  %p471_p4 = scmp.lt.s32.totalorder %s20_s13, %s20_s13 }
   0x9   :  { %p472_p5 = scmp.lt.s32.totalorder %s470_s22, %s466_s21 }
   0xb   :  { %p473_p6 = por %p472_p5, %p471_p4 }
   0xd   :  { %p474_p7 = pnand %p473_p6, %p467_p3 }
   0xf   :  { %477 = shalt.err (!%p474_p7)
}
  0x10   :  { %22 = dma.hbm_to_vmem [thread:$0]  %s577_s2, 16, %s20_s13, [#allocation3]  }
  0x11   :  { %478 = dma.done.wait [#allocation3], 16  }
  0x12   :  { %479 = vsyncadd [#allocation3], 4294967280  ;;  %v446_v0 = vld [vmem:[%s576_s1] sm:$0xff]   ;;  %v447_v1 = vld [vmem:[%s576_s1 + $0x8] sm:$0xff]   ;;  %vm106_vm0 = vcmask 261120  }
  0x13   :  { %421 = vmatprep.subr.bf16.mxu0 %v446_v0  ;;  %441 = vmatprep.subr.bf16.mxu1 %v446_v0  ;;  %v448_v2 = vld [vmem:[%s575_s0] sm:$0xff]   ;;  %v450_v4 = vld [vmem:[%s575_s0 + $0x8] sm:$0xff]   ;;  %v452_v6 = vld [vmem:[%s575_s0 + $0x10] sm:$0xff]  }
  0x14   :  { %422 = vmatpush3.bf16.msra.mxu0 %v446_v0  ;;  %443 = vmatpush3.bf16.msra.mxu1 %v446_v0  ;;  %v449_v3 = vld [vmem:[%s575_s0 + $0x20] sm:$0xff]   ;;  %v451_v5 = vld [vmem:[%s575_s0 + $0x28] sm:$0xff]   ;;  %v453_v7 = vld [vmem:[%s575_s0 + $0x30] sm:$0xff]  }
  0x15   :  { %423 = vmatprep.subr.bf16.mxu0 %v447_v1  ;;  %442 = vmatprep.subr.bf16.mxu1 %v447_v1  ;;  %v454_v8 = vld [vmem:[%s575_s0 + $0x18] sm:$0xff]   ;;  %v313_v11 = vld [vmem:[#allocation2] ss:$0 sm:$0xff] }
  0x16   :  { %425 = vmatprep.mubr.msk.bf16.mxu0 %vm106_vm0, %v448_v2  ;;  %433 = vmatprep.mubr.msk.bf16.mxu1 %vm106_vm0, %v449_v3  ;;  %v455_v9 = vld [vmem:[%s575_s0 + $0x38] sm:$0xff]  }
  0x18   :  { %424 = vmatpush3.bf16.msra.mxu0 %v447_v1  ;;  %444 = vmatpush3.bf16.msra.mxu1 %v447_v1 }
  0x1b   :  { %426 = vmatmul.mubr.msk.bf16.vlgmr.msra.gmra.mrb[0].mxu0 %vm106_vm0, %v450_v4  ;;  %434 = vmatmul.mubr.msk.bf16.vlgmr.msra.gmra.mrb[0].mxu1 %vm106_vm0, %v451_v5 }
  0x1c   :  { %429 = vmatprep.mubr.msk.bf16.mxu0 %vm106_vm0, %v452_v6  ;;  %437 = vmatprep.mubr.msk.bf16.mxu1 %vm106_vm0, %v453_v7 }
  0x23   :  { %430 = vmatmul.mubr.msk.bf16.gmra.mrb[4].mxu0 %vm106_vm0, %v454_v8  ;;  %438 = vmatmul.mubr.msk.bf16.gmra.mrb[4].mxu1 %vm106_vm0, %v455_v9 }
  0xee   :  { %v427_v10 = vpop.f32.mrb[0].mxu0  ;;  %v435_v12 = vpop.f32.mrb[0].mxu1 }
  0xef   :  { %v165_v13 = vpop.f32.mrb[1].mxu0  ;;  %v197_v14 = vpop.f32.mrb[1].mxu1  ;;  %v174_v17 = vadd.f32 %v427_v10, %v313_v11  ;;  %v206_v18 = vadd.f32 %v435_v12, %v313_v11 }
  0xf0   :  { %v428_v15 = vpop.f32.mrb[2].mxu0  ;;  %v436_v16 = vpop.f32.mrb[2].mxu1  ;;  %v166_v23 = vadd.f32 %v313_v11, %v165_v13  ;;  %v198_v24 = vadd.f32 %v313_v11, %v197_v14 }
  0xf1   :  { %v177_v19 = vadd.f32 %v428_v15, %v313_v11  ;;  %v209_v20 = vadd.f32 %v436_v16, %v313_v11  ;;  %v168_v21 = vpop.f32.mrb[3].mxu0  ;;  %v200_v22 = vpop.f32.mrb[3].mxu1 }
  0xf2   :  { %v169_v25 = vadd.f32 %v313_v11, %v168_v21  ;;  %v201_v26 = vadd.f32 %v313_v11, %v200_v22 }
  0xf3   :  { %v372_v27 = vpack.c.bf16 %v177_v19, %v174_v17  ;;  %v392_v28 = vpack.c.bf16 %v209_v20, %v206_v18 }
  0xf4   :  { %v367_v29 = vpack.c.bf16 %v169_v25, %v166_v23  ;;  %v387_v30 = vpack.c.bf16 %v201_v26, %v198_v24 }
  0xf5   :  { %404 = vst [vmem:[%s578_s3 + $0x8] sm:$0xff] %v372_v27   ;;  %408 = vst [vmem:[%s578_s3 + $0x28] sm:$0xff] %v392_v28  }
  0xf6   :  { %368 = vst [vmem:[%s578_s3] sm:$0xff] %v367_v29   ;;  %407 = vst [vmem:[%s578_s3 + $0x20] sm:$0xff] %v387_v30   ;;  %v431_v31 = vpop.f32.mrb[4].mxu0  ;;  %v439_v32 = vpop.f32.mrb[4].mxu1 }
  0xf7   :  { %v181_v33 = vpop.f32.mrb[5].mxu0  ;;  %v213_v34 = vpop.f32.mrb[5].mxu1  ;;  %v190_v37 = vadd.f32 %v431_v31, %v313_v11  ;;  %v222_v38 = vadd.f32 %v439_v32, %v313_v11 }
  0xf8   :  { %v432_v35 = vpop.f32.mrb[6].mxu0  ;;  %v440_v36 = vpop.f32.mrb[6].mxu1  ;;  %v182_v43 = vadd.f32 %v313_v11, %v181_v33  ;;  %v214_v44 = vadd.f32 %v313_v11, %v213_v34 }
  0xf9   :  { %v193_v39 = vadd.f32 %v432_v35, %v313_v11  ;;  %v225_v40 = vadd.f32 %v440_v36, %v313_v11  ;;  %v184_v41 = vpop.f32.mrb[7].mxu0  ;;  %v216_v42 = vpop.f32.mrb[7].mxu1 }
  0xfa   :  { %v185_v45 = vadd.f32 %v313_v11, %v184_v41  ;;  %v217_v46 = vadd.f32 %v313_v11, %v216_v42 }
  0xfb   :  { %v382_v47 = vpack.c.bf16 %v193_v39, %v190_v37  ;;  %v402_v48 = vpack.c.bf16 %v225_v40, %v222_v38 }
  0xfc   :  { %v377_v49 = vpack.c.bf16 %v185_v45, %v182_v43  ;;  %v397_v50 = vpack.c.bf16 %v217_v46, %v214_v44 }
  0xfd   :  { %406 = vst [vmem:[%s578_s3 + $0x18] sm:$0xff] %v382_v47   ;;  %410 = vst [vmem:[%s578_s3 + $0x38] sm:$0xff] %v402_v48  }
  0xfe   :  { %405 = vst [vmem:[%s578_s3 + $0x10] sm:$0xff] %v377_v49   ;;  %409 = vst [vmem:[%s578_s3 + $0x30] sm:$0xff] %v397_v50  }
  0xff   :  { %312 = vsyncpa [#allocation3], 1 }

// kernel: _lambda_.44
= control target key start
LH: loop header
LB: loop body
LE: loop exit
PB: predicated region body
PF: predicated region fallthrough
CT: control target
= control target key end

     0   :  { %8 = vsyncpa [#allocation3], 0  ;;  %s526_s12 = smov [#allocation2]   ;;  %s627_s0 = inlined_call_operand.vmem [shape: bf16[128,64], index: 0, kind: input, shape index: {}]   ;;  %s628_s1 = inlined_call_operand.vmem [shape: bf16[64,128], index: 1, kind: input, shape index: {}]   ;;  %s629_s2 = inlined_call_operand.hbm [shape: f32[1,128], index: 2, kind: input, shape index: {}]   ;;  %s630_s3 = inlined_call_operand.vmem [shape: bf16[128,128], index: 3, kind: output, shape index: {}]  }
   0x1   :  { %s19_s13 = sshll.u32 %s526_s12, 4  ;;  %s502_s16 = scalar_lea.hbm %s629_s2, 16  ;;  %s20_s13 = int_to_ptr.vmem [resolvable:$true] %s19_s13 }
   0x2   :  { %p503_p0 = scmp.ne.s32.totalorder %s629_s2, %s502_s16  ;;  %p506_p1 = scmp.lt.u32.totalorder %s502_s16, %s629_s2 }
   0x4   :  { %p508_p2 = pnand %p506_p1, %p503_p0 }
   0x6   :  { %511 = shalt.err (!%p508_p2)
}
   0x7   :  { %s512_s21 = scalar_lea.vmem %s20_s13, 16  ;;  %s516_s22 = scalar_lea.vmem %s20_s13, 32 }
   0x8   :  { %p513_p3 = scmp.ne.s32.totalorder %s20_s13, %s512_s21  ;;  %p517_p4 = scmp.lt.s32.totalorder %s20_s13, %s20_s13 }
   0x9   :  { %p518_p5 = scmp.lt.s32.totalorder %s516_s22, %s512_s21 }
   0xb   :  { %p519_p6 = por %p518_p5, %p517_p4 }
   0xd   :  { %p520_p7 = pnand %p519_p6, %p513_p3 }
   0xf   :  { %523 = shalt.err (!%p520_p7)
}
  0x10   :  { %22 = dma.hbm_to_vmem [thread:$0]  %s629_s2, 16, %s20_s13, [#allocation3]  }
  0x11   :  { %524 = dma.done.wait [#allocation3], 16  }
  0x12   :  { %525 = vsyncadd [#allocation3], 4294967280  ;;  %v490_v0 = vld [vmem:[%s628_s1] sm:$0xff]   ;;  %v491_v1 = vld [vmem:[%s628_s1 + $0x8] sm:$0xff]   ;;  %vm122_vm0 = vcmask 523264  }
  0x13   :  { %457 = vmatprep.subr.bf16.mxu0 %v490_v0  ;;  %481 = vmatprep.subr.bf16.mxu1 %v490_v0  ;;  %v492_v2 = vld [vmem:[%s628_s1 + $0x10] sm:$0xff]   ;;  %v494_v3 = vld [vmem:[%s627_s0] sm:$0xff]   ;;  %v493_v5 = vld [vmem:[%s628_s1 + $0x18] sm:$0xff]  }
  0x14   :  { %458 = vmatpush3.bf16.msra.mxu0 %v490_v0  ;;  %485 = vmatpush3.bf16.msra.mxu1 %v490_v0  ;;  %v495_v4 = vld [vmem:[%s627_s0 + $0x20] sm:$0xff]   ;;  %v496_v6 = vld [vmem:[%s627_s0 + $0x8] sm:$0xff]   ;;  %v498_v8 = vld [vmem:[%s627_s0 + $0x10] sm:$0xff]  }
  0x15   :  { %459 = vmatprep.subr.bf16.mxu0 %v491_v1  ;;  %482 = vmatprep.subr.bf16.mxu1 %v491_v1  ;;  %v497_v7 = vld [vmem:[%s627_s0 + $0x28] sm:$0xff]   ;;  %v499_v9 = vld [vmem:[%s627_s0 + $0x30] sm:$0xff]   ;;  %v500_v10 = vld [vmem:[%s627_s0 + $0x18] sm:$0xff]  }
  0x16   :  { %465 = vmatprep.mubr.msk.bf16.mxu0 %vm122_vm0, %v494_v3  ;;  %473 = vmatprep.mubr.msk.bf16.mxu1 %vm122_vm0, %v495_v4  ;;  %v501_v11 = vld [vmem:[%s627_s0 + $0x38] sm:$0xff]   ;;  %v345_v12 = vld [vmem:[#allocation2] ss:$0 sm:$0xff] }
  0x18   :  { %460 = vmatpush3.bf16.msra.mxu0 %v491_v1  ;;  %486 = vmatpush3.bf16.msra.mxu1 %v491_v1 }
  0x19   :  { %461 = vmatprep.subr.bf16.mxu0 %v492_v2  ;;  %483 = vmatprep.subr.bf16.mxu1 %v492_v2 }
  0x1c   :  { %462 = vmatpush3.bf16.msra.mxu0 %v492_v2  ;;  %487 = vmatpush3.bf16.msra.mxu1 %v492_v2 }
  0x1d   :  { %463 = vmatprep.subr.bf16.mxu0 %v493_v5  ;;  %484 = vmatprep.subr.bf16.mxu1 %v493_v5 }
  0x20   :  { %464 = vmatpush3.bf16.msra.mxu0 %v493_v5  ;;  %488 = vmatpush3.bf16.msra.mxu1 %v493_v5 }
  0x23   :  { %466 = vmatmul.mubr.msk.bf16.vlgmr.msra.gmra.mrb[0].mxu0 %vm122_vm0, %v496_v6  ;;  %474 = vmatmul.mubr.msk.bf16.vlgmr.msra.gmra.mrb[0].mxu1 %vm122_vm0, %v497_v7 }
  0x24   :  { %469 = vmatprep.mubr.msk.bf16.mxu0 %vm122_vm0, %v498_v8  ;;  %477 = vmatprep.mubr.msk.bf16.mxu1 %vm122_vm0, %v499_v9 }
  0x2b   :  { %470 = vmatmul.mubr.msk.bf16.gmra.mrb[4].mxu0 %vm122_vm0, %v500_v10  ;;  %478 = vmatmul.mubr.msk.bf16.gmra.mrb[4].mxu1 %vm122_vm0, %v501_v11 }
  0xf6   :  { %v467_v13 = vpop.f32.mrb[0].mxu0  ;;  %v475_v14 = vpop.f32.mrb[0].mxu1 }
  0xf7   :  { %v190_v15 = vadd.f32 %v467_v13, %v345_v12  ;;  %v222_v16 = vadd.f32 %v475_v14, %v345_v12  ;;  %v181_v17 = vpop.f32.mrb[1].mxu0  ;;  %v213_v18 = vpop.f32.mrb[1].mxu1 }
  0xf8   :  { %v182_v19 = vadd.f32 %v345_v12, %v181_v17  ;;  %v214_v20 = vadd.f32 %v345_v12, %v213_v18  ;;  %v468_v21 = vpop.f32.mrb[2].mxu0  ;;  %v476_v22 = vpop.f32.mrb[2].mxu1 }
  0xf9   :  { %v193_v23 = vadd.f32 %v468_v21, %v345_v12  ;;  %v225_v24 = vadd.f32 %v476_v22, %v345_v12  ;;  %v184_v25 = vpop.f32.mrb[3].mxu0  ;;  %v216_v26 = vpop.f32.mrb[3].mxu1  ;;  %v246_v29 = vmax.f32 %v190_v15, 0.0  ;;  %v254_v30 = vmax.f32 %v222_v16, 0.0 }
  0xfa   :  { %v185_v27 = vadd.f32 %v345_v12, %v184_v25  ;;  %v217_v28 = vadd.f32 %v345_v12, %v216_v26  ;;  %v244_v33 = vmax.f32 %v182_v19, 0.0  ;;  %v252_v34 = vmax.f32 %v214_v20, 0.0 }
  0xfb   :  { %v247_v31 = vmax.f32 %v193_v23, 0.0  ;;  %v255_v32 = vmax.f32 %v225_v24, 0.0 }
  0xfc   :  { %v245_v35 = vmax.f32 %v185_v27, 0.0  ;;  %v253_v36 = vmax.f32 %v217_v28, 0.0 }
  0xfd   :  { %v406_v37 = vpack.c.bf16 %v247_v31, %v246_v29  ;;  %v426_v38 = vpack.c.bf16 %v255_v32, %v254_v30 }
  0xfe   :  { %v401_v39 = vpack.c.bf16 %v245_v35, %v244_v33  ;;  %v421_v40 = vpack.c.bf16 %v253_v36, %v252_v34  ;;  %v471_v41 = vpop.f32.mrb[4].mxu0  ;;  %v479_v42 = vpop.f32.mrb[4].mxu1 }
  0xff   :  { %438 = vst [vmem:[%s630_s3 + $0x8] sm:$0xff] %v406_v37   ;;  %442 = vst [vmem:[%s630_s3 + $0x28] sm:$0xff] %v426_v38   ;;  %v206_v43 = vadd.f32 %v471_v41, %v345_v12  ;;  %v238_v44 = vadd.f32 %v479_v42, %v345_v12  ;;  %v197_v45 = vpop.f32.mrb[5].mxu0  ;;  %v229_v46 = vpop.f32.mrb[5].mxu1 }
 0x100   :  { %402 = vst [vmem:[%s630_s3] sm:$0xff] %v401_v39   ;;  %441 = vst [vmem:[%s630_s3 + $0x20] sm:$0xff] %v421_v40   ;;  %v198_v47 = vadd.f32 %v345_v12, %v197_v45  ;;  %v230_v48 = vadd.f32 %v345_v12, %v229_v46  ;;  %v472_v49 = vpop.f32.mrb[6].mxu0  ;;  %v480_v50 = vpop.f32.mrb[6].mxu1 }
 0x101   :  { %v209_v51 = vadd.f32 %v472_v49, %v345_v12  ;;  %v241_v52 = vadd.f32 %v480_v50, %v345_v12  ;;  %v200_v53 = vpop.f32.mrb[7].mxu0  ;;  %v232_v54 = vpop.f32.mrb[7].mxu1  ;;  %v250_v57 = vmax.f32 %v206_v43, 0.0  ;;  %v258_v58 = vmax.f32 %v238_v44, 0.0 }
 0x102   :  { %v201_v55 = vadd.f32 %v345_v12, %v200_v53  ;;  %v233_v56 = vadd.f32 %v345_v12, %v232_v54  ;;  %v248_v61 = vmax.f32 %v198_v47, 0.0  ;;  %v256_v62 = vmax.f32 %v230_v48, 0.0 }
 0x103   :  { %v251_v59 = vmax.f32 %v209_v51, 0.0  ;;  %v259_v60 = vmax.f32 %v241_v52, 0.0 }
 0x104   :  { %v249_v63 = vmax.f32 %v201_v55, 0.0  ;;  %v257_v0 = vmax.f32 %v233_v56, 0.0 }
 0x105   :  { %v416_v1 = vpack.c.bf16 %v251_v59, %v250_v57  ;;  %v436_v2 = vpack.c.bf16 %v259_v60, %v258_v58 }
 0x106   :  { %v411_v3 = vpack.c.bf16 %v249_v63, %v248_v61  ;;  %v431_v4 = vpack.c.bf16 %v257_v0, %v256_v62 }
 0x107   :  { %440 = vst [vmem:[%s630_s3 + $0x18] sm:$0xff] %v416_v1   ;;  %444 = vst [vmem:[%s630_s3 + $0x38] sm:$0xff] %v436_v2  }
 0x108   :  { %439 = vst [vmem:[%s630_s3 + $0x10] sm:$0xff] %v411_v3   ;;  %443 = vst [vmem:[%s630_s3 + $0x30] sm:$0xff] %v431_v4  }
 0x109   :  { %344 = vsyncpa [#allocation3], 1 }

// kernel: _lambda_.43
= control target key start
LH: loop header
LB: loop body
LE: loop exit
PB: predicated region body
PF: predicated region fallthrough
CT: control target
= control target key end

     0   :  { %9 = vsyncpa [#allocation3], 0  ;;  %s571_s15 = smov [#allocation2]   ;;  %s726_s0 = inlined_call_operand.vmem [shape: bf16[128,16], index: 0, kind: input, shape index: {}]   ;;  %s727_s1 = inlined_call_operand.vmem [shape: bf16[16,128], index: 1, kind: input, shape index: {}]   ;;  %s728_s2 = inlined_call_operand.hbm [shape: f32[1,128], index: 2, kind: input, shape index: {}]   ;;  %s729_s3 = inlined_call_operand.vmem [shape: bf16[128,128], index: 3, kind: input, shape index: {}]   ;;  %s730_s4 = inlined_call_operand.vmem [shape: bf16[128,128], index: 4, kind: output, shape index: {}]  }
   0x1   :  { %s20_s16 = sshll.u32 %s571_s15, 4  ;;  %s547_s19 = scalar_lea.hbm %s728_s2, 16  ;;  %s21_s16 = int_to_ptr.vmem [resolvable:$true] %s20_s16 }
   0x2   :  { %p548_p0 = scmp.ne.s32.totalorder %s728_s2, %s547_s19  ;;  %p551_p1 = scmp.lt.u32.totalorder %s547_s19, %s728_s2 }
   0x4   :  { %p553_p2 = pnand %p551_p1, %p548_p0 }
   0x6   :  { %556 = shalt.err (!%p553_p2)
}
   0x7   :  { %s557_s24 = scalar_lea.vmem %s21_s16, 16  ;;  %s561_s25 = scalar_lea.vmem %s21_s16, 32 }
   0x8   :  { %p558_p3 = scmp.ne.s32.totalorder %s21_s16, %s557_s24  ;;  %p562_p4 = scmp.lt.s32.totalorder %s21_s16, %s21_s16 }
   0x9   :  { %p563_p5 = scmp.lt.s32.totalorder %s561_s25, %s557_s24 }
   0xb   :  { %p564_p6 = por %p563_p5, %p562_p4 }
   0xd   :  { %p565_p7 = pnand %p564_p6, %p558_p3 }
   0xf   :  { %568 = shalt.err (!%p565_p7)
}
  0x10   :  { %23 = dma.hbm_to_vmem [thread:$0]  %s728_s2, 16, %s21_s16, [#allocation3]  }
  0x11   :  { %569 = dma.done.wait [#allocation3], 16  }
  0x12   :  { %570 = vsyncadd [#allocation3], 4294967280  ;;  %v538_v0 = vld [vmem:[%s727_s1] sm:$0xff]   ;;  %vm101_vm0 = vcmask 130048   ;;  %v541_v3 = vld [vmem:[%s726_s0 + $0x8] sm:$0xff]  }
  0x13   :  { %v539_v1 = vld [vmem:[%s726_s0] sm:$0xff]   ;;  %517 = vmatprep.subr.bf16.mxu0 %v538_v0  ;;  %535 = vmatprep.subr.bf16.mxu1 %v538_v0  ;;  %v542_v4 = vld [vmem:[%s726_s0 + $0x28] sm:$0xff]   ;;  %v543_v5 = vld [vmem:[%s726_s0 + $0x10] sm:$0xff]  }
  0x14   :  { %v540_v2 = vld [vmem:[%s726_s0 + $0x20] sm:$0xff]   ;;  %518 = vmatpush3.bf16.msra.mxu0 %v538_v0  ;;  %536 = vmatpush3.bf16.msra.mxu1 %v538_v0  ;;  %v544_v6 = vld [vmem:[%s726_s0 + $0x30] sm:$0xff]   ;;  %v545_v7 = vld [vmem:[%s726_s0 + $0x18] sm:$0xff]  }
  0x15   :  { %519 = vmatprep.mubr.msk.bf16.mxu0 %vm101_vm0, %v539_v1  ;;  %527 = vmatprep.mubr.msk.bf16.mxu1 %vm101_vm0, %v540_v2  ;;  %v546_v8 = vld [vmem:[%s726_s0 + $0x38] sm:$0xff]   ;;  %v494_v9 = vld [vmem:[%s729_s3 + $0x8] sm:$0xff]   ;;  %v423_v11 = vld [vmem:[%s729_s3] sm:$0xff]  }
  0x16   :  { %v498_v10 = vld [vmem:[%s729_s3 + $0x28] sm:$0xff]   ;;  %v497_v12 = vld [vmem:[%s729_s3 + $0x20] sm:$0xff]   ;;  %v661_v14 = vld [vmem:[%s729_s3 + $0x18] sm:$0xff]   ;;  %v428_v16 = vunpack.c.l.bf16 %v494_v9  ;;  %v424_v18 = vunpack.c.l.bf16 %v423_v11  ;;  %v429_v24 = vunpack.c.h.bf16 %v494_v9  ;;  %v425_v26 = vunpack.c.h.bf16 %v423_v11 }
  0x17   :  { %520 = vmatmul.mubr.msk.bf16.vlgmr.msra.gmra.mrb[0].mxu0 %vm101_vm0, %v541_v3  ;;  %528 = vmatmul.mubr.msk.bf16.vlgmr.msra.gmra.mrb[0].mxu1 %vm101_vm0, %v542_v4  ;;  %v656_v13 = vld [vmem:[#allocation2] ss:$0 sm:$0xff]  ;;  %v666_v15 = vld [vmem:[%s729_s3 + $0x38] sm:$0xff]   ;;  %v444_v17 = vunpack.c.l.bf16 %v498_v10  ;;  %v440_v19 = vunpack.c.l.bf16 %v497_v12  ;;  %v671_v20 = vld [vmem:[%s729_s3 + $0x10] sm:$0xff]   ;;  %v445_v25 = vunpack.c.h.bf16 %v498_v10  ;;  %v441_v27 = vunpack.c.h.bf16 %v497_v12 }
  0x18   :  { %523 = vmatprep.mubr.msk.bf16.mxu0 %vm101_vm0, %v543_v5  ;;  %531 = vmatprep.mubr.msk.bf16.mxu1 %vm101_vm0, %v544_v6  ;;  %v676_v21 = vld [vmem:[%s729_s3 + $0x30] sm:$0xff]   ;;  %v436_v32 = vunpack.c.l.bf16 %v661_v14  ;;  %v452_v33 = vunpack.c.l.bf16 %v666_v15  ;;  %v432_v38 = vunpack.c.l.bf16 %v671_v20  ;;  %v437_v52 = vunpack.c.h.bf16 %v661_v14 }
  0x19   :  { %v448_v39 = vunpack.c.l.bf16 %v676_v21  ;;  %v453_v53 = vunpack.c.h.bf16 %v666_v15  ;;  %v433_v56 = vunpack.c.h.bf16 %v671_v20  ;;  %v449_v57 = vunpack.c.h.bf16 %v676_v21 }
  0x1f   :  { %524 = vmatmul.mubr.msk.bf16.gmra.mrb[4].mxu0 %vm101_vm0, %v545_v7  ;;  %532 = vmatmul.mubr.msk.bf16.gmra.mrb[4].mxu1 %vm101_vm0, %v546_v8 }
  0xea   :  { %v521_v22 = vpop.f32.mrb[0].mxu0  ;;  %v529_v23 = vpop.f32.mrb[0].mxu1 }
  0xeb   :  { %v169_v28 = vadd.f32 %v521_v22, %v656_v13  ;;  %v201_v29 = vadd.f32 %v529_v23, %v656_v13  ;;  %v160_v30 = vpop.f32.mrb[1].mxu0  ;;  %v192_v31 = vpop.f32.mrb[1].mxu1 }
  0xec   :  { %v161_v34 = vadd.f32 %v656_v13, %v160_v30  ;;  %v193_v35 = vadd.f32 %v656_v13, %v192_v31  ;;  %v522_v36 = vpop.f32.mrb[2].mxu0  ;;  %v530_v37 = vpop.f32.mrb[2].mxu1 }
  0xed   :  { %v257_v40 = vadd.f32 %v428_v16, %v169_v28  ;;  %v265_v41 = vadd.f32 %v444_v17, %v201_v29  ;;  %v172_v42 = vadd.f32 %v522_v36, %v656_v13  ;;  %v204_v43 = vadd.f32 %v530_v37, %v656_v13  ;;  %v163_v44 = vpop.f32.mrb[3].mxu0  ;;  %v195_v45 = vpop.f32.mrb[3].mxu1 }
  0xee   :  { %v255_v46 = vadd.f32 %v424_v18, %v161_v34  ;;  %v263_v47 = vadd.f32 %v440_v19, %v193_v35  ;;  %v164_v48 = vadd.f32 %v656_v13, %v163_v44  ;;  %v196_v49 = vadd.f32 %v656_v13, %v195_v45 }
  0xef   :  { %v258_v50 = vadd.f32 %v429_v24, %v172_v42  ;;  %v266_v51 = vadd.f32 %v445_v25, %v204_v43  ;;  %v273_v58 = vmax.f32 %v257_v40, 0.0  ;;  %v281_v59 = vmax.f32 %v265_v41, 0.0 }
  0xf0   :  { %v256_v54 = vadd.f32 %v425_v26, %v164_v48  ;;  %v264_v55 = vadd.f32 %v441_v27, %v196_v49  ;;  %v271_v62 = vmax.f32 %v255_v46, 0.0  ;;  %v279_v63 = vmax.f32 %v263_v47, 0.0 }
  0xf1   :  { %v274_v60 = vmax.f32 %v258_v50, 0.0  ;;  %v282_v61 = vmax.f32 %v266_v51, 0.0 }
  0xf2   :  { %v272_v0 = vmax.f32 %v256_v54, 0.0  ;;  %v280_v1 = vmax.f32 %v264_v55, 0.0  ;;  %v525_v2 = vpop.f32.mrb[4].mxu0  ;;  %v533_v3 = vpop.f32.mrb[4].mxu1 }
  0xf3   :  { %v462_v4 = vpack.c.bf16 %v274_v60, %v273_v58  ;;  %v482_v5 = vpack.c.bf16 %v282_v61, %v281_v59  ;;  %v185_v6 = vadd.f32 %v525_v2, %v656_v13  ;;  %v217_v7 = vadd.f32 %v533_v3, %v656_v13  ;;  %v176_v8 = vpop.f32.mrb[5].mxu0  ;;  %v208_v9 = vpop.f32.mrb[5].mxu1 }
  0xf4   :  { %v457_v10 = vpack.c.bf16 %v272_v0, %v271_v62  ;;  %v477_v11 = vpack.c.bf16 %v280_v1, %v279_v63  ;;  %v177_v12 = vadd.f32 %v656_v13, %v176_v8  ;;  %v209_v14 = vadd.f32 %v656_v13, %v208_v9  ;;  %v526_v15 = vpop.f32.mrb[6].mxu0  ;;  %v534_v16 = vpop.f32.mrb[6].mxu1 }
  0xf5   :  { %501 = vst [vmem:[%s730_s4 + $0x8] sm:$0xff] %v462_v4   ;;  %505 = vst [vmem:[%s730_s4 + $0x28] sm:$0xff] %v482_v5   ;;  %v261_v17 = vadd.f32 %v436_v32, %v185_v6  ;;  %v269_v18 = vadd.f32 %v452_v33, %v217_v7  ;;  %v188_v19 = vadd.f32 %v526_v15, %v656_v13  ;;  %v179_v21 = vpop.f32.mrb[7].mxu0  ;;  %v211_v22 = vpop.f32.mrb[7].mxu1 }
  0xf6   :  { %v220_v20 = vadd.f32 %v534_v16, %v656_v13  ;;  %458 = vst [vmem:[%s730_s4] sm:$0xff] %v457_v10   ;;  %504 = vst [vmem:[%s730_s4 + $0x20] sm:$0xff] %v477_v11   ;;  %v259_v23 = vadd.f32 %v432_v38, %v177_v12  ;;  %v267_v24 = vadd.f32 %v448_v39, %v209_v14 }
  0xf7   :  { %v180_v25 = vadd.f32 %v656_v13, %v179_v21  ;;  %v212_v26 = vadd.f32 %v656_v13, %v211_v22  ;;  %v262_v27 = vadd.f32 %v437_v52, %v188_v19  ;;  %v277_v31 = vmax.f32 %v261_v17, 0.0 }
  0xf8   :  { %v270_v28 = vadd.f32 %v453_v53, %v220_v20  ;;  %v285_v32 = vmax.f32 %v269_v18, 0.0  ;;  %v275_v35 = vmax.f32 %v259_v23, 0.0  ;;  %v283_v36 = vmax.f32 %v267_v24, 0.0 }
  0xf9   :  { %v260_v29 = vadd.f32 %v433_v56, %v180_v25  ;;  %v268_v30 = vadd.f32 %v449_v57, %v212_v26  ;;  %v278_v33 = vmax.f32 %v262_v27, 0.0 }
  0xfa   :  { %v286_v34 = vmax.f32 %v270_v28, 0.0 }
  0xfb   :  { %v276_v37 = vmax.f32 %v260_v29, 0.0  ;;  %v284_v40 = vmax.f32 %v268_v30, 0.0  ;;  %v472_v41 = vpack.c.bf16 %v278_v33, %v277_v31 }
  0xfc   :  { %v492_v42 = vpack.c.bf16 %v286_v34, %v285_v32 }
  0xfd   :  { %v467_v38 = vpack.c.bf16 %v276_v37, %v275_v35  ;;  %v487_v39 = vpack.c.bf16 %v284_v40, %v283_v36  ;;  %503 = vst [vmem:[%s730_s4 + $0x18] sm:$0xff] %v472_v41  }
  0xfe   :  { %507 = vst [vmem:[%s730_s4 + $0x38] sm:$0xff] %v492_v42  }
  0xff   :  { %502 = vst [vmem:[%s730_s4 + $0x10] sm:$0xff] %v467_v38   ;;  %506 = vst [vmem:[%s730_s4 + $0x30] sm:$0xff] %v487_v39  }
 0x100   :  { %371 = vsyncpa [#allocation3], 1 }

// kernel: _lambda_.45
= control target key start
LH: loop header
LB: loop body
LE: loop exit
PB: predicated region body
PF: predicated region fallthrough
CT: control target
= control target key end

     0   :  { %v569_v0 = vmov 0   ;;  %vm182_vm0 = vcmask 130048   ;;  %s718_s1 = inlined_call_operand.vmem [shape: bf16[144,128], index: 1, kind: input, shape index: {}]   ;;  %s719_s0 = inlined_call_operand.vmem [shape: bf16[128,144], index: 0, kind: input, shape index: {}]   ;;  %s720_s2 = inlined_call_operand.vmem [shape: f32[1,128], index: 2, kind: input, shape index: {}]   ;;  %s721_s3 = inlined_call_operand.vmem [shape: bf16[128,128], index: 3, kind: output, shape index: {}]  }
   0x1   :  { %207 = vmatprep.subr.bf16.mxu0 %v569_v0  ;;  %517 = vmatprep.subr.bf16.mxu1 %v569_v0  ;;  %v536_v1 = vld [vmem:[%s718_s1] sm:$0xff]   ;;  %v537_v2 = vld [vmem:[%s718_s1 + $0x8] sm:$0xff]   ;;  %v538_v3 = vld [vmem:[%s718_s1 + $0x10] sm:$0xff]  }
   0x2   :  { %208 = vmatpush1.bf16.msra.mxu0 %v536_v1  ;;  %526 = vmatpush1.bf16.msra.mxu1 %v536_v1  ;;  %v539_v4 = vld [vmem:[%s718_s1 + $0x18] sm:$0xff]   ;;  %v547_v5 = vld [vmem:[%s719_s0 + $0x4] ss:$8 sps:$4 sm:$0xff]   ;;  %v542_v9 = vld [vmem:[%s718_s1 + $0x30] sm:$0xff]  }
   0x3   :  { %209 = vmatprep.subr.bf16.mxu0 %v569_v0  ;;  %518 = vmatprep.subr.bf16.mxu1 %v569_v0  ;;  %v550_v6 = vld [vmem:[%s719_s0 + $0x44] ss:$8 sps:$4 sm:$0xff]   ;;  %v543_v10 = vld [vmem:[%s718_s1 + $0x38] sm:$0xff]   ;;  %v545_v12 = vld [vmem:[%s719_s0] ss:$8 sps:$4 sm:$0xff]  }
   0x4   :  { %430 = vmatprep.mubr.msk.bf16.mxu0 %vm182_vm0, %v547_v5  ;;  %434 = vmatprep.mubr.msk.bf16.mxu1 %vm182_vm0, %v550_v6  ;;  %v540_v7 = vld [vmem:[%s718_s1 + $0x20] sm:$0xff]   ;;  %v541_v8 = vld [vmem:[%s718_s1 + $0x28] sm:$0xff]   ;;  %v551_v14 = vld [vmem:[%s719_s0 + $0x14] ss:$8 sps:$4 sm:$0xff]  }
   0x5   :  { %v544_v11 = vld [vmem:[%s718_s1 + $0x40] sm:$0xff]   ;;  %v553_v15 = vld [vmem:[%s719_s0 + $0x54] ss:$8 sps:$4 sm:$0xff]   ;;  %v555_v16 = vld [vmem:[%s719_s0 + $0x10] ss:$8 sps:$4 sm:$0xff]  }
   0x6   :  { %210 = vmatpush1.bf16.msra.mxu0 %v537_v2  ;;  %527 = vmatpush1.bf16.msra.mxu1 %v537_v2  ;;  %v548_v13 = vld [vmem:[%s719_s0 + $0x40] ss:$8 sps:$4 sm:$0xff]   ;;  %v556_v17 = vld [vmem:[%s719_s0 + $0x50] ss:$8 sps:$4 sm:$0xff]   ;;  %v557_v18 = vld [vmem:[%s719_s0 + $0x24] ss:$8 sps:$4 sm:$0xff]  }
   0x7   :  { %211 = vmatprep.subr.bf16.mxu0 %v569_v0  ;;  %519 = vmatprep.subr.bf16.mxu1 %v569_v0  ;;  %v559_v19 = vld [vmem:[%s719_s0 + $0x64] ss:$8 sps:$4 sm:$0xff]   ;;  %v561_v20 = vld [vmem:[%s719_s0 + $0x20] ss:$8 sps:$4 sm:$0xff]   ;;  %v563_v22 = vld [vmem:[%s719_s0 + $0x34] ss:$8 sps:$4 sm:$0xff]  }
   0x8   :  { %v562_v21 = vld [vmem:[%s719_s0 + $0x60] ss:$8 sps:$4 sm:$0xff]   ;;  %v565_v23 = vld [vmem:[%s719_s0 + $0x74] ss:$8 sps:$4 sm:$0xff]   ;;  %v567_v24 = vld [vmem:[%s719_s0 + $0x30] ss:$8 sps:$4 sm:$0xff]  }
   0x9   :  { %v568_v25 = vld [vmem:[%s719_s0 + $0x70] ss:$8 sps:$4 sm:$0xff]   ;;  %v676_v26 = vld [vmem:[%s720_s2] ss:$0 sm:$0xff] }
   0xa   :  { %212 = vmatpush1.bf16.msra.mxu0 %v538_v3  ;;  %528 = vmatpush1.bf16.msra.mxu1 %v538_v3 }
   0xb   :  { %213 = vmatprep.subr.bf16.mxu0 %v569_v0  ;;  %520 = vmatprep.subr.bf16.mxu1 %v569_v0 }
   0xe   :  { %214 = vmatpush1.bf16.msra.mxu0 %v539_v4  ;;  %529 = vmatpush1.bf16.msra.mxu1 %v539_v4 }
   0xf   :  { %215 = vmatprep.subr.bf16.mxu0 %v569_v0  ;;  %521 = vmatprep.subr.bf16.mxu1 %v569_v0 }
  0x12   :  { %216 = vmatpush1.bf16.msra.mxu0 %v540_v7  ;;  %530 = vmatpush1.bf16.msra.mxu1 %v540_v7 }
  0x13   :  { %217 = vmatprep.subr.bf16.mxu0 %v569_v0  ;;  %522 = vmatprep.subr.bf16.mxu1 %v569_v0 }
  0x16   :  { %218 = vmatpush1.bf16.msra.mxu0 %v541_v8  ;;  %531 = vmatpush1.bf16.msra.mxu1 %v541_v8 }
  0x17   :  { %219 = vmatprep.subr.bf16.mxu0 %v569_v0  ;;  %523 = vmatprep.subr.bf16.mxu1 %v569_v0 }
  0x1a   :  { %220 = vmatpush1.bf16.msra.mxu0 %v542_v9  ;;  %532 = vmatpush1.bf16.msra.mxu1 %v542_v9 }
  0x1b   :  { %221 = vmatprep.subr.bf16.mxu0 %v569_v0  ;;  %524 = vmatprep.subr.bf16.mxu1 %v569_v0 }
  0x1e   :  { %222 = vmatpush1.bf16.msra.mxu0 %v543_v10  ;;  %533 = vmatpush1.bf16.msra.mxu1 %v543_v10 }
  0x1f   :  { %223 = vmatprep.subr.bf16.mxu0 %v569_v0  ;;  %525 = vmatprep.subr.bf16.mxu1 %v569_v0 }
  0x22   :  { %224 = vmatpush1.bf16.msra.mxu0 %v544_v11  ;;  %534 = vmatpush1.bf16.msra.mxu1 %v544_v11 }
  0x25   :  { %240 = vmatmul.mubr.bf16.vlgmr.msra.gmra.mrb[0].mxu0 %v545_v12  ;;  %272 = vmatmul.mubr.bf16.vlgmr.msra.gmra.mrb[0].mxu1 %v548_v13 }
  0x26   :  { %431 = vmatprep.mubr.msk.bf16.mxu0 %vm182_vm0, %v551_v14  ;;  %435 = vmatprep.mubr.msk.bf16.mxu1 %vm182_vm0, %v553_v15 }
  0x2d   :  { %248 = vmatmul.mubr.bf16.gmra.mrb[4].mxu0 %v555_v16  ;;  %280 = vmatmul.mubr.bf16.gmra.mrb[4].mxu1 %v556_v17 }
  0x2e   :  { %432 = vmatprep.mubr.msk.bf16.mxu0 %vm182_vm0, %v557_v18  ;;  %436 = vmatprep.mubr.msk.bf16.mxu1 %vm182_vm0, %v559_v19 }
  0x35   :  { %256 = vmatmul.mubr.bf16.gmra.mrb[8].mxu0 %v561_v20  ;;  %288 = vmatmul.mubr.bf16.gmra.mrb[8].mxu1 %v562_v21 }
  0x36   :  { %433 = vmatprep.mubr.msk.bf16.mxu0 %vm182_vm0, %v563_v22  ;;  %437 = vmatprep.mubr.msk.bf16.mxu1 %vm182_vm0, %v565_v23 }
  0x3d   :  { %264 = vmatmul.mubr.bf16.gmra.mrb[12].mxu0 %v567_v24  ;;  %296 = vmatmul.mubr.bf16.gmra.mrb[12].mxu1 %v568_v25 }
  0xf8   :  { %v241_v27 = vpop.f32.mrb[0].mxu0  ;;  %v273_v28 = vpop.f32.mrb[0].mxu1 }
  0xf9   :  { %v242_v29 = vadd.f32 %v676_v26, %v241_v27  ;;  %v274_v30 = vadd.f32 %v676_v26, %v273_v28  ;;  %v243_v31 = vpop.f32.mrb[1].mxu0  ;;  %v275_v32 = vpop.f32.mrb[1].mxu1 }
  0xfa   :  { %v244_v33 = vpop.f32.mrb[2].mxu0  ;;  %v276_v34 = vpop.f32.mrb[2].mxu1 }
  0xfb   :  { %v245_v35 = vadd.f32 %v676_v26, %v244_v33  ;;  %v277_v36 = vadd.f32 %v676_v26, %v276_v34  ;;  %v246_v37 = vpop.f32.mrb[3].mxu0  ;;  %v278_v38 = vpop.f32.mrb[3].mxu1  ;;  %v304_v39 = vmax.f32 %v242_v29, 0.0  ;;  %v312_v40 = vmax.f32 %v274_v30, 0.0 }
  0xfd   :  { %v305_v41 = vmax.f32 %v245_v35, 0.0  ;;  %v313_v42 = vmax.f32 %v277_v36, 0.0 }
  0xff   :  { %v473_v43 = vpack.c.bf16 %v305_v41, %v304_v39  ;;  %v493_v44 = vpack.c.bf16 %v313_v42, %v312_v40 }
 0x100   :  { %v249_v45 = vpop.f32.mrb[4].mxu0  ;;  %v281_v46 = vpop.f32.mrb[4].mxu1 }
 0x101   :  { %474 = vst [vmem:[%s721_s3] sm:$0xff] %v473_v43   ;;  %513 = vst [vmem:[%s721_s3 + $0x20] sm:$0xff] %v493_v44   ;;  %v250_v47 = vadd.f32 %v676_v26, %v249_v45  ;;  %v282_v48 = vadd.f32 %v676_v26, %v281_v46  ;;  %v251_v49 = vpop.f32.mrb[5].mxu0  ;;  %v283_v50 = vpop.f32.mrb[5].mxu1 }
 0x102   :  { %v252_v51 = vpop.f32.mrb[6].mxu0  ;;  %v284_v52 = vpop.f32.mrb[6].mxu1 }
 0x103   :  { %v253_v53 = vadd.f32 %v676_v26, %v252_v51  ;;  %v285_v54 = vadd.f32 %v676_v26, %v284_v52  ;;  %v254_v55 = vpop.f32.mrb[7].mxu0  ;;  %v286_v56 = vpop.f32.mrb[7].mxu1  ;;  %v306_v57 = vmax.f32 %v250_v47, 0.0  ;;  %v314_v58 = vmax.f32 %v282_v48, 0.0 }
 0x105   :  { %v307_v59 = vmax.f32 %v253_v53, 0.0  ;;  %v315_v60 = vmax.f32 %v285_v54, 0.0 }
 0x107   :  { %v478_v61 = vpack.c.bf16 %v307_v59, %v306_v57  ;;  %v498_v62 = vpack.c.bf16 %v315_v60, %v314_v58 }
 0x108   :  { %v257_v63 = vpop.f32.mrb[8].mxu0  ;;  %v289_v0 = vpop.f32.mrb[8].mxu1 }
 0x109   :  { %510 = vst [vmem:[%s721_s3 + $0x8] sm:$0xff] %v478_v61   ;;  %514 = vst [vmem:[%s721_s3 + $0x28] sm:$0xff] %v498_v62   ;;  %v258_v1 = vadd.f32 %v676_v26, %v257_v63  ;;  %v290_v2 = vadd.f32 %v676_v26, %v289_v0  ;;  %v259_v3 = vpop.f32.mrb[9].mxu0  ;;  %v291_v4 = vpop.f32.mrb[9].mxu1 }
 0x10a   :  { %v260_v5 = vpop.f32.mrb[10].mxu0  ;;  %v292_v6 = vpop.f32.mrb[10].mxu1 }
 0x10b   :  { %v261_v7 = vadd.f32 %v676_v26, %v260_v5  ;;  %v293_v8 = vadd.f32 %v676_v26, %v292_v6  ;;  %v262_v9 = vpop.f32.mrb[11].mxu0  ;;  %v294_v10 = vpop.f32.mrb[11].mxu1  ;;  %v308_v11 = vmax.f32 %v258_v1, 0.0  ;;  %v316_v12 = vmax.f32 %v290_v2, 0.0 }
 0x10d   :  { %v309_v13 = vmax.f32 %v261_v7, 0.0  ;;  %v317_v14 = vmax.f32 %v293_v8, 0.0 }
 0x10f   :  { %v483_v15 = vpack.c.bf16 %v309_v13, %v308_v11  ;;  %v503_v16 = vpack.c.bf16 %v317_v14, %v316_v12 }
 0x110   :  { %v265_v17 = vpop.f32.mrb[12].mxu0  ;;  %v297_v18 = vpop.f32.mrb[12].mxu1 }
 0x111   :  { %511 = vst [vmem:[%s721_s3 + $0x10] sm:$0xff] %v483_v15   ;;  %515 = vst [vmem:[%s721_s3 + $0x30] sm:$0xff] %v503_v16   ;;  %v266_v19 = vadd.f32 %v676_v26, %v265_v17  ;;  %v298_v20 = vadd.f32 %v676_v26, %v297_v18  ;;  %v267_v21 = vpop.f32.mrb[13].mxu0  ;;  %v299_v22 = vpop.f32.mrb[13].mxu1 }
 0x112   :  { %v268_v23 = vpop.f32.mrb[14].mxu0  ;;  %v300_v24 = vpop.f32.mrb[14].mxu1 }
 0x113   :  { %v269_v25 = vadd.f32 %v676_v26, %v268_v23  ;;  %v301_v27 = vadd.f32 %v676_v26, %v300_v24  ;;  %v270_v28 = vpop.f32.mrb[15].mxu0  ;;  %v302_v29 = vpop.f32.mrb[15].mxu1  ;;  %v310_v30 = vmax.f32 %v266_v19, 0.0  ;;  %v318_v31 = vmax.f32 %v298_v20, 0.0 }
 0x115   :  { %v311_v32 = vmax.f32 %v269_v25, 0.0  ;;  %v319_v33 = vmax.f32 %v301_v27, 0.0 }
 0x117   :  { %v488_v34 = vpack.c.bf16 %v311_v32, %v310_v30  ;;  %v508_v35 = vpack.c.bf16 %v319_v33, %v318_v31 }
 0x119   :  { %512 = vst [vmem:[%s721_s3 + $0x18] sm:$0xff] %v488_v34   ;;  %516 = vst [vmem:[%s721_s3 + $0x38] sm:$0xff] %v508_v35  }

// kernel: _lambda_.47
= control target key start
LH: loop header
LB: loop body
LE: loop exit
PB: predicated region body
PF: predicated region fallthrough
CT: control target
= control target key end

     0   :  { %vm110_vm0 = vcmask 523264   ;;  %s579_s1 = inlined_call_operand.vmem [shape: bf16[64,128], index: 1, kind: input, shape index: {}]   ;;  %s580_s0 = inlined_call_operand.vmem [shape: bf16[128,64], index: 0, kind: input, shape index: {}]   ;;  %s581_s2 = inlined_call_operand.vmem [shape: f32[1,128], index: 2, kind: input, shape index: {}]   ;;  %s582_s3 = inlined_call_operand.vmem [shape: bf16[128,128], index: 3, kind: output, shape index: {}]  }
   0x1   :  { %v476_v0 = vld [vmem:[%s579_s1] sm:$0xff]   ;;  %v477_v1 = vld [vmem:[%s579_s1 + $0x8] sm:$0xff]   ;;  %v478_v2 = vld [vmem:[%s579_s1 + $0x10] sm:$0xff]  }
   0x2   :  { %444 = vmatprep.subr.bf16.mxu0 %v476_v0  ;;  %468 = vmatprep.subr.bf16.mxu1 %v476_v0  ;;  %v480_v3 = vld [vmem:[%s580_s0] sm:$0xff]   ;;  %v479_v5 = vld [vmem:[%s579_s1 + $0x18] sm:$0xff]   ;;  %v482_v6 = vld [vmem:[%s580_s0 + $0x8] sm:$0xff]  }
   0x3   :  { %445 = vmatpush3.bf16.msra.mxu0 %v476_v0  ;;  %472 = vmatpush3.bf16.msra.mxu1 %v476_v0  ;;  %v481_v4 = vld [vmem:[%s580_s0 + $0x20] sm:$0xff]   ;;  %v483_v7 = vld [vmem:[%s580_s0 + $0x28] sm:$0xff]   ;;  %v484_v8 = vld [vmem:[%s580_s0 + $0x10] sm:$0xff]  }
   0x4   :  { %446 = vmatprep.subr.bf16.mxu0 %v477_v1  ;;  %469 = vmatprep.subr.bf16.mxu1 %v477_v1  ;;  %v485_v9 = vld [vmem:[%s580_s0 + $0x30] sm:$0xff]   ;;  %v486_v10 = vld [vmem:[%s580_s0 + $0x18] sm:$0xff]   ;;  %v332_v12 = vld [vmem:[%s581_s2] ss:$0 sm:$0xff] }
   0x5   :  { %452 = vmatprep.mubr.msk.bf16.mxu0 %vm110_vm0, %v480_v3  ;;  %460 = vmatprep.mubr.msk.bf16.mxu1 %vm110_vm0, %v481_v4  ;;  %v487_v11 = vld [vmem:[%s580_s0 + $0x38] sm:$0xff]  }
   0x7   :  { %447 = vmatpush3.bf16.msra.mxu0 %v477_v1  ;;  %473 = vmatpush3.bf16.msra.mxu1 %v477_v1 }
   0x8   :  { %448 = vmatprep.subr.bf16.mxu0 %v478_v2  ;;  %470 = vmatprep.subr.bf16.mxu1 %v478_v2 }
   0xb   :  { %449 = vmatpush3.bf16.msra.mxu0 %v478_v2  ;;  %474 = vmatpush3.bf16.msra.mxu1 %v478_v2 }
   0xc   :  { %450 = vmatprep.subr.bf16.mxu0 %v479_v5  ;;  %471 = vmatprep.subr.bf16.mxu1 %v479_v5 }
   0xf   :  { %451 = vmatpush3.bf16.msra.mxu0 %v479_v5  ;;  %475 = vmatpush3.bf16.msra.mxu1 %v479_v5 }
  0x12   :  { %453 = vmatmul.mubr.msk.bf16.vlgmr.msra.gmra.mrb[0].mxu0 %vm110_vm0, %v482_v6  ;;  %461 = vmatmul.mubr.msk.bf16.vlgmr.msra.gmra.mrb[0].mxu1 %vm110_vm0, %v483_v7 }
  0x13   :  { %456 = vmatprep.mubr.msk.bf16.mxu0 %vm110_vm0, %v484_v8  ;;  %464 = vmatprep.mubr.msk.bf16.mxu1 %vm110_vm0, %v485_v9 }
  0x1a   :  { %457 = vmatmul.mubr.msk.bf16.gmra.mrb[4].mxu0 %vm110_vm0, %v486_v10  ;;  %465 = vmatmul.mubr.msk.bf16.gmra.mrb[4].mxu1 %vm110_vm0, %v487_v11 }
  0xe5   :  { %v454_v13 = vpop.f32.mrb[0].mxu0  ;;  %v462_v14 = vpop.f32.mrb[0].mxu1 }
  0xe6   :  { %v178_v15 = vadd.f32 %v454_v13, %v332_v12  ;;  %v210_v16 = vadd.f32 %v462_v14, %v332_v12  ;;  %v169_v17 = vpop.f32.mrb[1].mxu0  ;;  %v201_v18 = vpop.f32.mrb[1].mxu1 }
  0xe7   :  { %v170_v19 = vadd.f32 %v332_v12, %v169_v17  ;;  %v202_v20 = vadd.f32 %v332_v12, %v201_v18  ;;  %v455_v21 = vpop.f32.mrb[2].mxu0  ;;  %v463_v22 = vpop.f32.mrb[2].mxu1 }
  0xe8   :  { %v181_v23 = vadd.f32 %v455_v21, %v332_v12  ;;  %v213_v24 = vadd.f32 %v463_v22, %v332_v12  ;;  %v172_v25 = vpop.f32.mrb[3].mxu0  ;;  %v204_v26 = vpop.f32.mrb[3].mxu1  ;;  %v234_v29 = vmax.f32 %v178_v15, 0.0  ;;  %v242_v30 = vmax.f32 %v210_v16, 0.0 }
  0xe9   :  { %v173_v27 = vadd.f32 %v332_v12, %v172_v25  ;;  %v205_v28 = vadd.f32 %v332_v12, %v204_v26  ;;  %v232_v33 = vmax.f32 %v170_v19, 0.0  ;;  %v240_v34 = vmax.f32 %v202_v20, 0.0 }
  0xea   :  { %v235_v31 = vmax.f32 %v181_v23, 0.0  ;;  %v243_v32 = vmax.f32 %v213_v24, 0.0 }
  0xeb   :  { %v233_v35 = vmax.f32 %v173_v27, 0.0  ;;  %v241_v36 = vmax.f32 %v205_v28, 0.0 }
  0xec   :  { %v393_v37 = vpack.c.bf16 %v235_v31, %v234_v29  ;;  %v413_v38 = vpack.c.bf16 %v243_v32, %v242_v30 }
  0xed   :  { %v388_v39 = vpack.c.bf16 %v233_v35, %v232_v33  ;;  %v408_v40 = vpack.c.bf16 %v241_v36, %v240_v34  ;;  %v458_v41 = vpop.f32.mrb[4].mxu0  ;;  %v466_v42 = vpop.f32.mrb[4].mxu1 }
  0xee   :  { %425 = vst [vmem:[%s582_s3 + $0x8] sm:$0xff] %v393_v37   ;;  %429 = vst [vmem:[%s582_s3 + $0x28] sm:$0xff] %v413_v38   ;;  %v194_v43 = vadd.f32 %v458_v41, %v332_v12  ;;  %v226_v44 = vadd.f32 %v466_v42, %v332_v12  ;;  %v185_v45 = vpop.f32.mrb[5].mxu0  ;;  %v217_v46 = vpop.f32.mrb[5].mxu1 }
  0xef   :  { %389 = vst [vmem:[%s582_s3] sm:$0xff] %v388_v39   ;;  %428 = vst [vmem:[%s582_s3 + $0x20] sm:$0xff] %v408_v40   ;;  %v186_v47 = vadd.f32 %v332_v12, %v185_v45  ;;  %v218_v48 = vadd.f32 %v332_v12, %v217_v46  ;;  %v459_v49 = vpop.f32.mrb[6].mxu0  ;;  %v467_v50 = vpop.f32.mrb[6].mxu1 }
  0xf0   :  { %v197_v51 = vadd.f32 %v459_v49, %v332_v12  ;;  %v229_v52 = vadd.f32 %v467_v50, %v332_v12  ;;  %v188_v53 = vpop.f32.mrb[7].mxu0  ;;  %v220_v54 = vpop.f32.mrb[7].mxu1  ;;  %v238_v57 = vmax.f32 %v194_v43, 0.0  ;;  %v246_v58 = vmax.f32 %v226_v44, 0.0 }
  0xf1   :  { %v189_v55 = vadd.f32 %v332_v12, %v188_v53  ;;  %v221_v56 = vadd.f32 %v332_v12, %v220_v54  ;;  %v236_v61 = vmax.f32 %v186_v47, 0.0  ;;  %v244_v62 = vmax.f32 %v218_v48, 0.0 }
  0xf2   :  { %v239_v59 = vmax.f32 %v197_v51, 0.0  ;;  %v247_v60 = vmax.f32 %v229_v52, 0.0 }
  0xf3   :  { %v237_v63 = vmax.f32 %v189_v55, 0.0  ;;  %v245_v0 = vmax.f32 %v221_v56, 0.0 }
  0xf4   :  { %v403_v1 = vpack.c.bf16 %v239_v59, %v238_v57  ;;  %v423_v2 = vpack.c.bf16 %v247_v60, %v246_v58 }
  0xf5   :  { %v398_v3 = vpack.c.bf16 %v237_v63, %v236_v61  ;;  %v418_v4 = vpack.c.bf16 %v245_v0, %v244_v62 }
  0xf6   :  { %427 = vst [vmem:[%s582_s3 + $0x18] sm:$0xff] %v403_v1   ;;  %431 = vst [vmem:[%s582_s3 + $0x38] sm:$0xff] %v423_v2  }
  0xf7   :  { %426 = vst [vmem:[%s582_s3 + $0x10] sm:$0xff] %v398_v3   ;;  %430 = vst [vmem:[%s582_s3 + $0x30] sm:$0xff] %v418_v4  }

// kernel: _lambda_.46
= control target key start
LH: loop header
LB: loop body
LE: loop exit
PB: predicated region body
PF: predicated region fallthrough
CT: control target
= control target key end

     0   :  { %vm89_vm0 = vcmask 130048   ;;  %s678_s1 = inlined_call_operand.vmem [shape: bf16[16,128], index: 1, kind: input, shape index: {}]   ;;  %s679_s0 = inlined_call_operand.vmem [shape: bf16[128,16], index: 0, kind: input, shape index: {}]   ;;  %s680_s3 = inlined_call_operand.vmem [shape: bf16[128,128], index: 3, kind: input, shape index: {}]   ;;  %s681_s2 = inlined_call_operand.vmem [shape: f32[1,128], index: 2, kind: input, shape index: {}]   ;;  %s682_s4 = inlined_call_operand.vmem [shape: bf16[128,128], index: 4, kind: output, shape index: {}]  }
   0x1   :  { %v524_v0 = vld [vmem:[%s678_s1] sm:$0xff]   ;;  %v527_v3 = vld [vmem:[%s679_s0 + $0x8] sm:$0xff]   ;;  %v529_v5 = vld [vmem:[%s679_s0 + $0x10] sm:$0xff]  }
   0x2   :  { %v525_v1 = vld [vmem:[%s679_s0] sm:$0xff]   ;;  %504 = vmatprep.subr.bf16.mxu0 %v524_v0  ;;  %522 = vmatprep.subr.bf16.mxu1 %v524_v0  ;;  %v528_v4 = vld [vmem:[%s679_s0 + $0x28] sm:$0xff]   ;;  %v530_v6 = vld [vmem:[%s679_s0 + $0x30] sm:$0xff]  }
   0x3   :  { %v526_v2 = vld [vmem:[%s679_s0 + $0x20] sm:$0xff]   ;;  %505 = vmatpush3.bf16.msra.mxu0 %v524_v0  ;;  %523 = vmatpush3.bf16.msra.mxu1 %v524_v0  ;;  %v531_v7 = vld [vmem:[%s679_s0 + $0x18] sm:$0xff]   ;;  %v481_v9 = vld [vmem:[%s680_s3 + $0x8] sm:$0xff]  }
   0x4   :  { %506 = vmatprep.mubr.msk.bf16.mxu0 %vm89_vm0, %v525_v1  ;;  %514 = vmatprep.mubr.msk.bf16.mxu1 %vm89_vm0, %v526_v2  ;;  %v532_v8 = vld [vmem:[%s679_s0 + $0x38] sm:$0xff]   ;;  %v485_v10 = vld [vmem:[%s680_s3 + $0x28] sm:$0xff]   ;;  %v410_v11 = vld [vmem:[%s680_s3] sm:$0xff]   ;;  %v415_v16 = vunpack.c.l.bf16 %v481_v9  ;;  %v416_v24 = vunpack.c.h.bf16 %v481_v9 }
   0x5   :  { %v484_v12 = vld [vmem:[%s680_s3 + $0x20] sm:$0xff]   ;;  %v613_v14 = vld [vmem:[%s680_s3 + $0x18] sm:$0xff]   ;;  %v431_v17 = vunpack.c.l.bf16 %v485_v10  ;;  %v411_v18 = vunpack.c.l.bf16 %v410_v11  ;;  %v623_v20 = vld [vmem:[%s680_s3 + $0x10] sm:$0xff]   ;;  %v432_v25 = vunpack.c.h.bf16 %v485_v10  ;;  %v412_v26 = vunpack.c.h.bf16 %v410_v11 }
   0x6   :  { %507 = vmatmul.mubr.msk.bf16.vlgmr.msra.gmra.mrb[0].mxu0 %vm89_vm0, %v527_v3  ;;  %515 = vmatmul.mubr.msk.bf16.vlgmr.msra.gmra.mrb[0].mxu1 %vm89_vm0, %v528_v4  ;;  %v608_v13 = vld [vmem:[%s681_s2] ss:$0 sm:$0xff]  ;;  %v618_v15 = vld [vmem:[%s680_s3 + $0x38] sm:$0xff]   ;;  %v427_v19 = vunpack.c.l.bf16 %v484_v12  ;;  %v628_v21 = vld [vmem:[%s680_s3 + $0x30] sm:$0xff]   ;;  %v428_v27 = vunpack.c.h.bf16 %v484_v12  ;;  %v423_v32 = vunpack.c.l.bf16 %v613_v14  ;;  %v419_v38 = vunpack.c.l.bf16 %v623_v20 }
   0x7   :  { %510 = vmatprep.mubr.msk.bf16.mxu0 %vm89_vm0, %v529_v5  ;;  %518 = vmatprep.mubr.msk.bf16.mxu1 %vm89_vm0, %v530_v6  ;;  %v439_v33 = vunpack.c.l.bf16 %v618_v15  ;;  %v435_v39 = vunpack.c.l.bf16 %v628_v21  ;;  %v424_v52 = vunpack.c.h.bf16 %v613_v14  ;;  %v440_v53 = vunpack.c.h.bf16 %v618_v15 }
   0x8   :  { %v420_v56 = vunpack.c.h.bf16 %v623_v20  ;;  %v436_v57 = vunpack.c.h.bf16 %v628_v21 }
   0xe   :  { %511 = vmatmul.mubr.msk.bf16.gmra.mrb[4].mxu0 %vm89_vm0, %v531_v7  ;;  %519 = vmatmul.mubr.msk.bf16.gmra.mrb[4].mxu1 %vm89_vm0, %v532_v8 }
  0xd9   :  { %v508_v22 = vpop.f32.mrb[0].mxu0  ;;  %v516_v23 = vpop.f32.mrb[0].mxu1 }
  0xda   :  { %v157_v28 = vadd.f32 %v508_v22, %v608_v13  ;;  %v189_v29 = vadd.f32 %v516_v23, %v608_v13  ;;  %v148_v30 = vpop.f32.mrb[1].mxu0  ;;  %v180_v31 = vpop.f32.mrb[1].mxu1 }
  0xdb   :  { %v149_v34 = vadd.f32 %v608_v13, %v148_v30  ;;  %v181_v35 = vadd.f32 %v608_v13, %v180_v31  ;;  %v509_v36 = vpop.f32.mrb[2].mxu0  ;;  %v517_v37 = vpop.f32.mrb[2].mxu1 }
  0xdc   :  { %v245_v40 = vadd.f32 %v415_v16, %v157_v28  ;;  %v253_v41 = vadd.f32 %v431_v17, %v189_v29  ;;  %v160_v42 = vadd.f32 %v509_v36, %v608_v13  ;;  %v192_v43 = vadd.f32 %v517_v37, %v608_v13  ;;  %v151_v44 = vpop.f32.mrb[3].mxu0  ;;  %v183_v45 = vpop.f32.mrb[3].mxu1 }
  0xdd   :  { %v243_v46 = vadd.f32 %v411_v18, %v149_v34  ;;  %v251_v47 = vadd.f32 %v427_v19, %v181_v35  ;;  %v152_v48 = vadd.f32 %v608_v13, %v151_v44  ;;  %v184_v49 = vadd.f32 %v608_v13, %v183_v45 }
  0xde   :  { %v246_v50 = vadd.f32 %v416_v24, %v160_v42  ;;  %v254_v51 = vadd.f32 %v432_v25, %v192_v43  ;;  %v261_v58 = vmax.f32 %v245_v40, 0.0  ;;  %v269_v59 = vmax.f32 %v253_v41, 0.0 }
  0xdf   :  { %v244_v54 = vadd.f32 %v412_v26, %v152_v48  ;;  %v252_v55 = vadd.f32 %v428_v27, %v184_v49  ;;  %v259_v62 = vmax.f32 %v243_v46, 0.0  ;;  %v267_v63 = vmax.f32 %v251_v47, 0.0 }
  0xe0   :  { %v262_v60 = vmax.f32 %v246_v50, 0.0  ;;  %v270_v61 = vmax.f32 %v254_v51, 0.0 }
  0xe1   :  { %v260_v0 = vmax.f32 %v244_v54, 0.0  ;;  %v268_v1 = vmax.f32 %v252_v55, 0.0  ;;  %v512_v2 = vpop.f32.mrb[4].mxu0  ;;  %v520_v3 = vpop.f32.mrb[4].mxu1 }
  0xe2   :  { %v449_v4 = vpack.c.bf16 %v262_v60, %v261_v58  ;;  %v469_v5 = vpack.c.bf16 %v270_v61, %v269_v59  ;;  %v173_v6 = vadd.f32 %v512_v2, %v608_v13  ;;  %v205_v7 = vadd.f32 %v520_v3, %v608_v13  ;;  %v164_v8 = vpop.f32.mrb[5].mxu0  ;;  %v196_v9 = vpop.f32.mrb[5].mxu1 }
  0xe3   :  { %v444_v10 = vpack.c.bf16 %v260_v0, %v259_v62  ;;  %v464_v11 = vpack.c.bf16 %v268_v1, %v267_v63  ;;  %v165_v12 = vadd.f32 %v608_v13, %v164_v8  ;;  %v197_v14 = vadd.f32 %v608_v13, %v196_v9  ;;  %v513_v15 = vpop.f32.mrb[6].mxu0  ;;  %v521_v16 = vpop.f32.mrb[6].mxu1 }
  0xe4   :  { %488 = vst [vmem:[%s682_s4 + $0x8] sm:$0xff] %v449_v4   ;;  %492 = vst [vmem:[%s682_s4 + $0x28] sm:$0xff] %v469_v5   ;;  %v249_v17 = vadd.f32 %v423_v32, %v173_v6  ;;  %v257_v18 = vadd.f32 %v439_v33, %v205_v7  ;;  %v176_v19 = vadd.f32 %v513_v15, %v608_v13  ;;  %v167_v21 = vpop.f32.mrb[7].mxu0  ;;  %v199_v22 = vpop.f32.mrb[7].mxu1 }
  0xe5   :  { %v208_v20 = vadd.f32 %v521_v16, %v608_v13  ;;  %445 = vst [vmem:[%s682_s4] sm:$0xff] %v444_v10   ;;  %491 = vst [vmem:[%s682_s4 + $0x20] sm:$0xff] %v464_v11   ;;  %v247_v23 = vadd.f32 %v419_v38, %v165_v12  ;;  %v255_v24 = vadd.f32 %v435_v39, %v197_v14 }
  0xe6   :  { %v168_v25 = vadd.f32 %v608_v13, %v167_v21  ;;  %v200_v26 = vadd.f32 %v608_v13, %v199_v22  ;;  %v250_v27 = vadd.f32 %v424_v52, %v176_v19  ;;  %v265_v31 = vmax.f32 %v249_v17, 0.0 }
  0xe7   :  { %v258_v28 = vadd.f32 %v440_v53, %v208_v20  ;;  %v273_v32 = vmax.f32 %v257_v18, 0.0  ;;  %v263_v35 = vmax.f32 %v247_v23, 0.0  ;;  %v271_v36 = vmax.f32 %v255_v24, 0.0 }
  0xe8   :  { %v248_v29 = vadd.f32 %v420_v56, %v168_v25  ;;  %v256_v30 = vadd.f32 %v436_v57, %v200_v26  ;;  %v266_v33 = vmax.f32 %v250_v27, 0.0 }
  0xe9   :  { %v274_v34 = vmax.f32 %v258_v28, 0.0 }
  0xea   :  { %v264_v37 = vmax.f32 %v248_v29, 0.0  ;;  %v272_v40 = vmax.f32 %v256_v30, 0.0  ;;  %v459_v41 = vpack.c.bf16 %v266_v33, %v265_v31 }
  0xeb   :  { %v479_v42 = vpack.c.bf16 %v274_v34, %v273_v32 }
  0xec   :  { %v454_v38 = vpack.c.bf16 %v264_v37, %v263_v35  ;;  %v474_v39 = vpack.c.bf16 %v272_v40, %v271_v36  ;;  %490 = vst [vmem:[%s682_s4 + $0x18] sm:$0xff] %v459_v41  }
  0xed   :  { %494 = vst [vmem:[%s682_s4 + $0x38] sm:$0xff] %v479_v42  }
  0xee   :  { %489 = vst [vmem:[%s682_s4 + $0x10] sm:$0xff] %v454_v38   ;;  %493 = vst [vmem:[%s682_s4 + $0x30] sm:$0xff] %v474_v39  }

// kernel: _lambda_.49
= control target key start
LH: loop header
LB: loop body
LE: loop exit
PB: predicated region body
PF: predicated region fallthrough
CT: control target
= control target key end

     0   :  { %vm68_vm0 = vcmask 523264   ;;  %s247_s1 = inlined_call_operand.vmem [shape: bf16[64,128], index: 1, kind: input, shape index: {}]   ;;  %s248_s0 = inlined_call_operand.vmem [shape: bf16[32,64], index: 0, kind: input, shape index: {}]   ;;  %s249_s2 = inlined_call_operand.vmem [shape: f32[1,128], index: 2, kind: input, shape index: {}]   ;;  %s250_s3 = inlined_call_operand.vmem [shape: bf16[32,128], index: 3, kind: output, shape index: {}]  }
   0x1   :  { %v194_v0 = vld [vmem:[%s247_s1] sm:$0xff]   ;;  %v195_v1 = vld [vmem:[%s247_s1 + $0x8] sm:$0xff]   ;;  %v196_v2 = vld [vmem:[%s247_s1 + $0x10] sm:$0xff]  }
   0x2   :  { %182 = vmatprep.subr.bf16.mxu0 %v194_v0  ;;  %v198_v3 = vld [vmem:[%s248_s0] sm:$0xff]   ;;  %v197_v4 = vld [vmem:[%s247_s1 + $0x18] sm:$0xff]   ;;  %v199_v5 = vld [vmem:[%s248_s0 + $0x8] sm:$0xff]  }
   0x3   :  { %183 = vmatpush3.bf16.msra.mxu0 %v194_v0  ;;  %190 = vmatprep.mubr.msk.bf16.mxu0 %vm68_vm0, %v198_v3  ;;  %v148_v7 = vld [vmem:[%s249_s2] ss:$0 sm:$0xff] }
   0x4   :  { %184 = vmatprep.subr.bf16.mxu0 %v195_v1 }
   0x7   :  { %185 = vmatpush3.bf16.msra.mxu0 %v195_v1 }
   0x8   :  { %186 = vmatprep.subr.bf16.mxu0 %v196_v2 }
   0xb   :  { %187 = vmatpush3.bf16.msra.mxu0 %v196_v2 }
   0xc   :  { %188 = vmatprep.subr.bf16.mxu0 %v197_v4 }
   0xf   :  { %189 = vmatpush3.bf16.msra.mxu0 %v197_v4 }
  0x12   :  { %191 = vmatmul.mubr.msk.bf16.vlgmr.msra.gmra.mrb[0].mxu0 %vm68_vm0, %v199_v5 }
  0xe5   :  { %v192_v6 = vpop.f32.mrb[0].mxu0 }
  0xe6   :  { %v109_v8 = vpop.f32.mrb[1].mxu0  ;;  %v118_v10 = vadd.f32 %v192_v6, %v148_v7 }
  0xe7   :  { %v193_v9 = vpop.f32.mrb[2].mxu0  ;;  %v110_v13 = vadd.f32 %v148_v7, %v109_v8 }
  0xe8   :  { %v121_v11 = vadd.f32 %v193_v9, %v148_v7  ;;  %v112_v12 = vpop.f32.mrb[3].mxu0 }
  0xe9   :  { %v113_v14 = vadd.f32 %v148_v7, %v112_v12 }
  0xea   :  { %v173_v15 = vpack.c.bf16 %v121_v11, %v118_v10 }
  0xeb   :  { %v168_v16 = vpack.c.bf16 %v113_v14, %v110_v13 }
  0xec   :  { %175 = vst [vmem:[%s250_s3 + $0x8] sm:$0xff] %v173_v15  }
  0xed   :  { %169 = vst [vmem:[%s250_s3] sm:$0xff] %v168_v16  }

// kernel: _lambda_.50
= control target key start
LH: loop header
LB: loop body
LE: loop exit
PB: predicated region body
PF: predicated region fallthrough
CT: control target
= control target key end

     0   :  { %vm55_vm0 = vcmask 261120   ;;  %s254_s1 = inlined_call_operand.vmem [shape: bf16[32,128], index: 1, kind: input, shape index: {}]   ;;  %s255_s0 = inlined_call_operand.vmem [shape: bf16[32,32], index: 0, kind: input, shape index: {}]   ;;  %s256_s3 = inlined_call_operand.vmem [shape: bf16[32,128], index: 3, kind: input, shape index: {}]   ;;  %s257_s2 = inlined_call_operand.vmem [shape: f32[1,128], index: 2, kind: input, shape index: {}]   ;;  %s258_s4 = inlined_call_operand.vmem [shape: bf16[32,128], index: 4, kind: output, shape index: {}]  }
   0x1   :  { %v198_v0 = vld [vmem:[%s254_s1] sm:$0xff]   ;;  %v199_v1 = vld [vmem:[%s254_s1 + $0x8] sm:$0xff]  }
   0x2   :  { %190 = vmatprep.subr.bf16.mxu0 %v198_v0  ;;  %v200_v2 = vld [vmem:[%s255_s0] sm:$0xff]   ;;  %v201_v3 = vld [vmem:[%s255_s0 + $0x8] sm:$0xff]  }
   0x3   :  { %191 = vmatpush3.bf16.msra.mxu0 %v198_v0  ;;  %194 = vmatprep.mubr.msk.bf16.mxu0 %vm55_vm0, %v200_v2  ;;  %v184_v4 = vld [vmem:[%s256_s3 + $0x8] sm:$0xff]   ;;  %v167_v5 = vld [vmem:[%s256_s3] sm:$0xff]  }
   0x4   :  { %192 = vmatprep.subr.bf16.mxu0 %v199_v1  ;;  %v151_v6 = vld [vmem:[%s257_s2] ss:$0 sm:$0xff]  ;;  %v172_v7 = vunpack.c.l.bf16 %v184_v4  ;;  %v168_v9 = vunpack.c.l.bf16 %v167_v5  ;;  %v173_v12 = vunpack.c.h.bf16 %v184_v4  ;;  %v169_v15 = vunpack.c.h.bf16 %v167_v5 }
   0x7   :  { %193 = vmatpush3.bf16.msra.mxu0 %v199_v1 }
   0xa   :  { %195 = vmatmul.mubr.msk.bf16.vlgmr.msra.gmra.mrb[0].mxu0 %vm55_vm0, %v201_v3 }
  0xdd   :  { %v196_v8 = vpop.f32.mrb[0].mxu0 }
  0xde   :  { %v105_v10 = vadd.f32 %v196_v8, %v151_v6  ;;  %v96_v11 = vpop.f32.mrb[1].mxu0 }
  0xdf   :  { %v97_v13 = vadd.f32 %v151_v6, %v96_v11  ;;  %v197_v14 = vpop.f32.mrb[2].mxu0 }
  0xe0   :  { %v121_v16 = vadd.f32 %v172_v7, %v105_v10  ;;  %v108_v17 = vadd.f32 %v197_v14, %v151_v6  ;;  %v99_v18 = vpop.f32.mrb[3].mxu0 }
  0xe1   :  { %v119_v19 = vadd.f32 %v168_v9, %v97_v13  ;;  %v100_v20 = vadd.f32 %v151_v6, %v99_v18 }
  0xe2   :  { %v122_v21 = vadd.f32 %v173_v12, %v108_v17  ;;  %v125_v23 = vmax.f32 %v121_v16, 0.0 }
  0xe3   :  { %v120_v22 = vadd.f32 %v169_v15, %v100_v20  ;;  %v123_v25 = vmax.f32 %v119_v19, 0.0 }
  0xe4   :  { %v126_v24 = vmax.f32 %v122_v21, 0.0 }
  0xe5   :  { %v124_v26 = vmax.f32 %v120_v22, 0.0 }
  0xe6   :  { %v182_v27 = vpack.c.bf16 %v126_v24, %v125_v23 }
  0xe7   :  { %v177_v28 = vpack.c.bf16 %v124_v26, %v123_v25 }
  0xe8   :  { %185 = vst [vmem:[%s258_s4 + $0x8] sm:$0xff] %v182_v27  }
  0xe9   :  { %178 = vst [vmem:[%s258_s4] sm:$0xff] %v177_v28  }

// kernel: _lambda_.48
= control target key start
LH: loop header
LB: loop body
LE: loop exit
PB: predicated region body
PF: predicated region fallthrough
CT: control target
= control target key end

     0   :  { %vm204_vm0 = vcmask 261120   ;;  %s550_s1 = inlined_call_operand.vmem [shape: bf16[288,128], index: 1, kind: input, shape index: {}]   ;;  %s551_s0 = inlined_call_operand.vmem [shape: bf16[32,288], index: 0, kind: input, shape index: {}]   ;;  %s552_s2 = inlined_call_operand.vmem [shape: f32[1,128], index: 2, kind: input, shape index: {}]   ;;  %s553_s3 = inlined_call_operand.vmem [shape: bf16[32,128], index: 3, kind: output, shape index: {}]  }
   0x1   :  { %v423_v0 = vld [vmem:[%s550_s1 + $0x40] sm:$0xff]   ;;  %v425_v2 = vld [vmem:[%s550_s1 + $0x48] sm:$0xff]   ;;  %v427_v4 = vld [vmem:[%s550_s1 + $0x50] sm:$0xff]  }
   0x2   :  { %v424_v1 = vld [vmem:[%s550_s1] sm:$0xff]   ;;  %383 = vmatprep.subr.bf16.mxu0 %v423_v0  ;;  %v426_v3 = vld [vmem:[%s550_s1 + $0x8] sm:$0xff]   ;;  %v428_v5 = vld [vmem:[%s550_s1 + $0x10] sm:$0xff]  }
   0x3   :  { %384 = vmatpush3.bf16.msra.mxu0 %v424_v1  ;;  %v429_v6 = vld [vmem:[%s550_s1 + $0x58] sm:$0xff]   ;;  %v431_v8 = vld [vmem:[%s550_s1 + $0x60] sm:$0xff]   ;;  %v433_v11 = vld [vmem:[%s550_s1 + $0x68] sm:$0xff]  }
   0x4   :  { %385 = vmatprep.subr.bf16.mxu0 %v425_v2  ;;  %v430_v7 = vld [vmem:[%s550_s1 + $0x18] sm:$0xff]   ;;  %v432_v9 = vld [vmem:[%s550_s1 + $0x20] sm:$0xff]   ;;  %v434_v12 = vld [vmem:[%s550_s1 + $0x28] sm:$0xff]  }
   0x5   :  { %v438_v10 = vld [vmem:[%s550_s1 + $0x80] sm:$0xff]   ;;  %v435_v13 = vld [vmem:[%s550_s1 + $0x70] sm:$0xff]   ;;  %v443_v15 = vld [vmem:[%s550_s1 + $0x88] sm:$0xff]  }
   0x6   :  { %415 = vmatprep.subr.bf16.mxu1 %v438_v10  ;;  %v442_v14 = vld [vmem:[%s551_s0 + $0x4] ss:$12 sps:$4 sm:$0xff]   ;;  %v444_v16 = vld [vmem:[%s551_s0 + $0x8] ss:$12 sps:$4 sm:$0xff]   ;;  %v445_v17 = vld [vmem:[%s551_s0 + $0x20] ss:$12 sps:$4 sm:$0xff]  }
   0x7   :  { %386 = vmatpush3.bf16.msra.mxu0 %v426_v3  ;;  %416 = vmatpush3.bf16.msra.mxu1 %v438_v10  ;;  %v436_v18 = vld [vmem:[%s550_s1 + $0x30] sm:$0xff]   ;;  %v437_v19 = vld [vmem:[%s550_s1 + $0x78] sm:$0xff]   ;;  %v440_v21 = vld [vmem:[%s551_s0] ss:$12 sps:$4 sm:$0xff]  }
   0x8   :  { %387 = vmatprep.subr.bf16.mxu0 %v427_v4  ;;  %243 = vmatprep.mubr.bf16.mxu0 %v442_v14  ;;  %v439_v20 = vld [vmem:[%s550_s1 + $0x38] sm:$0xff]   ;;  %v337_v30 = vld [vmem:[%s552_s2] ss:$0 sm:$0xff] }
   0x9   :  { %417 = vmatprep.subr.bf16.mxu1 %v443_v15  ;;  %419 = vmatprep.mubr.msk.bf16.mxu1 %vm204_vm0, %v444_v16  ;;  %v446_v22 = vld [vmem:[%s551_s0 + $0x1c] ss:$12 sps:$4 sm:$0xff]   ;;  %v448_v23 = vld [vmem:[%s551_s0 + $0x18] ss:$12 sps:$4 sm:$0xff]  }
   0xb   :  { %388 = vmatpush3.bf16.msra.mxu0 %v428_v5  ;;  %418 = vmatpush3.bf16.msra.mxu1 %v443_v15 }
   0xc   :  { %389 = vmatprep.subr.bf16.mxu0 %v429_v6 }
   0xe   :  { %420 = vmatmul.mubr.msk.bf16.vlgmr.msra.gmra.mrb[0].mxu1 %vm204_vm0, %v445_v17 }
   0xf   :  { %390 = vmatpush3.bf16.msra.mxu0 %v430_v7 }
  0x10   :  { %391 = vmatprep.subr.bf16.mxu0 %v431_v8 }
  0x13   :  { %392 = vmatpush3.bf16.msra.mxu0 %v432_v9 }
  0x14   :  { %393 = vmatprep.subr.bf16.mxu0 %v433_v11 }
  0x17   :  { %394 = vmatpush3.bf16.msra.mxu0 %v434_v12 }
  0x18   :  { %395 = vmatprep.subr.bf16.mxu0 %v435_v13 }
  0x1b   :  { %396 = vmatpush3.bf16.msra.mxu0 %v436_v18 }
  0x1c   :  { %397 = vmatprep.subr.bf16.mxu0 %v437_v19 }
  0x1f   :  { %398 = vmatpush3.bf16.msra.mxu0 %v439_v20 }
  0x22   :  { %244 = vmatmul.mubr.bf16.vlgmr.msra.gmra.mrb[0].mxu0 %v440_v21 }
  0x23   :  { %251 = vmatprep.mubr.bf16.mxu0 %v446_v22 }
  0x2a   :  { %252 = vmatmul.mubr.bf16.gmra.mrb[4].mxu0 %v448_v23 }
  0xe1   :  { %v421_v24 = vpop.f32.mrb[0].mxu1 }
  0xe2   :  { %v294_v25 = vpop.f32.mrb[1].mxu1 }
  0xe3   :  { %v422_v26 = vpop.f32.mrb[2].mxu1 }
  0xe4   :  { %v297_v27 = vpop.f32.mrb[3].mxu1 }
  0xf5   :  { %v399_v28 = vpop.f32.mrb[0].mxu0 }
  0xf6   :  { %v400_v29 = vpop.f32.mrb[1].mxu0 }
  0xf7   :  { %v401_v31 = vadd.f32 %v400_v29, %v399_v28  ;;  %v402_v32 = vpop.f32.mrb[2].mxu0 }
  0xf8   :  { %v403_v33 = vpop.f32.mrb[3].mxu0 }
  0xf9   :  { %v404_v34 = vadd.f32 %v403_v33, %v402_v32  ;;  %v246_v35 = vadd.f32 %v401_v31, %v337_v30 }
  0xfb   :  { %v295_v36 = vadd.f32 %v294_v25, %v246_v35  ;;  %v249_v37 = vadd.f32 %v404_v34, %v337_v30 }
  0xfd   :  { %v298_v38 = vadd.f32 %v297_v27, %v249_v37  ;;  %v405_v39 = vpop.f32.mrb[4].mxu0  ;;  %v309_v41 = vmax.f32 %v295_v36, 0.0 }
  0xfe   :  { %v406_v40 = vpop.f32.mrb[5].mxu0 }
  0xff   :  { %v310_v42 = vmax.f32 %v298_v38, 0.0  ;;  %v407_v43 = vadd.f32 %v406_v40, %v405_v39  ;;  %v408_v44 = vpop.f32.mrb[6].mxu0 }
 0x100   :  { %v409_v45 = vpop.f32.mrb[7].mxu0 }
 0x101   :  { %v375_v46 = vpack.c.bf16 %v310_v42, %v309_v41  ;;  %v254_v47 = vadd.f32 %v407_v43, %v337_v30  ;;  %v410_v48 = vadd.f32 %v409_v45, %v408_v44 }
 0x103   :  { %376 = vst [vmem:[%s553_s3] sm:$0xff] %v375_v46   ;;  %v303_v49 = vadd.f32 %v421_v24, %v254_v47  ;;  %v257_v50 = vadd.f32 %v410_v48, %v337_v30 }
 0x105   :  { %v306_v51 = vadd.f32 %v422_v26, %v257_v50  ;;  %v311_v52 = vmax.f32 %v303_v49, 0.0 }
 0x107   :  { %v312_v53 = vmax.f32 %v306_v51, 0.0 }
 0x109   :  { %v380_v54 = vpack.c.bf16 %v312_v53, %v311_v52 }
 0x10b   :  { %382 = vst [vmem:[%s553_s3 + $0x8] sm:$0xff] %v380_v54  }

// kernel: _lambda_.51
= control target key start
LH: loop header
LB: loop body
LE: loop exit
PB: predicated region body
PF: predicated region fallthrough
CT: control target
= control target key end

     0   :  { %s308_s1 = inlined_call_operand.vmem [shape: bf16[128,128], index: 1, kind: input, shape index: {}]   ;;  %s309_s0 = inlined_call_operand.vmem [shape: bf16[32,128], index: 0, kind: input, shape index: {}]   ;;  %s310_s2 = inlined_call_operand.vmem [shape: f32[1,128], index: 2, kind: input, shape index: {}]   ;;  %s311_s3 = inlined_call_operand.vmem [shape: bf16[32,128], index: 3, kind: output, shape index: {}]  }
   0x1   :  { %v239_v0 = vld [vmem:[%s308_s1] sm:$0xff]   ;;  %v240_v1 = vld [vmem:[%s308_s1 + $0x8] sm:$0xff]   ;;  %v241_v2 = vld [vmem:[%s308_s1 + $0x10] sm:$0xff]  }
   0x2   :  { %219 = vmatprep.subr.bf16.mxu0 %v239_v0  ;;  %v242_v3 = vld [vmem:[%s308_s1 + $0x18] sm:$0xff]   ;;  %v247_v4 = vld [vmem:[%s309_s0] sm:$0xff]   ;;  %v244_v6 = vld [vmem:[%s308_s1 + $0x28] sm:$0xff]  }
   0x3   :  { %220 = vmatpush3.bf16.msra.mxu0 %v239_v0  ;;  %235 = vmatprep.mubr.bf16.mxu0 %v247_v4  ;;  %v243_v5 = vld [vmem:[%s308_s1 + $0x20] sm:$0xff]   ;;  %v245_v7 = vld [vmem:[%s308_s1 + $0x30] sm:$0xff]   ;;  %v246_v8 = vld [vmem:[%s308_s1 + $0x38] sm:$0xff]  }
   0x4   :  { %221 = vmatprep.subr.bf16.mxu0 %v240_v1  ;;  %v248_v9 = vld [vmem:[%s309_s0 + $0x8] sm:$0xff]   ;;  %v179_v10 = vld [vmem:[%s310_s2] ss:$0 sm:$0xff] }
   0x7   :  { %222 = vmatpush3.bf16.msra.mxu0 %v240_v1 }
   0x8   :  { %223 = vmatprep.subr.bf16.mxu0 %v241_v2 }
   0xb   :  { %224 = vmatpush3.bf16.msra.mxu0 %v241_v2 }
   0xc   :  { %225 = vmatprep.subr.bf16.mxu0 %v242_v3 }
   0xf   :  { %226 = vmatpush3.bf16.msra.mxu0 %v242_v3 }
  0x10   :  { %227 = vmatprep.subr.bf16.mxu0 %v243_v5 }
  0x13   :  { %228 = vmatpush3.bf16.msra.mxu0 %v243_v5 }
  0x14   :  { %229 = vmatprep.subr.bf16.mxu0 %v244_v6 }
  0x17   :  { %230 = vmatpush3.bf16.msra.mxu0 %v244_v6 }
  0x18   :  { %231 = vmatprep.subr.bf16.mxu0 %v245_v7 }
  0x1b   :  { %232 = vmatpush3.bf16.msra.mxu0 %v245_v7 }
  0x1c   :  { %233 = vmatprep.subr.bf16.mxu0 %v246_v8 }
  0x1f   :  { %234 = vmatpush3.bf16.msra.mxu0 %v246_v8 }
  0x22   :  { %236 = vmatmul.mubr.bf16.vlgmr.msra.gmra.mrb[0].mxu0 %v248_v9 }
  0xf5   :  { %v237_v11 = vpop.f32.mrb[0].mxu0 }
  0xf6   :  { %v145_v12 = vadd.f32 %v237_v11, %v179_v10  ;;  %v136_v13 = vpop.f32.mrb[1].mxu0 }
  0xf7   :  { %v137_v14 = vadd.f32 %v179_v10, %v136_v13  ;;  %v238_v15 = vpop.f32.mrb[2].mxu0 }
  0xf8   :  { %v148_v16 = vadd.f32 %v238_v15, %v179_v10  ;;  %v139_v17 = vpop.f32.mrb[3].mxu0  ;;  %v153_v19 = vmax.f32 %v145_v12, 0.0 }
  0xf9   :  { %v140_v18 = vadd.f32 %v179_v10, %v139_v17  ;;  %v151_v21 = vmax.f32 %v137_v14, 0.0 }
  0xfa   :  { %v154_v20 = vmax.f32 %v148_v16, 0.0 }
  0xfb   :  { %v152_v22 = vmax.f32 %v140_v18, 0.0 }
  0xfc   :  { %v206_v23 = vpack.c.bf16 %v154_v20, %v153_v19 }
  0xfd   :  { %v201_v24 = vpack.c.bf16 %v152_v22, %v151_v21 }
  0xfe   :  { %208 = vst [vmem:[%s311_s3 + $0x8] sm:$0xff] %v206_v23  }
  0xff   :  { %202 = vst [vmem:[%s311_s3] sm:$0xff] %v201_v24  }

// kernel: _lambda_.55
= control target key start
LH: loop header
LB: loop body
LE: loop exit
PB: predicated region body
PF: predicated region fallthrough
CT: control target
= control target key end

     0   :  { %v642_v33 = vmov 0.0   ;;  %vm643_vm0 = vmmov 0   ;;  %vm341_vm1 = vcmask 523264   ;;  %s793_s1 = inlined_call_operand.vmem [shape: bf16[576,128], index: 1, kind: input, shape index: {}]   ;;  %s794_s0 = inlined_call_operand.vmem [shape: bf16[16,576], index: 0, kind: input, shape index: {}]   ;;  %s795_s2 = inlined_call_operand.vmem [shape: f32[1,128], index: 2, kind: input, shape index: {}]   ;;  %s796_s3 = inlined_call_operand.vmem [shape: bf16[16,128], index: 3, kind: output, shape index: {}]  }
   0x1   :  { %v599_v0 = vld [vmem:[%s793_s1 + $0x40] sm:$0xff]   ;;  %v603_v4 = vld [vmem:[%s793_s1 + $0x48] sm:$0xff]   ;;  %v607_v8 = vld [vmem:[%s793_s1 + $0x50] sm:$0xff]  }
   0x2   :  { %v600_v1 = vld [vmem:[%s793_s1] sm:$0xff]   ;;  %536 = vmatprep.subr.bf16.mxu0 %v599_v0  ;;  %v604_v5 = vld [vmem:[%s793_s1 + $0x8] sm:$0xff]   ;;  %v608_v9 = vld [vmem:[%s793_s1 + $0x10] sm:$0xff]  }
   0x3   :  { %v601_v2 = vld [vmem:[%s793_s1 + $0xc0] sm:$0xff]   ;;  %537 = vmatpush3.bf16.msra.mxu0 %v600_v1  ;;  %v605_v6 = vld [vmem:[%s793_s1 + $0xc8] sm:$0xff]   ;;  %v609_v10 = vld [vmem:[%s793_s1 + $0xd0] sm:$0xff]  }
   0x4   :  { %v602_v3 = vld [vmem:[%s793_s1 + $0x80] sm:$0xff]   ;;  %558 = vmatprep.subr.bf16.mxu1 %v601_v2  ;;  %538 = vmatprep.subr.bf16.mxu0 %v603_v4  ;;  %v606_v7 = vld [vmem:[%s793_s1 + $0x88] sm:$0xff]   ;;  %v610_v11 = vld [vmem:[%s793_s1 + $0x90] sm:$0xff]  }
   0x5   :  { %559 = vmatpush3.bf16.msra.mxu1 %v602_v3  ;;  %v611_v12 = vld [vmem:[%s793_s1 + $0x58] sm:$0xff]   ;;  %v615_v16 = vld [vmem:[%s793_s1 + $0x60] sm:$0xff]   ;;  %v619_v20 = vld [vmem:[%s793_s1 + $0x68] sm:$0xff]  }
   0x6   :  { %560 = vmatprep.subr.bf16.mxu1 %v605_v6  ;;  %v612_v13 = vld [vmem:[%s793_s1 + $0x18] sm:$0xff]   ;;  %v616_v17 = vld [vmem:[%s793_s1 + $0x20] sm:$0xff]   ;;  %v620_v21 = vld [vmem:[%s793_s1 + $0x28] sm:$0xff]  }
   0x7   :  { %539 = vmatpush3.bf16.msra.mxu0 %v604_v5  ;;  %v613_v14 = vld [vmem:[%s793_s1 + $0xd8] sm:$0xff]   ;;  %v617_v18 = vld [vmem:[%s793_s1 + $0xe0] sm:$0xff]   ;;  %v621_v22 = vld [vmem:[%s793_s1 + $0xe8] sm:$0xff]  }
   0x8   :  { %540 = vmatprep.subr.bf16.mxu0 %v607_v8  ;;  %v614_v15 = vld [vmem:[%s793_s1 + $0x98] sm:$0xff]   ;;  %v618_v19 = vld [vmem:[%s793_s1 + $0xa0] sm:$0xff]   ;;  %v622_v23 = vld [vmem:[%s793_s1 + $0xa8] sm:$0xff]  }
   0x9   :  { %561 = vmatpush3.bf16.msra.mxu1 %v606_v7  ;;  %v623_v24 = vld [vmem:[%s793_s1 + $0x70] sm:$0xff]   ;;  %v627_v28 = vld [vmem:[%s793_s1 + $0x78] sm:$0xff]   ;;  %v636_v36 = vld [vmem:[%s794_s0 + $0xc] ss:$20 sps:$4 sm:$0xff]  }
   0xa   :  { %562 = vmatprep.subr.bf16.mxu1 %v609_v10  ;;  %v624_v25 = vld [vmem:[%s793_s1 + $0x30] sm:$0xff]   ;;  %v628_v29 = vld [vmem:[%s793_s1 + $0x38] sm:$0xff]   ;;  %v637_v37 = vld [vmem:[%s793_s1 + $0x100] sm:$0xff]   ;;  %418 = vmatprep.mubr.bf16.mxu1 %v636_v36 }
   0xb   :  { %541 = vmatpush3.bf16.msra.mxu0 %v608_v9  ;;  %v625_v26 = vld [vmem:[%s793_s1 + $0xf0] sm:$0xff]   ;;  %v629_v30 = vld [vmem:[%s793_s1 + $0xf8] sm:$0xff]   ;;  %v638_v38 = vld [vmem:[%s793_s1 + $0x108] sm:$0xff]  }
   0xc   :  { %542 = vmatprep.subr.bf16.mxu0 %v611_v12  ;;  %v626_v27 = vld [vmem:[%s793_s1 + $0xb0] sm:$0xff]   ;;  %v632_v32 = vld [vmem:[%s794_s0 + $0x4] ss:$20 sps:$4 sm:$0xff]   ;;  %v634_v35 = vld [vmem:[%s794_s0 + $0x8] ss:$20 sps:$4 sm:$0xff]  }
   0xd   :  { %563 = vmatpush3.bf16.msra.mxu1 %v610_v11  ;;  %v630_v31 = vld [vmem:[%s794_s0] ss:$20 sps:$4 sm:$0xff]   ;;  %v633_v34 = vld [vmem:[%s793_s1 + $0xb8] sm:$0xff]   ;;  %377 = vmatprep.mubr.bf16.mxu0 %v632_v32  ;;  %v641_v41 = vld [vmem:[%s794_s0 + $0x10] ss:$20 sps:$4 sm:$0xff]  }
   0xe   :  { %564 = vmatprep.subr.bf16.mxu1 %v613_v14  ;;  %v639_v39 = vld [vmem:[%s793_s1 + $0x110] sm:$0xff]   ;;  %v640_v40 = vld [vmem:[%s793_s1 + $0x118] sm:$0xff]   ;;  %v484_v43 = vld [vmem:[%s795_s2] ss:$0 sm:$0xff] }
   0xf   :  { %543 = vmatpush3.bf16.msra.mxu0 %v612_v13 }
  0x10   :  { %544 = vmatprep.subr.bf16.mxu0 %v615_v16 }
  0x11   :  { %565 = vmatpush3.bf16.msra.mxu1 %v614_v15 }
  0x12   :  { %566 = vmatprep.subr.bf16.mxu1 %v617_v18 }
  0x13   :  { %545 = vmatpush3.bf16.msra.mxu0 %v616_v17 }
  0x14   :  { %546 = vmatprep.subr.bf16.mxu0 %v619_v20 }
  0x15   :  { %567 = vmatpush3.bf16.msra.mxu1 %v618_v19 }
  0x16   :  { %568 = vmatprep.subr.bf16.mxu1 %v621_v22 }
  0x17   :  { %547 = vmatpush3.bf16.msra.mxu0 %v620_v21 }
  0x18   :  { %548 = vmatprep.subr.bf16.mxu0 %v623_v24 }
  0x19   :  { %569 = vmatpush3.bf16.msra.mxu1 %v622_v23 }
  0x1a   :  { %570 = vmatprep.subr.bf16.mxu1 %v625_v26 }
  0x1b   :  { %549 = vmatpush3.bf16.msra.mxu0 %v624_v25 }
  0x1c   :  { %550 = vmatprep.subr.bf16.mxu0 %v627_v28 }
  0x1d   :  { %571 = vmatpush3.bf16.msra.mxu1 %v626_v27 }
  0x1e   :  { %572 = vmatprep.subr.bf16.mxu1 %v629_v30 }
  0x1f   :  { %551 = vmatpush3.bf16.msra.mxu0 %v628_v29 }
  0x20   :  { %585 = vmatprep.subr.bf16.mxu0 %v642_v33 }
  0x21   :  { %573 = vmatpush3.bf16.msra.mxu1 %v633_v34 }
  0x22   :  { %378 = vmatmul.mubr.bf16.vlgmr.msra.gmra.mrb[0].mxu0 %v630_v31 }
  0x23   :  { %593 = vmatprep.mubr.msk.bf16.mxu0 %vm643_vm0, %v642_v33  ;;  %586 = vmatpush3.bf16.msra.mxu0 %v637_v37 }
  0x24   :  { %419 = vmatmul.mubr.bf16.vlgmr.msra.gmra.mrb[0].mxu1 %v634_v35  ;;  %587 = vmatprep.subr.bf16.mxu0 %v642_v33 }
  0x27   :  { %588 = vmatpush3.bf16.msra.mxu0 %v638_v38 }
  0x28   :  { %589 = vmatprep.subr.bf16.mxu0 %v642_v33 }
  0x2b   :  { %590 = vmatpush3.bf16.msra.mxu0 %v639_v39 }
  0x2c   :  { %591 = vmatprep.subr.bf16.mxu0 %v642_v33 }
  0x2f   :  { %592 = vmatpush3.bf16.msra.mxu0 %v640_v40 }
  0x32   :  { %594 = vmatmul.mubr.msk.bf16.vlgmr.msra.gmra.mrb[4].mxu0 %vm341_vm1, %v641_v41 }
  0xf5   :  { %v552_v42 = vpop.f32.mrb[0].mxu0 }
  0xf6   :  { %v553_v44 = vpop.f32.mrb[1].mxu0 }
  0xf7   :  { %v554_v45 = vadd.f32 %v553_v44, %v552_v42  ;;  %v555_v46 = vpop.f32.mrb[2].mxu0  ;;  %v574_v47 = vpop.f32.mrb[0].mxu1 }
  0xf8   :  { %v556_v48 = vpop.f32.mrb[3].mxu0  ;;  %v575_v51 = vpop.f32.mrb[1].mxu1 }
  0xf9   :  { %v380_v49 = vadd.f32 %v554_v45, %v484_v43  ;;  %v557_v50 = vadd.f32 %v556_v48, %v555_v46  ;;  %v576_v52 = vadd.f32 %v575_v51, %v574_v47  ;;  %v577_v53 = vpop.f32.mrb[2].mxu1 }
  0xfa   :  { %v578_v55 = vpop.f32.mrb[3].mxu1 }
  0xfb   :  { %v383_v54 = vadd.f32 %v557_v50, %v484_v43  ;;  %v579_v56 = vadd.f32 %v578_v55, %v577_v53  ;;  %v421_v57 = vadd.f32 %v576_v52, %v380_v49 }
  0xfd   :  { %v424_v58 = vadd.f32 %v579_v56, %v383_v54 }
 0x105   :  { %v461_v59 = vpop.f32.mrb[4].mxu0 }
 0x106   :  { %v462_v60 = vadd.f32 %v461_v59, %v421_v57  ;;  %v595_v61 = vpop.f32.mrb[5].mxu0 }
 0x107   :  { %v464_v62 = vpop.f32.mrb[6].mxu0 }
 0x108   :  { %v465_v63 = vadd.f32 %v464_v62, %v424_v58  ;;  %v596_v0 = vpop.f32.mrb[7].mxu0  ;;  %v468_v1 = vmax.f32 %v462_v60, 0.0 }
 0x10a   :  { %v469_v2 = vmax.f32 %v465_v63, 0.0 }
 0x10c   :  { %v534_v3 = vpack.c.bf16 %v469_v2, %v468_v1 }
 0x10e   :  { %535 = vst [vmem:[%s796_s3] sm:$0xff] %v534_v3  }

// kernel: _lambda_.56
= control target key start
LH: loop header
LB: loop body
LE: loop exit
PB: predicated region body
PF: predicated region fallthrough
CT: control target
= control target key end

     0   :  { %v239_v1 = vmov 0   ;;  %v35_v18 = vlaneseq  ;;  %s320_s1 = inlined_call_operand.vmem [shape: bf16[128,256], index: 1, kind: input, shape index: {}]   ;;  %s321_s0 = inlined_call_operand.vmem [shape: bf16[16,128], index: 0, kind: input, shape index: {}]   ;;  %s322_s2 = inlined_call_operand.vmem [shape: f32[1,256], index: 2, kind: input, shape index: {}]   ;;  %s323_s3 = inlined_call_operand.vmem [shape: bf16[16,256], index: 3, kind: output, shape index: {}]  }
   0x1   :  { %v214_v0 = vld [vmem:[%s320_s1 + $0x4] ss:$8 sps:$4 sm:$0xff]   ;;  %163 = vmatprep.mubr.bf16.mxu0 %v239_v1  ;;  %v216_v2 = vld [vmem:[%s320_s1] ss:$8 sps:$4 sm:$0xff]   ;;  %v217_v3 = vld [vmem:[%s320_s1 + $0x14] ss:$8 sps:$4 sm:$0xff]  }
   0x2   :  { %131 = vmatprep.subr.bf16.mxu0 %v214_v0  ;;  %v219_v4 = vld [vmem:[%s320_s1 + $0x10] ss:$8 sps:$4 sm:$0xff]   ;;  %v220_v5 = vld [vmem:[%s320_s1 + $0x24] ss:$8 sps:$4 sm:$0xff]   ;;  %v222_v6 = vld [vmem:[%s320_s1 + $0x20] ss:$8 sps:$4 sm:$0xff]  }
   0x3   :  { %132 = vmatpush1.bf16.msra.mxu0 %v216_v2  ;;  %v223_v7 = vld [vmem:[%s320_s1 + $0x34] ss:$8 sps:$4 sm:$0xff]   ;;  %v225_v8 = vld [vmem:[%s320_s1 + $0x30] ss:$8 sps:$4 sm:$0xff]   ;;  %v226_v9 = vld [vmem:[%s320_s1 + $0x44] ss:$8 sps:$4 sm:$0xff]  }
   0x4   :  { %133 = vmatprep.subr.bf16.mxu0 %v217_v3  ;;  %v228_v10 = vld [vmem:[%s320_s1 + $0x40] ss:$8 sps:$4 sm:$0xff]   ;;  %v229_v11 = vld [vmem:[%s320_s1 + $0x54] ss:$8 sps:$4 sm:$0xff]   ;;  %v231_v12 = vld [vmem:[%s320_s1 + $0x50] ss:$8 sps:$4 sm:$0xff]  }
   0x5   :  { %v232_v13 = vld [vmem:[%s320_s1 + $0x64] ss:$8 sps:$4 sm:$0xff]   ;;  %v234_v14 = vld [vmem:[%s320_s1 + $0x60] ss:$8 sps:$4 sm:$0xff]   ;;  %v235_v15 = vld [vmem:[%s320_s1 + $0x74] ss:$8 sps:$4 sm:$0xff]  }
   0x6   :  { %v237_v16 = vld [vmem:[%s320_s1 + $0x70] ss:$8 sps:$4 sm:$0xff]   ;;  %v238_v17 = vld [vmem:[%s321_s0] sm:$0xff]   ;;  %v36_v19 = vshrl.u32 %v35_v18, 7 }
   0x7   :  { %134 = vmatpush1.bf16.msra.mxu0 %v219_v4  ;;  %v33_v21 = vld [vmem:[%s322_s2] sm:$0x3] }
   0x8   :  { %135 = vmatprep.subr.bf16.mxu0 %v220_v5  ;;  %v37_v20 = vsub.s32 0, %v36_v19  ;;  %v41_v22 = vsub.s32 1, %v36_v19 }
   0xa   :  { %v38_v23 = vrot.slane %v33_v21, %v37_v20  ;;  %v42_v24 = vrot.slane %v33_v21, %v41_v22 }
   0xb   :  { %136 = vmatpush1.bf16.msra.mxu0 %v222_v6 }
   0xc   :  { %137 = vmatprep.subr.bf16.mxu0 %v223_v7 }
   0xf   :  { %138 = vmatpush1.bf16.msra.mxu0 %v225_v8 }
  0x10   :  { %139 = vmatprep.subr.bf16.mxu0 %v226_v9 }
  0x13   :  { %140 = vmatpush1.bf16.msra.mxu0 %v228_v10 }
  0x14   :  { %141 = vmatprep.subr.bf16.mxu0 %v229_v11 }
  0x17   :  { %142 = vmatpush1.bf16.msra.mxu0 %v231_v12 }
  0x18   :  { %143 = vmatprep.subr.bf16.mxu0 %v232_v13 }
  0x1b   :  { %144 = vmatpush1.bf16.msra.mxu0 %v234_v14 }
  0x1c   :  { %145 = vmatprep.subr.bf16.mxu0 %v235_v15 }
  0x1f   :  { %146 = vmatpush1.bf16.msra.mxu0 %v237_v16 }
  0x22   :  { %164 = vmatmul.mubr.bf16.vlgmr.msra.gmra.mrb[0].mxu0 %v238_v17 }
  0xf5   :  { %v165_v25 = vpop.f32.mrb[0].mxu0 }
  0xf6   :  { %v166_v26 = vadd.f32 %v165_v25, %v38_v23  ;;  %v167_v27 = vpop.f32.mrb[1].mxu0 }
  0xf7   :  { %v168_v28 = vadd.f32 %v167_v27, %v42_v24  ;;  %v169_v29 = vpop.f32.mrb[2].mxu0 }
  0xf8   :  { %v170_v30 = vadd.f32 %v169_v29, %v38_v23  ;;  %v171_v31 = vpop.f32.mrb[3].mxu0 }
  0xf9   :  { %v211_v32 = vpack.c.bf16 %v168_v28, %v166_v26  ;;  %v172_v33 = vadd.f32 %v171_v31, %v42_v24 }
  0xfb   :  { %186 = vst [vmem:[%s323_s3] sm:$0xff] %v211_v32  ;;  %v212_v34 = vpack.c.bf16 %v172_v33, %v170_v30 }
  0xfd   :  { %187 = vst [vmem:[%s323_s3 + $0x8] sm:$0xff] %v212_v34 }

// kernel: _lambda_.57
= control target key start
LH: loop header
LB: loop body
LE: loop exit
PB: predicated region body
PF: predicated region fallthrough
CT: control target
= control target key end

     0   :  { %v192_v1 = vmov 0   ;;  %vm85_vm0 = vcmask 523264   ;;  %v30_v10 = vlaneseq  ;;  %s260_s1 = inlined_call_operand.vmem [shape: bf16[64,256], index: 1, kind: input, shape index: {}]   ;;  %s261_s0 = inlined_call_operand.vmem [shape: bf16[16,64], index: 0, kind: input, shape index: {}]   ;;  %s262_s2 = inlined_call_operand.vmem [shape: f32[1,256], index: 2, kind: input, shape index: {}]   ;;  %s263_s3 = inlined_call_operand.vmem [shape: bf16[16,256], index: 3, kind: input, shape index: {}]   ;;  %s264_s4 = inlined_call_operand.vmem [shape: bf16[16,256], index: 4, kind: output, shape index: {}]  }
   0x1   :  { %v179_v0 = vld [vmem:[%s260_s1 + $0x4] ss:$8 sps:$4 sm:$0xff]   ;;  %121 = vmatprep.mubr.bf16.mxu0 %v192_v1  ;;  %v181_v2 = vld [vmem:[%s260_s1] ss:$8 sps:$4 sm:$0xff]   ;;  %v182_v3 = vld [vmem:[%s260_s1 + $0x14] ss:$8 sps:$4 sm:$0xff]  }
   0x2   :  { %89 = vmatprep.subr.bf16.mxu0 %v179_v0  ;;  %v184_v4 = vld [vmem:[%s260_s1 + $0x10] ss:$8 sps:$4 sm:$0xff]   ;;  %v185_v5 = vld [vmem:[%s260_s1 + $0x24] ss:$8 sps:$4 sm:$0xff]   ;;  %v187_v6 = vld [vmem:[%s260_s1 + $0x20] ss:$8 sps:$4 sm:$0xff]  }
   0x3   :  { %90 = vmatpush1.bf16.msra.mxu0 %v181_v2  ;;  %v188_v7 = vld [vmem:[%s260_s1 + $0x34] ss:$8 sps:$4 sm:$0xff]   ;;  %v190_v8 = vld [vmem:[%s260_s1 + $0x30] ss:$8 sps:$4 sm:$0xff]   ;;  %v191_v9 = vld [vmem:[%s261_s0] sm:$0xff]   ;;  %v31_v11 = vshrl.u32 %v30_v10, 7 }
   0x4   :  { %91 = vmatprep.subr.bf16.mxu0 %v182_v3  ;;  %v28_v13 = vld [vmem:[%s262_s2] sm:$0x3]  ;;  %v133_v18 = vld [vmem:[%s263_s3 + $0x8] sm:$0xff] }
   0x5   :  { %v32_v12 = vsub.s32 0, %v31_v11  ;;  %v36_v14 = vsub.s32 1, %v31_v11  ;;  %v132_v15 = vld [vmem:[%s263_s3] sm:$0xff]  ;;  %v136_v24 = vunpack.c.l.bf16 %v133_v18  ;;  %v137_v27 = vunpack.c.h.bf16 %v133_v18 }
   0x6   :  { %v134_v19 = vunpack.c.l.bf16 %v132_v15  ;;  %v135_v21 = vunpack.c.h.bf16 %v132_v15 }
   0x7   :  { %92 = vmatpush1.bf16.msra.mxu0 %v184_v4  ;;  %v33_v16 = vrot.slane %v28_v13, %v32_v12  ;;  %v37_v17 = vrot.slane %v28_v13, %v36_v14 }
   0x8   :  { %93 = vmatprep.subr.bf16.mxu0 %v185_v5 }
   0xb   :  { %94 = vmatpush1.bf16.msra.mxu0 %v187_v6 }
   0xc   :  { %95 = vmatprep.subr.bf16.mxu0 %v188_v7 }
   0xf   :  { %96 = vmatpush1.bf16.msra.mxu0 %v190_v8 }
  0x12   :  { %173 = vmatmul.mubr.msk.bf16.vlgmr.msra.gmra.mrb[0].mxu0 %vm85_vm0, %v191_v9 }
  0xe5   :  { %v123_v20 = vpop.f32.mrb[0].mxu0 }
  0xe6   :  { %v124_v22 = vadd.f32 %v123_v20, %v33_v16  ;;  %v125_v23 = vpop.f32.mrb[1].mxu0 }
  0xe7   :  { %v126_v25 = vadd.f32 %v125_v23, %v37_v17  ;;  %v127_v26 = vpop.f32.mrb[2].mxu0 }
  0xe8   :  { %v138_v28 = vadd.f32 %v134_v19, %v124_v22  ;;  %v128_v29 = vadd.f32 %v127_v26, %v33_v16  ;;  %v129_v30 = vpop.f32.mrb[3].mxu0 }
  0xe9   :  { %v139_v31 = vadd.f32 %v135_v21, %v126_v25  ;;  %v130_v32 = vadd.f32 %v129_v30, %v37_v17 }
  0xea   :  { %v142_v33 = vmax.f32 %v138_v28, 0.0  ;;  %v140_v34 = vadd.f32 %v136_v24, %v128_v29 }
  0xeb   :  { %v143_v35 = vmax.f32 %v139_v31, 0.0  ;;  %v141_v36 = vadd.f32 %v137_v27, %v130_v32 }
  0xec   :  { %v144_v37 = vmax.f32 %v140_v34, 0.0 }
  0xed   :  { %v176_v38 = vpack.c.bf16 %v143_v35, %v142_v33  ;;  %v145_v39 = vmax.f32 %v141_v36, 0.0 }
  0xef   :  { %158 = vst [vmem:[%s264_s4] sm:$0xff] %v176_v38  ;;  %v177_v40 = vpack.c.bf16 %v145_v39, %v144_v37 }
  0xf1   :  { %159 = vst [vmem:[%s264_s4 + $0x8] sm:$0xff] %v177_v40 }

// kernel: _lambda_.58
= control target key start
LH: loop header
LB: loop body
LE: loop exit
PB: predicated region body
PF: predicated region fallthrough
CT: control target
= control target key end

     0   :  { %s368_s1 = inlined_call_operand.vmem [shape: bf16[256,128], index: 1, kind: input, shape index: {}]   ;;  %s369_s0 = inlined_call_operand.vmem [shape: bf16[16,256], index: 0, kind: input, shape index: {}]   ;;  %s370_s2 = inlined_call_operand.vmem [shape: f32[1,128], index: 2, kind: input, shape index: {}]   ;;  %s371_s3 = inlined_call_operand.vmem [shape: bf16[16,128], index: 3, kind: output, shape index: {}]  }
   0x1   :  { %v269_v0 = vld [vmem:[%s368_s1 + $0x40] sm:$0xff]   ;;  %v271_v2 = vld [vmem:[%s368_s1 + $0x48] sm:$0xff]   ;;  %v273_v4 = vld [vmem:[%s368_s1 + $0x50] sm:$0xff]  }
   0x2   :  { %v270_v1 = vld [vmem:[%s368_s1] sm:$0xff]   ;;  %247 = vmatprep.subr.bf16.mxu0 %v269_v0  ;;  %v272_v3 = vld [vmem:[%s368_s1 + $0x8] sm:$0xff]   ;;  %v274_v5 = vld [vmem:[%s368_s1 + $0x10] sm:$0xff]  }
   0x3   :  { %248 = vmatpush3.bf16.msra.mxu0 %v270_v1  ;;  %v275_v6 = vld [vmem:[%s368_s1 + $0x58] sm:$0xff]   ;;  %v277_v8 = vld [vmem:[%s368_s1 + $0x60] sm:$0xff]   ;;  %v279_v10 = vld [vmem:[%s368_s1 + $0x68] sm:$0xff]  }
   0x4   :  { %249 = vmatprep.subr.bf16.mxu0 %v271_v2  ;;  %v276_v7 = vld [vmem:[%s368_s1 + $0x18] sm:$0xff]   ;;  %v278_v9 = vld [vmem:[%s368_s1 + $0x20] sm:$0xff]   ;;  %v280_v12 = vld [vmem:[%s368_s1 + $0x28] sm:$0xff]  }
   0x5   :  { %v287_v11 = vld [vmem:[%s369_s0 + $0x4] ss:$8 sps:$4 sm:$0xff]   ;;  %v281_v13 = vld [vmem:[%s368_s1 + $0x70] sm:$0xff]   ;;  %v283_v15 = vld [vmem:[%s368_s1 + $0x78] sm:$0xff]  }
   0x6   :  { %194 = vmatprep.mubr.bf16.mxu0 %v287_v11  ;;  %v282_v14 = vld [vmem:[%s368_s1 + $0x30] sm:$0xff]   ;;  %v284_v16 = vld [vmem:[%s368_s1 + $0x38] sm:$0xff]   ;;  %v285_v17 = vld [vmem:[%s369_s0] ss:$8 sps:$4 sm:$0xff]  }
   0x7   :  { %250 = vmatpush3.bf16.msra.mxu0 %v272_v3  ;;  %v219_v19 = vld [vmem:[%s370_s2] ss:$0 sm:$0xff] }
   0x8   :  { %251 = vmatprep.subr.bf16.mxu0 %v273_v4 }
   0xb   :  { %252 = vmatpush3.bf16.msra.mxu0 %v274_v5 }
   0xc   :  { %253 = vmatprep.subr.bf16.mxu0 %v275_v6 }
   0xf   :  { %254 = vmatpush3.bf16.msra.mxu0 %v276_v7 }
  0x10   :  { %255 = vmatprep.subr.bf16.mxu0 %v277_v8 }
  0x13   :  { %256 = vmatpush3.bf16.msra.mxu0 %v278_v9 }
  0x14   :  { %257 = vmatprep.subr.bf16.mxu0 %v279_v10 }
  0x17   :  { %258 = vmatpush3.bf16.msra.mxu0 %v280_v12 }
  0x18   :  { %259 = vmatprep.subr.bf16.mxu0 %v281_v13 }
  0x1b   :  { %260 = vmatpush3.bf16.msra.mxu0 %v282_v14 }
  0x1c   :  { %261 = vmatprep.subr.bf16.mxu0 %v283_v15 }
  0x1f   :  { %262 = vmatpush3.bf16.msra.mxu0 %v284_v16 }
  0x22   :  { %195 = vmatmul.mubr.bf16.vlgmr.msra.gmra.mrb[0].mxu0 %v285_v17 }
  0xf5   :  { %v263_v18 = vpop.f32.mrb[0].mxu0 }
  0xf6   :  { %v264_v20 = vpop.f32.mrb[1].mxu0 }
  0xf7   :  { %v265_v21 = vadd.f32 %v264_v20, %v263_v18  ;;  %v266_v22 = vpop.f32.mrb[2].mxu0 }
  0xf8   :  { %v267_v23 = vpop.f32.mrb[3].mxu0 }
  0xf9   :  { %v197_v24 = vadd.f32 %v265_v21, %v219_v19  ;;  %v268_v25 = vadd.f32 %v267_v23, %v266_v22 }
  0xfb   :  { %v200_v26 = vadd.f32 %v268_v25, %v219_v19  ;;  %v203_v27 = vmax.f32 %v197_v24, 0.0 }
  0xfd   :  { %v204_v28 = vmax.f32 %v200_v26, 0.0 }
  0xff   :  { %v245_v29 = vpack.c.bf16 %v204_v28, %v203_v27 }
 0x101   :  { %246 = vst [vmem:[%s371_s3] sm:$0xff] %v245_v29  }

// kernel: _lambda_.61
= control target key start
LH: loop header
LB: loop body
LE: loop exit
PB: predicated region body
PF: predicated region fallthrough
CT: control target
= control target key end

     0   :  { %s1627_s1 = inlined_call_operand.vmem [shape: bf16[256,1024], index: 1, kind: input, shape index: {}]   ;;  %s1628_s0 = inlined_call_operand.vmem [shape: bf16[4,8,256], index: 0, kind: input, shape index: {}]   ;;  %s1629_s2 = inlined_call_operand.vmem [shape: f32[1,1024], index: 2, kind: input, shape index: {}]   ;;  %s1630_s3 = inlined_call_operand.vmem [shape: f32[8,1024], index: 3, kind: output, shape index: {}]  }
   0x1   :  { %v39_v0 = vld [vmem:[%s1627_s1] sm:$0xff]  ;;  %v40_v2 = vld [vmem:[%s1627_s1 + $0x8] sm:$0xff]  ;;  %v1281_v60 = vld [vmem:[%s1628_s0 + $0x10] sm:$0xff] }
   0x2   :  { %v43_v1 = vld [vmem:[%s1627_s1 + $0x20] sm:$0xff]  ;;  %v44_v4 = vld [vmem:[%s1627_s1 + $0x28] sm:$0xff]  ;;  %v1286_v61 = vld [vmem:[%s1628_s0 + $0x18] sm:$0xff] }
   0x3   :  { %v1029_v3 = vcombine.high %v39_v0, %v43_v1  ;;  %v1028_v5 = vcombine.low %v39_v0, %v43_v1  ;;  %v47_v6 = vld [vmem:[%s1627_s1 + $0x40] sm:$0xff]  ;;  %v1031_v8 = vcombine.high %v40_v2, %v44_v4  ;;  %v1030_v9 = vcombine.low %v40_v2, %v44_v4  ;;  %v48_v11 = vld [vmem:[%s1627_s1 + $0x48] sm:$0xff] }
   0x4   :  { %v51_v7 = vld [vmem:[%s1627_s1 + $0x60] sm:$0xff]  ;;  %v52_v12 = vld [vmem:[%s1627_s1 + $0x68] sm:$0xff]  ;;  %v26_v0 = vunpack.c.h.bf16 %v1281_v60 }
   0x5   :  { %v1037_v10 = vcombine.high %v47_v6, %v51_v7  ;;  %v55_v13 = vld [vmem:[%s1627_s1 + $0x80] sm:$0xff]  ;;  %849 = vmatprep.subr.bf16.mxu0 %v1029_v3  ;;  %v1039_v14 = vcombine.high %v48_v11, %v52_v12  ;;  %v56_v16 = vld [vmem:[%s1627_s1 + $0x88] sm:$0xff]  ;;  %890 = vmatprep.subr.bf16.mxu1 %v1031_v8  ;;  %v1036_v18 = vcombine.low %v47_v6, %v51_v7  ;;  %v32_v3 = vunpack.c.h.bf16 %v1286_v61 }
   0x6   :  { %v59_v15 = vld [vmem:[%s1627_s1 + $0xa0] sm:$0xff]  ;;  %v60_v17 = vld [vmem:[%s1627_s1 + $0xa8] sm:$0xff]  ;;  %850 = vmatpush1.bf16.msra.mxu0 %v1028_v5  ;;  %891 = vmatpush1.bf16.msra.mxu1 %v1030_v9  ;;  %v1038_v19 = vcombine.low %v48_v11, %v52_v12 }
   0x7   :  { %851 = vmatprep.subr.bf16.mxu0 %v1037_v10  ;;  %v1045_v20 = vcombine.high %v55_v13, %v59_v15  ;;  %892 = vmatprep.subr.bf16.mxu1 %v1039_v14  ;;  %v1047_v21 = vcombine.high %v56_v16, %v60_v17  ;;  %v63_v22 = vld [vmem:[%s1627_s1 + $0xc0] sm:$0xff]  ;;  %v64_v24 = vld [vmem:[%s1627_s1 + $0xc8] sm:$0xff]  ;;  %v1044_v26 = vcombine.low %v55_v13, %v59_v15 }
   0x8   :  { %v67_v23 = vld [vmem:[%s1627_s1 + $0xe0] sm:$0xff]  ;;  %v68_v25 = vld [vmem:[%s1627_s1 + $0xe8] sm:$0xff]  ;;  %v1046_v27 = vcombine.low %v56_v16, %v60_v17 }
   0x9   :  { %v1053_v28 = vcombine.high %v63_v22, %v67_v23  ;;  %v1055_v29 = vcombine.high %v64_v24, %v68_v25  ;;  %v71_v30 = vld [vmem:[%s1627_s1 + $0x100] sm:$0xff]  ;;  %v72_v32 = vld [vmem:[%s1627_s1 + $0x108] sm:$0xff]  ;;  %v1052_v34 = vcombine.low %v63_v22, %v67_v23  ;;  %v1054_v35 = vcombine.low %v64_v24, %v68_v25 }
   0xa   :  { %852 = vmatpush1.bf16.msra.mxu0 %v1036_v18  ;;  %893 = vmatpush1.bf16.msra.mxu1 %v1038_v19  ;;  %v75_v31 = vld [vmem:[%s1627_s1 + $0x120] sm:$0xff]  ;;  %v76_v33 = vld [vmem:[%s1627_s1 + $0x128] sm:$0xff] }
   0xb   :  { %853 = vmatprep.subr.bf16.mxu0 %v1045_v20  ;;  %894 = vmatprep.subr.bf16.mxu1 %v1047_v21  ;;  %v1061_v36 = vcombine.high %v71_v30, %v75_v31  ;;  %v1063_v37 = vcombine.high %v72_v32, %v76_v33  ;;  %v79_v38 = vld [vmem:[%s1627_s1 + $0x140] sm:$0xff]  ;;  %v80_v40 = vld [vmem:[%s1627_s1 + $0x148] sm:$0xff]  ;;  %v1060_v42 = vcombine.low %v71_v30, %v75_v31 }
   0xc   :  { %v83_v39 = vld [vmem:[%s1627_s1 + $0x160] sm:$0xff]  ;;  %v84_v41 = vld [vmem:[%s1627_s1 + $0x168] sm:$0xff]  ;;  %v1062_v43 = vcombine.low %v72_v32, %v76_v33 }
   0xd   :  { %v1069_v44 = vcombine.high %v79_v38, %v83_v39  ;;  %v1071_v45 = vcombine.high %v80_v40, %v84_v41  ;;  %v87_v46 = vld [vmem:[%s1627_s1 + $0x180] sm:$0xff]  ;;  %v88_v48 = vld [vmem:[%s1627_s1 + $0x188] sm:$0xff]  ;;  %v1068_v50 = vcombine.low %v79_v38, %v83_v39  ;;  %v1070_v51 = vcombine.low %v80_v40, %v84_v41 }
   0xe   :  { %854 = vmatpush1.bf16.msra.mxu0 %v1044_v26  ;;  %895 = vmatpush1.bf16.msra.mxu1 %v1046_v27  ;;  %v91_v47 = vld [vmem:[%s1627_s1 + $0x1a0] sm:$0xff]  ;;  %v92_v49 = vld [vmem:[%s1627_s1 + $0x1a8] sm:$0xff] }
   0xf   :  { %855 = vmatprep.subr.bf16.mxu0 %v1053_v28  ;;  %896 = vmatprep.subr.bf16.mxu1 %v1055_v29  ;;  %v1077_v52 = vcombine.high %v87_v46, %v91_v47  ;;  %v95_v53 = vld [vmem:[%s1627_s1 + $0x1c0] sm:$0xff]  ;;  %v1271_v55 = vld [vmem:[%s1628_s0 + $0x8] sm:$0xff]  ;;  %v1079_v56 = vcombine.high %v88_v48, %v92_v49  ;;  %v1076_v1 = vcombine.low %v87_v46, %v91_v47 }
  0x10   :  { %v1266_v54 = vld [vmem:[%s1628_s0] sm:$0xff]  ;;  %v20_v59 = vunpack.c.h.bf16 %v1271_v55  ;;  %v96_v62 = vld [vmem:[%s1627_s1 + $0x1c8] sm:$0xff]  ;;  %v1078_v4 = vcombine.low %v88_v48, %v92_v49  ;;  %v19_v48 = vunpack.c.l.bf16 %v1271_v55 }
  0x11   :  { %v99_v57 = vld [vmem:[%s1627_s1 + $0x1e0] sm:$0xff]  ;;  %v16_v58 = vunpack.c.h.bf16 %v1266_v54  ;;  %v100_v63 = vld [vmem:[%s1627_s1 + $0x1e8] sm:$0xff]  ;;  %v15_v47 = vunpack.c.l.bf16 %v1266_v54 }
  0x12   :  { %856 = vmatpush1.bf16.msra.mxu0 %v1052_v34  ;;  %897 = vmatpush1.bf16.msra.mxu1 %v1054_v35  ;;  %v1085_v5 = vcombine.high %v95_v53, %v99_v57  ;;  %v1087_v6 = vcombine.high %v96_v62, %v100_v63  ;;  %v103_v7 = vld [vmem:[%s1627_s1 + $0x200] sm:$0xff]  ;;  %v104_v10 = vld [vmem:[%s1627_s1 + $0x208] sm:$0xff]  ;;  %v1084_v12 = vcombine.low %v95_v53, %v99_v57 }
  0x13   :  { %857 = vmatprep.subr.bf16.mxu0 %v1061_v36  ;;  %898 = vmatprep.subr.bf16.mxu1 %v1063_v37  ;;  %v22_v2 = vadd.f32 %v20_v59, %v16_v58  ;;  %v107_v8 = vld [vmem:[%s1627_s1 + $0x220] sm:$0xff]  ;;  %v108_v11 = vld [vmem:[%s1627_s1 + $0x228] sm:$0xff]  ;;  %v1086_v14 = vcombine.low %v96_v62, %v100_v63  ;;  %v21_v57 = vadd.f32 %v19_v48, %v15_v47  ;;  %v25_v58 = vunpack.c.l.bf16 %v1281_v60  ;;  %v66_v47 = vld [vmem:[%s1627_s1 + $0xd8] sm:$0xff] }
  0x14   :  { %v1093_v15 = vcombine.high %v103_v7, %v107_v8  ;;  %v1095_v16 = vcombine.high %v104_v10, %v108_v11  ;;  %v111_v17 = vld [vmem:[%s1627_s1 + $0x240] sm:$0xff]  ;;  %v112_v20 = vld [vmem:[%s1627_s1 + $0x248] sm:$0xff]  ;;  %v1092_v22 = vcombine.low %v103_v7, %v107_v8  ;;  %v1094_v24 = vcombine.low %v104_v10, %v108_v11  ;;  %v70_v48 = vld [vmem:[%s1627_s1 + $0xf8] sm:$0xff] }
  0x15   :  { %v28_v9 = vadd.f32 %v26_v0, %v22_v2  ;;  %v115_v18 = vld [vmem:[%s1627_s1 + $0x260] sm:$0xff]  ;;  %v116_v21 = vld [vmem:[%s1627_s1 + $0x268] sm:$0xff] }
  0x16   :  { %858 = vmatpush1.bf16.msra.mxu0 %v1060_v42  ;;  %899 = vmatpush1.bf16.msra.mxu1 %v1062_v43  ;;  %v1101_v25 = vcombine.high %v111_v17, %v115_v18  ;;  %v1103_v26 = vcombine.high %v112_v20, %v116_v21  ;;  %v119_v27 = vld [vmem:[%s1627_s1 + $0x280] sm:$0xff]  ;;  %v120_v29 = vld [vmem:[%s1627_s1 + $0x288] sm:$0xff]  ;;  %v1100_v31 = vcombine.low %v111_v17, %v115_v18  ;;  %v41_v18 = vld [vmem:[%s1627_s1 + $0x10] sm:$0xff] }
  0x17   :  { %859 = vmatprep.subr.bf16.mxu0 %v1069_v44  ;;  %900 = vmatprep.subr.bf16.mxu1 %v1071_v45  ;;  %v34_v13 = vadd.f32 %v32_v3, %v28_v9  ;;  %v123_v28 = vld [vmem:[%s1627_s1 + $0x2a0] sm:$0xff]  ;;  %v124_v30 = vld [vmem:[%s1627_s1 + $0x2a8] sm:$0xff]  ;;  %v1102_v32 = vcombine.low %v112_v20, %v116_v21  ;;  %v42_v21 = vld [vmem:[%s1627_s1 + $0x18] sm:$0xff] }
  0x18   :  { %v1109_v33 = vcombine.high %v119_v27, %v123_v28  ;;  %v1111_v34 = vcombine.high %v120_v29, %v124_v30  ;;  %v127_v35 = vld [vmem:[%s1627_s1 + $0x2c0] sm:$0xff]  ;;  %v128_v37 = vld [vmem:[%s1627_s1 + $0x2c8] sm:$0xff]  ;;  %v1108_v39 = vcombine.low %v119_v27, %v123_v28  ;;  %v1110_v40 = vcombine.low %v120_v29, %v124_v30  ;;  %v49_v28 = vld [vmem:[%s1627_s1 + $0x50] sm:$0xff] }
  0x19   :  { %v36_v19 = vmul.f32 0.25, %v34_v13  ;;  %v131_v36 = vld [vmem:[%s1627_s1 + $0x2e0] sm:$0xff]  ;;  %v132_v38 = vld [vmem:[%s1627_s1 + $0x2e8] sm:$0xff]  ;;  %v53_v29 = vld [vmem:[%s1627_s1 + $0x70] sm:$0xff] }
  0x1a   :  { %860 = vmatpush1.bf16.msra.mxu0 %v1068_v50  ;;  %901 = vmatpush1.bf16.msra.mxu1 %v1070_v51  ;;  %v1117_v41 = vcombine.high %v127_v35, %v131_v36  ;;  %v1119_v42 = vcombine.high %v128_v37, %v132_v38  ;;  %v135_v43 = vld [vmem:[%s1627_s1 + $0x300] sm:$0xff]  ;;  %v136_v45 = vld [vmem:[%s1627_s1 + $0x308] sm:$0xff]  ;;  %v1116_v49 = vcombine.low %v127_v35, %v131_v36 }
  0x1b   :  { %861 = vmatprep.subr.bf16.mxu0 %v1077_v52  ;;  %902 = vmatprep.subr.bf16.mxu1 %v1079_v56  ;;  %v1320_v23 = vpack.c.bf16 %v36_v19, %v36_v19  ;;  %v139_v44 = vld [vmem:[%s1627_s1 + $0x320] sm:$0xff]  ;;  %v140_v46 = vld [vmem:[%s1627_s1 + $0x328] sm:$0xff]  ;;  %v1118_v50 = vcombine.low %v128_v37, %v132_v38  ;;  %v45_v19 = vld [vmem:[%s1627_s1 + $0x30] sm:$0xff]  ;;  %v1041_v35 = vcombine.high %v49_v28, %v53_v29 }
  0x1c   :  { %v1125_v51 = vcombine.high %v135_v43, %v139_v44  ;;  %v1127_v52 = vcombine.high %v136_v45, %v140_v46  ;;  %v143_v53 = vld [vmem:[%s1627_s1 + $0x340] sm:$0xff]  ;;  %v144_v54 = vld [vmem:[%s1627_s1 + $0x348] sm:$0xff]  ;;  %v1124_v59 = vcombine.low %v135_v43, %v139_v44  ;;  %v1126_v62 = vcombine.low %v136_v45, %v140_v46  ;;  %v57_v37 = vld [vmem:[%s1627_s1 + $0x90] sm:$0xff] }
  0x1d   :  { %881 = vmatprep.mubr.bf16.mxu0 %v1320_v23  ;;  %922 = vmatprep.mubr.bf16.mxu1 %v1320_v23  ;;  %v147_v56 = vld [vmem:[%s1627_s1 + $0x360] sm:$0xff]  ;;  %v148_v55 = vld [vmem:[%s1627_s1 + $0x368] sm:$0xff]  ;;  %v61_v38 = vld [vmem:[%s1627_s1 + $0xb0] sm:$0xff] }
  0x1e   :  { %862 = vmatpush1.bf16.msra.mxu0 %v1076_v1  ;;  %903 = vmatpush1.bf16.msra.mxu1 %v1078_v4  ;;  %v1133_v63 = vcombine.high %v143_v53, %v147_v56  ;;  %v1135_v0 = vcombine.high %v144_v54, %v148_v55  ;;  %v151_v1 = vld [vmem:[%s1627_s1 + $0x380] sm:$0xff]  ;;  %v152_v60 = vld [vmem:[%s1627_s1 + $0x388] sm:$0xff]  ;;  %v27_v4 = vadd.f32 %v25_v58, %v21_v57  ;;  %v65_v45 = vld [vmem:[%s1627_s1 + $0xd0] sm:$0xff] }
  0x1f   :  { %863 = vmatprep.subr.bf16.mxu0 %v1085_v5  ;;  %904 = vmatprep.subr.bf16.mxu1 %v1087_v6  ;;  %v155_v2 = vld [vmem:[%s1627_s1 + $0x3a0] sm:$0xff]  ;;  %v156_v3 = vld [vmem:[%s1627_s1 + $0x3a8] sm:$0xff]  ;;  %v31_v5 = vunpack.c.l.bf16 %v1286_v61  ;;  %v1132_v6 = vcombine.low %v143_v53, %v147_v56  ;;  %v1134_v7 = vcombine.low %v144_v54, %v148_v55  ;;  %v1049_v43 = vcombine.high %v57_v37, %v61_v38  ;;  %v69_v46 = vld [vmem:[%s1627_s1 + $0xf0] sm:$0xff] }
  0x20   :  { %v1141_v8 = vcombine.high %v151_v1, %v155_v2  ;;  %v1143_v9 = vcombine.high %v152_v60, %v156_v3  ;;  %v159_v10 = vld [vmem:[%s1627_s1 + $0x3c0] sm:$0xff]  ;;  %v160_v61 = vld [vmem:[%s1627_s1 + $0x3c8] sm:$0xff]  ;;  %v73_v53 = vld [vmem:[%s1627_s1 + $0x110] sm:$0xff]  ;;  %v1056_v55 = vcombine.low %v65_v45, %v69_v46  ;;  %v1058_v57 = vcombine.low %v66_v47, %v70_v48 }
  0x21   :  { %v163_v11 = vld [vmem:[%s1627_s1 + $0x3e0] sm:$0xff]  ;;  %v33_v13 = vadd.f32 %v31_v5, %v27_v4  ;;  %v77_v56 = vld [vmem:[%s1627_s1 + $0x130] sm:$0xff]  ;;  %v78_v54 = vld [vmem:[%s1627_s1 + $0x138] sm:$0xff] }
  0x22   :  { %864 = vmatpush1.bf16.msra.mxu0 %v1084_v12  ;;  %905 = vmatpush1.bf16.msra.mxu1 %v1086_v14  ;;  %v164_v12 = vld [vmem:[%s1627_s1 + $0x3e8] sm:$0xff]  ;;  %v1140_v14 = vcombine.low %v151_v1, %v155_v2  ;;  %v1065_v58 = vcombine.high %v73_v53, %v77_v56  ;;  %v86_v1 = vld [vmem:[%s1627_s1 + $0x178] sm:$0xff]  ;;  %v1064_v2 = vcombine.low %v73_v53, %v77_v56  ;;  %v89_v5 = vld [vmem:[%s1627_s1 + $0x190] sm:$0xff] }
  0x23   :  { %865 = vmatprep.subr.bf16.mxu0 %v1093_v15  ;;  %906 = vmatprep.subr.bf16.mxu1 %v1095_v16  ;;  %v1142_v15 = vcombine.low %v152_v60, %v156_v3  ;;  %v1149_v16 = vcombine.high %v159_v10, %v163_v11  ;;  %v1151_v17 = vcombine.high %v160_v61, %v164_v12  ;;  %v35_v20 = vmul.f32 0.25, %v33_v13  ;;  %v101_v13 = vld [vmem:[%s1627_s1 + $0x1f0] sm:$0xff] }
  0x24   :  { %v137_v56 = vld [vmem:[%s1627_s1 + $0x310] sm:$0xff] }
  0x25   :  { %v1418_v30 = vpack.c.bf16 %v35_v20, %v35_v20  ;;  %v105_v20 = vld [vmem:[%s1627_s1 + $0x210] sm:$0xff] }
  0x26   :  { %866 = vmatpush1.bf16.msra.mxu0 %v1092_v22  ;;  %907 = vmatpush1.bf16.msra.mxu1 %v1094_v24  ;;  %v46_v22 = vld [vmem:[%s1627_s1 + $0x38] sm:$0xff]  ;;  %v1148_v24 = vcombine.low %v159_v10, %v163_v11 }
  0x27   :  { %867 = vmatprep.subr.bf16.mxu0 %v1101_v25  ;;  %908 = vmatprep.subr.bf16.mxu1 %v1103_v26  ;;  %v1150_v25 = vcombine.low %v160_v61, %v164_v12  ;;  %v1033_v26 = vcombine.high %v41_v18, %v45_v19  ;;  %v1035_v27 = vcombine.high %v42_v21, %v46_v22  ;;  %v97_v12 = vld [vmem:[%s1627_s1 + $0x1d0] sm:$0xff] }
  0x2a   :  { %868 = vmatpush1.bf16.msra.mxu0 %v1100_v31  ;;  %909 = vmatpush1.bf16.msra.mxu1 %v1102_v32  ;;  %v50_v31 = vld [vmem:[%s1627_s1 + $0x58] sm:$0xff] }
  0x2b   :  { %869 = vmatprep.subr.bf16.mxu0 %v1109_v33  ;;  %910 = vmatprep.subr.bf16.mxu1 %v1111_v34  ;;  %v54_v32 = vld [vmem:[%s1627_s1 + $0x78] sm:$0xff]  ;;  %v1032_v33 = vcombine.low %v41_v18, %v45_v19  ;;  %v1034_v34 = vcombine.low %v42_v21, %v46_v22  ;;  %v1089_v18 = vcombine.high %v97_v12, %v101_v13  ;;  %v109_v21 = vld [vmem:[%s1627_s1 + $0x230] sm:$0xff] }
  0x2c   :  { %v1043_v36 = vcombine.high %v50_v31, %v54_v32  ;;  %v106_v22 = vld [vmem:[%s1627_s1 + $0x218] sm:$0xff] }
  0x2e   :  { %870 = vmatpush1.bf16.msra.mxu0 %v1108_v39  ;;  %911 = vmatpush1.bf16.msra.mxu1 %v1110_v40  ;;  %v58_v39 = vld [vmem:[%s1627_s1 + $0x98] sm:$0xff] }
  0x2f   :  { %871 = vmatprep.subr.bf16.mxu0 %v1117_v41  ;;  %912 = vmatprep.subr.bf16.mxu1 %v1119_v42  ;;  %v62_v40 = vld [vmem:[%s1627_s1 + $0xb8] sm:$0xff]  ;;  %v1040_v41 = vcombine.low %v49_v28, %v53_v29  ;;  %v1042_v42 = vcombine.low %v50_v31, %v54_v32  ;;  %v113_v29 = vld [vmem:[%s1627_s1 + $0x250] sm:$0xff] }
  0x30   :  { %v1051_v44 = vcombine.high %v58_v39, %v62_v40  ;;  %v117_v31 = vld [vmem:[%s1627_s1 + $0x270] sm:$0xff]  ;;  %v114_v32 = vld [vmem:[%s1627_s1 + $0x258] sm:$0xff] }
  0x32   :  { %872 = vmatpush1.bf16.msra.mxu0 %v1116_v49  ;;  %913 = vmatpush1.bf16.msra.mxu1 %v1118_v50  ;;  %v1048_v49 = vcombine.low %v57_v37, %v61_v38  ;;  %v1050_v50 = vcombine.low %v58_v39, %v62_v40  ;;  %v121_v38 = vld [vmem:[%s1627_s1 + $0x290] sm:$0xff]  ;;  %v122_v40 = vld [vmem:[%s1627_s1 + $0x298] sm:$0xff] }
  0x33   :  { %873 = vmatprep.subr.bf16.mxu0 %v1125_v51  ;;  %914 = vmatprep.subr.bf16.mxu1 %v1127_v52  ;;  %v1057_v51 = vcombine.high %v65_v45, %v69_v46  ;;  %v1059_v52 = vcombine.high %v66_v47, %v70_v48  ;;  %v125_v39 = vld [vmem:[%s1627_s1 + $0x2b0] sm:$0xff]  ;;  %v130_v48 = vld [vmem:[%s1627_s1 + $0x2d8] sm:$0xff] }
  0x34   :  { %v129_v46 = vld [vmem:[%s1627_s1 + $0x2d0] sm:$0xff] }
  0x35   :  { %v133_v47 = vld [vmem:[%s1627_s1 + $0x2f0] sm:$0xff] }
  0x36   :  { %874 = vmatpush1.bf16.msra.mxu0 %v1124_v59  ;;  %915 = vmatpush1.bf16.msra.mxu1 %v1126_v62  ;;  %v81_v62 = vld [vmem:[%s1627_s1 + $0x150] sm:$0xff] }
  0x37   :  { %875 = vmatprep.subr.bf16.mxu0 %v1133_v63  ;;  %916 = vmatprep.subr.bf16.mxu1 %v1135_v0  ;;  %v85_v63 = vld [vmem:[%s1627_s1 + $0x170] sm:$0xff]  ;;  %v82_v0 = vld [vmem:[%s1627_s1 + $0x158] sm:$0xff] }
  0x38   :  { %v1073_v3 = vcombine.high %v81_v62, %v85_v63  ;;  %v1075_v4 = vcombine.high %v82_v0, %v86_v1  ;;  %v1074_v10 = vcombine.low %v82_v0, %v86_v1  ;;  %v149_v0 = vld [vmem:[%s1627_s1 + $0x370] sm:$0xff]  ;;  %v146_v1 = vld [vmem:[%s1627_s1 + $0x358] sm:$0xff] }
  0x3a   :  { %876 = vmatpush1.bf16.msra.mxu0 %v1132_v6  ;;  %917 = vmatpush1.bf16.msra.mxu1 %v1134_v7  ;;  %v93_v6 = vld [vmem:[%s1627_s1 + $0x1b0] sm:$0xff]  ;;  %v90_v7 = vld [vmem:[%s1627_s1 + $0x198] sm:$0xff] }
  0x3b   :  { %877 = vmatprep.subr.bf16.mxu0 %v1141_v8  ;;  %918 = vmatprep.subr.bf16.mxu1 %v1143_v9  ;;  %v94_v8 = vld [vmem:[%s1627_s1 + $0x1b8] sm:$0xff]  ;;  %v1072_v9 = vcombine.low %v81_v62, %v85_v63  ;;  %v1081_v11 = vcombine.high %v89_v5, %v93_v6  ;;  %v145_v63 = vld [vmem:[%s1627_s1 + $0x350] sm:$0xff] }
  0x3c   :  { %v1083_v61 = vcombine.high %v90_v7, %v94_v8 }
  0x3e   :  { %878 = vmatpush1.bf16.msra.mxu0 %v1140_v14  ;;  %919 = vmatpush1.bf16.msra.mxu1 %v1142_v15  ;;  %v98_v14 = vld [vmem:[%s1627_s1 + $0x1d8] sm:$0xff] }
  0x3f   :  { %879 = vmatprep.subr.bf16.mxu0 %v1149_v16  ;;  %920 = vmatprep.subr.bf16.mxu1 %v1151_v17  ;;  %v102_v15 = vld [vmem:[%s1627_s1 + $0x1f8] sm:$0xff]  ;;  %v1080_v16 = vcombine.low %v89_v5, %v93_v6  ;;  %v1082_v17 = vcombine.low %v90_v7, %v94_v8  ;;  %v153_v6 = vld [vmem:[%s1627_s1 + $0x390] sm:$0xff] }
  0x40   :  { %v1091_v19 = vcombine.high %v98_v14, %v102_v15  ;;  %v157_v7 = vld [vmem:[%s1627_s1 + $0x3b0] sm:$0xff]  ;;  %v154_v8 = vld [vmem:[%s1627_s1 + $0x398] sm:$0xff] }
  0x42   :  { %880 = vmatpush1.bf16.msra.mxu0 %v1148_v24  ;;  %921 = vmatpush1.bf16.msra.mxu1 %v1150_v25  ;;  %v110_v24 = vld [vmem:[%s1627_s1 + $0x238] sm:$0xff]  ;;  %v1088_v25 = vcombine.low %v97_v12, %v101_v13  ;;  %v161_v13 = vld [vmem:[%s1627_s1 + $0x3d0] sm:$0xff] }
  0x43   :  { %931 = vmatprep.subr.bf16.mxu0 %v1033_v26  ;;  %972 = vmatprep.subr.bf16.mxu1 %v1035_v27  ;;  %v1090_v26 = vcombine.low %v98_v14, %v102_v15  ;;  %v1097_v27 = vcombine.high %v105_v20, %v109_v21  ;;  %v1099_v28 = vcombine.high %v106_v22, %v110_v24  ;;  %v165_v14 = vld [vmem:[%s1627_s1 + $0x3f0] sm:$0xff]  ;;  %v162_v15 = vld [vmem:[%s1627_s1 + $0x3d8] sm:$0xff] }
  0x45   :  { %882 = vmatmul.mubr.bf16.vlgmr.msra.gmra.mrb[0].mxu0 %v1418_v30  ;;  %923 = vmatmul.mubr.bf16.vlgmr.msra.gmra.mrb[0].mxu1 %v1418_v30 }
  0x46   :  { %932 = vmatpush1.bf16.msra.mxu0 %v1032_v33  ;;  %973 = vmatpush1.bf16.msra.mxu1 %v1034_v34  ;;  %v118_v33 = vld [vmem:[%s1627_s1 + $0x278] sm:$0xff]  ;;  %v1096_v34 = vcombine.low %v105_v20, %v109_v21  ;;  %v1152_v21 = vcombine.low %v161_v13, %v165_v14 }
  0x47   :  { %933 = vmatprep.subr.bf16.mxu0 %v1041_v35  ;;  %974 = vmatprep.subr.bf16.mxu1 %v1043_v36  ;;  %v1098_v35 = vcombine.low %v106_v22, %v110_v24  ;;  %v1105_v36 = vcombine.high %v113_v29, %v117_v31  ;;  %v1107_v37 = vcombine.high %v114_v32, %v118_v33  ;;  %v169_v24 = vlaneseq }
  0x48   :  { %963 = vmatprep.mubr.bf16.mxu0 %v1320_v23  ;;  %1004 = vmatprep.mubr.bf16.mxu1 %v1320_v23  ;;  %v74_v23 = vld [vmem:[%s1627_s1 + $0x118] sm:$0xff] }
  0x49   :  { %v1067_v59 = vcombine.high %v74_v23, %v78_v54  ;;  %v1066_v60 = vcombine.low %v74_v23, %v78_v54  ;;  %v141_v23 = vld [vmem:[%s1627_s1 + $0x330] sm:$0xff]  ;;  %v138_v54 = vld [vmem:[%s1627_s1 + $0x318] sm:$0xff] }
  0x4a   :  { %934 = vmatpush1.bf16.msra.mxu0 %v1040_v41  ;;  %975 = vmatpush1.bf16.msra.mxu1 %v1042_v42  ;;  %v126_v41 = vld [vmem:[%s1627_s1 + $0x2b8] sm:$0xff]  ;;  %v1104_v42 = vcombine.low %v113_v29, %v117_v31 }
  0x4b   :  { %935 = vmatprep.subr.bf16.mxu0 %v1049_v43  ;;  %976 = vmatprep.subr.bf16.mxu1 %v1051_v44  ;;  %v1106_v43 = vcombine.low %v114_v32, %v118_v33  ;;  %v1113_v44 = vcombine.high %v121_v38, %v125_v39  ;;  %v1115_v45 = vcombine.high %v122_v40, %v126_v41 }
  0x4e   :  { %936 = vmatpush1.bf16.msra.mxu0 %v1048_v49  ;;  %977 = vmatpush1.bf16.msra.mxu1 %v1050_v50  ;;  %v134_v49 = vld [vmem:[%s1627_s1 + $0x2f8] sm:$0xff]  ;;  %v1112_v50 = vcombine.low %v121_v38, %v125_v39 }
  0x4f   :  { %937 = vmatprep.subr.bf16.mxu0 %v1057_v51  ;;  %978 = vmatprep.subr.bf16.mxu1 %v1059_v52  ;;  %v1114_v51 = vcombine.low %v122_v40, %v126_v41  ;;  %v1121_v52 = vcombine.high %v129_v46, %v133_v47  ;;  %v1123_v53 = vcombine.high %v130_v48, %v134_v49 }
  0x52   :  { %938 = vmatpush1.bf16.msra.mxu0 %v1056_v55  ;;  %979 = vmatpush1.bf16.msra.mxu1 %v1058_v57  ;;  %v142_v55 = vld [vmem:[%s1627_s1 + $0x338] sm:$0xff]  ;;  %v1120_v57 = vcombine.low %v129_v46, %v133_v47 }
  0x53   :  { %939 = vmatprep.subr.bf16.mxu0 %v1065_v58  ;;  %980 = vmatprep.subr.bf16.mxu1 %v1067_v59  ;;  %v1122_v58 = vcombine.low %v130_v48, %v134_v49  ;;  %v1129_v59 = vcombine.high %v137_v56, %v141_v23  ;;  %v1131_v62 = vcombine.high %v138_v54, %v142_v55 }
  0x56   :  { %940 = vmatpush1.bf16.msra.mxu0 %v1064_v2  ;;  %981 = vmatpush1.bf16.msra.mxu1 %v1066_v60  ;;  %v150_v2 = vld [vmem:[%s1627_s1 + $0x378] sm:$0xff]  ;;  %v1128_v60 = vcombine.low %v137_v56, %v141_v23 }
  0x57   :  { %941 = vmatprep.subr.bf16.mxu0 %v1073_v3  ;;  %982 = vmatprep.subr.bf16.mxu1 %v1075_v4  ;;  %v1130_v3 = vcombine.low %v138_v54, %v142_v55  ;;  %v1137_v4 = vcombine.high %v145_v63, %v149_v0  ;;  %v1139_v5 = vcombine.high %v146_v1, %v150_v2 }
  0x5a   :  { %942 = vmatpush1.bf16.msra.mxu0 %v1072_v9  ;;  %983 = vmatpush1.bf16.msra.mxu1 %v1074_v10  ;;  %v158_v9 = vld [vmem:[%s1627_s1 + $0x3b8] sm:$0xff]  ;;  %v1136_v10 = vcombine.low %v145_v63, %v149_v0 }
  0x5b   :  { %943 = vmatprep.subr.bf16.mxu0 %v1081_v11  ;;  %984 = vmatprep.subr.bf16.mxu1 %v1083_v61  ;;  %v1138_v11 = vcombine.low %v146_v1, %v150_v2  ;;  %v1145_v61 = vcombine.high %v153_v6, %v157_v7  ;;  %v1147_v12 = vcombine.high %v154_v8, %v158_v9 }
  0x5e   :  { %944 = vmatpush1.bf16.msra.mxu0 %v1080_v16  ;;  %985 = vmatpush1.bf16.msra.mxu1 %v1082_v17  ;;  %v166_v16 = vld [vmem:[%s1627_s1 + $0x3f8] sm:$0xff]  ;;  %v1144_v17 = vcombine.low %v153_v6, %v157_v7 }
  0x5f   :  { %945 = vmatprep.subr.bf16.mxu0 %v1089_v18  ;;  %986 = vmatprep.subr.bf16.mxu1 %v1091_v19  ;;  %v1146_v18 = vcombine.low %v154_v8, %v158_v9  ;;  %v1153_v19 = vcombine.high %v161_v13, %v165_v14  ;;  %v1155_v20 = vcombine.high %v162_v15, %v166_v16 }
  0x60   :  { %v1154_v22 = vcombine.low %v162_v15, %v166_v16 }
  0x62   :  { %946 = vmatpush1.bf16.msra.mxu0 %v1088_v25  ;;  %987 = vmatpush1.bf16.msra.mxu1 %v1090_v26  ;;  %v170_v25 = vshrl.u32 %v169_v24, 7 }
  0x63   :  { %947 = vmatprep.subr.bf16.mxu0 %v1097_v27  ;;  %988 = vmatprep.subr.bf16.mxu1 %v1099_v28  ;;  %v167_v27 = vld [vmem:[%s1629_s2] sm:$0xff] }
  0x64   :  { %v171_v26 = vsub.s32 0, %v170_v25  ;;  %v179_v28 = vsub.s32 2, %v170_v25  ;;  %v175_v29 = vsub.s32 1, %v170_v25  ;;  %v183_v31 = vsub.s32 3, %v170_v25 }
  0x65   :  { %v187_v47 = vsub.s32 4, %v170_v25  ;;  %v195_v48 = vsub.s32 6, %v170_v25  ;;  %v191_v49 = vsub.s32 5, %v170_v25 }
  0x66   :  { %948 = vmatpush1.bf16.msra.mxu0 %v1096_v34  ;;  %989 = vmatpush1.bf16.msra.mxu1 %v1098_v35  ;;  %v172_v32 = vrot.slane %v167_v27, %v171_v26  ;;  %v180_v33 = vrot.slane %v167_v27, %v179_v28  ;;  %v176_v34 = vrot.slane %v167_v27, %v175_v29 }
  0x67   :  { %949 = vmatprep.subr.bf16.mxu0 %v1105_v36  ;;  %990 = vmatprep.subr.bf16.mxu1 %v1107_v37  ;;  %v184_v35 = vrot.slane %v167_v27, %v183_v31 }
  0x6a   :  { %950 = vmatpush1.bf16.msra.mxu0 %v1104_v42  ;;  %991 = vmatpush1.bf16.msra.mxu1 %v1106_v43 }
  0x6b   :  { %951 = vmatprep.subr.bf16.mxu0 %v1113_v44  ;;  %992 = vmatprep.subr.bf16.mxu1 %v1115_v45 }
  0x6e   :  { %952 = vmatpush1.bf16.msra.mxu0 %v1112_v50  ;;  %993 = vmatpush1.bf16.msra.mxu1 %v1114_v51  ;;  %v199_v50 = vsub.s32 7, %v170_v25  ;;  %v188_v51 = vrot.slane %v167_v27, %v187_v47 }
  0x6f   :  { %953 = vmatprep.subr.bf16.mxu0 %v1121_v52  ;;  %994 = vmatprep.subr.bf16.mxu1 %v1123_v53  ;;  %v196_v52 = vrot.slane %v167_v27, %v195_v48  ;;  %v192_v53 = vrot.slane %v167_v27, %v191_v49 }
  0x70   :  { %v200_v56 = vrot.slane %v167_v27, %v199_v50 }
  0x72   :  { %954 = vmatpush1.bf16.msra.mxu0 %v1120_v57  ;;  %995 = vmatpush1.bf16.msra.mxu1 %v1122_v58 }
  0x73   :  { %955 = vmatprep.subr.bf16.mxu0 %v1129_v59  ;;  %996 = vmatprep.subr.bf16.mxu1 %v1131_v62 }
  0x76   :  { %956 = vmatpush1.bf16.msra.mxu0 %v1128_v60  ;;  %997 = vmatpush1.bf16.msra.mxu1 %v1130_v3 }
  0x77   :  { %957 = vmatprep.subr.bf16.mxu0 %v1137_v4  ;;  %998 = vmatprep.subr.bf16.mxu1 %v1139_v5 }
  0x7a   :  { %958 = vmatpush1.bf16.msra.mxu0 %v1136_v10  ;;  %999 = vmatpush1.bf16.msra.mxu1 %v1138_v11 }
  0x7b   :  { %959 = vmatprep.subr.bf16.mxu0 %v1145_v61  ;;  %1000 = vmatprep.subr.bf16.mxu1 %v1147_v12 }
  0x7e   :  { %960 = vmatpush1.bf16.msra.mxu0 %v1144_v17  ;;  %1001 = vmatpush1.bf16.msra.mxu1 %v1146_v18 }
  0x7f   :  { %961 = vmatprep.subr.bf16.mxu0 %v1153_v19  ;;  %1002 = vmatprep.subr.bf16.mxu1 %v1155_v20 }
  0x82   :  { %962 = vmatpush1.bf16.msra.mxu0 %v1152_v21  ;;  %1003 = vmatpush1.bf16.msra.mxu1 %v1154_v22 }
  0x85   :  { %964 = vmatmul.mubr.bf16.vlgmr.msra.gmra.mrb[4].mxu0 %v1418_v30  ;;  %1005 = vmatmul.mubr.bf16.vlgmr.msra.gmra.mrb[4].mxu1 %v1418_v30 }
 0x118   :  { %v883_v36 = vpop.f32.mrb[0].mxu0  ;;  %v924_v38 = vpop.f32.mrb[0].mxu1 }
 0x119   :  { %v884_v37 = vadd.f32 %v883_v36, %v172_v32  ;;  %v885_v39 = vpop.f32.mrb[1].mxu0  ;;  %v925_v40 = vadd.f32 %v924_v38, %v180_v33  ;;  %v926_v41 = vpop.f32.mrb[1].mxu1 }
 0x11a   :  { %v886_v30 = vadd.f32 %v885_v39, %v176_v34  ;;  %v887_v42 = vpop.f32.mrb[2].mxu0  ;;  %v927_v43 = vadd.f32 %v926_v41, %v184_v35  ;;  %v928_v44 = vpop.f32.mrb[2].mxu1 }
 0x11b   :  { %1013 = vst [vmem:[%s1630_s3] sm:$0xff] %v884_v37  ;;  %v888_v45 = vpop.f32.mrb[3].mxu0  ;;  %1015 = vst [vmem:[%s1630_s3 + $0x10] sm:$0xff] %v925_v40  ;;  %v929_v46 = vpop.f32.mrb[3].mxu1 }
 0x11c   :  { %1014 = vst [vmem:[%s1630_s3 + $0x8] sm:$0xff] %v886_v30  ;;  %1016 = vst [vmem:[%s1630_s3 + $0x18] sm:$0xff] %v927_v43 }
 0x158   :  { %v965_v23 = vpop.f32.mrb[4].mxu0  ;;  %v1006_v55 = vpop.f32.mrb[4].mxu1 }
 0x159   :  { %v966_v54 = vadd.f32 %v965_v23, %v188_v51  ;;  %v967_v57 = vpop.f32.mrb[5].mxu0  ;;  %v1007_v58 = vadd.f32 %v1006_v55, %v196_v52  ;;  %v1008_v62 = vpop.f32.mrb[5].mxu1 }
 0x15a   :  { %v968_v59 = vadd.f32 %v967_v57, %v192_v53  ;;  %v969_v63 = vpop.f32.mrb[6].mxu0  ;;  %v1009_v0 = vadd.f32 %v1008_v62, %v200_v56  ;;  %v1010_v1 = vpop.f32.mrb[6].mxu1 }
 0x15b   :  { %1017 = vst [vmem:[%s1630_s3 + $0x20] sm:$0xff] %v966_v54  ;;  %v970_v2 = vpop.f32.mrb[7].mxu0  ;;  %1019 = vst [vmem:[%s1630_s3 + $0x30] sm:$0xff] %v1007_v58  ;;  %v1011_v60 = vpop.f32.mrb[7].mxu1 }
 0x15c   :  { %1018 = vst [vmem:[%s1630_s3 + $0x28] sm:$0xff] %v968_v59  ;;  %1020 = vst [vmem:[%s1630_s3 + $0x38] sm:$0xff] %v1009_v0 }

</bundles_post_ra>
